<compile_context>
chip_gen: v5e
topology: v5e:2x2
jax: 0.10.0
libtpu: 0.0.40
codegen_flags: <defaults>
</compile_context>

<pallas_src>
import numpy as np
import jax
import jax.numpy as jnp
from jax import lax
from jax.experimental import pallas as pl
from jax.experimental.pallas import tpu as pltpu

MID = 512                      # branch width: nn.Conv2d(in_c, 512, ...)
DILATIONS = (6, 12, 18)        # dilated 3x3 branches, padding == dilation
MAX_D = max(DILATIONS)         # largest spatial shift (halo), 18


def _round_up(x, m):
    return -(-x // m) * m


def _vmem_limit_bytes():
    """Per-core VMEM budget.  v7x has only 64 MiB per TensorCore and the info
    query may report chip-level capacity, so clamp to a safe 48 MiB."""
    cap = 64 * 1024 * 1024
    try:
        cap = int(pltpu.get_tpu_info().vmem_capacity_bytes)
    except Exception:
        pass
    return min((3 * cap) // 4, 48 * 1024 * 1024)


def aspp_forward(x_nchw, params, *, compute_dtype=jnp.bfloat16,
                 out_dtype=jnp.bfloat16, max_band_rows=48):
    """Fused ASPP forward. Input/output are NCHW like the PyTorch module."""
    B, C, H, W = map(int, x_nchw.shape)
    Cout = int(params['ba'].shape[-1])
    D = MAX_D
    hp = lax.Precision.HIGHEST
    wa = params['wa']                                             # (5*MID, Cout)

    # --- image-pool branch (global mean -> 1x1 conv -> ReLU -> conv_after
    # slice).  Bilinear upsampling of a 1x1 map is a broadcast, so the branch
    # collapses to one per-batch row added at the end (precomputed here so the
    # kernel has no whole-image dependency and can be spatially tiled).
    mean = jnp.mean(x_nchw.astype(jnp.float32), axis=(2, 3))      # (B, C)
    pool = jax.nn.relu(jnp.dot(mean, params['wp'], precision=hp) + params['bp'])
    pool_row = jnp.dot(pool, wa[0:MID], precision=hp)             # (B, Cout)

    # --- fold every branch bias plus conv_after's bias into one row.
    bias_row = (jnp.dot(params['b0'], wa[MID:2 * MID], precision=hp)
                + jnp.dot(params['b6'], wa[2 * MID:3 * MID], precision=hp)
                + jnp.dot(params['b12'], wa[3 * MID:4 * MID], precision=hp)
                + jnp.dot(params['b18'], wa[4 * MID:5 * MID], precision=hp)
                + params['ba'])                                   # (1, Cout)

    # --- padded / tiled sizes (lane-dense channels, sublane-friendly widths).
    Cp = _round_up(C, 128)
    Coutp = _round_up(Cout, 128)
    W8 = _round_up(W, 8)
    Wcp = _round_up(W8 + 2 * D, 8)          # padded width incl. halo
    Hband = min(_round_up(H, 8), _round_up(max_band_rows, 8))
    NB = -(-H // Hband)                     # number of row bands
    Hc = NB * Hband + 2 * D                 # padded height incl. halo
    rows = Hband + 2 * D                    # haloed band rows per grid step
    blk = Hband * W8                        # flattened pixels per output block

    const_row = jnp.pad(pool_row + bias_row, ((0, 0), (0, Coutp - Cout)))
    const_row = const_row.reshape(B, 1, Coutp).astype(jnp.float32)

    # --- fuse each conv tap with its conv_after slice (exact in real
    # arithmetic: the only ReLU is applied after the final sum).  Taps with
    # identical spatial shifts are merged -> 25 taps of shape (C, Cout).
    taps = {}

    def add_tap(oy, ox, w_co):
        key = (oy, ox)
        taps[key] = w_co if key not in taps else taps[key] + w_co

    add_tap(D, D, jnp.dot(params['w0'], wa[MID:2 * MID], precision=hp))
    for bi, (dil, wk) in enumerate(zip(DILATIONS, ('w6', 'w12', 'w18'))):
        wf = jnp.einsum('kcm,mo->kco', params[wk].reshape(9, C, MID),
                        wa[(2 + bi) * MID:(3 + bi) * MID], precision=hp)
        for ky in range(3):
            for kx in range(3):
                add_tap(D + (ky - 1) * dil, D + (kx - 1) * dil, wf[ky * 3 + kx])
    tap_offsets = sorted(taps)                                    # 25 (oy, ox)
    ntap = len(tap_offsets)
    w_all = jnp.stack([taps[k] for k in tap_offsets])             # (25, C, Cout)
    w_all = jnp.pad(w_all, ((0, 0), (0, Cp - C), (0, Coutp - Cout)))
    w_all = w_all.astype(compute_dtype)                           # (25, Cp, Coutp)

    # --- Cout tiling: keep the resident (double-buffered) weight tile under a
    # ~16 MiB budget (v7x: 64 MiB/TC total) while staying a multiple of 128
    # (v5e MXU granularity).  K = Cp stays whole per matmul.
    tile = ((16 * 1024 * 1024) // (2 * ntap * Cp * 2)) // 128 * 128
    cout_tile = max(128, min(Coutp, tile))
    while Coutp % cout_tile:
        cout_tile -= 128
    NT = Coutp // cout_tile
    # v7x megacore balance: if the parallel extent would be 1, split Cout.
    if NT == 1 and B * NB == 1 and Coutp >= 256:
        cout_tile = max(128, (Coutp // 2) // 128 * 128)
        while Coutp % cout_tile:
            cout_tile -= 128
        NT = Coutp // cout_tile

    # --- single zero-padded bf16 input copy (cast BEFORE padding); no per-shift
    # HBM copies anymore.
    x_nhwc = jnp.transpose(x_nchw, (0, 2, 3, 1)).astype(compute_dtype)
    x_pad = jnp.pad(x_nhwc, ((0, 0), (D, Hc - D - H),
                             (D, Wcp - D - W), (0, Cp - C)))      # (B,Hc,Wcp,Cp)

    def kernel(x_hbm, w_ref, const_ref, out_ref, band_ref, dma_sem):
        b = pl.program_id(1)
        h = pl.program_id(2)
        r0 = pl.multiple_of(h * Hband, 8)
        # One haloed row band per grid step, brought in with a single DMA.
        # (Compute per step is ~25 matmuls, so the un-overlapped DMA is small.)
        copy = pltpu.make_async_copy(x_hbm.at[b, pl.ds(r0, rows)],
                                     band_ref, dma_sem)
        copy.start()
        copy.wait()

        acc = None
        # Static unroll over the 25 fused taps; weights are VMEM-resident.
        # Row/column offsets are even multiples of 6, so the sliced bf16 loads
        # never split packed sublane pairs.
        for t, (oy, ox) in enumerate(tap_offsets):
            lhs = band_ref[oy:oy + Hband, ox:ox + W8, :]
            lhs = lhs.reshape(blk, Cp)
            part = jnp.dot(lhs, w_ref[t], preferred_element_type=jnp.float32)
            acc = part if acc is None else acc + part             # f32 accumulate

        out_ref[...] = jnp.maximum(acc + const_ref[...], 0.0).astype(out_ref.dtype)

    out = pl.pallas_call(
        kernel,
        out_shape=jax.ShapeDtypeStruct((B, NB * blk, Coutp), out_dtype),
        grid_spec=pltpu.PrefetchScalarGridSpec(
            num_scalar_prefetch=0,
            grid=(NT, B, NB),                 # Cout tile outermost -> weights
            in_specs=[                        # fetched once per tile, resident
                pl.BlockSpec(memory_space=pl.ANY),                 # padded input (HBM)
                pl.BlockSpec((ntap, Cp, cout_tile),
                             lambda n, b, h: (0, 0, n)),           # fused weights
                pl.BlockSpec((None, 1, cout_tile),
                             lambda n, b, h: (b, 0, n)),           # pool + biases
            ],
            out_specs=pl.BlockSpec((None, blk, cout_tile),
                                   lambda n, b, h: (b, h, n)),     # lane-dense out
            scratch_shapes=[
                pltpu.VMEM((rows, Wcp, Cp), compute_dtype),        # haloed band
                pltpu.SemaphoreType.DMA(()),
            ],
        ),
        compiler_params=pltpu.CompilerParams(
            dimension_semantics=("parallel", "parallel", "parallel"),
            vmem_limit_bytes=_vmem_limit_bytes()),
    )(x_pad, w_all, const_row)

    out = out.reshape(B, NB * Hband, W8, Coutp)[:, :H, :W, :Cout]
    return jnp.transpose(out, (0, 3, 1, 2))                       # back to NCHW


def init_params(key, in_c):
    """Deterministic synthetic parameters (shapes from ASPP.__init__)."""
    ks = jax.random.split(key, 12)

    def nrm(k, shape, scale):
        return scale * jax.random.normal(k, shape, dtype=jnp.float32)

    return {
        'w0':  nrm(ks[0], (in_c, MID), 0.05),        'b0':  nrm(ks[1], (1, MID), 0.02),
        'w6':  nrm(ks[2], (3, 3, in_c, MID), 0.05),  'b6':  nrm(ks[3], (1, MID), 0.02),
        'w12': nrm(ks[4], (3, 3, in_c, MID), 0.05),  'b12': nrm(ks[5], (1, MID), 0.02),
        'w18': nrm(ks[6], (3, 3, in_c, MID), 0.05),  'b18': nrm(ks[7], (1, MID), 0.02),
        'wp':  nrm(ks[8], (in_c, MID), 0.05),        'bp':  nrm(ks[9], (1, MID), 0.02),
        'wa':  nrm(ks[10], (5 * MID, in_c), 0.05),   'ba':  nrm(ks[11], (1, in_c), 0.02),
    }


def aspp_reference(x_nchw, params):
    """Pure-JAX reference (lax convs) mirroring the PyTorch forward."""
    x = jnp.transpose(x_nchw, (0, 2, 3, 1)).astype(jnp.float32)   # NHWC
    B, H, W, C = x.shape
    hp = lax.Precision.HIGHEST

    m = jnp.mean(x, axis=(1, 2), keepdims=True)
    pool = jax.nn.relu(jnp.einsum('bhwc,cn->bhwn', m, params['wp'], precision=hp)
                       + params['bp'].reshape(1, 1, 1, -1))
    outs = [jnp.broadcast_to(pool, (B, H, W, MID))]
    outs.append(jnp.einsum('bhwc,cn->bhwn', x, params['w0'], precision=hp)
                + params['b0'].reshape(1, 1, 1, -1))
    for d, wk, bk in zip(DILATIONS, ('w6', 'w12', 'w18'), ('b6', 'b12', 'b18')):
        c = lax.conv_general_dilated(
            x, params[wk], window_strides=(1, 1),
            padding=((d, d), (d, d)), rhs_dilation=(d, d),
            dimension_numbers=('NHWC', 'HWIO', 'NHWC'), precision=hp)
        outs.append(c + params[bk].reshape(1, 1, 1, -1))
    cat = jnp.concatenate(outs, axis=-1)                          # (B,H,W,2560)
    y = jax.nn.relu(jnp.einsum('bhwc,co->bhwo', cat, params['wa'], precision=hp)
                    + params['ba'].reshape(1, 1, 1, -1))
    return jnp.transpose(y, (0, 3, 1, 2))


if __name__ == "__main__":
    key = jax.random.PRNGKey(0)
    # Second case exercises the crop/padding paths (H, W not multiples of 6/8).
    for (B, C, H, W) in [(2, 4, 16, 16), (1, 8, 13, 10)]:
        kx, kp, key = jax.random.split(key, 3)
        x = jax.random.normal(kx, (B, C, H, W), dtype=jnp.float32)
        params = init_params(kp, C)

        out = jax.block_until_ready(aspp_forward(x, params))
        ref = aspp_reference(x, params)

        out_f = np.asarray(out.astype(jnp.float32))
        ref_f = np.asarray(ref)
        # bf16 MXU operands + bf16 output + fused-weight reassociation vs. the
        # all-f32 reference.
        if not np.allclose(out_f, ref_f, rtol=2e-2, atol=2e-2):
            err = float(np.max(np.abs(out_f - ref_f)))
            raise AssertionError(
                f"Pallas ASPP mismatch vs reference at {(B, C, H, W)}, "
                f"max abs err = {err}")
    print("KERNEL_OK")
</pallas_src>

<mosaic_0001>
module attributes {stable_mosaic.version = 11 : i64} {
  func.func @kernel(%arg0: i32, %arg1: i32, %arg2: i32, %arg3: memref<2x52x56x128xbf16, #tpu.memory_space<any>>, %arg4: memref<25x128x128xbf16, #tpu.memory_space<vmem>>, %arg5: memref<1x1x128xf32, #tpu.memory_space<vmem>>, %arg6: memref<1x256x128xbf16, #tpu.memory_space<vmem>>, %arg7: memref<52x56x128xbf16, #tpu.memory_space<vmem>>, %arg8: memref<!tpu.dma_semaphore, #tpu.memory_space<semaphore_mem>>) attributes {dimension_semantics = [#tpu.dimension_semantics<parallel>, #tpu.dimension_semantics<parallel>, #tpu.dimension_semantics<parallel>], iteration_bounds = array<i64: 1, 2, 1>, scalar_prefetch = 0 : i64, scratch_operands = 2 : i64, tpu.core_type = #tpu.core_type<tc>, window_params = [{}, {transform_indices = @transform_1, window_bounds = array<i64: 25, 128, 128>}, {transform_indices = @transform_2, window_bounds = array<i64: 1, 1, 128>}, {transform_indices = @transform_3, window_bounds = array<i64: 1, 256, 128>}]} {
    %c16_i32 = arith.constant 16 : i32
    %0 = arith.muli %arg2, %c16_i32 : i32
    %1 = tpu.assume_multiple %0, 8 : i32
    %c0_i32 = arith.constant 0 : i32
    %c0_i32_0 = arith.constant 0 : i32
    %2 = tpu.memref_slice %arg3[%arg1, %1, %c0_i32, %c0_i32_0] : memref<2x52x56x128xbf16, #tpu.memory_space<any>> -> memref<1x52x56x128xbf16, #tpu.memory_space<any>>
    %3 = tpu.memref_squeeze %2 : memref<1x52x56x128xbf16, #tpu.memory_space<any>> -> memref<52x56x128xbf16, #tpu.memory_space<any>>
    tpu.enqueue_dma source(%3 : memref<52x56x128xbf16, #tpu.memory_space<any>>) target(%arg7 : memref<52x56x128xbf16, #tpu.memory_space<vmem>>) target_semaphore(%arg8 : memref<!tpu.dma_semaphore, #tpu.memory_space<semaphore_mem>>)
    %c0_i32_1 = arith.constant 0 : i32
    %c0_i32_2 = arith.constant 0 : i32
    %4 = tpu.memref_slice %arg3[%arg1, %1, %c0_i32_1, %c0_i32_2] : memref<2x52x56x128xbf16, #tpu.memory_space<any>> -> memref<1x52x56x128xbf16, #tpu.memory_space<any>>
    %5 = tpu.memref_squeeze %4 : memref<1x52x56x128xbf16, #tpu.memory_space<any>> -> memref<52x56x128xbf16, #tpu.memory_space<any>>
    tpu.wait_dma2 semaphore(%arg8 : memref<!tpu.dma_semaphore, #tpu.memory_space<semaphore_mem>>) src(%5 : memref<52x56x128xbf16, #tpu.memory_space<any>>) dst(%arg7 : memref<52x56x128xbf16, #tpu.memory_space<vmem>>)
    %c0 = arith.constant 0 : index
    %c0_3 = arith.constant 0 : index
    %c0_4 = arith.constant 0 : index
    %6 = vector.load %arg7[%c0, %c0_3, %c0_4] : memref<52x56x128xbf16, #tpu.memory_space<vmem>>, vector<16x16x128xbf16>
    %7 = vector.shape_cast %6 : vector<16x16x128xbf16> to vector<256x128xbf16>
    %c0_5 = arith.constant 0 : index
    %c0_6 = arith.constant 0 : index
    %c0_7 = arith.constant 0 : index
    %8 = vector.load %arg4[%c0_5, %c0_6, %c0_7] : memref<25x128x128xbf16, #tpu.memory_space<vmem>>, vector<1x128x128xbf16>
    %9 = vector.shape_cast %8 : vector<1x128x128xbf16> to vector<128x128xbf16>
    %cst = arith.constant dense<0.000000e+00> : vector<256x128xf32>
    %10 = tpu.matmul %7, %9, %cst {dimension_numbers = #tpu.dot_dimension_numbers<[1], [0], [0], [1], [0, 0, 1, 1], [], []>} : vector<256x128xbf16>, vector<128x128xbf16>, vector<256x128xf32> -> vector<256x128xf32>
    %c0_8 = arith.constant 0 : index
    %c18 = arith.constant 18 : index
    %c0_9 = arith.constant 0 : index
    %11 = vector.load %arg7[%c0_8, %c18, %c0_9] : memref<52x56x128xbf16, #tpu.memory_space<vmem>>, vector<16x16x128xbf16>
    %12 = vector.shape_cast %11 : vector<16x16x128xbf16> to vector<256x128xbf16>
    %c1 = arith.constant 1 : index
    %c0_10 = arith.constant 0 : index
    %c0_11 = arith.constant 0 : index
    %13 = vector.load %arg4[%c1, %c0_10, %c0_11] : memref<25x128x128xbf16, #tpu.memory_space<vmem>>, vector<1x128x128xbf16>
    %14 = vector.shape_cast %13 : vector<1x128x128xbf16> to vector<128x128xbf16>
    %cst_12 = arith.constant dense<0.000000e+00> : vector<256x128xf32>
    %15 = tpu.matmul %12, %14, %cst_12 {dimension_numbers = #tpu.dot_dimension_numbers<[1], [0], [0], [1], [0, 0, 1, 1], [], []>} : vector<256x128xbf16>, vector<128x128xbf16>, vector<256x128xf32> -> vector<256x128xf32>
    %16 = arith.addf %10, %15 : vector<256x128xf32>
    %c0_13 = arith.constant 0 : index
    %c36 = arith.constant 36 : index
    %c0_14 = arith.constant 0 : index
    %17 = vector.load %arg7[%c0_13, %c36, %c0_14] : memref<52x56x128xbf16, #tpu.memory_space<vmem>>, vector<16x16x128xbf16>
    %18 = vector.shape_cast %17 : vector<16x16x128xbf16> to vector<256x128xbf16>
    %c2 = arith.constant 2 : index
    %c0_15 = arith.constant 0 : index
    %c0_16 = arith.constant 0 : index
    %19 = vector.load %arg4[%c2, %c0_15, %c0_16] : memref<25x128x128xbf16, #tpu.memory_space<vmem>>, vector<1x128x128xbf16>
    %20 = vector.shape_cast %19 : vector<1x128x128xbf16> to vector<128x128xbf16>
    %cst_17 = arith.constant dense<0.000000e+00> : vector<256x128xf32>
    %21 = tpu.matmul %18, %20, %cst_17 {dimension_numbers = #tpu.dot_dimension_numbers<[1], [0], [0], [1], [0, 0, 1, 1], [], []>} : vector<256x128xbf16>, vector<128x128xbf16>, vector<256x128xf32> -> vector<256x128xf32>
    %22 = arith.addf %16, %21 : vector<256x128xf32>
    %c6 = arith.constant 6 : index
    %c6_18 = arith.constant 6 : index
    %c0_19 = arith.constant 0 : index
    %23 = vector.load %arg7[%c6, %c6_18, %c0_19] : memref<52x56x128xbf16, #tpu.memory_space<vmem>>, vector<16x16x128xbf16>
    %24 = vector.shape_cast %23 : vector<16x16x128xbf16> to vector<256x128xbf16>
    %c3 = arith.constant 3 : index
    %c0_20 = arith.constant 0 : index
    %c0_21 = arith.constant 0 : index
    %25 = vector.load %arg4[%c3, %c0_20, %c0_21] : memref<25x128x128xbf16, #tpu.memory_space<vmem>>, vector<1x128x128xbf16>
    %26 = vector.shape_cast %25 : vector<1x128x128xbf16> to vector<128x128xbf16>
    %cst_22 = arith.constant dense<0.000000e+00> : vector<256x128xf32>
    %27 = tpu.matmul %24, %26, %cst_22 {dimension_numbers = #tpu.dot_dimension_numbers<[1], [0], [0], [1], [0, 0, 1, 1], [], []>} : vector<256x128xbf16>, vector<128x128xbf16>, vector<256x128xf32> -> vector<256x128xf32>
    %28 = arith.addf %22, %27 : vector<256x128xf32>
    %c6_23 = arith.constant 6 : index
    %c18_24 = arith.constant 18 : index
    %c0_25 = arith.constant 0 : index
    %29 = vector.load %arg7[%c6_23, %c18_24, %c0_25] : memref<52x56x128xbf16, #tpu.memory_space<vmem>>, vector<16x16x128xbf16>
    %30 = vector.shape_cast %29 : vector<16x16x128xbf16> to vector<256x128xbf16>
    %c4 = arith.constant 4 : index
    %c0_26 = arith.constant 0 : index
    %c0_27 = arith.constant 0 : index
    %31 = vector.load %arg4[%c4, %c0_26, %c0_27] : memref<25x128x128xbf16, #tpu.memory_space<vmem>>, vector<1x128x128xbf16>
    %32 = vector.shape_cast %31 : vector<1x128x128xbf16> to vector<128x128xbf16>
    %cst_28 = arith.constant dense<0.000000e+00> : vector<256x128xf32>
    %33 = tpu.matmul %30, %32, %cst_28 {dimension_numbers = #tpu.dot_dimension_numbers<[1], [0], [0], [1], [0, 0, 1, 1], [], []>} : vector<256x128xbf16>, vector<128x128xbf16>, vector<256x128xf32> -> vector<256x128xf32>
    %34 = arith.addf %28, %33 : vector<256x128xf32>
    %c6_29 = arith.constant 6 : index
    %c30 = arith.constant 30 : index
    %c0_30 = arith.constant 0 : index
    %35 = vector.load %arg7[%c6_29, %c30, %c0_30] : memref<52x56x128xbf16, #tpu.memory_space<vmem>>, vector<16x16x128xbf16>
    %36 = vector.shape_cast %35 : vector<16x16x128xbf16> to vector<256x128xbf16>
    %c5 = arith.constant 5 : index
    %c0_31 = arith.constant 0 : index
    %c0_32 = arith.constant 0 : index
    %37 = vector.load %arg4[%c5, %c0_31, %c0_32] : memref<25x128x128xbf16, #tpu.memory_space<vmem>>, vector<1x128x128xbf16>
    %38 = vector.shape_cast %37 : vector<1x128x128xbf16> to vector<128x128xbf16>
    %cst_33 = arith.constant dense<0.000000e+00> : vector<256x128xf32>
    %39 = tpu.matmul %36, %38, %cst_33 {dimension_numbers = #tpu.dot_dimension_numbers<[1], [0], [0], [1], [0, 0, 1, 1], [], []>} : vector<256x128xbf16>, vector<128x128xbf16>, vector<256x128xf32> -> vector<256x128xf32>
    %40 = arith.addf %34, %39 : vector<256x128xf32>
    %c12 = arith.constant 12 : index
    %c12_34 = arith.constant 12 : index
    %c0_35 = arith.constant 0 : index
    %41 = vector.load %arg7[%c12, %c12_34, %c0_35] : memref<52x56x128xbf16, #tpu.memory_space<vmem>>, vector<16x16x128xbf16>
    %42 = vector.shape_cast %41 : vector<16x16x128xbf16> to vector<256x128xbf16>
    %c6_36 = arith.constant 6 : index
    %c0_37 = arith.constant 0 : index
    %c0_38 = arith.constant 0 : index
    %43 = vector.load %arg4[%c6_36, %c0_37, %c0_38] : memref<25x128x128xbf16, #tpu.memory_space<vmem>>, vector<1x128x128xbf16>
    %44 = vector.shape_cast %43 : vector<1x128x128xbf16> to vector<128x128xbf16>
    %cst_39 = arith.constant dense<0.000000e+00> : vector<256x128xf32>
    %45 = tpu.matmul %42, %44, %cst_39 {dimension_numbers = #tpu.dot_dimension_numbers<[1], [0], [0], [1], [0, 0, 1, 1], [], []>} : vector<256x128xbf16>, vector<128x128xbf16>, vector<256x128xf32> -> vector<256x128xf32>
    %46 = arith.addf %40, %45 : vector<256x128xf32>
    %c12_40 = arith.constant 12 : index
    %c18_41 = arith.constant 18 : index
    %c0_42 = arith.constant 0 : index
    %47 = vector.load %arg7[%c12_40, %c18_41, %c0_42] : memref<52x56x128xbf16, #tpu.memory_space<vmem>>, vector<16x16x128xbf16>
    %48 = vector.shape_cast %47 : vector<16x16x128xbf16> to vector<256x128xbf16>
    %c7 = arith.constant 7 : index
    %c0_43 = arith.constant 0 : index
    %c0_44 = arith.constant 0 : index
    %49 = vector.load %arg4[%c7, %c0_43, %c0_44] : memref<25x128x128xbf16, #tpu.memory_space<vmem>>, vector<1x128x128xbf16>
    %50 = vector.shape_cast %49 : vector<1x128x128xbf16> to vector<128x128xbf16>
    %cst_45 = arith.constant dense<0.000000e+00> : vector<256x128xf32>
    %51 = tpu.matmul %48, %50, %cst_45 {dimension_numbers = #tpu.dot_dimension_numbers<[1], [0], [0], [1], [0, 0, 1, 1], [], []>} : vector<256x128xbf16>, vector<128x128xbf16>, vector<256x128xf32> -> vector<256x128xf32>
    %52 = arith.addf %46, %51 : vector<256x128xf32>
    %c12_46 = arith.constant 12 : index
    %c24 = arith.constant 24 : index
    %c0_47 = arith.constant 0 : index
    %53 = vector.load %arg7[%c12_46, %c24, %c0_47] : memref<52x56x128xbf16, #tpu.memory_space<vmem>>, vector<16x16x128xbf16>
    %54 = vector.shape_cast %53 : vector<16x16x128xbf16> to vector<256x128xbf16>
    %c8 = arith.constant 8 : index
    %c0_48 = arith.constant 0 : index
    %c0_49 = arith.constant 0 : index
    %55 = vector.load %arg4[%c8, %c0_48, %c0_49] : memref<25x128x128xbf16, #tpu.memory_space<vmem>>, vector<1x128x128xbf16>
    %56 = vector.shape_cast %55 : vector<1x128x128xbf16> to vector<128x128xbf16>
    %cst_50 = arith.constant dense<0.000000e+00> : vector<256x128xf32>
    %57 = tpu.matmul %54, %56, %cst_50 {dimension_numbers = #tpu.dot_dimension_numbers<[1], [0], [0], [1], [0, 0, 1, 1], [], []>} : vector<256x128xbf16>, vector<128x128xbf16>, vector<256x128xf32> -> vector<256x128xf32>
    %58 = arith.addf %52, %57 : vector<256x128xf32>
    %c18_51 = arith.constant 18 : index
    %c0_52 = arith.constant 0 : index
    %c0_53 = arith.constant 0 : index
    %59 = vector.load %arg7[%c18_51, %c0_52, %c0_53] : memref<52x56x128xbf16, #tpu.memory_space<vmem>>, vector<16x16x128xbf16>
    %60 = vector.shape_cast %59 : vector<16x16x128xbf16> to vector<256x128xbf16>
    %c9 = arith.constant 9 : index
    %c0_54 = arith.constant 0 : index
    %c0_55 = arith.constant 0 : index
    %61 = vector.load %arg4[%c9, %c0_54, %c0_55] : memref<25x128x128xbf16, #tpu.memory_space<vmem>>, vector<1x128x128xbf16>
    %62 = vector.shape_cast %61 : vector<1x128x128xbf16> to vector<128x128xbf16>
    %cst_56 = arith.constant dense<0.000000e+00> : vector<256x128xf32>
    %63 = tpu.matmul %60, %62, %cst_56 {dimension_numbers = #tpu.dot_dimension_numbers<[1], [0], [0], [1], [0, 0, 1, 1], [], []>} : vector<256x128xbf16>, vector<128x128xbf16>, vector<256x128xf32> -> vector<256x128xf32>
    %64 = arith.addf %58, %63 : vector<256x128xf32>
    %c18_57 = arith.constant 18 : index
    %c6_58 = arith.constant 6 : index
    %c0_59 = arith.constant 0 : index
    %65 = vector.load %arg7[%c18_57, %c6_58, %c0_59] : memref<52x56x128xbf16, #tpu.memory_space<vmem>>, vector<16x16x128xbf16>
    %66 = vector.shape_cast %65 : vector<16x16x128xbf16> to vector<256x128xbf16>
    %c10 = arith.constant 10 : index
    %c0_60 = arith.constant 0 : index
    %c0_61 = arith.constant 0 : index
    %67 = vector.load %arg4[%c10, %c0_60, %c0_61] : memref<25x128x128xbf16, #tpu.memory_space<vmem>>, vector<1x128x128xbf16>
    %68 = vector.shape_cast %67 : vector<1x128x128xbf16> to vector<128x128xbf16>
    %cst_62 = arith.constant dense<0.000000e+00> : vector<256x128xf32>
    %69 = tpu.matmul %66, %68, %cst_62 {dimension_numbers = #tpu.dot_dimension_numbers<[1], [0], [0], [1], [0, 0, 1, 1], [], []>} : vector<256x128xbf16>, vector<128x128xbf16>, vector<256x128xf32> -> vector<256x128xf32>
    %70 = arith.addf %64, %69 : vector<256x128xf32>
    %c18_63 = arith.constant 18 : index
    %c12_64 = arith.constant 12 : index
    %c0_65 = arith.constant 0 : index
    %71 = vector.load %arg7[%c18_63, %c12_64, %c0_65] : memref<52x56x128xbf16, #tpu.memory_space<vmem>>, vector<16x16x128xbf16>
    %72 = vector.shape_cast %71 : vector<16x16x128xbf16> to vector<256x128xbf16>
    %c11 = arith.constant 11 : index
    %c0_66 = arith.constant 0 : index
    %c0_67 = arith.constant 0 : index
    %73 = vector.load %arg4[%c11, %c0_66, %c0_67] : memref<25x128x128xbf16, #tpu.memory_space<vmem>>, vector<1x128x128xbf16>
    %74 = vector.shape_cast %73 : vector<1x128x128xbf16> to vector<128x128xbf16>
    %cst_68 = arith.constant dense<0.000000e+00> : vector<256x128xf32>
    %75 = tpu.matmul %72, %74, %cst_68 {dimension_numbers = #tpu.dot_dimension_numbers<[1], [0], [0], [1], [0, 0, 1, 1], [], []>} : vector<256x128xbf16>, vector<128x128xbf16>, vector<256x128xf32> -> vector<256x128xf32>
    %76 = arith.addf %70, %75 : vector<256x128xf32>
    %c18_69 = arith.constant 18 : index
    %c18_70 = arith.constant 18 : index
    %c0_71 = arith.constant 0 : index
    %77 = vector.load %arg7[%c18_69, %c18_70, %c0_71] : memref<52x56x128xbf16, #tpu.memory_space<vmem>>, vector<16x16x128xbf16>
    %78 = vector.shape_cast %77 : vector<16x16x128xbf16> to vector<256x128xbf16>
    %c12_72 = arith.constant 12 : index
    %c0_73 = arith.constant 0 : index
    %c0_74 = arith.constant 0 : index
    %79 = vector.load %arg4[%c12_72, %c0_73, %c0_74] : memref<25x128x128xbf16, #tpu.memory_space<vmem>>, vector<1x128x128xbf16>
    %80 = vector.shape_cast %79 : vector<1x128x128xbf16> to vector<128x128xbf16>
    %cst_75 = arith.constant dense<0.000000e+00> : vector<256x128xf32>
    %81 = tpu.matmul %78, %80, %cst_75 {dimension_numbers = #tpu.dot_dimension_numbers<[1], [0], [0], [1], [0, 0, 1, 1], [], []>} : vector<256x128xbf16>, vector<128x128xbf16>, vector<256x128xf32> -> vector<256x128xf32>
    %82 = arith.addf %76, %81 : vector<256x128xf32>
    %c18_76 = arith.constant 18 : index
    %c24_77 = arith.constant 24 : index
    %c0_78 = arith.constant 0 : index
    %83 = vector.load %arg7[%c18_76, %c24_77, %c0_78] : memref<52x56x128xbf16, #tpu.memory_space<vmem>>, vector<16x16x128xbf16>
    %84 = vector.shape_cast %83 : vector<16x16x128xbf16> to vector<256x128xbf16>
    %c13 = arith.constant 13 : index
    %c0_79 = arith.constant 0 : index
    %c0_80 = arith.constant 0 : index
    %85 = vector.load %arg4[%c13, %c0_79, %c0_80] : memref<25x128x128xbf16, #tpu.memory_space<vmem>>, vector<1x128x128xbf16>
    %86 = vector.shape_cast %85 : vector<1x128x128xbf16> to vector<128x128xbf16>
    %cst_81 = arith.constant dense<0.000000e+00> : vector<256x128xf32>
    %87 = tpu.matmul %84, %86, %cst_81 {dimension_numbers = #tpu.dot_dimension_numbers<[1], [0], [0], [1], [0, 0, 1, 1], [], []>} : vector<256x128xbf16>, vector<128x128xbf16>, vector<256x128xf32> -> vector<256x128xf32>
    %88 = arith.addf %82, %87 : vector<256x128xf32>
    %c18_82 = arith.constant 18 : index
    %c30_83 = arith.constant 30 : index
    %c0_84 = arith.constant 0 : index
    %89 = vector.load %arg7[%c18_82, %c30_83, %c0_84] : memref<52x56x128xbf16, #tpu.memory_space<vmem>>, vector<16x16x128xbf16>
    %90 = vector.shape_cast %89 : vector<16x16x128xbf16> to vector<256x128xbf16>
    %c14 = arith.constant 14 : index
    %c0_85 = arith.constant 0 : index
    %c0_86 = arith.constant 0 : index
    %91 = vector.load %arg4[%c14, %c0_85, %c0_86] : memref<25x128x128xbf16, #tpu.memory_space<vmem>>, vector<1x128x128xbf16>
    %92 = vector.shape_cast %91 : vector<1x128x128xbf16> to vector<128x128xbf16>
    %cst_87 = arith.constant dense<0.000000e+00> : vector<256x128xf32>
    %93 = tpu.matmul %90, %92, %cst_87 {dimension_numbers = #tpu.dot_dimension_numbers<[1], [0], [0], [1], [0, 0, 1, 1], [], []>} : vector<256x128xbf16>, vector<128x128xbf16>, vector<256x128xf32> -> vector<256x128xf32>
    %94 = arith.addf %88, %93 : vector<256x128xf32>
    %c18_88 = arith.constant 18 : index
    %c36_89 = arith.constant 36 : index
    %c0_90 = arith.constant 0 : index
    %95 = vector.load %arg7[%c18_88, %c36_89, %c0_90] : memref<52x56x128xbf16, #tpu.memory_space<vmem>>, vector<16x16x128xbf16>
    %96 = vector.shape_cast %95 : vector<16x16x128xbf16> to vector<256x128xbf16>
    %c15 = arith.constant 15 : index
    %c0_91 = arith.constant 0 : index
    %c0_92 = arith.constant 0 : index
    %97 = vector.load %arg4[%c15, %c0_91, %c0_92] : memref<25x128x128xbf16, #tpu.memory_space<vmem>>, vector<1x128x128xbf16>
    %98 = vector.shape_cast %97 : vector<1x128x128xbf16> to vector<128x128xbf16>
    %cst_93 = arith.constant dense<0.000000e+00> : vector<256x128xf32>
    %99 = tpu.matmul %96, %98, %cst_93 {dimension_numbers = #tpu.dot_dimension_numbers<[1], [0], [0], [1], [0, 0, 1, 1], [], []>} : vector<256x128xbf16>, vector<128x128xbf16>, vector<256x128xf32> -> vector<256x128xf32>
    %100 = arith.addf %94, %99 : vector<256x128xf32>
    %c24_94 = arith.constant 24 : index
    %c12_95 = arith.constant 12 : index
    %c0_96 = arith.constant 0 : index
    %101 = vector.load %arg7[%c24_94, %c12_95, %c0_96] : memref<52x56x128xbf16, #tpu.memory_space<vmem>>, vector<16x16x128xbf16>
    %102 = vector.shape_cast %101 : vector<16x16x128xbf16> to vector<256x128xbf16>
    %c16 = arith.constant 16 : index
    %c0_97 = arith.constant 0 : index
    %c0_98 = arith.constant 0 : index
    %103 = vector.load %arg4[%c16, %c0_97, %c0_98] : memref<25x128x128xbf16, #tpu.memory_space<vmem>>, vector<1x128x128xbf16>
    %104 = vector.shape_cast %103 : vector<1x128x128xbf16> to vector<128x128xbf16>
    %cst_99 = arith.constant dense<0.000000e+00> : vector<256x128xf32>
    %105 = tpu.matmul %102, %104, %cst_99 {dimension_numbers = #tpu.dot_dimension_numbers<[1], [0], [0], [1], [0, 0, 1, 1], [], []>} : vector<256x128xbf16>, vector<128x128xbf16>, vector<256x128xf32> -> vector<256x128xf32>
    %106 = arith.addf %100, %105 : vector<256x128xf32>
    %c24_100 = arith.constant 24 : index
    %c18_101 = arith.constant 18 : index
    %c0_102 = arith.constant 0 : index
    %107 = vector.load %arg7[%c24_100, %c18_101, %c0_102] : memref<52x56x128xbf16, #tpu.memory_space<vmem>>, vector<16x16x128xbf16>
    %108 = vector.shape_cast %107 : vector<16x16x128xbf16> to vector<256x128xbf16>
    %c17 = arith.constant 17 : index
    %c0_103 = arith.constant 0 : index
    %c0_104 = arith.constant 0 : index
    %109 = vector.load %arg4[%c17, %c0_103, %c0_104] : memref<25x128x128xbf16, #tpu.memory_space<vmem>>, vector<1x128x128xbf16>
    %110 = vector.shape_cast %109 : vector<1x128x128xbf16> to vector<128x128xbf16>
    %cst_105 = arith.constant dense<0.000000e+00> : vector<256x128xf32>
    %111 = tpu.matmul %108, %110, %cst_105 {dimension_numbers = #tpu.dot_dimension_numbers<[1], [0], [0], [1], [0, 0, 1, 1], [], []>} : vector<256x128xbf16>, vector<128x128xbf16>, vector<256x128xf32> -> vector<256x128xf32>
    %112 = arith.addf %106, %111 : vector<256x128xf32>
    %c24_106 = arith.constant 24 : index
    %c24_107 = arith.constant 24 : index
    %c0_108 = arith.constant 0 : index
    %113 = vector.load %arg7[%c24_106, %c24_107, %c0_108] : memref<52x56x128xbf16, #tpu.memory_space<vmem>>, vector<16x16x128xbf16>
    %114 = vector.shape_cast %113 : vector<16x16x128xbf16> to vector<256x128xbf16>
    %c18_109 = arith.constant 18 : index
    %c0_110 = arith.constant 0 : index
    %c0_111 = arith.constant 0 : index
    %115 = vector.load %arg4[%c18_109, %c0_110, %c0_111] : memref<25x128x128xbf16, #tpu.memory_space<vmem>>, vector<1x128x128xbf16>
    %116 = vector.shape_cast %115 : vector<1x128x128xbf16> to vector<128x128xbf16>
    %cst_112 = arith.constant dense<0.000000e+00> : vector<256x128xf32>
    %117 = tpu.matmul %114, %116, %cst_112 {dimension_numbers = #tpu.dot_dimension_numbers<[1], [0], [0], [1], [0, 0, 1, 1], [], []>} : vector<256x128xbf16>, vector<128x128xbf16>, vector<256x128xf32> -> vector<256x128xf32>
    %118 = arith.addf %112, %117 : vector<256x128xf32>
    %c30_113 = arith.constant 30 : index
    %c6_114 = arith.constant 6 : index
    %c0_115 = arith.constant 0 : index
    %119 = vector.load %arg7[%c30_113, %c6_114, %c0_115] : memref<52x56x128xbf16, #tpu.memory_space<vmem>>, vector<16x16x128xbf16>
    %120 = vector.shape_cast %119 : vector<16x16x128xbf16> to vector<256x128xbf16>
    %c19 = arith.constant 19 : index
    %c0_116 = arith.constant 0 : index
    %c0_117 = arith.constant 0 : index
    %121 = vector.load %arg4[%c19, %c0_116, %c0_117] : memref<25x128x128xbf16, #tpu.memory_space<vmem>>, vector<1x128x128xbf16>
    %122 = vector.shape_cast %121 : vector<1x128x128xbf16> to vector<128x128xbf16>
    %cst_118 = arith.constant dense<0.000000e+00> : vector<256x128xf32>
    %123 = tpu.matmul %120, %122, %cst_118 {dimension_numbers = #tpu.dot_dimension_numbers<[1], [0], [0], [1], [0, 0, 1, 1], [], []>} : vector<256x128xbf16>, vector<128x128xbf16>, vector<256x128xf32> -> vector<256x128xf32>
    %124 = arith.addf %118, %123 : vector<256x128xf32>
    %c30_119 = arith.constant 30 : index
    %c18_120 = arith.constant 18 : index
    %c0_121 = arith.constant 0 : index
    %125 = vector.load %arg7[%c30_119, %c18_120, %c0_121] : memref<52x56x128xbf16, #tpu.memory_space<vmem>>, vector<16x16x128xbf16>
    %126 = vector.shape_cast %125 : vector<16x16x128xbf16> to vector<256x128xbf16>
    %c20 = arith.constant 20 : index
    %c0_122 = arith.constant 0 : index
    %c0_123 = arith.constant 0 : index
    %127 = vector.load %arg4[%c20, %c0_122, %c0_123] : memref<25x128x128xbf16, #tpu.memory_space<vmem>>, vector<1x128x128xbf16>
    %128 = vector.shape_cast %127 : vector<1x128x128xbf16> to vector<128x128xbf16>
    %cst_124 = arith.constant dense<0.000000e+00> : vector<256x128xf32>
    %129 = tpu.matmul %126, %128, %cst_124 {dimension_numbers = #tpu.dot_dimension_numbers<[1], [0], [0], [1], [0, 0, 1, 1], [], []>} : vector<256x128xbf16>, vector<128x128xbf16>, vector<256x128xf32> -> vector<256x128xf32>
    %130 = arith.addf %124, %129 : vector<256x128xf32>
    %c30_125 = arith.constant 30 : index
    %c30_126 = arith.constant 30 : index
    %c0_127 = arith.constant 0 : index
    %131 = vector.load %arg7[%c30_125, %c30_126, %c0_127] : memref<52x56x128xbf16, #tpu.memory_space<vmem>>, vector<16x16x128xbf16>
    %132 = vector.shape_cast %131 : vector<16x16x128xbf16> to vector<256x128xbf16>
    %c21 = arith.constant 21 : index
    %c0_128 = arith.constant 0 : index
    %c0_129 = arith.constant 0 : index
    %133 = vector.load %arg4[%c21, %c0_128, %c0_129] : memref<25x128x128xbf16, #tpu.memory_space<vmem>>, vector<1x128x128xbf16>
    %134 = vector.shape_cast %133 : vector<1x128x128xbf16> to vector<128x128xbf16>
    %cst_130 = arith.constant dense<0.000000e+00> : vector<256x128xf32>
    %135 = tpu.matmul %132, %134, %cst_130 {dimension_numbers = #tpu.dot_dimension_numbers<[1], [0], [0], [1], [0, 0, 1, 1], [], []>} : vector<256x128xbf16>, vector<128x128xbf16>, vector<256x128xf32> -> vector<256x128xf32>
    %136 = arith.addf %130, %135 : vector<256x128xf32>
    %c36_131 = arith.constant 36 : index
    %c0_132 = arith.constant 0 : index
    %c0_133 = arith.constant 0 : index
    %137 = vector.load %arg7[%c36_131, %c0_132, %c0_133] : memref<52x56x128xbf16, #tpu.memory_space<vmem>>, vector<16x16x128xbf16>
    %138 = vector.shape_cast %137 : vector<16x16x128xbf16> to vector<256x128xbf16>
    %c22 = arith.constant 22 : index
    %c0_134 = arith.constant 0 : index
    %c0_135 = arith.constant 0 : index
    %139 = vector.load %arg4[%c22, %c0_134, %c0_135] : memref<25x128x128xbf16, #tpu.memory_space<vmem>>, vector<1x128x128xbf16>
    %140 = vector.shape_cast %139 : vector<1x128x128xbf16> to vector<128x128xbf16>
    %cst_136 = arith.constant dense<0.000000e+00> : vector<256x128xf32>
    %141 = tpu.matmul %138, %140, %cst_136 {dimension_numbers = #tpu.dot_dimension_numbers<[1], [0], [0], [1], [0, 0, 1, 1], [], []>} : vector<256x128xbf16>, vector<128x128xbf16>, vector<256x128xf32> -> vector<256x128xf32>
    %142 = arith.addf %136, %141 : vector<256x128xf32>
    %c36_137 = arith.constant 36 : index
    %c18_138 = arith.constant 18 : index
    %c0_139 = arith.constant 0 : index
    %143 = vector.load %arg7[%c36_137, %c18_138, %c0_139] : memref<52x56x128xbf16, #tpu.memory_space<vmem>>, vector<16x16x128xbf16>
    %144 = vector.shape_cast %143 : vector<16x16x128xbf16> to vector<256x128xbf16>
    %c23 = arith.constant 23 : index
    %c0_140 = arith.constant 0 : index
    %c0_141 = arith.constant 0 : index
    %145 = vector.load %arg4[%c23, %c0_140, %c0_141] : memref<25x128x128xbf16, #tpu.memory_space<vmem>>, vector<1x128x128xbf16>
    %146 = vector.shape_cast %145 : vector<1x128x128xbf16> to vector<128x128xbf16>
    %cst_142 = arith.constant dense<0.000000e+00> : vector<256x128xf32>
    %147 = tpu.matmul %144, %146, %cst_142 {dimension_numbers = #tpu.dot_dimension_numbers<[1], [0], [0], [1], [0, 0, 1, 1], [], []>} : vector<256x128xbf16>, vector<128x128xbf16>, vector<256x128xf32> -> vector<256x128xf32>
    %148 = arith.addf %142, %147 : vector<256x128xf32>
    %c36_143 = arith.constant 36 : index
    %c36_144 = arith.constant 36 : index
    %c0_145 = arith.constant 0 : index
    %149 = vector.load %arg7[%c36_143, %c36_144, %c0_145] : memref<52x56x128xbf16, #tpu.memory_space<vmem>>, vector<16x16x128xbf16>
    %150 = vector.shape_cast %149 : vector<16x16x128xbf16> to vector<256x128xbf16>
    %c24_146 = arith.constant 24 : index
    %c0_147 = arith.constant 0 : index
    %c0_148 = arith.constant 0 : index
    %151 = vector.load %arg4[%c24_146, %c0_147, %c0_148] : memref<25x128x128xbf16, #tpu.memory_space<vmem>>, vector<1x128x128xbf16>
    %152 = vector.shape_cast %151 : vector<1x128x128xbf16> to vector<128x128xbf16>
    %cst_149 = arith.constant dense<0.000000e+00> : vector<256x128xf32>
    %153 = tpu.matmul %150, %152, %cst_149 {dimension_numbers = #tpu.dot_dimension_numbers<[1], [0], [0], [1], [0, 0, 1, 1], [], []>} : vector<256x128xbf16>, vector<128x128xbf16>, vector<256x128xf32> -> vector<256x128xf32>
    %154 = arith.addf %148, %153 : vector<256x128xf32>
    %c0_150 = arith.constant 0 : index
    %c0_151 = arith.constant 0 : index
    %c0_152 = arith.constant 0 : index
    %155 = vector.load %arg5[%c0_150, %c0_151, %c0_152] : memref<1x1x128xf32, #tpu.memory_space<vmem>>, vector<1x1x128xf32>
    %156 = vector.shape_cast %155 : vector<1x1x128xf32> to vector<1x128xf32>
    %157 = vector.broadcast %156 : vector<1x128xf32> to vector<256x128xf32>
    %158 = arith.addf %154, %157 : vector<256x128xf32>
    %cst_153 = arith.constant 0.000000e+00 : f32
    %159 = vector.broadcast %cst_153 : f32 to vector<256x128xf32>
    %160 = arith.maximumf %158, %159 : vector<256x128xf32>
    %161 = arith.truncf %160 : vector<256x128xf32> to vector<256x128xbf16>
    %c0_154 = arith.constant 0 : index
    %c0_155 = arith.constant 0 : index
    %c0_156 = arith.constant 0 : index
    %162 = vector.load %arg6[%c0_154, %c0_155, %c0_156] : memref<1x256x128xbf16, #tpu.memory_space<vmem>>, vector<1x256x128xbf16>
    %163 = vector.shape_cast %162 : vector<1x256x128xbf16> to vector<256x128xbf16>
    %164 = vector.shape_cast %161 : vector<256x128xbf16> to vector<1x256x128xbf16>
    tpu.vector_store %arg6[%c0_154, %c0_155, %c0_156], %164 {strides = array<i32>} : memref<1x256x128xbf16, #tpu.memory_space<vmem>>, vector<1x256x128xbf16>,
    return
  }
  func.func @transform_1(%arg0: i32, %arg1: i32, %arg2: i32) -> (i32, i32, i32) {
    %c0_i32 = arith.constant 0 : i32
    %c0_i32_0 = arith.constant 0 : i32
    %c0_i32_1 = arith.constant 0 : i32
    return %c0_i32, %c0_i32_0, %arg0 : i32, i32, i32
  }
  func.func @transform_2(%arg0: i32, %arg1: i32, %arg2: i32) -> (i32, i32, i32) {
    %c0_i32 = arith.constant 0 : i32
    %c0_i32_0 = arith.constant 0 : i32
    return %arg1, %c0_i32, %arg0 : i32, i32, i32
  }
  func.func @transform_3(%arg0: i32, %arg1: i32, %arg2: i32) -> (i32, i32, i32) {
    %c0_i32 = arith.constant 0 : i32
    return %arg1, %arg2, %arg0 : i32, i32, i32
  }
}

</mosaic_0001>

<bundles_post_ra>
// kernel: tpu_custom_call.1
= control target key start
LH: loop header
LB: loop body
LE: loop exit
PB: predicated region body
PF: predicated region fallthrough
CT: control target
= control target key end

     0   :  { %8 = vsyncpa [#allocation5], 0  ;;  %s15161_s0 = inlined_call_operand.hbm [shape: bf16[2,52,56,128], index: 0, kind: input, shape index: {}]   ;;  %s15162_s1 = inlined_call_operand.hbm [shape: bf16[25,128,128], index: 1, kind: input, shape index: {}]   ;;  %s15163_s2 = inlined_call_operand.hbm [shape: f32[2,1,128], index: 2, kind: input, shape index: {}]   ;;  %s15164_s3 = inlined_call_operand.hbm [shape: bf16[2,256,128], index: 3, kind: output, shape index: {}]  }
   0x1   :  { %9 = vsyncpa [#allocation8], 0 }
   0x2   :  { %11 = vsyncpa [#allocation8 + $0x1], 0 }
   0x3   :  { %12 = vsyncpa [#allocation6], 0 }
   0x4   :  { %14 = vsyncpa [#allocation6 + $0x1], 0  ;;  %s13134_s12 = smov 0   ;;  %s13136_s13 = smov 0  }
   0x5   :  { %s13138_s14 = smov 0   ;;  %s13140_s15 = smov 0  }
   0x6   :  { %s13142_s16 = smov 0   ;;  %s13144_s17 = smov 0  }
   0x7 LB: > { %s10934_s18 = sadd.s32 4294967295, %s13106_s17   ;;  %p10936_p0 = scmp.ge.s32.totalorder %s13106_s17, 1  ;;  %s13106_s17 = sphi %s13144_s17, %s20_s17   ;;  %s13102_s16 = sphi %s13142_s16, %s15195_s16   ;;  %s13098_s15 = sphi %s13140_s15, %s15194_s15   ;;  %s13094_s14 = sphi %s13138_s14, %s15193_s14   ;;  %s13090_s13 = sphi %s13136_s13, %s15192_s13   ;;  %s13086_s12 = sphi %s13134_s12, %s15191_s12  }
   0x8   : > { %p13166_p1 = scmp.eq.s32.totalorder %s10934_s18, 0  ;;  %p128_p2 = scmp.lt.s32.totalorder %s13106_s17, 3 }
   0x9   : > { %s141_s22 = sshll.u32 %s15162_s1, 4  ;;  %s13108_s24 = smov [#allocation4]   ;;  %s142_s22 = int_to_ptr.hbm [resolvable:$true] %s141_s22 }
   0xa   : > { %p13174_p3 = pnand %p10936_p0, %p128_p2  ;;  %s143_s25 = sshll.u32 %s13108_s24, 4  ;;  %s144_s25 = int_to_ptr.vmem [resolvable:$true] %s143_s25 }
   0xb   : > { %p10938_p6 = scmp.ge.s32.totalorder %s13106_s17, 2  ;;  %s13109_s26 = smov 64  }
   0xc   : > { %p12862_p4 = pneg %p13174_p3  ;;  %s13110_s27 = smov 4  }
   0xd   : > { %s10935_s28 = sadd.s32 4294967294, %s13106_s17   ;;  %s35_s29 = sadd.s32 1, %s13102_s16 }
   0xe   : > { %p12863_p5 = pnand %p12862_p4, %p13166_p1  ;;  %s74_s30 = sadd.s32 1, %s13094_s14 }
   0xf   : > { %p37_p7 = scmp.ge.s32.totalorder %s35_s29, 2  ;;  %p81_p8 = scmp.ne.s32.totalorder %s13094_s14, %s13090_s13 }
  0x10   : > { %12865 = dma.hbm_to_vmem [thread:$0]  (!%p12863_p5), %s142_s22, 25600, %s144_s25, [#allocation5], %s13109_s26, %s13109_s26, %s13110_s27  }
  0x11   : > { %p82_p9 = scmp.eq.s32.totalorder %s13106_s17, 0  ;;  %p87_p10 = scmp.ne.s32.totalorder %s13090_s13, %s13086_s12 }
  0x12   : > { %s15197_s29 = smov (%p37_p7, %s35_s29), 0  ;;  %p115_p13 = scmp.eq.s32.totalorder %s10934_s18, 1 }
  0x13   : > { %p13193_p11 = por %p82_p9, %p81_p8  ;;  %p13199_p12 = por %p13166_p1, %p87_p10 }
  0x14   : > { %s69_s6 = ssub.s32 %s13102_s16, %s15197_s29  ;;  %p121_p2 = scmp.eq.s32.totalorder %s10935_s28, 1 }
  0x15   : > { %p72_p0 = scmp.eq.s32.totalorder %s69_s6, 0  ;;  %p13205_p4 = por %p115_p13, %p81_p8 }
  0x16   : > { %p12875_p5 = scmp.lt.s32.totalorder %s13106_s17, 2  ;;  %p13213_p7 = por %p121_p2, %p87_p10 }
  0x17   : > { %s13211_s8 = scalar_select %p72_p0, %s13094_s14, %s74_s30  }
  0x18   : > { %s157_s10 = sand.u32 1, %s13094_s14   ;;  %s164_s21 = scalar_lea.hbm %s15163_s2, %s13102_s16 }
  0x19   : > { %s160_s22 = scalar_lea.vmem [#allocation7], %s157_s10  ;;  %s166_s24 = sshll.u32 %s164_s21, 4  ;;  %s167_s24 = int_to_ptr.hbm [resolvable:$true] %s166_s24 }
  0x1a   : > { %s168_s18 = sshll.u32 %s160_s22, 4  ;;  %p12867_p8 = pnand %p12875_p5, %p13193_p11  ;;  %s169_s18 = int_to_ptr.vmem [resolvable:$true] %s168_s18 }
  0x1b   : > { %s158_s25 = scalar_lea.sflag [#allocation8], %s157_s10  ;;  %177 = sbr.rel (%p13174_p3) target bundleno = 1824 (0x720), region = 28 }
  0x1c   : > { %12869 = dma.hbm_to_vmem [thread:$0]  (!%p12867_p8), %s167_s24, 16, %s169_s18, %s158_s25  }
  0x20   : > { %13071 = dma.done.wait (%p13166_p1), [#allocation5], 25600  }
  0x21   : > { %13073 = vsyncadd (%p13166_p1), [#allocation5], 4294941696  ;;  %s13231_s26 = sand.u32 1, %s13090_s13  }
  0x22   : > { %s185_s27 = scalar_lea.sflag [#allocation8], %s13231_s26  ;;  %s187_s28 = scalar_lea.vmem [#allocation7], %s13231_s26 }
  0x23   : > { %13075 = dma.done.wait (%p13199_p12), %s185_s27, 16  }
  0x24   : > { %13077 = vsyncadd (%p13199_p12), %s185_s27, 4294967280  ;;  %s10941_s23 = sshll.u32 %s13231_s26, 7  ;;  %s12437_s30 = smul.u32 1456, %s13098_s15 }
  0x25   : > { %s13111_s10 = smov [#allocation2]   ;;  %s12998_s24 = scalar_lea.hbm %s15161_s0, 2912 }
  0x26   : > { %s214_s6 = scalar_lea.hbm %s15161_s0, %s12437_s30  ;;  %s224_s11 = sshll.u32 %s13111_s10, 4  ;;  %s225_s11 = int_to_ptr.vmem [resolvable:$true] %s224_s11 }
  0x27   : > { %s222_s20 = sshll.u32 %s214_s6, 4  ;;  %s223_s20 = int_to_ptr.hbm [resolvable:$true] %s222_s20 }
  0x28   : > { %s12994_s21 = sshra.s32 %s223_s20, 4  ;;  %s12995_s21 = int_to_ptr.hbm [resolvable:$true] %s12994_s21 }
  0x29   : > { %s12996_s22 = scalar_lea.hbm %s12995_s21, 1456  ;;  %p12999_p3 = scmp.lt.s32.totalorder %s12995_s21, %s15161_s0 }
  0x2a   : > { %p12997_p1 = scmp.ne.s32.totalorder %s12995_s21, %s12996_s22  ;;  %p13000_p9 = scmp.lt.s32.totalorder %s12998_s24, %s12996_s22 }
  0x2c   : > { %p13001_p10 = por %p13000_p9, %p12999_p3 }
  0x2e   : > { %p13002_p11 = pnand %p13001_p10, %p12997_p1 }
  0x30   : > { %13005 = shalt.err (!%p13002_p11)  }
  0x31   : > { %227 = dma.hbm_to_vmem [thread:$0]  %s223_s20, 23296, %s225_s11, [#allocation3] }
  0x32   : > { %s13250_s30 = scalar_lea.vmem [#allocation9], %s10941_s23 }
  0x33   : > { %13078 = dma.done.wait [#allocation3], 23296 }
  0x34   : > { %13079 = vsyncadd [#allocation3], 4294944000  ;;  %v12469_v0 = vld [vmem:[#allocation4 + $0x78] sm:$0xff]  ;;  %v12468_v1 = vld [vmem:[#allocation4 + $0x70] sm:$0xff]  ;;  %vm377_vm0 = vcmask 1042432   ;;  %vm378_vm1 = vcmask 1046532  }
  0x35   : > { %12830 = vmatpush.bf16.msra.mxu1 %v12469_v0  ;;  %12831 = vmatpush.bf16.msra.mxu2 %v12469_v0  ;;  %v12467_v2 = vld [vmem:[#allocation4 + $0x68] sm:$0xff]  ;;  %v12466_v3 = vld [vmem:[#allocation4 + $0x60] sm:$0xff]  ;;  %v306_v5 = vld [vmem:[#allocation2 + $0xec] sm:$0xf]  ;;  %vm1039_vm3 = vcmask 1041408   ;;  %vm1040_vm4 = vcmask 1045508  }
  0x36   : > { %12832 = vmatpush.bf16.msra.mxu3 %v12469_v0  ;;  %621 = vmatpush.bf16.msra.mxu0 %v12469_v0  ;;  %v294_v4 = vld [vmem:[#allocation2 + $0x7c] sm:$0xf]  ;;  %v282_v7 = vld [vmem:[#allocation2 + $0xc] sm:$0xf]  ;;  %v293_v8 = vld [vmem:[#allocation2 + $0x78] sm:$0xe] }
  0x37   : > { %v318_v6 = vld [vmem:[#allocation2 + $0x15c] sm:$0xf]  ;;  %v295_v9 = vld [vmem:[#allocation2 + $0x80] sm:$0x1]  ;;  %v410_v10 = vrot.slane %v294_v4, 5  ;;  %v12465_v11 = vld [vmem:[#allocation4 + $0x58] sm:$0xff] }
  0x38   : > { %v305_v12 = vld [vmem:[#allocation2 + $0xe8] sm:$0xe]  ;;  %v307_v13 = vld [vmem:[#allocation2 + $0xf0] sm:$0x1]  ;;  %v438_v14 = vrot.slane %v306_v5, 5  ;;  %v466_v17 = vrot.slane %v318_v6, 5  ;;  %vm13254_vm2 = vmor %vm377_vm0, %vm378_vm1 }
  0x39   : > { %12833 = vmatpush.bf16.msra.mxu1 %v12468_v1  ;;  %12834 = vmatpush.bf16.msra.mxu2 %v12468_v1  ;;  %v317_v15 = vld [vmem:[#allocation2 + $0x158] sm:$0xe]  ;;  %v319_v16 = vld [vmem:[#allocation2 + $0x160] sm:$0x1]  ;;  %v382_v18 = vrot.slane %v282_v7, 5  ;;  %v10947_v21 = vrot.slane %v293_v8, 9  ;;  %vm13330_vm7 = vmor %vm1039_vm3, %vm1040_vm4 }
  0x3a   : > { %12835 = vmatpush.bf16.msra.mxu3 %v12468_v1  ;;  %622 = vmatpush.bf16.msra.mxu0 %v12468_v1  ;;  %v281_v19 = vld [vmem:[#allocation2 + $0x8] sm:$0xe]  ;;  %v283_v20 = vld [vmem:[#allocation2 + $0x10] sm:$0x1]  ;;  %v412_v22 = vrot.slane %v410_v10, 4  ;;  %v413_v23 = vrot.slane %v295_v9, 5 }
  0x3b   : > { %v10951_v24 = vrot.slane %v305_v12, 9  ;;  %v12464_v25 = vld [vmem:[#allocation4 + $0x50] sm:$0xff]  ;;  %v440_v27 = vrot.slane %v438_v14, 4  ;;  %v441_v28 = vrot.slane %v307_v13, 5  ;;  %v10955_v29 = vrot.slane %v317_v15, 9  ;;  %v12463_v37 = vld [vmem:[#allocation4 + $0x48] sm:$0xff] }
  0x3c   : > { %v469_v30 = vrot.slane %v319_v16, 5  ;;  %v468_v31 = vrot.slane %v466_v17, 4  ;;  %v10943_v32 = vrot.slane %v281_v19, 9  ;;  %v384_v33 = vrot.slane %v382_v18, 4  ;;  %v12462_v48 = vld [vmem:[#allocation4 + $0x40] sm:$0xff]  ;;  %v12477_v54 = vld [vmem:[#allocation4 + $0xb8] sm:$0xff] }
  0x3d   : > { %12836 = vmatpush.bf16.msra.mxu1 %v12467_v2  ;;  %12837 = vmatpush.bf16.msra.mxu2 %v12467_v2  ;;  %v385_v34 = vrot.slane %v283_v20, 5  ;;  %v411_v35 = vsel %vm13254_vm2, %v10947_v21, %v410_v10  ;;  %v439_v36 = vsel %vm13254_vm2, %v10951_v24, %v438_v14  ;;  %v414_v38 = vsel %vm13254_vm2, %v412_v22, %v413_v23  ;;  %v297_v53 = vld [vmem:[#allocation2 + $0x98] sm:$0xf]  ;;  %v309_v55 = vld [vmem:[#allocation2 + $0x108] sm:$0xf]  ;;  %v12484_v12 = vld [vmem:[#allocation4 + $0xf0] sm:$0xff] }
  0x3e   : > { %12838 = vmatpush.bf16.msra.mxu3 %v12467_v2  ;;  %623 = vmatpush.bf16.msra.mxu0 %v12467_v2  ;;  %v442_v39 = vsel %vm13254_vm2, %v440_v27, %v441_v28  ;;  %v467_v40 = vsel %vm13254_vm2, %v10955_v29, %v466_v17  ;;  %v470_v41 = vsel %vm13254_vm2, %v468_v31, %v469_v30  ;;  %v517_v44 = vunpack.c.l.b16 %v411_v35  ;;  %v12485_v56 = vld [vmem:[#allocation4 + $0xf8] sm:$0xff]  ;;  %v321_v57 = vld [vmem:[#allocation2 + $0x178] sm:$0xf]  ;;  %v296_v62 = vld [vmem:[#allocation2 + $0x94] sm:$0xe]  ;;  %s10821_s6 = sshll.u32 %s13250_s30, 4  ;;  %s10822_s6 = int_to_ptr.vmem [resolvable:$true] %s10821_s6 }
  0x3f   : > { %v383_v42 = vsel %vm13254_vm2, %v10943_v32, %v382_v18  ;;  %v386_v43 = vsel %vm13254_vm2, %v384_v33, %v385_v34  ;;  %v518_v45 = vunpack.c.l.b16 %v414_v38  ;;  %v525_v46 = vunpack.c.l.b16 %v439_v36  ;;  %v285_v58 = vld [vmem:[#allocation2 + $0x28] sm:$0xf]  ;;  %v298_v63 = vld [vmem:[#allocation2 + $0x9c] sm:$0x1]  ;;  %v308_v5 = vld [vmem:[#allocation2 + $0x104] sm:$0xe] }
  0x40   : > { %v526_v47 = vunpack.c.l.b16 %v442_v39  ;;  %v533_v49 = vunpack.c.l.b16 %v467_v40  ;;  %v534_v50 = vunpack.c.l.b16 %v470_v41  ;;  %v509_v51 = vunpack.c.l.b16 %v383_v42  ;;  %v12461_v61 = vld [vmem:[#allocation4 + $0x38] sm:$0xff]  ;;  %v320_v8 = vld [vmem:[#allocation2 + $0x174] sm:$0xe]  ;;  %v322_v9 = vld [vmem:[#allocation2 + $0x17c] sm:$0x1]  ;;  %s13038_s18 = scalar_lea.hbm %s15164_s3, 256 }
  0x41   : > { %12839 = vmatpush.bf16.msra.mxu1 %v12466_v3  ;;  %12840 = vmatpush.bf16.msra.mxu2 %v12466_v3  ;;  %v510_v52 = vunpack.c.l.b16 %v386_v43  ;;  %v545_v59 = vpack.c.b16 %v518_v45, %v517_v44  ;;  %v417_v0 = vrot.slane %v297_v53, 5  ;;  %v12493_v4 = vld [vmem:[#allocation4 + $0x138] sm:$0xff]  ;;  %v445_v7 = vrot.slane %v309_v55, 5  ;;  %v284_v13 = vld [vmem:[#allocation2 + $0x24] sm:$0xe]  ;;  %v12475_v30 = vld [vmem:[#allocation4 + $0xa8] sm:$0xff] }
  0x42   : > { %12841 = vmatpush.bf16.msra.mxu3 %v12466_v3  ;;  %624 = vmatpush.bf16.msra.mxu0 %v12466_v3  ;;  %v549_v60 = vpack.c.b16 %v526_v47, %v525_v46  ;;  %v553_v1 = vpack.c.b16 %v534_v50, %v533_v49  ;;  %v12476_v3 = vld [vmem:[#allocation4 + $0xb0] sm:$0xff]  ;;  %v310_v6 = vld [vmem:[#allocation2 + $0x10c] sm:$0x1]  ;;  %v473_v10 = vrot.slane %v321_v57, 5  ;;  %v10948_v15 = vrot.slane %v296_v62, 9  ;;  %v12483_v31 = vld [vmem:[#allocation4 + $0xe8] sm:$0xff] }
  0x43   : > { %v541_v2 = vpack.c.b16 %v510_v52, %v509_v51  ;;  %v286_v14 = vld [vmem:[#allocation2 + $0x2c] sm:$0x1]  ;;  %v419_v16 = vrot.slane %v417_v0, 4  ;;  %v420_v17 = vrot.slane %v298_v63, 5  ;;  %v10952_v18 = vrot.slane %v308_v5, 9  ;;  %v12460_v23 = vld [vmem:[#allocation4 + $0x30] sm:$0xff] }
  0x44   : > { %v447_v19 = vrot.slane %v445_v7, 4  ;;  %v448_v20 = vrot.slane %v310_v6, 5  ;;  %v10956_v21 = vrot.slane %v320_v8, 9  ;;  %v476_v22 = vrot.slane %v322_v9, 5  ;;  %v12492_v29 = vld [vmem:[#allocation4 + $0x130] sm:$0xff]  ;;  %v12459_v40 = vld [vmem:[#allocation4 + $0x28] sm:$0xff] }
  0x45   : > { %12842 = vmatpush.bf16.msra.mxu1 %v12465_v11  ;;  %12843 = vmatpush.bf16.msra.mxu2 %v12465_v11  ;;  %v475_v24 = vrot.slane %v473_v10, 4  ;;  %v392_v28 = vrot.slane %v286_v14, 5  ;;  %v418_v32 = vsel %vm13254_vm2, %v10948_v15, %v417_v0  ;;  %v421_v33 = vsel %vm13254_vm2, %v419_v16, %v420_v17  ;;  %v12491_v41 = vld [vmem:[#allocation4 + $0x128] sm:$0xff]  ;;  %v12474_v44 = vld [vmem:[#allocation4 + $0xa0] sm:$0xff]  ;;  %v13290_v53 = vld [vmem:[#allocation2 + $0x124] sm:$0xf] }
  0x46   : > { %12844 = vmatpush.bf16.msra.mxu3 %v12465_v11  ;;  %625 = vmatpush.bf16.msra.mxu0 %v12465_v11  ;;  %v389_v11 = vrot.slane %v285_v58, 5  ;;  %v446_v34 = vsel %vm13254_vm2, %v10952_v18, %v445_v7  ;;  %v449_v35 = vsel %vm13254_vm2, %v447_v19, %v448_v20  ;;  %v474_v36 = vsel %vm13254_vm2, %v10956_v21, %v473_v10  ;;  %v12482_v45 = vld [vmem:[#allocation4 + $0xe0] sm:$0xff]  ;;  %v12481_v62 = vld [vmem:[#allocation4 + $0xd8] sm:$0xff]  ;;  %v325_v8 = vld [vmem:[#allocation2 + $0x198] sm:$0x1] }
  0x47   : > { %v519_v42 = vunpack.c.l.b16 %v418_v32  ;;  %v520_v43 = vunpack.c.l.b16 %v421_v33  ;;  %v527_v46 = vunpack.c.l.b16 %v446_v34  ;;  %v528_v47 = vunpack.c.l.b16 %v449_v35  ;;  %v300_v52 = vld [vmem:[#allocation2 + $0xb4] sm:$0xf]  ;;  %v299_v58 = vld [vmem:[#allocation2 + $0xb0] sm:$0xe]  ;;  %v313_v6 = vld [vmem:[#allocation2 + $0x128] sm:$0x1] }
  0x48   : > { %v391_v27 = vrot.slane %v389_v11, 4  ;;  %v12458_v55 = vld [vmem:[#allocation4 + $0x20] sm:$0xff]  ;;  %v424_v0 = vrot.slane %v300_v52, 5  ;;  %v287_v9 = vld [vmem:[#allocation2 + $0x40] sm:$0xe]  ;;  %v10949_v16 = vrot.slane %v299_v58, 9 }
  0x49   : > { %12845 = vmatpush.bf16.msra.mxu1 %v12464_v25  ;;  %12846 = vmatpush.bf16.msra.mxu2 %v12464_v25  ;;  %v546_v57 = vpack.c.b16 %v520_v43, %v519_v42  ;;  %v550_v63 = vpack.c.b16 %v528_v47, %v527_v46  ;;  %v323_v7 = vld [vmem:[#allocation2 + $0x190] sm:$0xe]  ;;  %v12472_v14 = vld [vmem:[#allocation4 + $0x90] sm:$0xff]  ;;  %v455_v21 = vrot.slane %v313_v6, 5  ;;  %v12479_v32 = vld [vmem:[#allocation4 + $0xc8] sm:$0xff]  ;;  %vm1501_vm5 = vcmask 1040384  }
  0x4a   : > { %12847 = vmatpush.bf16.msra.mxu3 %v12464_v25  ;;  %626 = vmatpush.bf16.msra.mxu0 %v12464_v25  ;;  %v10944_v25 = vrot.slane %v284_v13, 9  ;;  %v393_v39 = vsel %vm13254_vm2, %v391_v27, %v392_v28  ;;  %v289_v13 = vld [vmem:[#allocation2 + $0x48] sm:$0x1]  ;;  %v12480_v15 = vld [vmem:[#allocation4 + $0xd0] sm:$0xff]  ;;  %v426_v17 = vrot.slane %v424_v0, 4  ;;  %v425_v33 = vsel %vm13254_vm2, %v10949_v16, %v424_v0  ;;  %v12487_v42 = vld [vmem:[#allocation4 + $0x108] sm:$0xff] }
  0x4b   : > { %v512_v51 = vunpack.c.l.b16 %v393_v39  ;;  %v399_v28 = vrot.slane %v289_v13, 5  ;;  %v12470_v43 = vld [vmem:[#allocation4 + $0x80] sm:$0xff]  ;;  %v302_v58 = vld [vmem:[#allocation2 + $0xcc] sm:$0xe]  ;;  %v316_v6 = vld [vmem:[#allocation2 + $0x144] sm:$0x1] }
  0x4c   : > { %v390_v38 = vsel %vm13254_vm2, %v10944_v25, %v389_v11  ;;  %v12457_v11 = vld [vmem:[#allocation4 + $0x18] sm:$0xff]  ;;  %v10945_v25 = vrot.slane %v287_v9, 9  ;;  %v328_v9 = vld [vmem:[#allocation2 + $0x1b4] sm:$0x1]  ;;  %v462_v16 = vrot.slane %v316_v6, 5  ;;  %vm1502_vm6 = vcmask 1044484  }
  0x4d   : > { %12848 = vmatpush.bf16.msra.mxu1 %v12463_v37  ;;  %12849 = vmatpush.bf16.msra.mxu2 %v12463_v37  ;;  %v511_v50 = vunpack.c.l.b16 %v390_v38  ;;  %vm13334_vm8 = vmor %vm1501_vm5, %vm1502_vm6 }
  0x4e   : > { %12850 = vmatpush.bf16.msra.mxu3 %v12463_v37  ;;  %627 = vmatpush.bf16.msra.mxu0 %v12463_v37  ;;  %v477_v37 = vsel %vm13254_vm2, %v475_v24, %v476_v22  ;;  %v10957_v22 = vrot.slane %v323_v7, 9  ;;  %v483_v24 = vrot.slane %v325_v8, 5  ;;  %v326_v7 = vld [vmem:[#allocation2 + $0x1ac] sm:$0xe] }
  0x4f   : > { %v536_v49 = vunpack.c.l.b16 %v477_v37  ;;  %v542_v5 = vpack.c.b16 %v512_v51, %v511_v50 }
  0x51   : > { %12851 = vmatpush.bf16.msra.mxu1 %v12462_v48  ;;  %12852 = vmatpush.bf16.msra.mxu2 %v12462_v48 }
  0x52   : > { %12853 = vmatpush.bf16.msra.mxu3 %v12462_v48  ;;  %628 = vmatpush.bf16.msra.mxu0 %v12462_v48  ;;  %v535_v48 = vunpack.c.l.b16 %v474_v36 }
  0x54   : > { %649 = vmatmul.bf16.vlgmr.msra.gmra.mxu1 %v545_v59  ;;  %669 = vmatmul.bf16.vlgmr.msra.gmra.mxu2 %v549_v60  ;;  %v301_v59 = vld [vmem:[#allocation2 + $0xb8] sm:$0x1]  ;;  %v12473_v60 = vld [vmem:[#allocation4 + $0x98] sm:$0xff] }
  0x55   : > { %1283 = vmatpush.bf16.msrb.mxu2 %v12477_v54  ;;  %689 = vmatmul.bf16.vlgmr.msra.gmra.mxu3 %v553_v1  ;;  %v13292_v54 = vld [vmem:[#allocation2 + $0x194] sm:$0xf]  ;;  %v311_v1 = vld [vmem:[#allocation2 + $0x120] sm:$0xe]  ;;  %v427_v18 = vrot.slane %v301_v59, 5 }
  0x56   : > { %1745 = vmatpush.bf16.msrb.mxu3 %v12485_v56  ;;  %629 = vmatmul.bf16.vlgmr.msra.gmra.mxu0 %v541_v2  ;;  %v12490_v56 = vld [vmem:[#allocation4 + $0x120] sm:$0xff]  ;;  %v452_v2 = vrot.slane %v13290_v53, 5  ;;  %v10953_v19 = vrot.slane %v311_v1, 9  ;;  %v291_v59 = vld [vmem:[#allocation2 + $0x60] sm:$0xf] }
  0x57   : > { %854 = vmatpush.bf16.msrb.mxu1 %v12461_v61  ;;  %2203 = vmatpush.bf16.msrb.mxu0 %v12493_v4  ;;  %v288_v61 = vld [vmem:[#allocation2 + $0x44] sm:$0xf]  ;;  %v554_v4 = vpack.c.b16 %v536_v49, %v535_v48  ;;  %v428_v34 = vsel %vm13254_vm2, %v426_v17, %v427_v18  ;;  %v303_v53 = vld [vmem:[#allocation2 + $0xd0] sm:$0xf]  ;;  %v403_v8 = vrot.slane %v291_v59, 5  ;;  %v10958_v17 = vrot.slane %v326_v7, 9 }
  0x58   : > { %v396_v10 = vrot.slane %v288_v61, 5  ;;  %v454_v20 = vrot.slane %v452_v2, 4  ;;  %v453_v35 = vsel %vm13254_vm2, %v10953_v19, %v452_v2  ;;  %v522_v46 = vunpack.c.l.b16 %v428_v34  ;;  %v304_v2 = vld [vmem:[#allocation2 + $0xd4] sm:$0x1]  ;;  %v12509_v19 = vld [vmem:[#allocation4 + $0x1b8] sm:$0xff] }
  0x59   : > { %1284 = vmatpush.bf16.msrb.mxu2 %v12476_v3  ;;  %v480_v3 = vrot.slane %v13292_v54, 5  ;;  %v529_v47 = vunpack.c.l.b16 %v453_v35  ;;  %v315_v54 = vld [vmem:[#allocation2 + $0x140] sm:$0xf]  ;;  %v434_v13 = vrot.slane %v304_v2, 5  ;;  %v1868_v59 = vld [vmem:[#allocation2 + $0xb8] sm:$0x1] }
  0x5a   : > { %1746 = vmatpush.bf16.msrb.mxu3 %v12484_v12  ;;  %v12489_v12 = vld [vmem:[#allocation4 + $0x118] sm:$0xff]  ;;  %v398_v27 = vrot.slane %v396_v10, 4  ;;  %v456_v36 = vsel %vm13254_vm2, %v454_v20, %v455_v21  ;;  %v397_v39 = vsel %vm13254_vm2, %v10945_v25, %v396_v10  ;;  %v290_v10 = vld [vmem:[#allocation2 + $0x5c] sm:$0xe] }
  0x5b   : > { %855 = vmatpush.bf16.msrb.mxu1 %v12460_v23  ;;  %2204 = vmatpush.bf16.msrb.mxu0 %v12492_v29  ;;  %v482_v23 = vrot.slane %v480_v3, 4  ;;  %v12456_v29 = vld [vmem:[#allocation4 + $0x10] sm:$0xff]  ;;  %v481_v37 = vsel %vm13254_vm2, %v10957_v22, %v480_v3  ;;  %v530_v48 = vunpack.c.l.b16 %v456_v36  ;;  %v513_v51 = vunpack.c.l.b16 %v397_v39  ;;  %v314_v3 = vld [vmem:[#allocation2 + $0x13c] sm:$0xe]  ;;  %v12517_v20 = vld [vmem:[#allocation4 + $0x1f8] sm:$0xff] }
  0x5c   : > { %v537_v49 = vunpack.c.l.b16 %v481_v37  ;;  %v12501_v21 = vld [vmem:[#allocation4 + $0x178] sm:$0xff]  ;;  %v490_v22 = vrot.slane %v328_v9, 5 }
  0x5d   : > { %1285 = vmatpush.bf16.msrb.mxu2 %v12475_v30  ;;  %v12488_v30 = vld [vmem:[#allocation4 + $0x110] sm:$0xff]  ;;  %v484_v38 = vsel %vm13254_vm2, %v482_v23, %v483_v24  ;;  %v551_v61 = vpack.c.b16 %v530_v48, %v529_v47  ;;  %v10946_v23 = vrot.slane %v290_v10, 9  ;;  %v405_v24 = vrot.slane %v403_v8, 4 }
  0x5e   : > { %1747 = vmatpush.bf16.msrb.mxu3 %v12483_v31  ;;  %v12471_v31 = vld [vmem:[#allocation4 + $0x88] sm:$0xff]  ;;  %v538_v50 = vunpack.c.l.b16 %v484_v38 }
  0x5f   : > { %856 = vmatpush.bf16.msrb.mxu1 %v12459_v40  ;;  %2205 = vmatpush.bf16.msrb.mxu0 %v12491_v41  ;;  %v400_v40 = vsel %vm13254_vm2, %v398_v27, %v399_v28  ;;  %v12455_v41 = vld [vmem:[#allocation4 + $0x8] sm:$0xff]  ;;  %v12541_v27 = vld [vmem:[#allocation4 + $0x238] sm:$0xff]  ;;  %v404_v34 = vsel %vm13254_vm2, %v10946_v23, %v403_v8 }
  0x60   : > { %v514_v52 = vunpack.c.l.b16 %v400_v40  ;;  %v555_v0 = vpack.c.b16 %v538_v50, %v537_v49 }
  0x61   : > { %1286 = vmatpush.bf16.msrb.mxu2 %v12474_v44  ;;  %v12478_v44 = vld [vmem:[#allocation4 + $0xc0] sm:$0xff] }
  0x62   : > { %1748 = vmatpush.bf16.msrb.mxu3 %v12482_v45  ;;  %v521_v45 = vunpack.c.l.b16 %v425_v33  ;;  %v543_v1 = vpack.c.b16 %v514_v52, %v513_v51  ;;  %v943_v51 = vld [vmem:[#allocation2 + $0x10] sm:$0xc]  ;;  %v945_v52 = vld [vmem:[#allocation2 + $0x18] sm:$0x3] }
  0x63   : > { %857 = vmatpush.bf16.msrb.mxu1 %v12458_v55  ;;  %2206 = vmatpush.bf16.msrb.mxu0 %v12490_v56  ;;  %v327_v55 = vld [vmem:[#allocation2 + $0x1b0] sm:$0xf] }
  0x64   : > { %654 = vmatmul.bf16.gmra.mxu1 %v546_v57  ;;  %674 = vmatmul.bf16.gmra.mxu2 %v550_v63  ;;  %v12454_v56 = vld [vmem:[#allocation4] sm:$0xff]  ;;  %v459_v63 = vrot.slane %v315_v54, 5 }
  0x65   : > { %1287 = vmatpush.bf16.msrb.mxu2 %v12473_v60  ;;  %694 = vmatmul.bf16.gmra.mxu3 %v554_v4  ;;  %v12486_v57 = vld [vmem:[#allocation4 + $0x100] sm:$0xff]  ;;  %v547_v60 = vpack.c.b16 %v522_v46, %v521_v45  ;;  %v487_v4 = vrot.slane %v327_v55, 5  ;;  %v1406_v45 = vld [vmem:[#allocation2 + $0xac] sm:$0xf]  ;;  %v1405_v55 = vld [vmem:[#allocation2 + $0xa8] sm:$0x8] }
  0x66   : > { %1749 = vmatpush.bf16.msrb.mxu3 %v12481_v62  ;;  %634 = vmatmul.bf16.gmra.mxu0 %v542_v5  ;;  %v431_v62 = vrot.slane %v303_v53, 5  ;;  %v10950_v5 = vrot.slane %v302_v58, 9  ;;  %v1867_v46 = vld [vmem:[#allocation2 + $0xb4] sm:$0xf]  ;;  %v1506_v54 = vrot.slane %v1406_v45, 7 }
  0x67   : > { %858 = vmatpush.bf16.msrb.mxu1 %v12457_v11  ;;  %2207 = vmatpush.bf16.msrb.mxu0 %v12489_v12  ;;  %v292_v11 = vld [vmem:[#allocation2 + $0x64] sm:$0x1]  ;;  %v489_v18 = vrot.slane %v487_v4, 4  ;;  %v1866_v58 = vld [vmem:[#allocation2 + $0xb0] sm:$0xe] }
  0x68   : > { %v433_v12 = vrot.slane %v431_v62, 4  ;;  %v406_v25 = vrot.slane %v292_v11, 5  ;;  %v432_v28 = vsel %vm13254_vm2, %v10950_v5, %v431_v62  ;;  %v1047_v62 = vrot.slane %v945_v52, 6 }
  0x69   : > { %1288 = vmatpush.bf16.msrb.mxu2 %v12472_v14  ;;  %v10954_v14 = vrot.slane %v314_v3, 9  ;;  %v491_v33 = vsel %vm13254_vm2, %v489_v18, %v490_v22  ;;  %v523_v36 = vunpack.c.l.b16 %v432_v28  ;;  %v11183_v3 = vrot.slane %v1866_v58, 9  ;;  %v12438_v22 = vld [vmem:[#allocation2] sm:$0xff]  ;;  %v946_v28 = vld [vmem:[#allocation2 + $0x2c] sm:$0xc] }
  0x6a   : > { %1750 = vmatpush.bf16.msrb.mxu3 %v12480_v15  ;;  %v461_v15 = vrot.slane %v459_v63, 4  ;;  %v407_v35 = vsel %vm13254_vm2, %v405_v24, %v406_v25  ;;  %v1967_v5 = vrot.slane %v1868_v59, 5 }
  0x6b   : > { %859 = vmatpush.bf16.msrb.mxu1 %v12456_v29  ;;  %2208 = vmatpush.bf16.msrb.mxu0 %v12488_v30  ;;  %v435_v29 = vsel %vm13254_vm2, %v433_v12, %v434_v13  ;;  %v460_v30 = vsel %vm13254_vm2, %v10954_v14, %v459_v63  ;;  %v11135_v63 = vrot.slane %v1405_v55, 11 }
  0x6c   : > { %v524_v37 = vunpack.c.l.b16 %v435_v29  ;;  %v531_v38 = vunpack.c.l.b16 %v460_v30  ;;  %v948_v30 = vld [vmem:[#allocation2 + $0x34] sm:$0x3] }
  0x6d   : > { %1289 = vmatpush.bf16.msrb.mxu2 %v12471_v31  ;;  %v463_v31 = vsel %vm13254_vm2, %v461_v15, %v462_v16  ;;  %v1507_v9 = vsel %vm13334_vm8, %v11135_v63, %v1506_v54  ;;  %v1873_v63 = vld [vmem:[#allocation2 + $0xec] sm:$0xf] }
  0x6e   : > { %1751 = vmatpush.bf16.msrb.mxu3 %v12479_v32  ;;  %v488_v32 = vsel %vm13254_vm2, %v10958_v17, %v487_v4  ;;  %v532_v39 = vunpack.c.l.b16 %v463_v31  ;;  %v548_v47 = vpack.c.b16 %v524_v37, %v523_v36  ;;  %v1633_v15 = vunpack.c.l.b16 %v1507_v9  ;;  %v1408_v31 = vld [vmem:[#allocation2 + $0xc4] sm:$0x8]  ;;  %v951_v9 = vld [vmem:[#allocation2 + $0x50] sm:$0x3] }
  0x6f   : > { %860 = vmatpush.bf16.msrb.mxu1 %v12455_v41  ;;  %2209 = vmatpush.bf16.msrb.mxu0 %v12487_v42  ;;  %v539_v40 = vunpack.c.l.b16 %v488_v32  ;;  %v540_v41 = vunpack.c.l.b16 %v491_v33  ;;  %v515_v42 = vunpack.c.l.b16 %v404_v34  ;;  %v1410_v33 = vld [vmem:[#allocation2 + $0xcc] sm:$0x7]  ;;  %v11088_v36 = vrot.slane %v946_v28, 10 }
  0x70   : > { %v552_v48 = vpack.c.b16 %v532_v39, %v531_v38  ;;  %v1869_v34 = vld [vmem:[#allocation2 + $0xcc] sm:$0xe]  ;;  %v1054_v38 = vrot.slane %v948_v30, 6  ;;  %v11136_v39 = vrot.slane %v1408_v31, 11 }
  0x71   : > { %1290 = vmatpush.bf16.msrb.mxu2 %v12470_v43  ;;  %v516_v43 = vunpack.c.l.b16 %v407_v35  ;;  %v556_v49 = vpack.c.b16 %v540_v41, %v539_v40  ;;  %v1871_v35 = vld [vmem:[#allocation2 + $0xd4] sm:$0x1]  ;;  %v12508_v41 = vld [vmem:[#allocation4 + $0x1b0] sm:$0xff]  ;;  %v11184_v45 = vrot.slane %v1869_v34, 9 }
  0x72   : > { %1752 = vmatpush.bf16.msrb.mxu3 %v12478_v44  ;;  %v944_v44 = vld [vmem:[#allocation2 + $0x14] sm:$0xf] }
  0x73   : > { %861 = vmatpush.bf16.msrb.mxu1 %v12454_v56  ;;  %2210 = vmatpush.bf16.msrb.mxu0 %v12486_v57  ;;  %v544_v50 = vpack.c.b16 %v516_v43, %v515_v42  ;;  %v1044_v53 = vrot.slane %v944_v44, 6  ;;  %v1964_v56 = vrot.slane %v1867_v46, 5  ;;  %v1407_v57 = vld [vmem:[#allocation2 + $0xb0] sm:$0x7]  ;;  %v12516_v42 = vld [vmem:[#allocation4 + $0x1f0] sm:$0xff]  ;;  %v1516_v44 = vrot.slane %v1410_v33, 7 }
  0x74   : > { %659 = vmatmul.bf16.gmra.mxu1 %v547_v60  ;;  %679 = vmatmul.bf16.gmra.mxu2 %v551_v61  ;;  %v11087_v60 = vrot.slane %v943_v51, 10  ;;  %v1509_v2 = vrot.slane %v1407_v57, 7  ;;  %v12500_v43 = vld [vmem:[#allocation4 + $0x170] sm:$0xff] }
  0x75   : > { %699 = vmatmul.bf16.gmra.mxu3 %v555_v0  ;;  %3120 = vmatpush.bf16.msra.mxu2 %v12509_v19  ;;  %v1046_v61 = vrot.slane %v1044_v53, 4  ;;  %v1508_v0 = vrot.slane %v1506_v54, 4  ;;  %v1966_v4 = vrot.slane %v1964_v56, 4  ;;  %v1965_v11 = vsel %vm13254_vm2, %v11183_v3, %v1964_v56  ;;  %v947_v19 = vld [vmem:[#allocation2 + $0x30] sm:$0xf] }
  0x76   : > { %639 = vmatmul.bf16.gmra.mxu0 %v543_v1  ;;  %3578 = vmatpush.bf16.msra.mxu3 %v12517_v20  ;;  %v1045_v7 = vsel %vm13330_vm7, %v11087_v60, %v1044_v53  ;;  %v2091_v17 = vunpack.c.l.b16 %v1965_v11  ;;  %v1409_v20 = vld [vmem:[#allocation2 + $0xc8] sm:$0xf]  ;;  %v1051_v24 = vrot.slane %v947_v19, 6  ;;  %v1978_v11 = vrot.slane %v1873_v63, 5 }
  0x77   : > { %2661 = vmatpush.bf16.msra.mxu1 %v12501_v21  ;;  %3860 = vmatpush.bf16.msra.mxu0 %v12541_v27  ;;  %v1048_v8 = vsel %vm13330_vm7, %v1046_v61, %v1047_v62  ;;  %v1510_v10 = vsel %vm13334_vm8, %v1508_v0, %v1509_v2  ;;  %v1968_v12 = vsel %vm13254_vm2, %v1966_v4, %v1967_v5  ;;  %v1171_v13 = vunpack.c.l.b16 %v1045_v7  ;;  %v1870_v21 = vld [vmem:[#allocation2 + $0xd0] sm:$0xf]  ;;  %v950_v61 = vld [vmem:[#allocation2 + $0x4c] sm:$0xf]  ;;  %v1412_v62 = vld [vmem:[#allocation2 + $0xe4] sm:$0xf] }
  0x78   : > { %v1172_v14 = vunpack.c.l.b16 %v1048_v8  ;;  %v1634_v16 = vunpack.c.l.b16 %v1510_v10  ;;  %v2092_v18 = vunpack.c.l.b16 %v1968_v12  ;;  %v1513_v29 = vrot.slane %v1409_v20, 7  ;;  %v12439_v0 = vld [vmem:[#allocation2 + $0x1c] sm:$0xff]  ;;  %v949_v5 = vld [vmem:[#allocation2 + $0x48] sm:$0xc] }
  0x79   : > { %v1971_v32 = vrot.slane %v1870_v21, 5  ;;  %v1053_v37 = vrot.slane %v1051_v24, 4  ;;  %3121 = vmatpush.bf16.msra.mxu2 %v12508_v41  ;;  %v1058_v7 = vrot.slane %v950_v61, 6  ;;  %v1520_v8 = vrot.slane %v1412_v62, 7  ;;  %v1411_v10 = vld [vmem:[#allocation2 + $0xe0] sm:$0x8] }
  0x7a   : > { %v1203_v23 = vpack.c.b16 %v1172_v14, %v1171_v13  ;;  %v1665_v25 = vpack.c.b16 %v1634_v16, %v1633_v15  ;;  %v2123_v27 = vpack.c.b16 %v2092_v18, %v2091_v17  ;;  %v1515_v40 = vrot.slane %v1513_v29, 4  ;;  %3579 = vmatpush.bf16.msra.mxu3 %v12516_v42  ;;  %v1413_v12 = vld [vmem:[#allocation2 + $0xe8] sm:$0x7]  ;;  %v1874_v14 = vld [vmem:[#allocation2 + $0xf0] sm:$0x1] }
  0x7b   : > { %v1973_v46 = vrot.slane %v1971_v32, 4  ;;  %2662 = vmatpush.bf16.msra.mxu1 %v12500_v43  ;;  %v1514_v51 = vsel %vm13334_vm8, %v11136_v39, %v1513_v29  ;;  %v1972_v53 = vsel %vm13254_vm2, %v11184_v45, %v1971_v32  ;;  %v1872_v13 = vld [vmem:[#allocation2 + $0xe8] sm:$0xe]  ;;  %v11089_v15 = vrot.slane %v949_v5, 10 }
  0x7c   : > { %v1517_v52 = vsel %vm13334_vm8, %v1515_v40, %v1516_v44  ;;  %v1635_v57 = vunpack.c.l.b16 %v1514_v51  ;;  %v2093_v59 = vunpack.c.l.b16 %v1972_v53  ;;  %v1060_v16 = vrot.slane %v1058_v7, 4  ;;  %v1876_v39 = vld [vmem:[#allocation2 + $0x108] sm:$0xf]  ;;  %v12440_v40 = vld [vmem:[#allocation2 + $0x38] sm:$0xff]  ;;  %v952_v44 = vld [vmem:[#allocation2 + $0x64] sm:$0xc] }
  0x7d   : > { %v1636_v58 = vunpack.c.l.b16 %v1517_v52  ;;  %v1061_v17 = vrot.slane %v951_v9, 6  ;;  %v11137_v18 = vrot.slane %v1411_v10, 11  ;;  %v1522_v19 = vrot.slane %v1520_v8, 4  ;;  %v1875_v51 = vld [vmem:[#allocation2 + $0x104] sm:$0xe]  ;;  %v12539_v9 = vld [vmem:[#allocation4 + $0x228] sm:$0xff] }
  0x7e   : > { %v1523_v20 = vrot.slane %v1413_v12, 7  ;;  %v11185_v21 = vrot.slane %v1872_v13, 9  ;;  %v1877_v52 = vld [vmem:[#allocation2 + $0x10c] sm:$0x1]  ;;  %v11090_v53 = vrot.slane %v952_v44, 10  ;;  %v11186_v61 = vrot.slane %v1875_v51, 9 }
  0x7f   : > { %v1666_v3 = vpack.c.b16 %v1636_v58, %v1635_v57  ;;  %v12507_v58 = vld [vmem:[#allocation4 + $0x1a8] sm:$0xff]  ;;  %v1988_v63 = vrot.slane %v1877_v52, 5 }
  0x80   : > { %v1524_v28 = vsel %vm13334_vm8, %v1522_v19, %v1523_v20  ;;  %v1979_v29 = vsel %vm13254_vm2, %v11185_v21, %v1978_v11  ;;  %3122 = vmatpush.bf16.msra.mxu2 %v12507_v58  ;;  %v12441_v19 = vld [vmem:[#allocation2 + $0x54] sm:$0xff] }
  0x81   : > { %v1638_v34 = vunpack.c.l.b16 %v1524_v28  ;;  %v1417_v28 = vld [vmem:[#allocation2 + $0x118] sm:$0x8] }
  0x84   : > { %664 = vmatmul.bf16.gmra.mxu1 %v548_v47  ;;  %684 = vmatmul.bf16.gmra.mxu2 %v552_v48  ;;  %v1974_v47 = vrot.slane %v1871_v35, 5  ;;  %v12540_v48 = vld [vmem:[#allocation4 + $0x230] sm:$0xff]  ;;  %v2095_v35 = vunpack.c.l.b16 %v1979_v29 }
  0x85   : > { %704 = vmatmul.bf16.gmra.mxu3 %v556_v49  ;;  %3861 = vmatpush.bf16.msra.mxu0 %v12540_v48  ;;  %v1052_v49 = vsel %vm13330_vm7, %v11088_v36, %v1051_v24  ;;  %v1059_v24 = vsel %vm13330_vm7, %v11089_v15, %v1058_v7  ;;  %v1414_v48 = vld [vmem:[#allocation2 + $0xfc] sm:$0x8] }
  0x86   : > { %644 = vmatmul.bf16.gmra.mxu0 %v544_v50  ;;  %v1055_v50 = vsel %vm13330_vm7, %v1053_v37, %v1054_v38  ;;  %v1975_v54 = vsel %vm13254_vm2, %v1973_v46, %v1974_v47  ;;  %v1173_v55 = vunpack.c.l.b16 %v1052_v49  ;;  %v1175_v31 = vunpack.c.l.b16 %v1059_v24  ;;  %v953_v37 = vld [vmem:[#allocation2 + $0x68] sm:$0xf]  ;;  %v1415_v38 = vld [vmem:[#allocation2 + $0x100] sm:$0xf]  ;;  %v954_v47 = vld [vmem:[#allocation2 + $0x6c] sm:$0x3] }
  0x87   : > { %v1174_v56 = vunpack.c.l.b16 %v1055_v50  ;;  %v2094_v60 = vunpack.c.l.b16 %v1975_v54  ;;  %v1065_v45 = vrot.slane %v953_v37, 6  ;;  %v1527_v46 = vrot.slane %v1415_v38, 7  ;;  %v1416_v50 = vld [vmem:[#allocation2 + $0x104] sm:$0x7] }
  0x88   : > { %v1985_v49 = vrot.slane %v1876_v39, 5 }
  0x89   : > { %v1204_v2 = vpack.c.b16 %v1174_v56, %v1173_v55  ;;  %v2124_v4 = vpack.c.b16 %v2094_v60, %v2093_v59  ;;  %v1067_v54 = vrot.slane %v1065_v45, 4  ;;  %v1068_v55 = vrot.slane %v954_v47, 6  ;;  %v12515_v59 = vld [vmem:[#allocation4 + $0x1e8] sm:$0xff]  ;;  %3862 = vmatpush.bf16.msra.mxu0 %v12539_v9  ;;  %v1883_v9 = vld [vmem:[#allocation2 + $0x144] sm:$0x1] }
  0x8a   : > { %v11138_v56 = vrot.slane %v1414_v48, 11  ;;  %v1529_v57 = vrot.slane %v1527_v46, 4  ;;  %v1530_v60 = vrot.slane %v1416_v50, 7  ;;  %v1987_v62 = vrot.slane %v1985_v49, 4  ;;  %3580 = vmatpush.bf16.msra.mxu3 %v12515_v59 }
  0x8b   : > { %v1986_v7 = vsel %vm13254_vm2, %v11186_v61, %v1985_v49 }
  0x8c   : > { %v1531_v5 = vsel %vm13334_vm8, %v1529_v57, %v1530_v60  ;;  %v12442_v57 = vld [vmem:[#allocation2 + $0x70] sm:$0xff] }
  0x8d   : > { %v1640_v13 = vunpack.c.l.b16 %v1531_v5 }
  0x94   : > { %862 = vmatmul.bf16.vlgmr.msrb.gmra.mxu1 %v12438_v22  ;;  %1291 = vmatmul.bf16.vlgmr.msrb.gmra.mxu2 %v1203_v23  ;;  %v1980_v22 = vrot.slane %v1978_v11, 4  ;;  %v1981_v23 = vrot.slane %v1874_v14, 5  ;;  %v2097_v14 = vunpack.c.l.b16 %v1986_v7  ;;  %v1422_v7 = vld [vmem:[#allocation2 + $0x13c] sm:$0x7] }
  0x95   : > { %1753 = vmatmul.bf16.vlgmr.msrb.gmra.mxu3 %v1665_v25  ;;  %v1062_v25 = vsel %vm13330_vm7, %v1060_v16, %v1061_v17  ;;  %v956_v16 = vld [vmem:[#allocation2 + $0x84] sm:$0xf]  ;;  %v1418_v17 = vld [vmem:[#allocation2 + $0x11c] sm:$0xf] }
  0x96   : > { %2211 = vmatmul.bf16.vlgmr.msrb.gmra.mxu0 %v2123_v27  ;;  %v1521_v27 = vsel %vm13334_vm8, %v11137_v18, %v1520_v8  ;;  %v1982_v30 = vsel %vm13254_vm2, %v1980_v22, %v1981_v23  ;;  %v1176_v32 = vunpack.c.l.b16 %v1062_v25  ;;  %v1989_v8 = vsel %vm13254_vm2, %v1987_v62, %v1988_v63  ;;  %v1879_v18 = vld [vmem:[#allocation2 + $0x124] sm:$0xf]  ;;  %v955_v23 = vld [vmem:[#allocation2 + $0x80] sm:$0xc]  ;;  %v958_v62 = vld [vmem:[#allocation2 + $0x9c] sm:$0xc] }
  0x97   : > { %v1637_v33 = vunpack.c.l.b16 %v1521_v27  ;;  %v2096_v36 = vunpack.c.l.b16 %v1982_v30  ;;  %v2098_v15 = vunpack.c.l.b16 %v1989_v8  ;;  %v1072_v24 = vrot.slane %v956_v16, 6  ;;  %v957_v27 = vld [vmem:[#allocation2 + $0x88] sm:$0x3]  ;;  %v1419_v30 = vld [vmem:[#allocation2 + $0x120] sm:$0x7]  ;;  %v12514_v16 = vld [vmem:[#allocation4 + $0x1e0] sm:$0xff] }
  0x98   : > { %v1205_v41 = vpack.c.b16 %v1176_v32, %v1175_v31  ;;  %v1534_v25 = vrot.slane %v1418_v17, 7  ;;  %v1992_v29 = vrot.slane %v1879_v18, 5  ;;  %v1878_v31 = vld [vmem:[#allocation2 + $0x120] sm:$0xe]  ;;  %v1880_v32 = vld [vmem:[#allocation2 + $0x128] sm:$0x1]  ;;  %3581 = vmatpush.bf16.msra.mxu3 %v12514_v16 }
  0x99   : > { %v1667_v42 = vpack.c.b16 %v1638_v34, %v1637_v33  ;;  %v2125_v43 = vpack.c.b16 %v2096_v36, %v2095_v35  ;;  %v2126_v22 = vpack.c.b16 %v2098_v15, %v2097_v14  ;;  %v11091_v33 = vrot.slane %v955_v23, 10  ;;  %v1881_v8 = vld [vmem:[#allocation2 + $0x13c] sm:$0xe]  ;;  %v12506_v15 = vld [vmem:[#allocation4 + $0x1a0] sm:$0xff] }
  0x9a   : > { %v1074_v34 = vrot.slane %v1072_v24, 4  ;;  %v1075_v35 = vrot.slane %v957_v27, 6  ;;  %v11139_v36 = vrot.slane %v1417_v28, 11  ;;  %v1536_v37 = vrot.slane %v1534_v25, 4  ;;  %3123 = vmatpush.bf16.msra.mxu2 %v12506_v15  ;;  %v12498_v23 = vld [vmem:[#allocation4 + $0x160] sm:$0xff] }
  0x9b   : > { %v1537_v38 = vrot.slane %v1419_v30, 7  ;;  %v11187_v39 = vrot.slane %v1878_v31, 9  ;;  %v1544_v17 = vrot.slane %v1422_v7, 7  ;;  %v11188_v18 = vrot.slane %v1881_v8, 9 }
  0x9c   : > { %v1535_v44 = vsel %vm13334_vm8, %v11139_v36, %v1534_v25 }
  0x9d   : > { %v1641_v50 = vunpack.c.l.b16 %v1535_v44 }
  0xa4   : > { %867 = vmatmul.bf16.gmra.mxu1 %v12439_v0  ;;  %1296 = vmatmul.bf16.gmra.mxu2 %v1204_v2  ;;  %v12499_v0 = vld [vmem:[#allocation4 + $0x168] sm:$0xff]  ;;  %v1066_v2 = vsel %vm13330_vm7, %v11090_v53, %v1065_v45  ;;  %v1538_v45 = vsel %vm13334_vm8, %v1536_v37, %v1537_v38 }
  0xa5   : > { %1758 = vmatmul.bf16.gmra.mxu3 %v1666_v3  ;;  %v1069_v3 = vsel %vm13330_vm7, %v1067_v54, %v1068_v55  ;;  %2663 = vmatpush.bf16.msra.mxu1 %v12499_v0  ;;  %v1177_v10 = vunpack.c.l.b16 %v1066_v2  ;;  %v1642_v51 = vunpack.c.l.b16 %v1538_v45  ;;  %v959_v54 = vld [vmem:[#allocation2 + $0xa0] sm:$0xf]  ;;  %v1421_v55 = vld [vmem:[#allocation2 + $0x138] sm:$0xf]  ;;  %v12443_v45 = vld [vmem:[#allocation2 + $0x8c] sm:$0xff] }
  0xa6   : > { %2216 = vmatmul.bf16.gmra.mxu0 %v2124_v4  ;;  %v1528_v4 = vsel %vm13334_vm8, %v11138_v56, %v1527_v46  ;;  %v1178_v11 = vunpack.c.l.b16 %v1069_v3  ;;  %v1993_v46 = vsel %vm13254_vm2, %v11187_v39, %v1992_v29  ;;  %v1882_v56 = vld [vmem:[#allocation2 + $0x140] sm:$0xf]  ;;  %v1079_v63 = vrot.slane %v959_v54, 6  ;;  %v960_v3 = vld [vmem:[#allocation2 + $0xa4] sm:$0x3] }
  0xa7   : > { %v1639_v12 = vunpack.c.l.b16 %v1528_v4  ;;  %v2099_v52 = vunpack.c.l.b16 %v1993_v46  ;;  %v1669_v60 = vpack.c.b16 %v1642_v51, %v1641_v50  ;;  %v1541_v0 = vrot.slane %v1421_v55, 7  ;;  %v1420_v4 = vld [vmem:[#allocation2 + $0x134] sm:$0x8]  ;;  %v961_v50 = vld [vmem:[#allocation2 + $0xb8] sm:$0xc] }
  0xa8   : > { %v1206_v20 = vpack.c.b16 %v1178_v11, %v1177_v10  ;;  %v1999_v5 = vrot.slane %v1882_v56, 5  ;;  %v11092_v10 = vrot.slane %v958_v62, 10  ;;  %v1081_v11 = vrot.slane %v1079_v63, 4  ;;  %v963_v54 = vld [vmem:[#allocation2 + $0xc0] sm:$0x3] }
  0xa9   : > { %v1668_v21 = vpack.c.b16 %v1640_v13, %v1639_v12  ;;  %v1082_v12 = vrot.slane %v960_v3, 6  ;;  %v11140_v13 = vrot.slane %v1420_v4, 11  ;;  %v1543_v14 = vrot.slane %v1541_v0, 4  ;;  %2664 = vmatpush.bf16.msra.mxu1 %v12498_v23  ;;  %v1423_v55 = vld [vmem:[#allocation2 + $0x150] sm:$0x8] }
  0xaa   : > { %v1080_v25 = vsel %vm13330_vm7, %v11092_v10, %v1079_v63  ;;  %v2000_v31 = vsel %vm13254_vm2, %v11188_v18, %v1999_v5  ;;  %v1089_v63 = vrot.slane %v963_v54, 6 }
  0xab   : > { %v1083_v27 = vsel %vm13330_vm7, %v1081_v11, %v1082_v12  ;;  %v1545_v30 = vsel %vm13334_vm8, %v1543_v14, %v1544_v17  ;;  %v2101_v38 = vunpack.c.l.b16 %v2000_v31  ;;  %v1427_v31 = vld [vmem:[#allocation2 + $0x170] sm:$0xf] }
  0xac   : > { %v1644_v37 = vunpack.c.l.b16 %v1545_v30  ;;  %v965_v30 = vld [vmem:[#allocation2 + $0xd8] sm:$0xf] }
  0xb4   : > { %872 = vmatmul.bf16.gmra.mxu1 %v12440_v40  ;;  %1301 = vmatmul.bf16.gmra.mxu2 %v1205_v41  ;;  %v1994_v40 = vrot.slane %v1992_v29, 4  ;;  %v1995_v41 = vrot.slane %v1880_v32, 5  ;;  %v1542_v29 = vsel %vm13334_vm8, %v11140_v13, %v1541_v0  ;;  %v11141_v0 = vrot.slane %v1423_v55, 11 }
  0xb5   : > { %1763 = vmatmul.bf16.gmra.mxu3 %v1667_v42  ;;  %v1073_v42 = vsel %vm13330_vm7, %v11091_v33, %v1072_v24  ;;  %v12538_v33 = vld [vmem:[#allocation4 + $0x220] sm:$0xff]  ;;  %v1643_v36 = vunpack.c.l.b16 %v1542_v29 }
  0xb6   : > { %2221 = vmatmul.bf16.gmra.mxu0 %v2125_v43  ;;  %v1076_v43 = vsel %vm13330_vm7, %v1074_v34, %v1075_v35  ;;  %v1996_v47 = vsel %vm13254_vm2, %v1994_v40, %v1995_v41  ;;  %v1179_v48 = vunpack.c.l.b16 %v1073_v42  ;;  %v1181_v34 = vunpack.c.l.b16 %v1080_v25  ;;  %v962_v40 = vld [vmem:[#allocation2 + $0xbc] sm:$0xf]  ;;  %v1424_v41 = vld [vmem:[#allocation2 + $0x154] sm:$0xf] }
  0xb7   : > { %v1180_v49 = vunpack.c.l.b16 %v1076_v43  ;;  %v2100_v53 = vunpack.c.l.b16 %v1996_v47  ;;  %v1182_v35 = vunpack.c.l.b16 %v1083_v27  ;;  %3863 = vmatpush.bf16.msra.mxu0 %v12538_v33  ;;  %v1885_v43 = vld [vmem:[#allocation2 + $0x15c] sm:$0xf]  ;;  %v1086_v51 = vrot.slane %v962_v40, 6  ;;  %v1888_v33 = vld [vmem:[#allocation2 + $0x178] sm:$0xf] }
  0xb8   : > { %v2006_v56 = vrot.slane %v1885_v43, 5  ;;  %v964_v40 = vld [vmem:[#allocation2 + $0xd4] sm:$0xc]  ;;  %v1555_v43 = vrot.slane %v1427_v31, 7 }
  0xb9   : > { %v1207_v58 = vpack.c.b16 %v1180_v49, %v1179_v48  ;;  %v2127_v61 = vpack.c.b16 %v2100_v53, %v2099_v52  ;;  %v1208_v46 = vpack.c.b16 %v1182_v35, %v1181_v34  ;;  %v1670_v48 = vpack.c.b16 %v1644_v37, %v1643_v36  ;;  %v12444_v35 = vld [vmem:[#allocation2 + $0xa8] sm:$0xff] }
  0xba   : > { %v1548_v52 = vrot.slane %v1424_v41, 7  ;;  %v1088_v62 = vrot.slane %v1086_v51, 4  ;;  %v2008_v7 = vrot.slane %v2006_v56, 4  ;;  %v1093_v41 = vrot.slane %v965_v30, 6 }
  0xbb   : > { %v11094_v54 = vrot.slane %v964_v40, 10  ;;  %v12445_v40 = vld [vmem:[#allocation2 + $0xc4] sm:$0xff] }
  0xbc   : > { %v1550_v3 = vrot.slane %v1548_v52, 4  ;;  %v1090_v13 = vsel %vm13330_vm7, %v1088_v62, %v1089_v63  ;;  %v1549_v15 = vsel %vm13334_vm8, %v11141_v0, %v1548_v52  ;;  %v1889_v52 = vld [vmem:[#allocation2 + $0x17c] sm:$0x1]  ;;  %v1095_v55 = vrot.slane %v1093_v41, 4 }
  0xbd   : > { %v1645_v23 = vunpack.c.l.b16 %v1549_v15 }
  0xc4   : > { %877 = vmatmul.bf16.gmra.mxu1 %v12441_v19  ;;  %1306 = vmatmul.bf16.gmra.mxu2 %v1206_v20  ;;  %v2001_v19 = vrot.slane %v1999_v5, 4  ;;  %v2002_v20 = vrot.slane %v1883_v9, 5 }
  0xc5   : > { %1768 = vmatmul.bf16.gmra.mxu3 %v1668_v21 }
  0xc6   : > { %2226 = vmatmul.bf16.gmra.mxu0 %v2126_v22  ;;  %v2003_v32 = vsel %vm13254_vm2, %v2001_v19, %v2002_v20  ;;  %v1184_v20 = vunpack.c.l.b16 %v1090_v13 }
  0xc7   : > { %v2102_v39 = vunpack.c.l.b16 %v2003_v32 }
  0xc9   : > { %v2128_v49 = vpack.c.b16 %v2102_v39, %v2101_v38 }
  0xd1   : > { %v13398_v59 = vpop.f32.mrf.mxu1 }
  0xd3   : > { %v13400_v2 = vpop.f32.mrf.mxu0 }
  0xd4   : > { %882 = vmatmul.bf16.gmra.mxu1 %v12442_v57  ;;  %1311 = vmatmul.bf16.gmra.mxu2 %v1207_v58  ;;  %v1425_v57 = vld [vmem:[#allocation2 + $0x158] sm:$0x7] }
  0xd5   : > { %1773 = vmatmul.bf16.gmra.mxu3 %v1669_v60  ;;  %v1884_v58 = vld [vmem:[#allocation2 + $0x158] sm:$0xe]  ;;  %v1886_v60 = vld [vmem:[#allocation2 + $0x160] sm:$0x1]  ;;  %v1551_v4 = vrot.slane %v1425_v57, 7 }
  0xd6   : > { %2231 = vmatmul.bf16.gmra.mxu0 %v2127_v61  ;;  %v11093_v61 = vrot.slane %v961_v50, 10  ;;  %v11189_v5 = vrot.slane %v1884_v58, 9  ;;  %v2009_v8 = vrot.slane %v1886_v60, 5  ;;  %v1428_v50 = vld [vmem:[#allocation2 + $0x174] sm:$0x7]  ;;  %v1557_v58 = vrot.slane %v1555_v43, 4 }
  0xd7   : > { %v13402_v21 = vpop.f32.mrf.mxu2  ;;  %v1552_v16 = vsel %vm13334_vm8, %v1550_v3, %v1551_v4  ;;  %v12505_v60 = vld [vmem:[#allocation4 + $0x198] sm:$0xff]  ;;  %v1558_v62 = vrot.slane %v1428_v50, 7  ;;  %v2016_v3 = vrot.slane %v1889_v52, 5 }
  0xd8   : > { %v13404_v22 = vpop.f32.mrf.mxu3  ;;  %v1087_v12 = vsel %vm13330_vm7, %v11093_v61, %v1086_v51  ;;  %v2007_v17 = vsel %vm13254_vm2, %v11189_v5, %v2006_v56  ;;  %v2010_v18 = vsel %vm13254_vm2, %v2008_v7, %v2009_v8  ;;  %v1646_v25 = vunpack.c.l.b16 %v1552_v16  ;;  %v1887_v51 = vld [vmem:[#allocation2 + $0x174] sm:$0xe]  ;;  %v12513_v61 = vld [vmem:[#allocation4 + $0x1d8] sm:$0xff]  ;;  %3124 = vmatpush.bf16.msra.mxu2 %v12505_v60  ;;  %v1892_v60 = vld [vmem:[#allocation2 + $0x198] sm:$0x1] }
  0xd9   : > { %v13406_v24 = vpop.f32.mrf.mxu1  ;;  %v1183_v19 = vunpack.c.l.b16 %v1087_v12  ;;  %v2103_v27 = vunpack.c.l.b16 %v2007_v17  ;;  %v2104_v29 = vunpack.c.l.b16 %v2010_v18  ;;  %v11190_v63 = vrot.slane %v1887_v51, 9  ;;  %3582 = vmatpush.bf16.msra.mxu3 %v12513_v61 }
  0xda   : > { %v1671_v38 = vpack.c.b16 %v1646_v25, %v1645_v23  ;;  %v1094_v8 = vsel %vm13330_vm7, %v11094_v54, %v1093_v41  ;;  %v1559_v16 = vsel %vm13334_vm8, %v1557_v58, %v1558_v62  ;;  %v969_v54 = vld [vmem:[#allocation2 + $0xf8] sm:$0x3]  ;;  %v1890_v58 = vld [vmem:[#allocation2 + $0x190] sm:$0xe] }
  0xdb   : > { %v13412_v28 = vpop.f32.mrf.mxu0  ;;  %v1209_v36 = vpack.c.b16 %v1184_v20, %v1183_v19  ;;  %v2129_v39 = vpack.c.b16 %v2104_v29, %v2103_v27  ;;  %v12497_v19 = vld [vmem:[#allocation4 + $0x158] sm:$0xff]  ;;  %v1185_v23 = vunpack.c.l.b16 %v1094_v8  ;;  %v1648_v29 = vunpack.c.l.b16 %v1559_v16 }
  0xdc   : > { %v12537_v20 = vld [vmem:[#allocation4 + $0x218] sm:$0xff]  ;;  %2665 = vmatpush.bf16.msra.mxu1 %v12497_v19  ;;  %v2023_v16 = vrot.slane %v1892_v60, 5 }
  0xdd   : > { %3864 = vmatpush.bf16.msra.mxu0 %v12537_v20 }
  0xdf   : > { %v13422_v42 = vpop.f32.mrf.mxu2 }
  0xe0   : > { %v13424_v44 = vpop.f32.mrf.mxu3 }
  0xe1   : > { %v13426_v47 = vpop.f32.mrf.mxu1 }
  0xe3   : > { %v13428_v53 = vpop.f32.mrf.mxu0 }
  0xe4   : > { %887 = vmatmul.bf16.gmra.mxu1 %v12443_v45  ;;  %1316 = vmatmul.bf16.gmra.mxu2 %v1208_v46  ;;  %v966_v46 = vld [vmem:[#allocation2 + $0xdc] sm:$0x3] }
  0xe5   : > { %1778 = vmatmul.bf16.gmra.mxu3 %v1670_v48  ;;  %v1426_v48 = vld [vmem:[#allocation2 + $0x16c] sm:$0x8]  ;;  %v1096_v56 = vrot.slane %v966_v46, 6 }
  0xe6   : > { %2236 = vmatmul.bf16.gmra.mxu0 %v2128_v49  ;;  %v2013_v49 = vrot.slane %v1888_v33, 5  ;;  %v11142_v57 = vrot.slane %v1426_v48, 11  ;;  %v968_v33 = vld [vmem:[#allocation2 + $0xf4] sm:$0xf] }
  0xe7   : > { %v13430_v9 = vpop.f32.mrf.mxu2  ;;  %v1097_v12 = vsel %vm13330_vm7, %v1095_v55, %v1096_v56  ;;  %v1100_v50 = vrot.slane %v968_v33, 6  ;;  %v1429_v55 = vld [vmem:[#allocation2 + $0x188] sm:$0x8] }
  0xe8   : > { %v13432_v10 = vpop.f32.mrf.mxu3  ;;  %v2015_v0 = vrot.slane %v2013_v49, 4  ;;  %v1556_v15 = vsel %vm13334_vm8, %v11142_v57, %v1555_v43  ;;  %v2014_v17 = vsel %vm13254_vm2, %v11190_v63, %v2013_v49  ;;  %v1186_v25 = vunpack.c.l.b16 %v1097_v12  ;;  %v967_v49 = vld [vmem:[#allocation2 + $0xf0] sm:$0xc] }
  0xe9   : > { %v13434_v11 = vpop.f32.mrf.mxu1  ;;  %v1647_v27 = vunpack.c.l.b16 %v1556_v15  ;;  %v2105_v30 = vunpack.c.l.b16 %v2014_v17  ;;  %v1431_v57 = vld [vmem:[#allocation2 + $0x190] sm:$0x7]  ;;  %v11095_v61 = vrot.slane %v967_v49, 10  ;;  %v1102_v62 = vrot.slane %v1100_v50, 4  ;;  %v1433_v49 = vld [vmem:[#allocation2 + $0x1a8] sm:$0xf] }
  0xea   : > { %v2017_v18 = vsel %vm13254_vm2, %v2015_v0, %v2016_v3  ;;  %v1210_v41 = vpack.c.b16 %v1186_v25, %v1185_v23  ;;  %v1103_v63 = vrot.slane %v969_v54, 6  ;;  %v11143_v0 = vrot.slane %v1429_v55, 11  ;;  %v12446_v55 = vld [vmem:[#allocation2 + $0xe0] sm:$0xff] }
  0xeb   : > { %v13440_v14 = vpop.f32.mrf.mxu0  ;;  %v2106_v31 = vunpack.c.l.b16 %v2017_v18  ;;  %v1672_v46 = vpack.c.b16 %v1648_v29, %v1647_v27  ;;  %v1565_v8 = vrot.slane %v1431_v57, 7  ;;  %v11191_v12 = vrot.slane %v1890_v58, 9 }
  0xec   : > { %v1101_v20 = vsel %vm13330_vm7, %v11095_v61, %v1100_v50  ;;  %v1104_v23 = vsel %vm13330_vm7, %v1102_v62, %v1103_v63  ;;  %v970_v62 = vld [vmem:[#allocation2 + $0x10c] sm:$0xc]  ;;  %v972_v63 = vld [vmem:[#allocation2 + $0x114] sm:$0x3] }
  0xed   : > { %v2130_v48 = vpack.c.b16 %v2106_v31, %v2105_v30  ;;  %v1187_v33 = vunpack.c.l.b16 %v1101_v20  ;;  %v1893_v20 = vld [vmem:[#allocation2 + $0x1ac] sm:$0xe] }
  0xef   : > { %v13450_v32 = vpop.f32.mrf.mxu2 }
  0xf0   : > { %v13452_v34 = vpop.f32.mrf.mxu3 }
  0xf1   : > { %v13454_v37 = vpop.f32.mrf.mxu1 }
  0xf3   : > { %v13456_v45 = vpop.f32.mrf.mxu0 }
  0xf4   : > { %892 = vmatmul.bf16.gmra.mxu1 %v12444_v35  ;;  %1321 = vmatmul.bf16.gmra.mxu2 %v1209_v36  ;;  %v1430_v35 = vld [vmem:[#allocation2 + $0x18c] sm:$0xf] }
  0xf5   : > { %1783 = vmatmul.bf16.gmra.mxu3 %v1671_v38  ;;  %v1891_v38 = vld [vmem:[#allocation2 + $0x194] sm:$0xf]  ;;  %v1562_v51 = vrot.slane %v1430_v35, 7  ;;  %v1188_v35 = vunpack.c.l.b16 %v1104_v23 }
  0xf6   : > { %2241 = vmatmul.bf16.gmra.mxu0 %v2129_v39  ;;  %v2020_v56 = vrot.slane %v1891_v38, 5  ;;  %v1895_v23 = vld [vmem:[#allocation2 + $0x1b4] sm:$0x1] }
  0xf7   : > { %v13458_v4 = vpop.f32.mrf.mxu2  ;;  %v1564_v3 = vrot.slane %v1562_v51, 4  ;;  %v1563_v27 = vsel %vm13334_vm8, %v11143_v0, %v1562_v51  ;;  %v1894_v51 = vld [vmem:[#allocation2 + $0x1b0] sm:$0xf]  ;;  %v1211_v57 = vpack.c.b16 %v1188_v35, %v1187_v33  ;;  %v1569_v0 = vrot.slane %v1433_v49, 7 }
  0xf8   : > { %v13460_v5 = vpop.f32.mrf.mxu3  ;;  %v2022_v15 = vrot.slane %v2020_v56, 4  ;;  %v2021_v30 = vsel %vm13254_vm2, %v11191_v12, %v2020_v56  ;;  %v1649_v38 = vunpack.c.l.b16 %v1563_v27  ;;  %v1432_v12 = vld [vmem:[#allocation2 + $0x1a4] sm:$0x8]  ;;  %v11096_v27 = vrot.slane %v970_v62, 10 }
  0xf9   : > { %v13462_v7 = vpop.f32.mrf.mxu1  ;;  %v1566_v29 = vsel %vm13334_vm8, %v1564_v3, %v1565_v8  ;;  %v1571_v33 = vrot.slane %v1569_v0, 4 }
  0xfa   : > { %v2024_v31 = vsel %vm13254_vm2, %v2022_v15, %v2023_v16  ;;  %v1434_v15 = vld [vmem:[#allocation2 + $0x1ac] sm:$0x7]  ;;  %v2027_v16 = vrot.slane %v1894_v51, 5 }
  0xfb   : > { %v13468_v13 = vpop.f32.mrf.mxu0  ;;  %v1572_v35 = vrot.slane %v1434_v15, 7 }
  0xff   : > { %v13478_v36 = vpop.f32.mrf.mxu2 }
 0x100   : > { %v13480_v39 = vpop.f32.mrf.mxu3 }
 0x101   : > { %v13482_v43 = vpop.f32.mrf.mxu1 }
 0x103   : > { %v13484_v52 = vpop.f32.mrf.mxu0 }
 0x104   : > { %897 = vmatmul.bf16.gmra.mxu1 %v12445_v40  ;;  %1326 = vmatmul.bf16.gmra.mxu2 %v1210_v41  ;;  %v1650_v40 = vunpack.c.l.b16 %v1566_v29  ;;  %v2107_v41 = vunpack.c.l.b16 %v2021_v30  ;;  %v1110_v30 = vrot.slane %v972_v63, 6 }
 0x105   : > { %1788 = vmatmul.bf16.gmra.mxu3 %v1672_v46  ;;  %v2108_v46 = vunpack.c.l.b16 %v2024_v31  ;;  %v11144_v31 = vrot.slane %v1432_v12, 11 }
 0x106   : > { %2246 = vmatmul.bf16.gmra.mxu0 %v2130_v48  ;;  %v971_v48 = vld [vmem:[#allocation2 + $0x110] sm:$0xf]  ;;  %v1673_v60 = vpack.c.b16 %v1650_v40, %v1649_v38  ;;  %v12504_v38 = vld [vmem:[#allocation4 + $0x190] sm:$0xff] }
 0x107   : > { %v13486_v17 = vpop.f32.mrf.mxu2  ;;  %v1107_v58 = vrot.slane %v971_v48, 6  ;;  %v2131_v61 = vpack.c.b16 %v2108_v46, %v2107_v41  ;;  %v12512_v40 = vld [vmem:[#allocation4 + $0x1d0] sm:$0xff]  ;;  %v11192_v41 = vrot.slane %v1893_v20, 9  ;;  %v2030_v46 = vrot.slane %v1895_v23, 5  ;;  %3125 = vmatpush.bf16.msra.mxu2 %v12504_v38 }
 0x108   : > { %v13488_v18 = vpop.f32.mrf.mxu3  ;;  %3583 = vmatpush.bf16.msra.mxu3 %v12512_v40  ;;  %v12536_v20 = vld [vmem:[#allocation4 + $0x210] sm:$0xff]  ;;  %v1897_v40 = vld [vmem:[#allocation2 + $0x1cc] sm:$0xf] }
 0x109   : > { %v13490_v19 = vpop.f32.mrf.mxu1  ;;  %v1109_v29 = vrot.slane %v1107_v58, 4  ;;  %3865 = vmatpush.bf16.msra.mxu0 %v12536_v20  ;;  %v1896_v20 = vld [vmem:[#allocation2 + $0x1c8] sm:$0xe] }
 0x10b   : > { %v13496_v25 = vpop.f32.mrf.mxu0 }
 0x10f   : > { %v13506_v50 = vpop.f32.mrf.mxu2 }
 0x110   : > { %v13508_v54 = vpop.f32.mrf.mxu3 }
 0x111   : > { %v863_v56 = vpop.f32.mrf.mxu1 }
 0x112   : > { %v864_v3 = vadd.f32 %v863_v56, %v13400_v2  ;;  %v2029_v2 = vrot.slane %v2027_v16, 4  ;;  %v1111_v56 = vsel %vm13330_vm7, %v1109_v29, %v1110_v30 }
 0x113   : > { %v2212_v8 = vpop.f32.mrf.mxu0 }
 0x114   : > { %902 = vmatmul.bf16.gmra.mxu1 %v12446_v55  ;;  %1331 = vmatmul.bf16.gmra.mxu2 %v1211_v57  ;;  %v1108_v57 = vsel %vm13330_vm7, %v11096_v27, %v1107_v58  ;;  %v2031_v15 = vsel %vm13254_vm2, %v2029_v2, %v2030_v46  ;;  %v12496_v58 = vld [vmem:[#allocation4 + $0x150] sm:$0xff]  ;;  %v1190_v27 = vunpack.c.l.b16 %v1111_v56  ;;  %v975_v56 = vld [vmem:[#allocation2 + $0x130] sm:$0x3] }
 0x115   : > { %1793 = vmatmul.bf16.gmra.mxu3 %v1673_v60  ;;  %v1570_v60 = vsel %vm13334_vm8, %v11144_v31, %v1569_v0  ;;  %v1189_v23 = vunpack.c.l.b16 %v1108_v57  ;;  %2666 = vmatpush.bf16.msra.mxu1 %v12496_v58  ;;  %v973_v57 = vld [vmem:[#allocation2 + $0x128] sm:$0xc]  ;;  %v2034_v58 = vrot.slane %v1897_v40, 5 }
 0x116   : > { %2251 = vmatmul.bf16.gmra.mxu0 %v2131_v61  ;;  %v1573_v61 = vsel %vm13334_vm8, %v1571_v33, %v1572_v35  ;;  %v1651_v29 = vunpack.c.l.b16 %v1570_v60  ;;  %v2110_v33 = vunpack.c.l.b16 %v2031_v15  ;;  %v1436_v35 = vld [vmem:[#allocation2 + $0x1c4] sm:$0xf]  ;;  %v1437_v15 = vld [vmem:[#allocation2 + $0x1c8] sm:$0x7] }
 0x117   : > { %v1292_v48 = vpop.f32.mrf.mxu2  ;;  %v1652_v30 = vunpack.c.l.b16 %v1573_v61  ;;  %v1212_v2 = vpack.c.b16 %v1190_v27, %v1189_v23 }
 0x118   : > { %v1372_v49 = vadd.f32 %v1292_v48, %v864_v3  ;;  %v1754_v51 = vpop.f32.mrf.mxu3  ;;  %v2028_v3 = vsel %vm13254_vm2, %v11192_v41, %v2027_v16  ;;  %v12447_v48 = vld [vmem:[#allocation2 + $0xfc] sm:$0xff] }
 0x119   : > { %v865_v55 = vpop.f32.mrf.mxu1  ;;  %v2109_v31 = vunpack.c.l.b16 %v2028_v3  ;;  %v1435_v3 = vld [vmem:[#allocation2 + $0x1c0] sm:$0x8] }
 0x11a   : > { %v1834_v62 = vadd.f32 %v1754_v51, %v1372_v49  ;;  %v866_v63 = vadd.f32 %v865_v55, %v13412_v28  ;;  %v974_v28 = vld [vmem:[#allocation2 + $0x12c] sm:$0xf]  ;;  %v1674_v51 = vpack.c.b16 %v1652_v30, %v1651_v29  ;;  %v1117_v29 = vrot.slane %v975_v56, 6 }
 0x11b   : > { %v2214_v12 = vpop.f32.mrf.mxu0  ;;  %v1114_v46 = vrot.slane %v974_v28, 6  ;;  %v2132_v55 = vpack.c.b16 %v2110_v33, %v2109_v31  ;;  %v11145_v30 = vrot.slane %v1435_v3, 11  ;;  %v1579_v33 = vrot.slane %v1437_v15, 7 }
 0x11c   : > { %v13524_v0 = vadd.f32 %v2212_v8, %v1834_v62  ;;  %v1576_v8 = vrot.slane %v1436_v35, 7  ;;  %v11193_v28 = vrot.slane %v1896_v20, 9 }
 0x11d   : > { %v1116_v23 = vrot.slane %v1114_v46, 4 }
 0x11e   : > { %15177 = vst [vmem:[#allocation18_spill] sm:$0xff] %v13524_v0  ;;  %v1898_v0 = vld [vmem:[#allocation2 + $0x1d0] sm:$0x1]  ;;  %v1578_v31 = vrot.slane %v1576_v8, 4 }
 0x11f   : > { %v1294_v38 = vpop.f32.mrf.mxu2  ;;  %v2037_v35 = vrot.slane %v1898_v0, 5 }
 0x120   : > { %v1373_v16 = vadd.f32 %v1294_v38, %v866_v63  ;;  %v1756_v41 = vpop.f32.mrf.mxu3  ;;  %v11097_v63 = vrot.slane %v973_v57, 10  ;;  %v2035_v57 = vsel %vm13254_vm2, %v11193_v28, %v2034_v58 }
 0x121   : > { %v868_v49 = vpop.f32.mrf.mxu1 }
 0x122   : > { %v1835_v62 = vadd.f32 %v1756_v41, %v1373_v16  ;;  %v869_v60 = vadd.f32 %v868_v49, %v13428_v53  ;;  %v2036_v53 = vrot.slane %v2034_v58, 4  ;;  %v1580_v49 = vsel %vm13334_vm8, %v1578_v31, %v1579_v33  ;;  %v12448_v33 = vld [vmem:[#allocation2 + $0x118] sm:$0xff] }
 0x123   : > { %v2217_v61 = vpop.f32.mrf.mxu0  ;;  %v1654_v15 = vunpack.c.l.b16 %v1580_v49  ;;  %v1440_v49 = vld [vmem:[#allocation2 + $0x1e4] sm:$0x7] }
 0x124   : > { %907 = vmatmul.bf16.gmra.mxu1 %v12447_v48  ;;  %1336 = vmatmul.bf16.gmra.mxu2 %v1212_v2  ;;  %v13527_v27 = vadd.f32 %v2214_v12, %v1835_v62  ;;  %v1115_v48 = vsel %vm13330_vm7, %v11097_v63, %v1114_v46  ;;  %v1118_v12 = vsel %vm13330_vm7, %v1116_v23, %v1117_v29  ;;  %v977_v63 = vld [vmem:[#allocation2 + $0x148] sm:$0xf]  ;;  %v1439_v23 = vld [vmem:[#allocation2 + $0x1e0] sm:$0xf] }
 0x125   : > { %1798 = vmatmul.bf16.gmra.mxu3 %v1674_v51  ;;  %v1577_v2 = vsel %vm13334_vm8, %v11145_v30, %v1576_v8  ;;  %v2038_v56 = vsel %vm13254_vm2, %v2036_v53, %v2037_v35  ;;  %v1191_v46 = vunpack.c.l.b16 %v1115_v48  ;;  %v1192_v62 = vunpack.c.l.b16 %v1118_v12  ;;  %v1900_v30 = vld [vmem:[#allocation2 + $0x1e8] sm:$0xf]  ;;  %v976_v35 = vld [vmem:[#allocation2 + $0x144] sm:$0xc] }
 0x126   : > { %2256 = vmatmul.bf16.gmra.mxu0 %v2132_v55  ;;  %v1653_v3 = vunpack.c.l.b16 %v1577_v2  ;;  %v2111_v8 = vunpack.c.l.b16 %v2035_v57  ;;  %v2112_v20 = vunpack.c.l.b16 %v2038_v56  ;;  %v1121_v58 = vrot.slane %v977_v63, 6  ;;  %v1438_v2 = vld [vmem:[#allocation2 + $0x1dc] sm:$0x8]  ;;  %v1899_v57 = vld [vmem:[#allocation2 + $0x1e4] sm:$0xe] }
 0x127   : > { %v1297_v38 = vpop.f32.mrf.mxu2  ;;  %v1901_v56 = vld [vmem:[#allocation2 + $0x1ec] sm:$0x1]  ;;  %v12503_v63 = vld [vmem:[#allocation4 + $0x188] sm:$0xff] }
 0x128   : > { %v1374_v16 = vadd.f32 %v1297_v38, %v869_v60  ;;  %v1759_v40 = vpop.f32.mrf.mxu3  ;;  %v1213_v38 = vpack.c.b16 %v1192_v62, %v1191_v46  ;;  %v2133_v53 = vpack.c.b16 %v2112_v20, %v2111_v8  ;;  %v1123_v46 = vrot.slane %v1121_v58, 4  ;;  %3126 = vmatpush.bf16.msra.mxu2 %v12503_v63  ;;  %v1903_v63 = vld [vmem:[#allocation2 + $0x204] sm:$0xf] }
 0x129   : > { %v870_v41 = vpop.f32.mrf.mxu1  ;;  %v1586_v20 = vrot.slane %v1440_v49, 7  ;;  %v12535_v49 = vld [vmem:[#allocation4 + $0x208] sm:$0xff] }
 0x12a   : > { %v1836_v51 = vadd.f32 %v1759_v40, %v1374_v16  ;;  %v871_v55 = vadd.f32 %v870_v41, %v13440_v14  ;;  %v1675_v16 = vpack.c.b16 %v1654_v15, %v1653_v3  ;;  %v978_v40 = vld [vmem:[#allocation2 + $0x14c] sm:$0x3]  ;;  %v11146_v15 = vrot.slane %v1438_v2, 11  ;;  %3866 = vmatpush.bf16.msra.mxu0 %v12535_v49  ;;  %v1904_v49 = vld [vmem:[#allocation2 + $0x208] sm:$0x1] }
 0x12b   : > { %v2219_v0 = vpop.f32.mrf.mxu0  ;;  %v1124_v3 = vrot.slane %v978_v40, 6 }
 0x12c   : > { %v13542_v60 = vadd.f32 %v2217_v61, %v1836_v51  ;;  %v1583_v61 = vrot.slane %v1439_v23, 7  ;;  %v2041_v51 = vrot.slane %v1900_v30, 5  ;;  %v11194_v23 = vrot.slane %v1899_v57, 9 }
 0x12e   : > { %v1585_v8 = vrot.slane %v1583_v61, 4 }
 0x12f   : > { %v1299_v29 = vpop.f32.mrf.mxu2 }
 0x130   : > { %v1375_v14 = vadd.f32 %v1299_v29, %v871_v55  ;;  %v1761_v31 = vpop.f32.mrf.mxu3  ;;  %v11098_v55 = vrot.slane %v976_v35, 10  ;;  %v2043_v29 = vrot.slane %v2041_v51, 4 }
 0x131   : > { %v873_v28 = vpop.f32.mrf.mxu1 }
 0x132   : > { %v1837_v41 = vadd.f32 %v1761_v31, %v1375_v14  ;;  %v874_v48 = vadd.f32 %v873_v28, %v13456_v45  ;;  %v12511_v45 = vld [vmem:[#allocation4 + $0x1c8] sm:$0xff]  ;;  %v2044_v14 = vrot.slane %v1901_v56, 5  ;;  %v1125_v28 = vsel %vm13330_vm7, %v1123_v46, %v1124_v3 }
 0x133   : > { %v2222_v12 = vpop.f32.mrf.mxu0  ;;  %3584 = vmatpush.bf16.msra.mxu3 %v12511_v45  ;;  %v1194_v56 = vunpack.c.l.b16 %v1125_v28 }
 0x134   : > { %912 = vmatmul.bf16.gmra.mxu1 %v12448_v33  ;;  %1341 = vmatmul.bf16.gmra.mxu2 %v1213_v38  ;;  %v13545_v62 = vadd.f32 %v2219_v0, %v1837_v41  ;;  %v1122_v0 = vsel %vm13330_vm7, %v11098_v55, %v1121_v58  ;;  %v2045_v2 = vsel %vm13254_vm2, %v2043_v29, %v2044_v14  ;;  %v12495_v58 = vld [vmem:[#allocation4 + $0x148] sm:$0xff] }
 0x135   : > { %1803 = vmatmul.bf16.gmra.mxu3 %v1675_v16  ;;  %v1584_v16 = vsel %vm13334_vm8, %v11146_v15, %v1583_v61  ;;  %v1193_v57 = vunpack.c.l.b16 %v1122_v0  ;;  %2667 = vmatpush.bf16.msra.mxu1 %v12495_v58  ;;  %v2114_v15 = vunpack.c.l.b16 %v2045_v2  ;;  %v981_v0 = vld [vmem:[#allocation2 + $0x168] sm:$0x3]  ;;  %v2048_v2 = vrot.slane %v1903_v63, 5  ;;  %v1902_v58 = vld [vmem:[#allocation2 + $0x200] sm:$0xe] }
 0x136   : > { %2261 = vmatmul.bf16.gmra.mxu0 %v2133_v53  ;;  %v1587_v53 = vsel %vm13334_vm8, %v1585_v8, %v1586_v20  ;;  %v1655_v55 = vunpack.c.l.b16 %v1584_v16  ;;  %v1442_v8 = vld [vmem:[#allocation2 + $0x1fc] sm:$0xf] }
 0x137   : > { %v1302_v30 = vpop.f32.mrf.mxu2  ;;  %v1656_v46 = vunpack.c.l.b16 %v1587_v53  ;;  %v1214_v29 = vpack.c.b16 %v1194_v56, %v1193_v57 }
 0x138   : > { %v1376_v31 = vadd.f32 %v1302_v30, %v874_v48  ;;  %v1764_v33 = vpop.f32.mrf.mxu3  ;;  %v2042_v48 = vsel %vm13254_vm2, %v11194_v23, %v2041_v51  ;;  %v12449_v23 = vld [vmem:[#allocation2 + $0x134] sm:$0xff] }
 0x139   : > { %v875_v38 = vpop.f32.mrf.mxu1  ;;  %v2113_v3 = vunpack.c.l.b16 %v2042_v48  ;;  %v1443_v48 = vld [vmem:[#allocation2 + $0x200] sm:$0x7] }
 0x13a   : > { %v1838_v35 = vadd.f32 %v1764_v33, %v1376_v31  ;;  %v876_v40 = vadd.f32 %v875_v38, %v13468_v13  ;;  %v980_v13 = vld [vmem:[#allocation2 + $0x164] sm:$0xf]  ;;  %v1676_v31 = vpack.c.b16 %v1656_v46, %v1655_v55  ;;  %v979_v38 = vld [vmem:[#allocation2 + $0x160] sm:$0xc]  ;;  %v1131_v55 = vrot.slane %v981_v0, 6 }
 0x13b   : > { %v2224_v41 = vpop.f32.mrf.mxu0  ;;  %v1128_v14 = vrot.slane %v980_v13, 6  ;;  %v2134_v33 = vpack.c.b16 %v2114_v15, %v2113_v3  ;;  %v1593_v15 = vrot.slane %v1443_v48, 7  ;;  %v11195_v13 = vrot.slane %v1902_v58, 9 }
 0x13c   : > { %v13560_v61 = vadd.f32 %v2222_v12, %v1838_v35  ;;  %v1590_v12 = vrot.slane %v1442_v8, 7  ;;  %v1441_v35 = vld [vmem:[#allocation2 + $0x1f8] sm:$0x8]  ;;  %v2051_v8 = vrot.slane %v1904_v49, 5 }
 0x13d   : > { %v1130_v57 = vrot.slane %v1128_v14, 4  ;;  %v11147_v46 = vrot.slane %v1441_v35, 11  ;;  %v2049_v0 = vsel %vm13254_vm2, %v11195_v13, %v2048_v2 }
 0x13e   : > { %v1592_v3 = vrot.slane %v1590_v12, 4 }
 0x13f   : > { %v1304_v20 = vpop.f32.mrf.mxu2 }
 0x140   : > { %v1377_v51 = vadd.f32 %v1304_v20, %v876_v40  ;;  %v1766_v45 = vpop.f32.mrf.mxu3  ;;  %v11099_v40 = vrot.slane %v979_v38, 10 }
 0x141   : > { %v878_v30 = vpop.f32.mrf.mxu1 }
 0x142   : > { %v1839_v28 = vadd.f32 %v1766_v45, %v1377_v51  ;;  %v879_v16 = vadd.f32 %v878_v30, %v13484_v52  ;;  %v2050_v52 = vrot.slane %v2048_v2, 4  ;;  %v1594_v30 = vsel %vm13334_vm8, %v1592_v3, %v1593_v15  ;;  %v12450_v15 = vld [vmem:[#allocation2 + $0x150] sm:$0xff] }
 0x143   : > { %v2227_v53 = vpop.f32.mrf.mxu0  ;;  %v1658_v58 = vunpack.c.l.b16 %v1594_v30 }
 0x144   : > { %917 = vmatmul.bf16.gmra.mxu1 %v12449_v23  ;;  %1346 = vmatmul.bf16.gmra.mxu2 %v1214_v29  ;;  %v13563_v56 = vadd.f32 %v2224_v41, %v1839_v28  ;;  %v1129_v23 = vsel %vm13330_vm7, %v11099_v40, %v1128_v14  ;;  %v1132_v41 = vsel %vm13330_vm7, %v1130_v57, %v1131_v55  ;;  %v983_v40 = vld [vmem:[#allocation2 + $0x180] sm:$0xf]  ;;  %v1445_v57 = vld [vmem:[#allocation2 + $0x218] sm:$0xf] }
 0x145   : > { %1808 = vmatmul.bf16.gmra.mxu3 %v1676_v31  ;;  %v1591_v29 = vsel %vm13334_vm8, %v11147_v46, %v1590_v12  ;;  %v2052_v28 = vsel %vm13254_vm2, %v2050_v52, %v2051_v8  ;;  %v1195_v14 = vunpack.c.l.b16 %v1129_v23  ;;  %v2115_v12 = vunpack.c.l.b16 %v2049_v0  ;;  %v1906_v46 = vld [vmem:[#allocation2 + $0x220] sm:$0xf]  ;;  %v982_v8 = vld [vmem:[#allocation2 + $0x17c] sm:$0xc]  ;;  %v1907_v0 = vld [vmem:[#allocation2 + $0x224] sm:$0x1] }
 0x146   : > { %2266 = vmatmul.bf16.gmra.mxu0 %v2134_v33  ;;  %v1657_v48 = vunpack.c.l.b16 %v1591_v29  ;;  %v2116_v49 = vunpack.c.l.b16 %v2052_v28  ;;  %v1135_v2 = vrot.slane %v983_v40, 6  ;;  %v1446_v29 = vld [vmem:[#allocation2 + $0x21c] sm:$0x7]  ;;  %v2055_v30 = vrot.slane %v1906_v46, 5 }
 0x147   : > { %v1307_v20 = vpop.f32.mrf.mxu2 }
 0x148   : > { %v1378_v51 = vadd.f32 %v1307_v20, %v879_v16  ;;  %v1769_v63 = vpop.f32.mrf.mxu3  ;;  %v1196_v16 = vunpack.c.l.b16 %v1132_v41  ;;  %v2135_v52 = vpack.c.b16 %v2116_v49, %v2115_v12  ;;  %v1444_v41 = vld [vmem:[#allocation2 + $0x214] sm:$0x8]  ;;  %v1137_v28 = vrot.slane %v1135_v2, 4 }
 0x149   : > { %v880_v45 = vpop.f32.mrf.mxu1  ;;  %v12502_v12 = vld [vmem:[#allocation4 + $0x180] sm:$0xff]  ;;  %v2057_v46 = vrot.slane %v2055_v30, 4 }
 0x14a   : > { %v1840_v31 = vadd.f32 %v1769_v63, %v1378_v51  ;;  %v881_v33 = vadd.f32 %v880_v45, %v13496_v25  ;;  %v1215_v20 = vpack.c.b16 %v1196_v16, %v1195_v14  ;;  %v1677_v51 = vpack.c.b16 %v1658_v58, %v1657_v48  ;;  %v984_v63 = vld [vmem:[#allocation2 + $0x184] sm:$0x3]  ;;  %v12510_v49 = vld [vmem:[#allocation4 + $0x1c0] sm:$0xff]  ;;  %3127 = vmatpush.bf16.msra.mxu2 %v12502_v12  ;;  %v986_v12 = vld [vmem:[#allocation2 + $0x19c] sm:$0xf] }
 0x14b   : > { %v2229_v38 = vpop.f32.mrf.mxu0  ;;  %v1138_v14 = vrot.slane %v984_v63, 6  ;;  %v11148_v16 = vrot.slane %v1444_v41, 11  ;;  %v1600_v58 = vrot.slane %v1446_v29, 7  ;;  %3585 = vmatpush.bf16.msra.mxu3 %v12510_v49  ;;  %v12494_v29 = vld [vmem:[#allocation4 + $0x140] sm:$0xff]  ;;  %v1909_v49 = vld [vmem:[#allocation2 + $0x23c] sm:$0xf] }
 0x14c   : > { %v13578_v35 = vadd.f32 %v2227_v53, %v1840_v31  ;;  %v1597_v53 = vrot.slane %v1445_v57, 7  ;;  %v1905_v31 = vld [vmem:[#allocation2 + $0x21c] sm:$0xe]  ;;  %2668 = vmatpush.bf16.msra.mxu1 %v12494_v29  ;;  %v2062_v29 = vrot.slane %v1909_v49, 5 }
 0x14d   : > { %v11196_v57 = vrot.slane %v1905_v31, 9  ;;  %v12534_v31 = vld [vmem:[#allocation4 + $0x200] sm:$0xff] }
 0x14e   : > { %v1599_v48 = vrot.slane %v1597_v53, 4  ;;  %3867 = vmatpush.bf16.msra.mxu0 %v12534_v31 }
 0x14f   : > { %v1309_v55 = vpop.f32.mrf.mxu2 }
 0x150   : > { %v1379_v25 = vadd.f32 %v1309_v55, %v881_v33  ;;  %v1771_v3 = vpop.f32.mrf.mxu3  ;;  %v11100_v33 = vrot.slane %v982_v8, 10  ;;  %v1598_v8 = vsel %vm13334_vm8, %v11148_v16, %v1597_v53 }
 0x151   : > { %v883_v13 = vpop.f32.mrf.mxu1  ;;  %v1659_v53 = vunpack.c.l.b16 %v1598_v8 }
 0x152   : > { %v1841_v45 = vadd.f32 %v1771_v3, %v1379_v25  ;;  %v884_v40 = vadd.f32 %v883_v13, %v13398_v59  ;;  %v2058_v25 = vrot.slane %v1907_v0, 5  ;;  %v1601_v13 = vsel %vm13334_vm8, %v1599_v48, %v1600_v58  ;;  %v1448_v58 = vld [vmem:[#allocation2 + $0x234] sm:$0xf] }
 0x153   : > { %v2232_v23 = vpop.f32.mrf.mxu0  ;;  %v1604_v8 = vrot.slane %v1448_v58, 7 }
 0x154   : > { %922 = vmatmul.bf16.gmra.mxu1 %v12450_v15  ;;  %1351 = vmatmul.bf16.gmra.mxu2 %v1215_v20  ;;  %v13580_v55 = vadd.f32 %v2229_v38, %v1841_v45  ;;  %v2056_v45 = vsel %vm13254_vm2, %v11196_v57, %v2055_v30  ;;  %v2059_v41 = vsel %vm13254_vm2, %v2057_v46, %v2058_v25  ;;  %v12451_v46 = vld [vmem:[#allocation2 + $0x16c] sm:$0xff] }
 0x155   : > { %1813 = vmatmul.bf16.gmra.mxu3 %v1677_v51  ;;  %v1136_v51 = vsel %vm13330_vm7, %v11100_v33, %v1135_v2  ;;  %v2118_v16 = vunpack.c.l.b16 %v2059_v41  ;;  %v1449_v41 = vld [vmem:[#allocation2 + $0x238] sm:$0x7] }
 0x156   : > { %2271 = vmatmul.bf16.gmra.mxu0 %v2135_v52  ;;  %v1139_v52 = vsel %vm13330_vm7, %v1137_v28, %v1138_v14  ;;  %v1197_v2 = vunpack.c.l.b16 %v1136_v51  ;;  %v1660_v28 = vunpack.c.l.b16 %v1601_v13  ;;  %v2117_v14 = vunpack.c.l.b16 %v2056_v45  ;;  %v1447_v45 = vld [vmem:[#allocation2 + $0x230] sm:$0x8] }
 0x157   : > { %v1312_v3 = vpop.f32.mrf.mxu2  ;;  %v1198_v0 = vunpack.c.l.b16 %v1139_v52  ;;  %v987_v52 = vld [vmem:[#allocation2 + $0x1a0] sm:$0x3] }
 0x158   : > { %v1380_v15 = vadd.f32 %v1312_v3, %v884_v40  ;;  %v1774_v20 = vpop.f32.mrf.mxu3  ;;  %v1142_v3 = vrot.slane %v986_v12, 6  ;;  %v2136_v51 = vpack.c.b16 %v2118_v16, %v2117_v14  ;;  %v2064_v12 = vrot.slane %v2062_v29, 4 }
 0x159   : > { %v885_v38 = vpop.f32.mrf.mxu1  ;;  %v1216_v25 = vpack.c.b16 %v1198_v0, %v1197_v2  ;;  %v1145_v2 = vrot.slane %v987_v52, 6  ;;  %v11149_v0 = vrot.slane %v1447_v45, 11 }
 0x15a   : > { %v1842_v63 = vadd.f32 %v1774_v20, %v1380_v15  ;;  %v886_v48 = vadd.f32 %v885_v38, %v13406_v24  ;;  %v1678_v20 = vpack.c.b16 %v1660_v28, %v1659_v53  ;;  %v1908_v24 = vld [vmem:[#allocation2 + $0x238] sm:$0xe]  ;;  %v1910_v38 = vld [vmem:[#allocation2 + $0x240] sm:$0x1]  ;;  %v1606_v53 = vrot.slane %v1604_v8, 4 }
 0x15b   : > { %v2234_v59 = vpop.f32.mrf.mxu0  ;;  %v1607_v28 = vrot.slane %v1449_v41, 7  ;;  %v11197_v16 = vrot.slane %v1908_v24, 9  ;;  %v2065_v58 = vrot.slane %v1910_v38, 5 }
 0x15c   : > { %v13595_v33 = vadd.f32 %v2232_v23, %v1842_v63  ;;  %v985_v23 = vld [vmem:[#allocation2 + $0x198] sm:$0xc] }
 0x15d   : > { %v11101_v31 = vrot.slane %v985_v23, 10  ;;  %v2066_v52 = vsel %vm13254_vm2, %v2064_v12, %v2065_v58 }
 0x15f   : > { %v1314_v30 = vpop.f32.mrf.mxu2 }
 0x160   : > { %v1381_v40 = vadd.f32 %v1314_v30, %v886_v48  ;;  %v1776_v57 = vpop.f32.mrf.mxu3  ;;  %v1144_v48 = vrot.slane %v1142_v3, 4 }
 0x161   : > { %v888_v15 = vpop.f32.mrf.mxu1 }
 0x162   : > { %v1843_v63 = vadd.f32 %v1776_v57, %v1381_v40  ;;  %v889_v14 = vadd.f32 %v888_v15, %v13426_v47  ;;  %v1608_v47 = vsel %vm13334_vm8, %v1606_v53, %v1607_v28  ;;  %v2063_v15 = vsel %vm13254_vm2, %v11197_v16, %v2062_v29  ;;  %v1912_v53 = vld [vmem:[#allocation2 + $0x258] sm:$0xf]  ;;  %v12452_v29 = vld [vmem:[#allocation2 + $0x188] sm:$0xff] }
 0x163   : > { %v2237_v13 = vpop.f32.mrf.mxu0  ;;  %v1662_v24 = vunpack.c.l.b16 %v1608_v47  ;;  %v2119_v38 = vunpack.c.l.b16 %v2063_v15  ;;  %v1452_v47 = vld [vmem:[#allocation2 + $0x254] sm:$0x7]  ;;  %v2069_v15 = vrot.slane %v1912_v53, 5 }
 0x164   : > { %927 = vmatmul.bf16.gmra.mxu1 %v12451_v46  ;;  %1356 = vmatmul.bf16.gmra.mxu2 %v1216_v25  ;;  %v13598_v30 = vadd.f32 %v2234_v59, %v1843_v63  ;;  %v1143_v25 = vsel %vm13330_vm7, %v11101_v31, %v1142_v3  ;;  %v1146_v59 = vsel %vm13330_vm7, %v1144_v48, %v1145_v2  ;;  %v2120_v31 = vunpack.c.l.b16 %v2066_v52  ;;  %v1451_v2 = vld [vmem:[#allocation2 + $0x250] sm:$0xf] }
 0x165   : > { %1818 = vmatmul.bf16.gmra.mxu3 %v1678_v20  ;;  %v1605_v20 = vsel %vm13334_vm8, %v11149_v0, %v1604_v8  ;;  %v1199_v63 = vunpack.c.l.b16 %v1143_v25  ;;  %v1200_v45 = vunpack.c.l.b16 %v1146_v59  ;;  %v989_v8 = vld [vmem:[#allocation2 + $0x1b8] sm:$0xf]  ;;  %v1611_v25 = vrot.slane %v1451_v2, 7 }
 0x166   : > { %2276 = vmatmul.bf16.gmra.mxu0 %v2136_v51  ;;  %v1661_v41 = vunpack.c.l.b16 %v1605_v20  ;;  %v2071_v53 = vrot.slane %v2069_v15, 4 }
 0x167   : > { %v1317_v49 = vpop.f32.mrf.mxu2  ;;  %v1217_v16 = vpack.c.b16 %v1200_v45, %v1199_v63 }
 0x168   : > { %v1382_v40 = vadd.f32 %v1317_v49, %v889_v14  ;;  %v1779_v57 = vpop.f32.mrf.mxu3  ;;  %v1149_v49 = vrot.slane %v989_v8, 6  ;;  %v1679_v58 = vpack.c.b16 %v1662_v24, %v1661_v41  ;;  %v1613_v41 = vrot.slane %v1611_v25, 4 }
 0x169   : > { %v890_v46 = vpop.f32.mrf.mxu1  ;;  %v1614_v24 = vrot.slane %v1452_v47, 7  ;;  %v12565_v47 = vld [vmem:[#allocation4 + $0x278] sm:$0xff] }
 0x16a   : > { %v1844_v51 = vadd.f32 %v1779_v57, %v1382_v40  ;;  %v891_v48 = vadd.f32 %v890_v46, %v13434_v11  ;;  %v2137_v40 = vpack.c.b16 %v2120_v31, %v2119_v38  ;;  %v990_v57 = vld [vmem:[#allocation2 + $0x1bc] sm:$0x3]  ;;  %v1911_v11 = vld [vmem:[#allocation2 + $0x254] sm:$0xe]  ;;  %v12573_v38 = vld [vmem:[#allocation4 + $0x2b8] sm:$0xff]  ;;  %4175 = vmatpush.bf16.msrb.mxu1 %v12565_v47 }
 0x16b   : > { %v2239_v23 = vpop.f32.mrf.mxu0  ;;  %v1913_v46 = vld [vmem:[#allocation2 + $0x25c] sm:$0x1]  ;;  %v1152_v63 = vrot.slane %v990_v57, 6  ;;  %v12581_v31 = vld [vmem:[#allocation4 + $0x2f8] sm:$0xff]  ;;  %v11198_v2 = vrot.slane %v1911_v11, 9  ;;  %4633 = vmatpush.bf16.msrb.mxu2 %v12573_v38 }
 0x16c   : > { %v13613_v3 = vadd.f32 %v2237_v13, %v1844_v51  ;;  %v988_v13 = vld [vmem:[#allocation2 + $0x1b4] sm:$0xc]  ;;  %v1450_v51 = vld [vmem:[#allocation2 + $0x24c] sm:$0x8]  ;;  %5091 = vmatpush.bf16.msrb.mxu3 %v12581_v31  ;;  %v2325_v38 = vld [vmem:[#allocation2 + $0xb8] sm:$0xf] }
 0x16d   : > { %v11102_v52 = vrot.slane %v988_v13, 10  ;;  %v11150_v45 = vrot.slane %v1450_v51, 11  ;;  %v12589_v11 = vld [vmem:[#allocation4 + $0x338] sm:$0xff]  ;;  %v2785_v47 = vld [vmem:[#allocation2 + $0x15c] sm:$0x3] }
 0x16e   : > { %5549 = vmatpush.bf16.msrb.mxu0 %v12589_v11 }
 0x16f   : > { %v1319_v0 = vpop.f32.mrf.mxu2  ;;  %v1612_v13 = vsel %vm13334_vm8, %v11150_v45, %v1611_v25 }
 0x170   : > { %v1383_v28 = vadd.f32 %v1319_v0, %v891_v48  ;;  %v1781_v14 = vpop.f32.mrf.mxu3  ;;  %v1151_v48 = vrot.slane %v1149_v49, 4  ;;  %v1663_v25 = vunpack.c.l.b16 %v1612_v13 }
 0x171   : > { %v893_v12 = vpop.f32.mrf.mxu1 }
 0x172   : > { %v1845_v59 = vadd.f32 %v1781_v14, %v1383_v28  ;;  %v894_v8 = vadd.f32 %v893_v12, %v13454_v37  ;;  %v2072_v28 = vrot.slane %v1913_v46, 5  ;;  %v1615_v12 = vsel %vm13334_vm8, %v1613_v41, %v1614_v24  ;;  %v2784_v24 = vld [vmem:[#allocation2 + $0x158] sm:$0xf] }
 0x173   : > { %v2242_v20 = vpop.f32.mrf.mxu0 }
 0x174   : > { %932 = vmatmul.bf16.gmra.mxu1 %v12452_v29  ;;  %1361 = vmatmul.bf16.gmra.mxu2 %v1217_v16  ;;  %v13616_v0 = vadd.f32 %v2239_v23, %v1845_v59  ;;  %v2070_v59 = vsel %vm13254_vm2, %v11198_v2, %v2069_v15  ;;  %v2073_v51 = vsel %vm13254_vm2, %v2071_v53, %v2072_v28  ;;  %v3242_v15 = vld [vmem:[#allocation2 + $0x15c] sm:$0xf]  ;;  %v12453_v53 = vld [vmem:[#allocation2 + $0x1a4] sm:$0xff] }
 0x175   : > { %1823 = vmatmul.bf16.gmra.mxu3 %v1679_v58  ;;  %v1150_v58 = vsel %vm13330_vm7, %v11102_v52, %v1149_v49  ;;  %v2122_v45 = vunpack.c.l.b16 %v2073_v51  ;;  %v3339_v13 = vrot.slane %v3242_v15, 5  ;;  %v2783_v51 = vld [vmem:[#allocation2 + $0x154] sm:$0xc] }
 0x176   : > { %2281 = vmatmul.bf16.gmra.mxu0 %v2137_v40  ;;  %v1153_v40 = vsel %vm13330_vm7, %v1151_v48, %v1152_v63  ;;  %v1201_v49 = vunpack.c.l.b16 %v1150_v58  ;;  %v1664_v48 = vunpack.c.l.b16 %v1615_v12  ;;  %v2121_v63 = vunpack.c.l.b16 %v2070_v59  ;;  %v2326_v59 = vld [vmem:[#allocation2 + $0xbc] sm:$0x7] }
 0x177   : > { %v1322_v14 = vpop.f32.mrf.mxu2  ;;  %v1202_v46 = vunpack.c.l.b16 %v1153_v40  ;;  %v2881_v40 = vrot.slane %v2784_v24, 6 }
 0x178   : > { %v1384_v29 = vadd.f32 %v1322_v14, %v894_v8  ;;  %v1784_v16 = vpop.f32.mrf.mxu3  ;;  %v2422_v14 = vrot.slane %v2325_v38, 7  ;;  %v2138_v58 = vpack.c.b16 %v2122_v45, %v2121_v63  ;;  %v3341_v38 = vrot.slane %v3339_v13, 4 }
 0x179   : > { %v895_v23 = vpop.f32.mrf.mxu1  ;;  %v1218_v28 = vpack.c.b16 %v1202_v46, %v1201_v49  ;;  %v2425_v49 = vrot.slane %v2326_v59, 7  ;;  %v11279_v46 = vrot.slane %v2783_v51, 10 }
 0x17a   : > { %v1846_v57 = vadd.f32 %v1784_v16, %v1384_v29  ;;  %v896_v41 = vadd.f32 %v895_v23, %v13462_v7  ;;  %v1680_v16 = vpack.c.b16 %v1664_v48, %v1663_v25  ;;  %v3241_v7 = vld [vmem:[#allocation2 + $0x158] sm:$0xe]  ;;  %v3243_v23 = vld [vmem:[#allocation2 + $0x160] sm:$0x1]  ;;  %v2883_v25 = vrot.slane %v2881_v40, 4 }
 0x17b   : > { %v2244_v37 = vpop.f32.mrf.mxu0  ;;  %v2884_v48 = vrot.slane %v2785_v47, 6  ;;  %v11327_v45 = vrot.slane %v3241_v7, 9  ;;  %v3342_v24 = vrot.slane %v3243_v23, 5 }
 0x17c   : > { %v13631_v52 = vadd.f32 %v2242_v20, %v1846_v57  ;;  %v2324_v20 = vld [vmem:[#allocation2 + $0xb4] sm:$0x8] }
 0x17d   : > { %v11231_v11 = vrot.slane %v2324_v20, 11  ;;  %v3340_v20 = vsel %vm13254_vm2, %v11327_v45, %v3339_v13 }
 0x17e   : > { %v3466_v23 = vunpack.c.l.b16 %v3340_v20  ;;  %v2788_v20 = vld [vmem:[#allocation2 + $0x178] sm:$0x3] }
 0x17f   : > { %v1324_v31 = vpop.f32.mrf.mxu2 }
 0x180   : > { %v1385_v8 = vadd.f32 %v1324_v31, %v896_v41  ;;  %v1786_v2 = vpop.f32.mrf.mxu3  ;;  %v2424_v41 = vrot.slane %v2422_v14, 4 }
 0x181   : > { %v898_v29 = vpop.f32.mrf.mxu1 }
 0x182   : > { %v1847_v57 = vadd.f32 %v1786_v2, %v1385_v8  ;;  %v899_v63 = vadd.f32 %v898_v29, %v13482_v43 }
 0x183   : > { %v2247_v12 = vpop.f32.mrf.mxu0 }
 0x184   : > { %937 = vmatmul.bf16.gmra.mxu1 %v12453_v53  ;;  %1366 = vmatmul.bf16.gmra.mxu2 %v1218_v28  ;;  %v13634_v31 = vadd.f32 %v2244_v37, %v1847_v57  ;;  %v2423_v53 = vsel %vm13334_vm8, %v11231_v11, %v2422_v14  ;;  %v2426_v37 = vsel %vm13334_vm8, %v2424_v41, %v2425_v49  ;;  %v2787_v49 = vld [vmem:[#allocation2 + $0x174] sm:$0xf] }
 0x185   : > { %1828 = vmatmul.bf16.gmra.mxu3 %v1680_v16  ;;  %v2882_v16 = vsel %vm13330_vm7, %v11279_v46, %v2881_v40  ;;  %v3343_v57 = vsel %vm13254_vm2, %v3341_v38, %v3342_v24  ;;  %v2549_v59 = vunpack.c.l.b16 %v2423_v53  ;;  %v2550_v14 = vunpack.c.l.b16 %v2426_v37  ;;  %v2328_v40 = vld [vmem:[#allocation2 + $0xd4] sm:$0xf]  ;;  %v3245_v46 = vld [vmem:[#allocation2 + $0x178] sm:$0xf] }
 0x186   : > { %2286 = vmatmul.bf16.gmra.mxu0 %v2138_v58  ;;  %v2885_v58 = vsel %vm13330_vm7, %v2883_v25, %v2884_v48  ;;  %v3008_v51 = vunpack.c.l.b16 %v2882_v16  ;;  %v3467_v11 = vunpack.c.l.b16 %v3343_v57  ;;  %v2888_v53 = vrot.slane %v2787_v49, 6 }
 0x187   : > { %v1327_v15 = vpop.f32.mrf.mxu2  ;;  %v3009_v47 = vunpack.c.l.b16 %v2885_v58  ;;  %v2581_v13 = vpack.c.b16 %v2550_v14, %v2549_v59  ;;  %v2329_v58 = vld [vmem:[#allocation2 + $0xd8] sm:$0x7] }
 0x188   : > { %v1386_v8 = vadd.f32 %v1327_v15, %v899_v63  ;;  %v1789_v2 = vpop.f32.mrf.mxu3  ;;  %v2429_v15 = vrot.slane %v2328_v40, 7  ;;  %v3498_v24 = vpack.c.b16 %v3467_v11, %v3466_v23  ;;  %v2432_v14 = vrot.slane %v2329_v58, 7  ;;  %v12572_v11 = vld [vmem:[#allocation4 + $0x2b0] sm:$0xff] }
 0x189   : > { %v900_v28 = vpop.f32.mrf.mxu1  ;;  %v3040_v45 = vpack.c.b16 %v3009_v47, %v3008_v51  ;;  %v2890_v47 = vrot.slane %v2888_v53, 4  ;;  %v2891_v23 = vrot.slane %v2788_v20, 6  ;;  %v12580_v40 = vld [vmem:[#allocation4 + $0x2f0] sm:$0xff]  ;;  %4634 = vmatpush.bf16.msrb.mxu2 %v12572_v11  ;;  %v2790_v11 = vld [vmem:[#allocation2 + $0x190] sm:$0xf] }
 0x18a   : > { %v1848_v43 = vadd.f32 %v1789_v2, %v1386_v8  ;;  %v901_v41 = vadd.f32 %v900_v28, %v13490_v19  ;;  %v12518_v8 = vld [vmem:[#allocation2 + $0x15c] sm:$0xff]  ;;  %v2327_v2 = vld [vmem:[#allocation2 + $0xd0] sm:$0x8]  ;;  %v3244_v19 = vld [vmem:[#allocation2 + $0x174] sm:$0xe]  ;;  %5092 = vmatpush.bf16.msrb.mxu3 %v12580_v40 }
 0x18b   : > { %v2249_v29 = vpop.f32.mrf.mxu0  ;;  %v3246_v28 = vld [vmem:[#allocation2 + $0x17c] sm:$0x1]  ;;  %v11232_v57 = vrot.slane %v2327_v2, 11  ;;  %v12564_v20 = vld [vmem:[#allocation4 + $0x270] sm:$0xff] }
 0x18c   : > { %v13649_v7 = vadd.f32 %v2247_v12, %v1848_v43  ;;  %v3346_v12 = vrot.slane %v3245_v46, 5  ;;  %v2786_v43 = vld [vmem:[#allocation2 + $0x170] sm:$0xc]  ;;  %v11328_v46 = vrot.slane %v3244_v19, 9  ;;  %4176 = vmatpush.bf16.msrb.mxu1 %v12564_v20  ;;  %v2791_v20 = vld [vmem:[#allocation2 + $0x194] sm:$0x3] }
 0x18d   : > { %v11280_v51 = vrot.slane %v2786_v43, 10 }
 0x18e   : > { %v3347_v58 = vsel %vm13254_vm2, %v11328_v46, %v3346_v12 }
 0x18f   : > { %v1329_v25 = vpop.f32.mrf.mxu2  ;;  %v2889_v2 = vsel %vm13330_vm7, %v11280_v51, %v2888_v53 }
 0x190   : > { %v1387_v48 = vadd.f32 %v1329_v25, %v901_v41  ;;  %v1791_v63 = vpop.f32.mrf.mxu3  ;;  %v2431_v41 = vrot.slane %v2429_v15, 4  ;;  %v3348_v25 = vrot.slane %v3346_v12, 4  ;;  %v3248_v12 = vld [vmem:[#allocation2 + $0x194] sm:$0xf] }
 0x191   : > { %v903_v38 = vpop.f32.mrf.mxu1 }
 0x192   : > { %v1849_v37 = vadd.f32 %v1791_v63, %v1387_v48  ;;  %v904_v49 = vadd.f32 %v903_v38, %v13402_v21  ;;  %v3349_v48 = vrot.slane %v3246_v28, 5  ;;  %v2892_v21 = vsel %vm13330_vm7, %v2890_v47, %v2891_v23  ;;  %v2331_v47 = vld [vmem:[#allocation2 + $0xf0] sm:$0xf] }
 0x193   : > { %v2252_v16 = vpop.f32.mrf.mxu0 }
 0x194   : > { %2669 = vmatmul.bf16.vlgmr.msra.gmra.mxu1 %v2581_v13  ;;  %3128 = vmatmul.bf16.vlgmr.msra.gmra.mxu2 %v3040_v45  ;;  %v13652_v59 = vadd.f32 %v2249_v29, %v1849_v37  ;;  %v2430_v29 = vsel %vm13334_vm8, %v11232_v57, %v2429_v15  ;;  %v3350_v43 = vsel %vm13254_vm2, %v3348_v25, %v3349_v48  ;;  %v12588_v15 = vld [vmem:[#allocation4 + $0x330] sm:$0xff]  ;;  %v3010_v57 = vunpack.c.l.b16 %v2889_v2 }
 0x195   : > { %3586 = vmatmul.bf16.vlgmr.msra.gmra.mxu3 %v3498_v24  ;;  %v2551_v19 = vunpack.c.l.b16 %v2430_v29  ;;  %5550 = vmatpush.bf16.msrb.mxu0 %v12588_v15  ;;  %v3469_v51 = vunpack.c.l.b16 %v3350_v43  ;;  %v12519_v29 = vld [vmem:[#allocation2 + $0x178] sm:$0xff]  ;;  %v2895_v2 = vrot.slane %v2790_v11, 6  ;;  %v2789_v43 = vld [vmem:[#allocation2 + $0x18c] sm:$0xc] }
 0x196   : > { %3868 = vmatmul.bf16.vlgmr.msra.gmra.mxu0 %v12518_v8  ;;  %v2433_v8 = vsel %vm13334_vm8, %v2431_v41, %v2432_v14  ;;  %v3011_v41 = vunpack.c.l.b16 %v2892_v21  ;;  %v3468_v14 = vunpack.c.l.b16 %v3347_v58  ;;  %v2332_v58 = vld [vmem:[#allocation2 + $0xf4] sm:$0x7] }
 0x197   : > { %v1332_v63 = vpop.f32.mrf.mxu2  ;;  %v2552_v28 = vunpack.c.l.b16 %v2433_v8  ;;  %v2330_v8 = vld [vmem:[#allocation2 + $0xec] sm:$0x8] }
 0x198   : > { %v1388_v13 = vadd.f32 %v1332_v63, %v904_v49  ;;  %v1794_v45 = vpop.f32.mrf.mxu3  ;;  %v3041_v48 = vpack.c.b16 %v3011_v41, %v3010_v57  ;;  %v2436_v63 = vrot.slane %v2331_v47, 7  ;;  %v11233_v15 = vrot.slane %v2330_v8, 11 }
 0x199   : > { %v905_v24 = vpop.f32.mrf.mxu1  ;;  %v2582_v25 = vpack.c.b16 %v2552_v28, %v2551_v19  ;;  %v2439_v28 = vrot.slane %v2332_v58, 7  ;;  %v11281_v57 = vrot.slane %v2789_v43, 10  ;;  %v2897_v41 = vrot.slane %v2895_v2, 4 }
 0x19a   : > { %v1850_v38 = vadd.f32 %v1794_v45, %v1388_v13  ;;  %v906_v23 = vadd.f32 %v905_v24, %v13422_v42  ;;  %v3499_v45 = vpack.c.b16 %v3469_v51, %v3468_v14  ;;  %v3247_v42 = vld [vmem:[#allocation2 + $0x190] sm:$0xe]  ;;  %v3249_v24 = vld [vmem:[#allocation2 + $0x198] sm:$0x1]  ;;  %v2898_v14 = vrot.slane %v2791_v20, 6 }
 0x19b   : > { %v2254_v37 = vpop.f32.mrf.mxu0  ;;  %v11329_v47 = vrot.slane %v3247_v42, 9 }
 0x19c   : > { %v13667_v53 = vadd.f32 %v2252_v16, %v1850_v38  ;;  %v3353_v16 = vrot.slane %v3248_v12, 5  ;;  %v3356_v12 = vrot.slane %v3249_v24, 5 }
 0x19e   : > { %v3355_v11 = vrot.slane %v3353_v16, 4  ;;  %v3354_v8 = vsel %vm13254_vm2, %v11329_v47, %v3353_v16 }
 0x19f   : > { %v1334_v40 = vpop.f32.mrf.mxu2  ;;  %v3470_v24 = vunpack.c.l.b16 %v3354_v8  ;;  %v2794_v8 = vld [vmem:[#allocation2 + $0x1b0] sm:$0x3] }
 0x1a0   : > { %v1389_v49 = vadd.f32 %v1334_v40, %v906_v23  ;;  %v1796_v46 = vpop.f32.mrf.mxu3  ;;  %v2438_v23 = vrot.slane %v2436_v63, 4 }
 0x1a1   : > { %v908_v13 = vpop.f32.mrf.mxu1 }
 0x1a2   : > { %v1851_v21 = vadd.f32 %v1796_v46, %v1389_v49  ;;  %v909_v51 = vadd.f32 %v908_v13, %v13430_v9 }
 0x1a3   : > { %v2257_v38 = vpop.f32.mrf.mxu0 }
 0x1a4   : > { %2674 = vmatmul.bf16.gmra.mxu1 %v2582_v25  ;;  %3133 = vmatmul.bf16.gmra.mxu2 %v3041_v48  ;;  %v13670_v19 = vadd.f32 %v2254_v37, %v1851_v21  ;;  %v2437_v25 = vsel %vm13334_vm8, %v11233_v15, %v2436_v63  ;;  %v2440_v37 = vsel %vm13334_vm8, %v2438_v23, %v2439_v28  ;;  %v2793_v28 = vld [vmem:[#allocation2 + $0x1ac] sm:$0xf] }
 0x1a5   : > { %3591 = vmatmul.bf16.gmra.mxu3 %v3499_v45  ;;  %v2896_v45 = vsel %vm13330_vm7, %v11281_v57, %v2895_v2  ;;  %v3357_v21 = vsel %vm13254_vm2, %v3355_v11, %v3356_v12  ;;  %v2553_v58 = vunpack.c.l.b16 %v2437_v25  ;;  %v2554_v63 = vunpack.c.l.b16 %v2440_v37  ;;  %v2334_v2 = vld [vmem:[#allocation2 + $0x10c] sm:$0xf]  ;;  %v3251_v57 = vld [vmem:[#allocation2 + $0x1b0] sm:$0xf] }
 0x1a6   : > { %3873 = vmatmul.bf16.gmra.mxu0 %v12519_v29  ;;  %v2899_v29 = vsel %vm13330_vm7, %v2897_v41, %v2898_v14  ;;  %v3012_v43 = vunpack.c.l.b16 %v2896_v45  ;;  %v3471_v15 = vunpack.c.l.b16 %v3357_v21  ;;  %v2902_v25 = vrot.slane %v2793_v28, 6 }
 0x1a7   : > { %v1337_v40 = vpop.f32.mrf.mxu2  ;;  %v3013_v20 = vunpack.c.l.b16 %v2899_v29  ;;  %v2583_v16 = vpack.c.b16 %v2554_v63, %v2553_v58  ;;  %v2335_v29 = vld [vmem:[#allocation2 + $0x110] sm:$0x7] }
 0x1a8   : > { %v1390_v49 = vadd.f32 %v1337_v40, %v909_v51  ;;  %v1799_v46 = vpop.f32.mrf.mxu3  ;;  %v2443_v40 = vrot.slane %v2334_v2, 7  ;;  %v3500_v12 = vpack.c.b16 %v3471_v15, %v3470_v24  ;;  %v2446_v63 = vrot.slane %v2335_v29, 7  ;;  %v12571_v15 = vld [vmem:[#allocation4 + $0x2a8] sm:$0xff] }
 0x1a9   : > { %v910_v48 = vpop.f32.mrf.mxu1  ;;  %v3042_v47 = vpack.c.b16 %v3013_v20, %v3012_v43  ;;  %v2904_v20 = vrot.slane %v2902_v25, 4  ;;  %v2905_v24 = vrot.slane %v2794_v8, 6  ;;  %v12579_v2 = vld [vmem:[#allocation4 + $0x2e8] sm:$0xff]  ;;  %4635 = vmatpush.bf16.msrb.mxu2 %v12571_v15  ;;  %v2796_v15 = vld [vmem:[#allocation2 + $0x1c8] sm:$0xf] }
 0x1aa   : > { %v1852_v9 = vadd.f32 %v1799_v46, %v1390_v49  ;;  %v911_v23 = vadd.f32 %v910_v48, %v13450_v32  ;;  %v12520_v49 = vld [vmem:[#allocation2 + $0x194] sm:$0xff]  ;;  %v2333_v46 = vld [vmem:[#allocation2 + $0x108] sm:$0x8]  ;;  %v3250_v32 = vld [vmem:[#allocation2 + $0x1ac] sm:$0xe]  ;;  %5093 = vmatpush.bf16.msrb.mxu3 %v12579_v2 }
 0x1ab   : > { %v2259_v13 = vpop.f32.mrf.mxu0  ;;  %v3252_v48 = vld [vmem:[#allocation2 + $0x1b4] sm:$0x1]  ;;  %v11234_v21 = vrot.slane %v2333_v46, 11  ;;  %v12563_v8 = vld [vmem:[#allocation4 + $0x268] sm:$0xff] }
 0x1ac   : > { %v13685_v42 = vadd.f32 %v2257_v38, %v1852_v9  ;;  %v3360_v38 = vrot.slane %v3251_v57, 5  ;;  %v2792_v9 = vld [vmem:[#allocation2 + $0x1a8] sm:$0xc]  ;;  %v11330_v57 = vrot.slane %v3250_v32, 9  ;;  %4177 = vmatpush.bf16.msrb.mxu1 %v12563_v8  ;;  %v2797_v8 = vld [vmem:[#allocation2 + $0x1cc] sm:$0x3] }
 0x1ad   : > { %v11282_v43 = vrot.slane %v2792_v9, 10 }
 0x1ae   : > { %v3361_v29 = vsel %vm13254_vm2, %v11330_v57, %v3360_v38 }
 0x1af   : > { %v1339_v41 = vpop.f32.mrf.mxu2  ;;  %v2903_v46 = vsel %vm13330_vm7, %v11282_v43, %v2902_v25 }
 0x1b0   : > { %v1391_v14 = vadd.f32 %v1339_v41, %v911_v23  ;;  %v1801_v51 = vpop.f32.mrf.mxu3  ;;  %v2445_v23 = vrot.slane %v2443_v40, 4  ;;  %v3362_v41 = vrot.slane %v3360_v38, 4  ;;  %v3254_v38 = vld [vmem:[#allocation2 + $0x1cc] sm:$0xf] }
 0x1b1   : > { %v913_v11 = vpop.f32.mrf.mxu1 }
 0x1b2   : > { %v1853_v37 = vadd.f32 %v1801_v51, %v1391_v14  ;;  %v914_v28 = vadd.f32 %v913_v11, %v13458_v4  ;;  %v3363_v14 = vrot.slane %v3252_v48, 5  ;;  %v2906_v4 = vsel %vm13330_vm7, %v2904_v20, %v2905_v24  ;;  %v2337_v20 = vld [vmem:[#allocation2 + $0x128] sm:$0xf] }
 0x1b3   : > { %v2262_v45 = vpop.f32.mrf.mxu0 }
 0x1b4   : > { %2679 = vmatmul.bf16.gmra.mxu1 %v2583_v16  ;;  %3138 = vmatmul.bf16.gmra.mxu2 %v3042_v47  ;;  %v13688_v58 = vadd.f32 %v2259_v13, %v1853_v37  ;;  %v2444_v13 = vsel %vm13334_vm8, %v11234_v21, %v2443_v40  ;;  %v3364_v9 = vsel %vm13254_vm2, %v3362_v41, %v3363_v14  ;;  %v12587_v40 = vld [vmem:[#allocation4 + $0x328] sm:$0xff]  ;;  %v3014_v21 = vunpack.c.l.b16 %v2903_v46 }
 0x1b5   : > { %3596 = vmatmul.bf16.gmra.mxu3 %v3500_v12  ;;  %v2555_v32 = vunpack.c.l.b16 %v2444_v13  ;;  %5551 = vmatpush.bf16.msrb.mxu0 %v12587_v40  ;;  %v3473_v43 = vunpack.c.l.b16 %v3364_v9  ;;  %v12521_v13 = vld [vmem:[#allocation2 + $0x1b0] sm:$0xff]  ;;  %v2909_v46 = vrot.slane %v2796_v15, 6  ;;  %v2795_v9 = vld [vmem:[#allocation2 + $0x1c4] sm:$0xc] }
 0x1b6   : > { %3878 = vmatmul.bf16.gmra.mxu0 %v12520_v49  ;;  %v2447_v49 = vsel %vm13334_vm8, %v2445_v23, %v2446_v63  ;;  %v3015_v23 = vunpack.c.l.b16 %v2906_v4  ;;  %v3472_v63 = vunpack.c.l.b16 %v3361_v29  ;;  %v2338_v29 = vld [vmem:[#allocation2 + $0x12c] sm:$0x7] }
 0x1b7   : > { %v1342_v51 = vpop.f32.mrf.mxu2  ;;  %v2556_v48 = vunpack.c.l.b16 %v2447_v49  ;;  %v2336_v49 = vld [vmem:[#allocation2 + $0x124] sm:$0x8] }
 0x1b8   : > { %v1392_v16 = vadd.f32 %v1342_v51, %v914_v28  ;;  %v1804_v47 = vpop.f32.mrf.mxu3  ;;  %v3043_v14 = vpack.c.b16 %v3015_v23, %v3014_v21  ;;  %v2450_v51 = vrot.slane %v2337_v20, 7  ;;  %v11235_v40 = vrot.slane %v2336_v49, 11 }
 0x1b9   : > { %v915_v12 = vpop.f32.mrf.mxu1  ;;  %v2584_v41 = vpack.c.b16 %v2556_v48, %v2555_v32  ;;  %v2453_v48 = vrot.slane %v2338_v29, 7  ;;  %v11283_v21 = vrot.slane %v2795_v9, 10  ;;  %v2911_v23 = vrot.slane %v2909_v46, 4 }
 0x1ba   : > { %v1854_v11 = vadd.f32 %v1804_v47, %v1392_v16  ;;  %v916_v24 = vadd.f32 %v915_v12, %v13478_v36  ;;  %v3501_v47 = vpack.c.b16 %v3473_v43, %v3472_v63  ;;  %v3253_v36 = vld [vmem:[#allocation2 + $0x1c8] sm:$0xe]  ;;  %v3255_v12 = vld [vmem:[#allocation2 + $0x1d0] sm:$0x1]  ;;  %v2912_v63 = vrot.slane %v2797_v8, 6 }
 0x1bb   : > { %v2264_v37 = vpop.f32.mrf.mxu0  ;;  %v11331_v20 = vrot.slane %v3253_v36, 9 }
 0x1bc   : > { %v13703_v25 = vadd.f32 %v2262_v45, %v1854_v11  ;;  %v3367_v45 = vrot.slane %v3254_v38, 5  ;;  %v3370_v38 = vrot.slane %v3255_v12, 5 }
 0x1be   : > { %v3369_v15 = vrot.slane %v3367_v45, 4  ;;  %v3368_v49 = vsel %vm13254_vm2, %v11331_v20, %v3367_v45 }
 0x1bf   : > { %v1344_v2 = vpop.f32.mrf.mxu2  ;;  %v3474_v12 = vunpack.c.l.b16 %v3368_v49  ;;  %v2800_v49 = vld [vmem:[#allocation2 + $0x1e8] sm:$0x3] }
 0x1c0   : > { %v1393_v28 = vadd.f32 %v1344_v2, %v916_v24  ;;  %v1806_v57 = vpop.f32.mrf.mxu3  ;;  %v2452_v24 = vrot.slane %v2450_v51, 4 }
 0x1c1   : > { %v918_v16 = vpop.f32.mrf.mxu1 }
 0x1c2   : > { %v1855_v4 = vadd.f32 %v1806_v57, %v1393_v28  ;;  %v919_v43 = vadd.f32 %v918_v16, %v13486_v17 }
 0x1c3   : > { %v2267_v11 = vpop.f32.mrf.mxu0 }
 0x1c4   : > { %2684 = vmatmul.bf16.gmra.mxu1 %v2584_v41  ;;  %3143 = vmatmul.bf16.gmra.mxu2 %v3043_v14  ;;  %v13706_v32 = vadd.f32 %v2264_v37, %v1855_v4  ;;  %v2451_v41 = vsel %vm13334_vm8, %v11235_v40, %v2450_v51  ;;  %v2454_v37 = vsel %vm13334_vm8, %v2452_v24, %v2453_v48  ;;  %v2799_v48 = vld [vmem:[#allocation2 + $0x1e4] sm:$0xf] }
 0x1c5   : > { %3601 = vmatmul.bf16.gmra.mxu3 %v3501_v47  ;;  %v2910_v47 = vsel %vm13330_vm7, %v11283_v21, %v2909_v46  ;;  %v3371_v4 = vsel %vm13254_vm2, %v3369_v15, %v3370_v38  ;;  %v2557_v29 = vunpack.c.l.b16 %v2451_v41  ;;  %v2558_v51 = vunpack.c.l.b16 %v2454_v37  ;;  %v2340_v46 = vld [vmem:[#allocation2 + $0x144] sm:$0xf]  ;;  %v3257_v21 = vld [vmem:[#allocation2 + $0x1e8] sm:$0xf] }
 0x1c6   : > { %3883 = vmatmul.bf16.gmra.mxu0 %v12521_v13  ;;  %v2913_v13 = vsel %vm13330_vm7, %v2911_v23, %v2912_v63  ;;  %v3016_v9 = vunpack.c.l.b16 %v2910_v47  ;;  %v3475_v40 = vunpack.c.l.b16 %v3371_v4  ;;  %v2916_v41 = vrot.slane %v2799_v48, 6 }
 0x1c7   : > { %v1347_v2 = vpop.f32.mrf.mxu2  ;;  %v3017_v8 = vunpack.c.l.b16 %v2913_v13  ;;  %v2585_v45 = vpack.c.b16 %v2558_v51, %v2557_v29  ;;  %v2341_v13 = vld [vmem:[#allocation2 + $0x148] sm:$0x7] }
 0x1c8   : > { %v1394_v28 = vadd.f32 %v1347_v2, %v919_v43  ;;  %v1809_v57 = vpop.f32.mrf.mxu3  ;;  %v2457_v2 = vrot.slane %v2340_v46, 7  ;;  %v3502_v38 = vpack.c.b16 %v3475_v40, %v3474_v12  ;;  %v2460_v51 = vrot.slane %v2341_v13, 7  ;;  %v12570_v40 = vld [vmem:[#allocation4 + $0x2a0] sm:$0xff] }
 0x1c9   : > { %v920_v14 = vpop.f32.mrf.mxu1  ;;  %v3044_v20 = vpack.c.b16 %v3017_v8, %v3016_v9  ;;  %v2918_v8 = vrot.slane %v2916_v41, 4  ;;  %v2919_v12 = vrot.slane %v2800_v49, 6  ;;  %v12578_v46 = vld [vmem:[#allocation4 + $0x2e0] sm:$0xff]  ;;  %4636 = vmatpush.bf16.msrb.mxu2 %v12570_v40  ;;  %v2802_v40 = vld [vmem:[#allocation2 + $0x200] sm:$0xf] }
 0x1ca   : > { %v1856_v17 = vadd.f32 %v1809_v57, %v1394_v28  ;;  %v921_v24 = vadd.f32 %v920_v14, %v13506_v50  ;;  %v12522_v28 = vld [vmem:[#allocation2 + $0x1cc] sm:$0xff]  ;;  %v2339_v57 = vld [vmem:[#allocation2 + $0x140] sm:$0x8]  ;;  %v3256_v50 = vld [vmem:[#allocation2 + $0x1e4] sm:$0xe]  ;;  %5094 = vmatpush.bf16.msrb.mxu3 %v12578_v46 }
 0x1cb   : > { %v2269_v16 = vpop.f32.mrf.mxu0  ;;  %v3258_v14 = vld [vmem:[#allocation2 + $0x1ec] sm:$0x1]  ;;  %v11236_v4 = vrot.slane %v2339_v57, 11  ;;  %v12562_v49 = vld [vmem:[#allocation4 + $0x260] sm:$0xff] }
 0x1cc   : > { %v13721_v36 = vadd.f32 %v2267_v11, %v1856_v17  ;;  %v3374_v11 = vrot.slane %v3257_v21, 5  ;;  %v2798_v17 = vld [vmem:[#allocation2 + $0x1e0] sm:$0xc]  ;;  %v11332_v21 = vrot.slane %v3256_v50, 9  ;;  %4178 = vmatpush.bf16.msrb.mxu1 %v12562_v49  ;;  %v2803_v49 = vld [vmem:[#allocation2 + $0x204] sm:$0x3] }
 0x1cd   : > { %v11284_v9 = vrot.slane %v2798_v17, 10 }
 0x1ce   : > { %v3375_v13 = vsel %vm13254_vm2, %v11332_v21, %v3374_v11 }
 0x1cf   : > { %v1349_v23 = vpop.f32.mrf.mxu2  ;;  %v2917_v57 = vsel %vm13330_vm7, %v11284_v9, %v2916_v41 }
 0x1d0   : > { %v1395_v63 = vadd.f32 %v1349_v23, %v921_v24  ;;  %v1811_v43 = vpop.f32.mrf.mxu3  ;;  %v2459_v24 = vrot.slane %v2457_v2, 4  ;;  %v3376_v23 = vrot.slane %v3374_v11, 4  ;;  %v3260_v11 = vld [vmem:[#allocation2 + $0x204] sm:$0xf] }
 0x1d1   : > { %v923_v15 = vpop.f32.mrf.mxu1 }
 0x1d2   : > { %v1857_v37 = vadd.f32 %v1811_v43, %v1395_v63  ;;  %v924_v48 = vadd.f32 %v923_v15, %v13404_v22  ;;  %v3377_v63 = vrot.slane %v3258_v14, 5  ;;  %v2920_v22 = vsel %vm13330_vm7, %v2918_v8, %v2919_v12  ;;  %v2343_v8 = vld [vmem:[#allocation2 + $0x160] sm:$0xf] }
 0x1d3   : > { %v2272_v47 = vpop.f32.mrf.mxu0 }
 0x1d4   : > { %2689 = vmatmul.bf16.gmra.mxu1 %v2585_v45  ;;  %3148 = vmatmul.bf16.gmra.mxu2 %v3044_v20  ;;  %v13724_v29 = vadd.f32 %v2269_v16, %v1857_v37  ;;  %v2458_v16 = vsel %vm13334_vm8, %v11236_v4, %v2457_v2  ;;  %v3378_v17 = vsel %vm13254_vm2, %v3376_v23, %v3377_v63  ;;  %v12586_v2 = vld [vmem:[#allocation4 + $0x320] sm:$0xff]  ;;  %v3018_v4 = vunpack.c.l.b16 %v2917_v57 }
 0x1d5   : > { %3606 = vmatmul.bf16.gmra.mxu3 %v3502_v38  ;;  %v2559_v50 = vunpack.c.l.b16 %v2458_v16  ;;  %5552 = vmatpush.bf16.msrb.mxu0 %v12586_v2  ;;  %v3477_v9 = vunpack.c.l.b16 %v3378_v17  ;;  %v12523_v16 = vld [vmem:[#allocation2 + $0x1e8] sm:$0xff]  ;;  %v2923_v57 = vrot.slane %v2802_v40, 6  ;;  %v2801_v17 = vld [vmem:[#allocation2 + $0x1fc] sm:$0xc] }
 0x1d6   : > { %3888 = vmatmul.bf16.gmra.mxu0 %v12522_v28  ;;  %v2461_v28 = vsel %vm13334_vm8, %v2459_v24, %v2460_v51  ;;  %v3019_v24 = vunpack.c.l.b16 %v2920_v22  ;;  %v3476_v51 = vunpack.c.l.b16 %v3375_v13  ;;  %v2344_v13 = vld [vmem:[#allocation2 + $0x164] sm:$0x7] }
 0x1d7   : > { %v1352_v43 = vpop.f32.mrf.mxu2  ;;  %v2560_v14 = vunpack.c.l.b16 %v2461_v28  ;;  %v2342_v28 = vld [vmem:[#allocation2 + $0x15c] sm:$0x8] }
 0x1d8   : > { %v1396_v45 = vadd.f32 %v1352_v43, %v924_v48  ;;  %v1814_v20 = vpop.f32.mrf.mxu3  ;;  %v3045_v63 = vpack.c.b16 %v3019_v24, %v3018_v4  ;;  %v2464_v43 = vrot.slane %v2343_v8, 7  ;;  %v11237_v2 = vrot.slane %v2342_v28, 11 }
 0x1d9   : > { %v925_v38 = vpop.f32.mrf.mxu1  ;;  %v2586_v23 = vpack.c.b16 %v2560_v14, %v2559_v50  ;;  %v2467_v14 = vrot.slane %v2344_v13, 7  ;;  %v11285_v4 = vrot.slane %v2801_v17, 10  ;;  %v2925_v24 = vrot.slane %v2923_v57, 4 }
 0x1da   : > { %v1858_v15 = vadd.f32 %v1814_v20, %v1396_v45  ;;  %v926_v12 = vadd.f32 %v925_v38, %v13424_v44  ;;  %v3503_v20 = vpack.c.b16 %v3477_v9, %v3476_v51  ;;  %v3259_v44 = vld [vmem:[#allocation2 + $0x200] sm:$0xe]  ;;  %v3261_v38 = vld [vmem:[#allocation2 + $0x208] sm:$0x1]  ;;  %v2926_v51 = vrot.slane %v2803_v49, 6 }
 0x1db   : > { %v2274_v37 = vpop.f32.mrf.mxu0  ;;  %v11333_v8 = vrot.slane %v3259_v44, 9 }
 0x1dc   : > { %v13739_v41 = vadd.f32 %v2272_v47, %v1858_v15  ;;  %v3381_v47 = vrot.slane %v3260_v11, 5  ;;  %v3384_v11 = vrot.slane %v3261_v38, 5 }
 0x1de   : > { %v3383_v40 = vrot.slane %v3381_v47, 4  ;;  %v3382_v28 = vsel %vm13254_vm2, %v11333_v8, %v3381_v47 }
 0x1df   : > { %v1354_v46 = vpop.f32.mrf.mxu2  ;;  %v3478_v38 = vunpack.c.l.b16 %v3382_v28  ;;  %v2806_v28 = vld [vmem:[#allocation2 + $0x220] sm:$0x3] }
 0x1e0   : > { %v1397_v48 = vadd.f32 %v1354_v46, %v926_v12  ;;  %v1816_v21 = vpop.f32.mrf.mxu3  ;;  %v2466_v12 = vrot.slane %v2464_v43, 4 }
 0x1e1   : > { %v928_v45 = vpop.f32.mrf.mxu1 }
 0x1e2   : > { %v1859_v22 = vadd.f32 %v1816_v21, %v1397_v48  ;;  %v929_v9 = vadd.f32 %v928_v45, %v13432_v10 }
 0x1e3   : > { %v2277_v15 = vpop.f32.mrf.mxu0 }
 0x1e4   : > { %2694 = vmatmul.bf16.gmra.mxu1 %v2586_v23  ;;  %3153 = vmatmul.bf16.gmra.mxu2 %v3045_v63  ;;  %v13742_v50 = vadd.f32 %v2274_v37, %v1859_v22  ;;  %v2465_v23 = vsel %vm13334_vm8, %v11237_v2, %v2464_v43  ;;  %v2468_v37 = vsel %vm13334_vm8, %v2466_v12, %v2467_v14  ;;  %v2805_v14 = vld [vmem:[#allocation2 + $0x21c] sm:$0xf] }
 0x1e5   : > { %3611 = vmatmul.bf16.gmra.mxu3 %v3503_v20  ;;  %v2924_v20 = vsel %vm13330_vm7, %v11285_v4, %v2923_v57  ;;  %v3385_v22 = vsel %vm13254_vm2, %v3383_v40, %v3384_v11  ;;  %v2561_v13 = vunpack.c.l.b16 %v2465_v23  ;;  %v2562_v43 = vunpack.c.l.b16 %v2468_v37  ;;  %v2346_v57 = vld [vmem:[#allocation2 + $0x17c] sm:$0xf]  ;;  %v3263_v4 = vld [vmem:[#allocation2 + $0x220] sm:$0xf] }
 0x1e6   : > { %3893 = vmatmul.bf16.gmra.mxu0 %v12523_v16  ;;  %v2927_v16 = vsel %vm13330_vm7, %v2925_v24, %v2926_v51  ;;  %v3020_v17 = vunpack.c.l.b16 %v2924_v20  ;;  %v3479_v2 = vunpack.c.l.b16 %v3385_v22  ;;  %v2930_v23 = vrot.slane %v2805_v14, 6 }
 0x1e7   : > { %v1357_v46 = vpop.f32.mrf.mxu2  ;;  %v3021_v49 = vunpack.c.l.b16 %v2927_v16  ;;  %v2587_v47 = vpack.c.b16 %v2562_v43, %v2561_v13  ;;  %v2347_v16 = vld [vmem:[#allocation2 + $0x180] sm:$0x7] }
 0x1e8   : > { %v1398_v48 = vadd.f32 %v1357_v46, %v929_v9  ;;  %v1819_v21 = vpop.f32.mrf.mxu3  ;;  %v2471_v46 = vrot.slane %v2346_v57, 7  ;;  %v3504_v11 = vpack.c.b16 %v3479_v2, %v3478_v38  ;;  %v2474_v43 = vrot.slane %v2347_v16, 7  ;;  %v12569_v2 = vld [vmem:[#allocation4 + $0x298] sm:$0xff] }
 0x1e9   : > { %v930_v63 = vpop.f32.mrf.mxu1  ;;  %v3046_v8 = vpack.c.b16 %v3021_v49, %v3020_v17  ;;  %v2932_v49 = vrot.slane %v2930_v23, 4  ;;  %v2933_v38 = vrot.slane %v2806_v28, 6  ;;  %v12577_v57 = vld [vmem:[#allocation4 + $0x2d8] sm:$0xff]  ;;  %4637 = vmatpush.bf16.msrb.mxu2 %v12569_v2  ;;  %v2808_v2 = vld [vmem:[#allocation2 + $0x238] sm:$0xf] }
 0x1ea   : > { %v1860_v10 = vadd.f32 %v1819_v21, %v1398_v48  ;;  %v931_v12 = vadd.f32 %v930_v63, %v13452_v34  ;;  %v12524_v48 = vld [vmem:[#allocation2 + $0x204] sm:$0xff]  ;;  %v2345_v21 = vld [vmem:[#allocation2 + $0x178] sm:$0x8]  ;;  %v3262_v34 = vld [vmem:[#allocation2 + $0x21c] sm:$0xe]  ;;  %5095 = vmatpush.bf16.msrb.mxu3 %v12577_v57 }
 0x1eb   : > { %v2279_v45 = vpop.f32.mrf.mxu0  ;;  %v3264_v63 = vld [vmem:[#allocation2 + $0x224] sm:$0x1]  ;;  %v11238_v22 = vrot.slane %v2345_v21, 11  ;;  %v12561_v28 = vld [vmem:[#allocation4 + $0x258] sm:$0xff] }
 0x1ec   : > { %v13757_v44 = vadd.f32 %v2277_v15, %v1860_v10  ;;  %v3388_v15 = vrot.slane %v3263_v4, 5  ;;  %v2804_v10 = vld [vmem:[#allocation2 + $0x218] sm:$0xc]  ;;  %v11334_v4 = vrot.slane %v3262_v34, 9  ;;  %4179 = vmatpush.bf16.msrb.mxu1 %v12561_v28  ;;  %v2809_v28 = vld [vmem:[#allocation2 + $0x23c] sm:$0x3] }
 0x1ed   : > { %v11286_v17 = vrot.slane %v2804_v10, 10 }
 0x1ee   : > { %v3389_v16 = vsel %vm13254_vm2, %v11334_v4, %v3388_v15 }
 0x1ef   : > { %v1359_v24 = vpop.f32.mrf.mxu2  ;;  %v2931_v21 = vsel %vm13330_vm7, %v11286_v17, %v2930_v23 }
 0x1f0   : > { %v1399_v51 = vadd.f32 %v1359_v24, %v931_v12  ;;  %v1821_v9 = vpop.f32.mrf.mxu3  ;;  %v2473_v12 = vrot.slane %v2471_v46, 4  ;;  %v3390_v24 = vrot.slane %v3388_v15, 4  ;;  %v3266_v15 = vld [vmem:[#allocation2 + $0x23c] sm:$0xf] }
 0x1f1   : > { %v933_v40 = vpop.f32.mrf.mxu1 }
 0x1f2   : > { %v1861_v37 = vadd.f32 %v1821_v9, %v1399_v51  ;;  %v934_v14 = vadd.f32 %v933_v40, %v13460_v5  ;;  %v3391_v51 = vrot.slane %v3264_v63, 5  ;;  %v2934_v5 = vsel %vm13330_vm7, %v2932_v49, %v2933_v38  ;;  %v2349_v49 = vld [vmem:[#allocation2 + $0x198] sm:$0xf] }
 0x1f3   : > { %v2282_v20 = vpop.f32.mrf.mxu0 }
 0x1f4   : > { %2699 = vmatmul.bf16.gmra.mxu1 %v2587_v47  ;;  %3158 = vmatmul.bf16.gmra.mxu2 %v3046_v8  ;;  %v13760_v13 = vadd.f32 %v2279_v45, %v1861_v37  ;;  %v2472_v45 = vsel %vm13334_vm8, %v11238_v22, %v2471_v46  ;;  %v3392_v10 = vsel %vm13254_vm2, %v3390_v24, %v3391_v51  ;;  %v12585_v46 = vld [vmem:[#allocation4 + $0x318] sm:$0xff]  ;;  %v3022_v22 = vunpack.c.l.b16 %v2931_v21 }
 0x1f5   : > { %3616 = vmatmul.bf16.gmra.mxu3 %v3504_v11  ;;  %v2563_v34 = vunpack.c.l.b16 %v2472_v45  ;;  %5553 = vmatpush.bf16.msrb.mxu0 %v12585_v46  ;;  %v3481_v17 = vunpack.c.l.b16 %v3392_v10  ;;  %v12525_v45 = vld [vmem:[#allocation2 + $0x220] sm:$0xff]  ;;  %v2937_v21 = vrot.slane %v2808_v2, 6  ;;  %v2807_v10 = vld [vmem:[#allocation2 + $0x234] sm:$0xc] }
 0x1f6   : > { %3898 = vmatmul.bf16.gmra.mxu0 %v12524_v48  ;;  %v2475_v48 = vsel %vm13334_vm8, %v2473_v12, %v2474_v43  ;;  %v3023_v12 = vunpack.c.l.b16 %v2934_v5  ;;  %v3480_v43 = vunpack.c.l.b16 %v3389_v16  ;;  %v2350_v16 = vld [vmem:[#allocation2 + $0x19c] sm:$0x7] }
 0x1f7   : > { %v1362_v9 = vpop.f32.mrf.mxu2  ;;  %v2564_v63 = vunpack.c.l.b16 %v2475_v48  ;;  %v2348_v48 = vld [vmem:[#allocation2 + $0x194] sm:$0x8] }
 0x1f8   : > { %v1400_v47 = vadd.f32 %v1362_v9, %v934_v14  ;;  %v1824_v8 = vpop.f32.mrf.mxu3  ;;  %v3047_v51 = vpack.c.b16 %v3023_v12, %v3022_v22  ;;  %v2478_v9 = vrot.slane %v2349_v49, 7  ;;  %v11239_v46 = vrot.slane %v2348_v48, 11 }
 0x1f9   : > { %v935_v11 = vpop.f32.mrf.mxu1  ;;  %v2588_v24 = vpack.c.b16 %v2564_v63, %v2563_v34  ;;  %v2481_v63 = vrot.slane %v2350_v16, 7  ;;  %v11287_v22 = vrot.slane %v2807_v10, 10  ;;  %v2939_v12 = vrot.slane %v2937_v21, 4 }
 0x1fa   : > { %v1862_v40 = vadd.f32 %v1824_v8, %v1400_v47  ;;  %v936_v38 = vadd.f32 %v935_v11, %v13480_v39  ;;  %v3505_v8 = vpack.c.b16 %v3481_v17, %v3480_v43  ;;  %v3265_v39 = vld [vmem:[#allocation2 + $0x238] sm:$0xe]  ;;  %v3267_v11 = vld [vmem:[#allocation2 + $0x240] sm:$0x1]  ;;  %v2940_v43 = vrot.slane %v2809_v28, 6 }
 0x1fb   : > { %v2284_v37 = vpop.f32.mrf.mxu0  ;;  %v11335_v49 = vrot.slane %v3265_v39, 9 }
 0x1fc   : > { %v13775_v23 = vadd.f32 %v2282_v20, %v1862_v40  ;;  %v3395_v20 = vrot.slane %v3266_v15, 5  ;;  %v3398_v15 = vrot.slane %v3267_v11, 5 }
 0x1fe   : > { %v3397_v2 = vrot.slane %v3395_v20, 4  ;;  %v3396_v48 = vsel %vm13254_vm2, %v11335_v49, %v3395_v20 }
 0x1ff   : > { %v1364_v57 = vpop.f32.mrf.mxu2  ;;  %v3482_v11 = vunpack.c.l.b16 %v3396_v48  ;;  %v2353_v48 = vld [vmem:[#allocation2 + $0x1b8] sm:$0x7] }
 0x200   : > { %v1401_v14 = vadd.f32 %v1364_v57, %v936_v38  ;;  %v1826_v4 = vpop.f32.mrf.mxu3  ;;  %v2480_v38 = vrot.slane %v2478_v9, 4 }
 0x201   : > { %v938_v47 = vpop.f32.mrf.mxu1 }
 0x202   : > { %v1863_v5 = vadd.f32 %v1826_v4, %v1401_v14  ;;  %v939_v17 = vadd.f32 %v938_v47, %v13488_v18 }
 0x203   : > { %v2287_v40 = vpop.f32.mrf.mxu0 }
 0x204   : > { %2704 = vmatmul.bf16.gmra.mxu1 %v2588_v24  ;;  %3163 = vmatmul.bf16.gmra.mxu2 %v3047_v51  ;;  %v13778_v34 = vadd.f32 %v2284_v37, %v1863_v5  ;;  %v2479_v24 = vsel %vm13334_vm8, %v11239_v46, %v2478_v9  ;;  %v2482_v37 = vsel %vm13334_vm8, %v2480_v38, %v2481_v63  ;;  %v2811_v63 = vld [vmem:[#allocation2 + $0x254] sm:$0xf] }
 0x205   : > { %3621 = vmatmul.bf16.gmra.mxu3 %v3505_v8  ;;  %v2938_v8 = vsel %vm13330_vm7, %v11287_v22, %v2937_v21  ;;  %v3399_v5 = vsel %vm13254_vm2, %v3397_v2, %v3398_v15  ;;  %v2565_v16 = vunpack.c.l.b16 %v2479_v24  ;;  %v2566_v9 = vunpack.c.l.b16 %v2482_v37  ;;  %v2352_v21 = vld [vmem:[#allocation2 + $0x1b4] sm:$0xf]  ;;  %v3269_v22 = vld [vmem:[#allocation2 + $0x258] sm:$0xf] }
 0x206   : > { %3903 = vmatmul.bf16.gmra.mxu0 %v12525_v45  ;;  %v2941_v45 = vsel %vm13330_vm7, %v2939_v12, %v2940_v43  ;;  %v3024_v10 = vunpack.c.l.b16 %v2938_v8  ;;  %v3483_v46 = vunpack.c.l.b16 %v3399_v5  ;;  %v2944_v24 = vrot.slane %v2811_v63, 6  ;;  %v15179_v8 = vld [vmem:[#allocation18_spill] sm:$0xff]  ;;  %v12576_v63 = vld [vmem:[#allocation4 + $0x2d0] sm:$0xff] }
 0x207   : > { %v1367_v57 = vpop.f32.mrf.mxu2  ;;  %v3025_v28 = vunpack.c.l.b16 %v2941_v45  ;;  %v2589_v20 = vpack.c.b16 %v2566_v9, %v2565_v16  ;;  %v3268_v5 = vld [vmem:[#allocation2 + $0x254] sm:$0xe]  ;;  %5096 = vmatpush.bf16.msrb.mxu3 %v12576_v63 }
 0x208   : > { %v1402_v14 = vadd.f32 %v1367_v57, %v939_v17  ;;  %v1829_v4 = vpop.f32.mrf.mxu3  ;;  %v2485_v57 = vrot.slane %v2352_v21, 7  ;;  %v3506_v15 = vpack.c.b16 %v3483_v46, %v3482_v11  ;;  %v2946_v46 = vrot.slane %v2944_v24, 4 }
 0x209   : > { %v940_v51 = vpop.f32.mrf.mxu1  ;;  %v3048_v49 = vpack.c.b16 %v3025_v28, %v3024_v10  ;;  %v2488_v28 = vrot.slane %v2353_v48, 7  ;;  %v12560_v48 = vld [vmem:[#allocation4 + $0x250] sm:$0xff] }
 0x20a   : > { %v1864_v18 = vadd.f32 %v1829_v4, %v1402_v14  ;;  %v941_v38 = vadd.f32 %v940_v51, %v13508_v54  ;;  %v12526_v14 = vld [vmem:[#allocation2 + $0x23c] sm:$0xff]  ;;  %v2351_v4 = vld [vmem:[#allocation2 + $0x1b0] sm:$0x8]  ;;  %v2812_v51 = vld [vmem:[#allocation2 + $0x258] sm:$0x3]  ;;  %v2487_v9 = vrot.slane %v2485_v57, 4  ;;  %4180 = vmatpush.bf16.msrb.mxu1 %v12560_v48 }
 0x20b   : > { %v2289_v47 = vpop.f32.mrf.mxu0  ;;  %v2810_v54 = vld [vmem:[#allocation2 + $0x250] sm:$0xc]  ;;  %v11240_v16 = vrot.slane %v2351_v4, 11  ;;  %v2947_v21 = vrot.slane %v2812_v51, 6 }
 0x20c   : > { %v13793_v39 = vadd.f32 %v2287_v40, %v1864_v18  ;;  %v3402_v40 = vrot.slane %v3269_v22, 5  ;;  %v11288_v11 = vrot.slane %v2810_v54, 10  ;;  %v11336_v22 = vrot.slane %v3268_v5, 9  ;;  %v12584_v54 = vld [vmem:[#allocation4 + $0x310] sm:$0xff]  ;;  %v3271_v48 = vld [vmem:[#allocation2 + $0x270] sm:$0xe] }
 0x20d   : > { %v2948_v4 = vsel %vm13330_vm7, %v2946_v46, %v2947_v21  ;;  %5554 = vmatpush.bf16.msrb.mxu0 %v12584_v54  ;;  %v2814_v46 = vld [vmem:[#allocation2 + $0x270] sm:$0xf]  ;;  %v3272_v21 = vld [vmem:[#allocation2 + $0x274] sm:$0xf]  ;;  %v3273_v54 = vld [vmem:[#allocation2 + $0x278] sm:$0x1] }
 0x20e   : > { %15178 = vst [vmem:[#allocation19_spill] sm:$0xff] %v13793_v39  ;;  %v3270_v39 = vld [vmem:[#allocation2 + $0x25c] sm:$0x1] }
 0x20f   : > { %v1369_v12 = vpop.f32.mrf.mxu2 }
 0x210   : > { %v1403_v43 = vadd.f32 %v1369_v12, %v941_v38  ;;  %v1831_v17 = vpop.f32.mrf.mxu3  ;;  %v12568_v38 = vld [vmem:[#allocation4 + $0x290] sm:$0xff]  ;;  %v3404_v12 = vrot.slane %v3402_v40, 4 }
 0x211   : > { %v2670_v2 = vpop.f32.mrf.mxu1  ;;  %4638 = vmatpush.bf16.msrb.mxu2 %v12568_v38 }
 0x212   : > { %v1865_v37 = vadd.f32 %v1831_v17, %v1403_v43  ;;  %v2750_v45 = vadd.f32 %v2670_v2, %v15179_v8  ;;  %v3405_v43 = vrot.slane %v3270_v39, 5 }
 0x213   : > { %v3869_v18 = vpop.f32.mrf.mxu0 }
 0x214   : > { %2709 = vmatmul.bf16.gmra.mxu1 %v2589_v20  ;;  %3168 = vmatmul.bf16.gmra.mxu2 %v3048_v49  ;;  %v13797_v10 = vadd.f32 %v2289_v47, %v1865_v37  ;;  %v2486_v47 = vsel %vm13334_vm8, %v11240_v16, %v2485_v57  ;;  %v3406_v57 = vsel %vm13254_vm2, %v3404_v12, %v3405_v43 }
 0x215   : > { %3626 = vmatmul.bf16.gmra.mxu3 %v3506_v15  ;;  %v2489_v15 = vsel %vm13334_vm8, %v2487_v9, %v2488_v28  ;;  %v2567_v51 = vunpack.c.l.b16 %v2486_v47  ;;  %v3027_v9 = vunpack.c.l.b16 %v2948_v4  ;;  %v2354_v47 = vld [vmem:[#allocation2 + $0x1cc] sm:$0x8] }
 0x216   : > { %3908 = vmatmul.bf16.gmra.mxu0 %v12526_v14  ;;  %v2945_v14 = vsel %vm13330_vm7, %v11288_v11, %v2944_v24  ;;  %v2568_v5 = vunpack.c.l.b16 %v2489_v15  ;;  %v3485_v11 = vunpack.c.l.b16 %v3406_v57  ;;  %v3409_v15 = vrot.slane %v3272_v21, 5  ;;  %v2815_v57 = vld [vmem:[#allocation2 + $0x274] sm:$0x3] }
 0x217   : > { %v3129_v17 = vpop.f32.mrf.mxu2  ;;  %v3026_v16 = vunpack.c.l.b16 %v2945_v14 }
 0x218   : > { %v3209_v20 = vadd.f32 %v3129_v17, %v2750_v45  ;;  %v3587_v49 = vpop.f32.mrf.mxu3  ;;  %v3403_v45 = vsel %vm13254_vm2, %v11336_v22, %v3402_v40  ;;  %v2590_v22 = vpack.c.b16 %v2568_v5, %v2567_v51 }
 0x219   : > { %v2672_v2 = vpop.f32.mrf.mxu1  ;;  %v3484_v28 = vunpack.c.l.b16 %v3403_v45  ;;  %v3049_v12 = vpack.c.b16 %v3027_v9, %v3026_v16  ;;  %v2813_v45 = vld [vmem:[#allocation2 + $0x26c] sm:$0xc] }
 0x21a   : > { %v3667_v37 = vadd.f32 %v3587_v49, %v3209_v20  ;;  %v2751_v39 = vadd.f32 %v2672_v2, %v13527_v27  ;;  %v2355_v27 = vld [vmem:[#allocation2 + $0x1d0] sm:$0xf]  ;;  %v12527_v49 = vld [vmem:[#allocation2 + $0x258] sm:$0xff]  ;;  %v2951_v2 = vrot.slane %v2814_v46, 6  ;;  %v11289_v9 = vrot.slane %v2813_v45, 10 }
 0x21b   : > { %v3871_v8 = vpop.f32.mrf.mxu0  ;;  %v2492_v43 = vrot.slane %v2355_v27, 7  ;;  %v3507_v20 = vpack.c.b16 %v3485_v11, %v3484_v28  ;;  %v2954_v11 = vrot.slane %v2815_v57, 6  ;;  %v11337_v27 = vrot.slane %v3271_v48, 9 }
 0x21c   : > { %v13812_v24 = vadd.f32 %v3869_v18, %v3667_v37  ;;  %v2356_v37 = vld [vmem:[#allocation2 + $0x1d4] sm:$0x7]  ;;  %v2953_v28 = vrot.slane %v2951_v2, 4  ;;  %v3412_v46 = vrot.slane %v3273_v54, 5 }
 0x21d   : > { %v2494_v51 = vrot.slane %v2492_v43, 4  ;;  %v2495_v16 = vrot.slane %v2356_v37, 7 }
 0x21f   : > { %v3131_v38 = vpop.f32.mrf.mxu2 }
 0x220   : > { %v3210_v40 = vadd.f32 %v3131_v38, %v2751_v39  ;;  %v3589_v63 = vpop.f32.mrf.mxu3  ;;  %v11241_v39 = vrot.slane %v2354_v47, 11 }
 0x221   : > { %v2675_v17 = vpop.f32.mrf.mxu1 }
 0x222   : > { %v3668_v14 = vadd.f32 %v3589_v63, %v3210_v40  ;;  %v2752_v18 = vadd.f32 %v2675_v17, %v13542_v60  ;;  %v3411_v60 = vrot.slane %v3409_v15, 4  ;;  %v2493_v63 = vsel %vm13334_vm8, %v11241_v39, %v2492_v43  ;;  %v2358_v39 = vld [vmem:[#allocation2 + $0x1ec] sm:$0xf] }
 0x223   : > { %v3874_v4 = vpop.f32.mrf.mxu0  ;;  %v2955_v17 = vsel %vm13330_vm7, %v2953_v28, %v2954_v11 }
 0x224   : > { %2714 = vmatmul.bf16.gmra.mxu1 %v2590_v22  ;;  %3173 = vmatmul.bf16.gmra.mxu2 %v3049_v12  ;;  %v13815_v5 = vadd.f32 %v3871_v8, %v3668_v14  ;;  %v2496_v8 = vsel %vm13334_vm8, %v2494_v51, %v2495_v16  ;;  %v2952_v12 = vsel %vm13330_vm7, %v11289_v9, %v2951_v2  ;;  %v3029_v57 = vunpack.c.l.b16 %v2955_v17  ;;  %v2817_v51 = vld [vmem:[#allocation2 + $0x28c] sm:$0xf]  ;;  %v3275_v16 = vld [vmem:[#allocation2 + $0x290] sm:$0xf]  ;;  %v2816_v17 = vld [vmem:[#allocation2 + $0x288] sm:$0xc] }
 0x225   : > { %3631 = vmatmul.bf16.gmra.mxu3 %v3507_v20  ;;  %v3410_v14 = vsel %vm13254_vm2, %v11337_v27, %v3409_v15  ;;  %v3413_v43 = vsel %vm13254_vm2, %v3411_v60, %v3412_v46  ;;  %v2570_v37 = vunpack.c.l.b16 %v2496_v8  ;;  %v3028_v45 = vunpack.c.l.b16 %v2952_v12  ;;  %v12528_v60 = vld [vmem:[#allocation2 + $0x274] sm:$0xff]  ;;  %v2357_v46 = vld [vmem:[#allocation2 + $0x1e8] sm:$0x8]  ;;  %v2359_v12 = vld [vmem:[#allocation2 + $0x1f0] sm:$0x7] }
 0x226   : > { %3913 = vmatmul.bf16.gmra.mxu0 %v12527_v49  ;;  %v3486_v2 = vunpack.c.l.b16 %v3410_v14  ;;  %v3487_v54 = vunpack.c.l.b16 %v3413_v43  ;;  %v2499_v15 = vrot.slane %v2358_v39, 7  ;;  %v3274_v14 = vld [vmem:[#allocation2 + $0x28c] sm:$0xe]  ;;  %v3276_v43 = vld [vmem:[#allocation2 + $0x294] sm:$0x1]  ;;  %v12567_v39 = vld [vmem:[#allocation4 + $0x288] sm:$0xff] }
 0x227   : > { %v3134_v21 = vpop.f32.mrf.mxu2  ;;  %4639 = vmatpush.bf16.msrb.mxu2 %v12567_v39 }
 0x228   : > { %v3211_v38 = vadd.f32 %v3134_v21, %v2752_v18  ;;  %v3592_v40 = vpop.f32.mrf.mxu3  ;;  %v2569_v18 = vunpack.c.l.b16 %v2493_v63  ;;  %v3050_v21 = vpack.c.b16 %v3029_v57, %v3028_v45  ;;  %v3416_v63 = vrot.slane %v3275_v16, 5 }
 0x229   : > { %v2677_v22 = vpop.f32.mrf.mxu1  ;;  %v2502_v45 = vrot.slane %v2359_v12, 7  ;;  %v11290_v57 = vrot.slane %v2816_v17, 10  ;;  %v12559_v17 = vld [vmem:[#allocation4 + $0x248] sm:$0xff] }
 0x22a   : > { %v3669_v20 = vadd.f32 %v3592_v40, %v3211_v38  ;;  %v2753_v49 = vadd.f32 %v2677_v22, %v13545_v62  ;;  %v2591_v11 = vpack.c.b16 %v2570_v37, %v2569_v18  ;;  %v3508_v38 = vpack.c.b16 %v3487_v54, %v3486_v2  ;;  %4181 = vmatpush.bf16.msrb.mxu1 %v12559_v17  ;;  %v3277_v17 = vld [vmem:[#allocation2 + $0x2a8] sm:$0xe] }
 0x22b   : > { %v3876_v47 = vpop.f32.mrf.mxu0  ;;  %v2958_v40 = vrot.slane %v2817_v51, 6  ;;  %v2501_v18 = vrot.slane %v2499_v15, 4  ;;  %v11338_v51 = vrot.slane %v3274_v14, 9  ;;  %v3418_v16 = vrot.slane %v3416_v63, 4 }
 0x22c   : > { %v13830_v48 = vadd.f32 %v3874_v4, %v3669_v20  ;;  %v2818_v20 = vld [vmem:[#allocation2 + $0x290] sm:$0x3] }
 0x22d   : > { %v2960_v2 = vrot.slane %v2958_v40, 4  ;;  %v2961_v54 = vrot.slane %v2818_v20, 6  ;;  %v12583_v20 = vld [vmem:[#allocation4 + $0x308] sm:$0xff] }
 0x22e   : > { %5555 = vmatpush.bf16.msrb.mxu0 %v12583_v20  ;;  %v3279_v20 = vld [vmem:[#allocation2 + $0x2b0] sm:$0x1] }
 0x22f   : > { %v3136_v9 = vpop.f32.mrf.mxu2 }
 0x230   : > { %v3212_v62 = vadd.f32 %v3136_v9, %v2753_v49  ;;  %v3594_v28 = vpop.f32.mrf.mxu3  ;;  %v11242_v49 = vrot.slane %v2357_v46, 11  ;;  %v3419_v9 = vrot.slane %v3276_v43, 5 }
 0x231   : > { %v2680_v27 = vpop.f32.mrf.mxu1 }
 0x232   : > { %v3670_v22 = vadd.f32 %v3594_v28, %v3212_v62  ;;  %v2754_v4 = vadd.f32 %v2680_v27, %v13560_v61  ;;  %v12575_v61 = vld [vmem:[#allocation4 + $0x2c8] sm:$0xff]  ;;  %v2503_v27 = vsel %vm13334_vm8, %v2501_v18, %v2502_v45 }
 0x233   : > { %v3879_v8 = vpop.f32.mrf.mxu0  ;;  %5097 = vmatpush.bf16.msrb.mxu3 %v12575_v61  ;;  %v2572_v43 = vunpack.c.l.b16 %v2503_v27 }
 0x234   : > { %2719 = vmatmul.bf16.gmra.mxu1 %v2591_v11  ;;  %3178 = vmatmul.bf16.gmra.mxu2 %v3050_v21  ;;  %v13833_v37 = vadd.f32 %v3876_v47, %v3670_v22  ;;  %v2500_v47 = vsel %vm13334_vm8, %v11242_v49, %v2499_v15  ;;  %v3420_v15 = vsel %vm13254_vm2, %v3418_v16, %v3419_v9 }
 0x235   : > { %3636 = vmatmul.bf16.gmra.mxu3 %v3508_v38  ;;  %v2959_v38 = vsel %vm13330_vm7, %v11290_v57, %v2958_v40  ;;  %v2571_v14 = vunpack.c.l.b16 %v2500_v47  ;;  %v3489_v57 = vunpack.c.l.b16 %v3420_v15  ;;  %v2360_v47 = vld [vmem:[#allocation2 + $0x204] sm:$0x8]  ;;  %v2821_v15 = vld [vmem:[#allocation2 + $0x2ac] sm:$0x3] }
 0x236   : > { %3918 = vmatmul.bf16.gmra.mxu0 %v12528_v60  ;;  %v2962_v60 = vsel %vm13330_vm7, %v2960_v2, %v2961_v54  ;;  %v3030_v49 = vunpack.c.l.b16 %v2959_v38  ;;  %v2820_v2 = vld [vmem:[#allocation2 + $0x2a8] sm:$0xf]  ;;  %v3278_v54 = vld [vmem:[#allocation2 + $0x2ac] sm:$0xf] }
 0x237   : > { %v3139_v62 = vpop.f32.mrf.mxu2  ;;  %v3031_v18 = vunpack.c.l.b16 %v2962_v60  ;;  %v3423_v27 = vrot.slane %v3278_v54, 5 }
 0x238   : > { %v3213_v28 = vadd.f32 %v3139_v62, %v2754_v4  ;;  %v3597_v11 = vpop.f32.mrf.mxu3  ;;  %v3417_v4 = vsel %vm13254_vm2, %v11338_v51, %v3416_v63  ;;  %v2592_v51 = vpack.c.b16 %v2572_v43, %v2571_v14 }
 0x239   : > { %v2682_v21 = vpop.f32.mrf.mxu1  ;;  %v3488_v45 = vunpack.c.l.b16 %v3417_v4  ;;  %v3051_v16 = vpack.c.b16 %v3031_v18, %v3030_v49  ;;  %v2819_v4 = vld [vmem:[#allocation2 + $0x2a4] sm:$0xc] }
 0x23a   : > { %v3671_v46 = vadd.f32 %v3597_v11, %v3213_v28  ;;  %v2755_v22 = vadd.f32 %v2682_v21, %v13563_v56  ;;  %v2361_v56 = vld [vmem:[#allocation2 + $0x208] sm:$0xf]  ;;  %v12529_v11 = vld [vmem:[#allocation2 + $0x290] sm:$0xff]  ;;  %v2965_v21 = vrot.slane %v2820_v2, 6  ;;  %v11291_v18 = vrot.slane %v2819_v4, 10 }
 0x23b   : > { %v3881_v12 = vpop.f32.mrf.mxu0  ;;  %v2506_v9 = vrot.slane %v2361_v56, 7  ;;  %v3509_v28 = vpack.c.b16 %v3489_v57, %v3488_v45  ;;  %v2968_v57 = vrot.slane %v2821_v15, 6  ;;  %v11339_v56 = vrot.slane %v3277_v17, 9 }
 0x23c   : > { %v13848_v40 = vadd.f32 %v3879_v8, %v3671_v46  ;;  %v2362_v46 = vld [vmem:[#allocation2 + $0x20c] sm:$0x7]  ;;  %v2967_v45 = vrot.slane %v2965_v21, 4  ;;  %v3426_v2 = vrot.slane %v3279_v20, 5 }
 0x23d   : > { %v2508_v14 = vrot.slane %v2506_v9, 4  ;;  %v2509_v49 = vrot.slane %v2362_v46, 7 }
 0x23f   : > { %v3141_v39 = vpop.f32.mrf.mxu2 }
 0x240   : > { %v3214_v63 = vadd.f32 %v3141_v39, %v2755_v22  ;;  %v3599_v61 = vpop.f32.mrf.mxu3  ;;  %v11243_v22 = vrot.slane %v2360_v47, 11 }
 0x241   : > { %v2685_v62 = vpop.f32.mrf.mxu1 }
 0x242   : > { %v3672_v38 = vadd.f32 %v3599_v61, %v3214_v63  ;;  %v2756_v8 = vadd.f32 %v2685_v62, %v13578_v35  ;;  %v3425_v35 = vrot.slane %v3423_v27, 4  ;;  %v2507_v61 = vsel %vm13334_vm8, %v11243_v22, %v2506_v9  ;;  %v2364_v22 = vld [vmem:[#allocation2 + $0x224] sm:$0xf] }
 0x243   : > { %v3884_v60 = vpop.f32.mrf.mxu0  ;;  %v2969_v62 = vsel %vm13330_vm7, %v2967_v45, %v2968_v57 }
 0x244   : > { %2724 = vmatmul.bf16.gmra.mxu1 %v2592_v51  ;;  %3183 = vmatmul.bf16.gmra.mxu2 %v3051_v16  ;;  %v13851_v43 = vadd.f32 %v3881_v12, %v3672_v38  ;;  %v2510_v12 = vsel %vm13334_vm8, %v2508_v14, %v2509_v49  ;;  %v2966_v16 = vsel %vm13330_vm7, %v11291_v18, %v2965_v21  ;;  %v3033_v15 = vunpack.c.l.b16 %v2969_v62  ;;  %v2823_v14 = vld [vmem:[#allocation2 + $0x2c4] sm:$0xf]  ;;  %v3281_v49 = vld [vmem:[#allocation2 + $0x2c8] sm:$0xf]  ;;  %v2822_v62 = vld [vmem:[#allocation2 + $0x2c0] sm:$0xc] }
 0x245   : > { %3641 = vmatmul.bf16.gmra.mxu3 %v3509_v28  ;;  %v3424_v38 = vsel %vm13254_vm2, %v11339_v56, %v3423_v27  ;;  %v3427_v9 = vsel %vm13254_vm2, %v3425_v35, %v3426_v2  ;;  %v2574_v46 = vunpack.c.l.b16 %v2510_v12  ;;  %v3032_v4 = vunpack.c.l.b16 %v2966_v16  ;;  %v12530_v35 = vld [vmem:[#allocation2 + $0x2ac] sm:$0xff]  ;;  %v2363_v2 = vld [vmem:[#allocation2 + $0x220] sm:$0x8]  ;;  %v2365_v16 = vld [vmem:[#allocation2 + $0x228] sm:$0x7] }
 0x246   : > { %3923 = vmatmul.bf16.gmra.mxu0 %v12529_v11  ;;  %v3490_v21 = vunpack.c.l.b16 %v3424_v38  ;;  %v3491_v20 = vunpack.c.l.b16 %v3427_v9  ;;  %v2513_v27 = vrot.slane %v2364_v22, 7  ;;  %v3280_v38 = vld [vmem:[#allocation2 + $0x2c4] sm:$0xe]  ;;  %v3282_v9 = vld [vmem:[#allocation2 + $0x2cc] sm:$0x1]  ;;  %v12566_v22 = vld [vmem:[#allocation4 + $0x280] sm:$0xff] }
 0x247   : > { %v3144_v54 = vpop.f32.mrf.mxu2  ;;  %4640 = vmatpush.bf16.msrb.mxu2 %v12566_v22 }
 0x248   : > { %v3215_v39 = vadd.f32 %v3144_v54, %v2756_v8  ;;  %v3602_v63 = vpop.f32.mrf.mxu3  ;;  %v2573_v8 = vunpack.c.l.b16 %v2507_v61  ;;  %v3052_v54 = vpack.c.b16 %v3033_v15, %v3032_v4  ;;  %v3430_v61 = vrot.slane %v3281_v49, 5 }
 0x249   : > { %v2687_v51 = vpop.f32.mrf.mxu1  ;;  %v2516_v4 = vrot.slane %v2365_v16, 7  ;;  %v11292_v15 = vrot.slane %v2822_v62, 10  ;;  %v12558_v62 = vld [vmem:[#allocation4 + $0x240] sm:$0xff] }
 0x24a   : > { %v3673_v28 = vadd.f32 %v3602_v63, %v3215_v39  ;;  %v2757_v11 = vadd.f32 %v2687_v51, %v13580_v55  ;;  %v2593_v57 = vpack.c.b16 %v2574_v46, %v2573_v8  ;;  %v3510_v39 = vpack.c.b16 %v3491_v20, %v3490_v21  ;;  %4182 = vmatpush.bf16.msrb.mxu1 %v12558_v62  ;;  %v3283_v62 = vld [vmem:[#allocation2 + $0x2e0] sm:$0xe] }
 0x24b   : > { %v3886_v47 = vpop.f32.mrf.mxu0  ;;  %v2972_v63 = vrot.slane %v2823_v14, 6  ;;  %v2515_v8 = vrot.slane %v2513_v27, 4  ;;  %v11340_v14 = vrot.slane %v3280_v38, 9  ;;  %v3432_v49 = vrot.slane %v3430_v61, 4 }
 0x24c   : > { %v13866_v17 = vadd.f32 %v3884_v60, %v3673_v28  ;;  %v2824_v28 = vld [vmem:[#allocation2 + $0x2c8] sm:$0x3] }
 0x24d   : > { %v2974_v21 = vrot.slane %v2972_v63, 4  ;;  %v2975_v20 = vrot.slane %v2824_v28, 6  ;;  %v12582_v28 = vld [vmem:[#allocation4 + $0x300] sm:$0xff] }
 0x24e   : > { %5556 = vmatpush.bf16.msrb.mxu0 %v12582_v28  ;;  %v3285_v28 = vld [vmem:[#allocation2 + $0x2e8] sm:$0x1] }
 0x24f   : > { %v3146_v18 = vpop.f32.mrf.mxu2 }
 0x250   : > { %v3216_v55 = vadd.f32 %v3146_v18, %v2757_v11  ;;  %v3604_v45 = vpop.f32.mrf.mxu3  ;;  %v11244_v11 = vrot.slane %v2363_v2, 11  ;;  %v3433_v18 = vrot.slane %v3282_v9, 5 }
 0x251   : > { %v2690_v56 = vpop.f32.mrf.mxu1 }
 0x252   : > { %v3674_v51 = vadd.f32 %v3604_v45, %v3216_v55  ;;  %v2758_v60 = vadd.f32 %v2690_v56, %v13595_v33  ;;  %v12574_v33 = vld [vmem:[#allocation4 + $0x2c0] sm:$0xff]  ;;  %v2517_v56 = vsel %vm13334_vm8, %v2515_v8, %v2516_v4 }
 0x253   : > { %v3889_v12 = vpop.f32.mrf.mxu0  ;;  %5098 = vmatpush.bf16.msrb.mxu3 %v12574_v33  ;;  %v2576_v9 = vunpack.c.l.b16 %v2517_v56 }
 0x254   : > { %2729 = vmatmul.bf16.gmra.mxu1 %v2593_v57  ;;  %3188 = vmatmul.bf16.gmra.mxu2 %v3052_v54  ;;  %v13869_v46 = vadd.f32 %v3886_v47, %v3674_v51  ;;  %v2514_v47 = vsel %vm13334_vm8, %v11244_v11, %v2513_v27  ;;  %v3434_v27 = vsel %vm13254_vm2, %v3432_v49, %v3433_v18 }
 0x255   : > { %3646 = vmatmul.bf16.gmra.mxu3 %v3510_v39  ;;  %v2973_v39 = vsel %vm13330_vm7, %v11292_v15, %v2972_v63  ;;  %v2575_v38 = vunpack.c.l.b16 %v2514_v47  ;;  %v3493_v15 = vunpack.c.l.b16 %v3434_v27  ;;  %v2366_v47 = vld [vmem:[#allocation2 + $0x23c] sm:$0x8]  ;;  %v2827_v27 = vld [vmem:[#allocation2 + $0x2e4] sm:$0x3] }
 0x256   : > { %3928 = vmatmul.bf16.gmra.mxu0 %v12530_v35  ;;  %v2976_v35 = vsel %vm13330_vm7, %v2974_v21, %v2975_v20  ;;  %v3034_v11 = vunpack.c.l.b16 %v2973_v39  ;;  %v2826_v21 = vld [vmem:[#allocation2 + $0x2e0] sm:$0xf]  ;;  %v3284_v20 = vld [vmem:[#allocation2 + $0x2e4] sm:$0xf] }
 0x257   : > { %v3149_v55 = vpop.f32.mrf.mxu2  ;;  %v3035_v8 = vunpack.c.l.b16 %v2976_v35  ;;  %v3437_v56 = vrot.slane %v3284_v20, 5 }
 0x258   : > { %v3217_v45 = vadd.f32 %v3149_v55, %v2758_v60  ;;  %v3607_v57 = vpop.f32.mrf.mxu3  ;;  %v3431_v60 = vsel %vm13254_vm2, %v11340_v14, %v3430_v61  ;;  %v2594_v14 = vpack.c.b16 %v2576_v9, %v2575_v38 }
 0x259   : > { %v2692_v54 = vpop.f32.mrf.mxu1  ;;  %v3492_v4 = vunpack.c.l.b16 %v3431_v60  ;;  %v3053_v49 = vpack.c.b16 %v3035_v8, %v3034_v11  ;;  %v2825_v60 = vld [vmem:[#allocation2 + $0x2dc] sm:$0xc] }
 0x25a   : > { %v3675_v2 = vadd.f32 %v3607_v57, %v3217_v45  ;;  %v2759_v51 = vadd.f32 %v2692_v54, %v13598_v30  ;;  %v2367_v30 = vld [vmem:[#allocation2 + $0x240] sm:$0xf]  ;;  %v12531_v57 = vld [vmem:[#allocation2 + $0x2c8] sm:$0xff]  ;;  %v2979_v54 = vrot.slane %v2826_v21, 6  ;;  %v11293_v8 = vrot.slane %v2825_v60, 10 }
 0x25b   : > { %v3891_v16 = vpop.f32.mrf.mxu0  ;;  %v2520_v18 = vrot.slane %v2367_v30, 7  ;;  %v3511_v45 = vpack.c.b16 %v3493_v15, %v3492_v4  ;;  %v2982_v15 = vrot.slane %v2827_v27, 6  ;;  %v11341_v30 = vrot.slane %v3283_v62, 9 }
 0x25c   : > { %v13884_v63 = vadd.f32 %v3889_v12, %v3675_v2  ;;  %v2368_v2 = vld [vmem:[#allocation2 + $0x244] sm:$0x7]  ;;  %v2981_v4 = vrot.slane %v2979_v54, 4  ;;  %v3440_v21 = vrot.slane %v3285_v28, 5 }
 0x25d   : > { %v2522_v38 = vrot.slane %v2520_v18, 4  ;;  %v2523_v11 = vrot.slane %v2368_v2, 7 }
 0x25f   : > { %v3151_v22 = vpop.f32.mrf.mxu2 }
 0x260   : > { %v3218_v61 = vadd.f32 %v3151_v22, %v2759_v51  ;;  %v3609_v33 = vpop.f32.mrf.mxu3  ;;  %v11245_v51 = vrot.slane %v2366_v47, 11 }
 0x261   : > { %v2695_v55 = vpop.f32.mrf.mxu1 }
 0x262   : > { %v3676_v39 = vadd.f32 %v3609_v33, %v3218_v61  ;;  %v2760_v12 = vadd.f32 %v2695_v55, %v13613_v3  ;;  %v3439_v3 = vrot.slane %v3437_v56, 4  ;;  %v2521_v33 = vsel %vm13334_vm8, %v11245_v51, %v2520_v18  ;;  %v2370_v51 = vld [vmem:[#allocation2 + $0x25c] sm:$0xf] }
 0x263   : > { %v3894_v35 = vpop.f32.mrf.mxu0  ;;  %v2983_v55 = vsel %vm13330_vm7, %v2981_v4, %v2982_v15 }
 0x264   : > { %2734 = vmatmul.bf16.gmra.mxu1 %v2594_v14  ;;  %3193 = vmatmul.bf16.gmra.mxu2 %v3053_v49  ;;  %v13887_v9 = vadd.f32 %v3891_v16, %v3676_v39  ;;  %v2524_v16 = vsel %vm13334_vm8, %v2522_v38, %v2523_v11  ;;  %v2980_v49 = vsel %vm13330_vm7, %v11293_v8, %v2979_v54  ;;  %v3037_v27 = vunpack.c.l.b16 %v2983_v55  ;;  %v2829_v38 = vld [vmem:[#allocation2 + $0x2fc] sm:$0xf]  ;;  %v3287_v11 = vld [vmem:[#allocation2 + $0x300] sm:$0xf]  ;;  %v2828_v55 = vld [vmem:[#allocation2 + $0x2f8] sm:$0xc] }
 0x265   : > { %3651 = vmatmul.bf16.gmra.mxu3 %v3511_v45  ;;  %v3438_v39 = vsel %vm13254_vm2, %v11341_v30, %v3437_v56  ;;  %v3441_v18 = vsel %vm13254_vm2, %v3439_v3, %v3440_v21  ;;  %v2578_v2 = vunpack.c.l.b16 %v2524_v16  ;;  %v3036_v60 = vunpack.c.l.b16 %v2980_v49  ;;  %v12532_v3 = vld [vmem:[#allocation2 + $0x2e4] sm:$0xff]  ;;  %v2369_v21 = vld [vmem:[#allocation2 + $0x258] sm:$0x8]  ;;  %v2371_v49 = vld [vmem:[#allocation2 + $0x260] sm:$0x7] }
 0x266   : > { %3933 = vmatmul.bf16.gmra.mxu0 %v12531_v57  ;;  %v3494_v54 = vunpack.c.l.b16 %v3438_v39  ;;  %v3495_v28 = vunpack.c.l.b16 %v3441_v18  ;;  %v2527_v56 = vrot.slane %v2370_v51, 7  ;;  %v3286_v39 = vld [vmem:[#allocation2 + $0x2fc] sm:$0xe]  ;;  %v3288_v18 = vld [vmem:[#allocation2 + $0x304] sm:$0x1]  ;;  %v12621_v51 = vld [vmem:[#allocation4 + $0x3b8] sm:$0xff] }
 0x267   : > { %v3154_v20 = vpop.f32.mrf.mxu2  ;;  %6289 = vmatpush.bf16.msra.mxu2 %v12621_v51  ;;  %v5213_v51 = vld [vmem:[#allocation2 + $0x204] sm:$0xf] }
 0x268   : > { %v3219_v22 = vadd.f32 %v3154_v20, %v2760_v12  ;;  %v3612_v61 = vpop.f32.mrf.mxu3  ;;  %v2577_v12 = vunpack.c.l.b16 %v2521_v33  ;;  %v3054_v20 = vpack.c.b16 %v3037_v27, %v3036_v60  ;;  %v3444_v33 = vrot.slane %v3287_v11, 5 }
 0x269   : > { %v2697_v14 = vpop.f32.mrf.mxu1  ;;  %v2530_v60 = vrot.slane %v2371_v49, 7  ;;  %v11294_v27 = vrot.slane %v2828_v55, 10  ;;  %v12613_v55 = vld [vmem:[#allocation4 + $0x378] sm:$0xff] }
 0x26a   : > { %v3677_v45 = vadd.f32 %v3612_v61, %v3219_v22  ;;  %v2761_v57 = vadd.f32 %v2697_v14, %v13616_v0  ;;  %v2595_v15 = vpack.c.b16 %v2578_v2, %v2577_v12  ;;  %v3512_v22 = vpack.c.b16 %v3495_v28, %v3494_v54  ;;  %5831 = vmatpush.bf16.msra.mxu1 %v12613_v55  ;;  %v5212_v55 = vld [vmem:[#allocation2 + $0x200] sm:$0xe] }
 0x26b   : > { %v3896_v47 = vpop.f32.mrf.mxu0  ;;  %v2986_v61 = vrot.slane %v2829_v38, 6  ;;  %v2529_v12 = vrot.slane %v2527_v56, 4  ;;  %v11342_v38 = vrot.slane %v3286_v39, 9  ;;  %v3446_v11 = vrot.slane %v3444_v33, 4 }
 0x26c   : > { %v13902_v62 = vadd.f32 %v3894_v35, %v3677_v45  ;;  %v2830_v45 = vld [vmem:[#allocation2 + $0x300] sm:$0x3] }
 0x26d   : > { %v2988_v54 = vrot.slane %v2986_v61, 4  ;;  %v2989_v28 = vrot.slane %v2830_v45, 6  ;;  %v12637_v45 = vld [vmem:[#allocation4 + $0x438] sm:$0xff] }
 0x26e   : > { %7206 = vmatpush.bf16.msra.mxu0 %v12637_v45  ;;  %v5214_v45 = vld [vmem:[#allocation2 + $0x208] sm:$0x1] }
 0x26f   : > { %v3156_v8 = vpop.f32.mrf.mxu2 }
 0x270   : > { %v3220_v0 = vadd.f32 %v3156_v8, %v2761_v57  ;;  %v3614_v4 = vpop.f32.mrf.mxu3  ;;  %v11246_v57 = vrot.slane %v2369_v21, 11  ;;  %v3447_v8 = vrot.slane %v3288_v18, 5 }
 0x271   : > { %v2700_v30 = vpop.f32.mrf.mxu1 }
 0x272   : > { %v3678_v14 = vadd.f32 %v3614_v4, %v3220_v0  ;;  %v2762_v35 = vadd.f32 %v2700_v30, %v13631_v52  ;;  %v12629_v52 = vld [vmem:[#allocation4 + $0x3f8] sm:$0xff]  ;;  %v2531_v30 = vsel %vm13334_vm8, %v2529_v12, %v2530_v60 }
 0x273   : > { %v3899_v16 = vpop.f32.mrf.mxu0  ;;  %6747 = vmatpush.bf16.msra.mxu3 %v12629_v52  ;;  %v2580_v18 = vunpack.c.l.b16 %v2531_v30 }
 0x274   : > { %2739 = vmatmul.bf16.gmra.mxu1 %v2595_v15  ;;  %3198 = vmatmul.bf16.gmra.mxu2 %v3054_v20  ;;  %v13905_v2 = vadd.f32 %v3896_v47, %v3678_v14  ;;  %v2528_v47 = vsel %vm13334_vm8, %v11246_v57, %v2527_v56  ;;  %v3448_v56 = vsel %vm13254_vm2, %v3446_v11, %v3447_v8 }
 0x275   : > { %3656 = vmatmul.bf16.gmra.mxu3 %v3512_v22  ;;  %v2987_v22 = vsel %vm13330_vm7, %v11294_v27, %v2986_v61  ;;  %v2579_v39 = vunpack.c.l.b16 %v2528_v47  ;;  %v3497_v27 = vunpack.c.l.b16 %v3448_v56  ;;  %v4296_v47 = vld [vmem:[#allocation2 + $0x1f8] sm:$0x8]  ;;  %v5310_v56 = vrot.slane %v5213_v51, 5 }
 0x276   : > { %3938 = vmatmul.bf16.gmra.mxu0 %v12532_v3  ;;  %v2990_v3 = vsel %vm13330_vm7, %v2988_v54, %v2989_v28  ;;  %v3038_v57 = vunpack.c.l.b16 %v2987_v22  ;;  %v4755_v54 = vld [vmem:[#allocation2 + $0x200] sm:$0xf] }
 0x277   : > { %v3159_v0 = vpop.f32.mrf.mxu2  ;;  %v3039_v12 = vunpack.c.l.b16 %v2990_v3  ;;  %v4852_v30 = vrot.slane %v4755_v54, 6  ;;  %v5313_v54 = vrot.slane %v5214_v45, 5 }
 0x278   : > { %v3221_v4 = vadd.f32 %v3159_v0, %v2762_v35  ;;  %v3617_v15 = vpop.f32.mrf.mxu3  ;;  %v3445_v35 = vsel %vm13254_vm2, %v11342_v38, %v3444_v33  ;;  %v2596_v38 = vpack.c.b16 %v2580_v18, %v2579_v39 }
 0x279   : > { %v2702_v20 = vpop.f32.mrf.mxu1  ;;  %v3496_v60 = vunpack.c.l.b16 %v3445_v35  ;;  %v3055_v11 = vpack.c.b16 %v3039_v12, %v3038_v57  ;;  %v4756_v35 = vld [vmem:[#allocation2 + $0x204] sm:$0x3] }
 0x27a   : > { %v3679_v21 = vadd.f32 %v3617_v15, %v3221_v4  ;;  %v2763_v14 = vadd.f32 %v2702_v20, %v13634_v31  ;;  %v4297_v31 = vld [vmem:[#allocation2 + $0x1fc] sm:$0xf]  ;;  %v12533_v15 = vld [vmem:[#allocation2 + $0x300] sm:$0xff] }
 0x27b   : > { %v3901_v49 = vpop.f32.mrf.mxu0  ;;  %v4394_v8 = vrot.slane %v4297_v31, 7  ;;  %v3513_v4 = vpack.c.b16 %v3497_v27, %v3496_v60  ;;  %v4298_v20 = vld [vmem:[#allocation2 + $0x200] sm:$0x7]  ;;  %v4854_v60 = vrot.slane %v4852_v30, 4  ;;  %v4855_v27 = vrot.slane %v4756_v35, 6 }
 0x27c   : > { %v13920_v61 = vadd.f32 %v3899_v16, %v3679_v21  ;;  %v4754_v21 = vld [vmem:[#allocation2 + $0x1fc] sm:$0xc]  ;;  %v4397_v57 = vrot.slane %v4298_v20, 7  ;;  %v11663_v31 = vrot.slane %v5212_v55, 9 }
 0x27d   : > { %v4396_v39 = vrot.slane %v4394_v8, 4  ;;  %v11615_v12 = vrot.slane %v4754_v21, 10 }
 0x27e   : > { %v5311_v20 = vsel %vm13254_vm2, %v11663_v31, %v5310_v56 }
 0x27f   : > { %v3161_v28 = vpop.f32.mrf.mxu2 }
 0x280   : > { %v3222_v33 = vadd.f32 %v3161_v28, %v2763_v14  ;;  %v3619_v52 = vpop.f32.mrf.mxu3  ;;  %v11567_v14 = vrot.slane %v4296_v47, 11 }
 0x281   : > { %v2705_v0 = vpop.f32.mrf.mxu1 }
 0x282   : > { %v3680_v22 = vadd.f32 %v3619_v52, %v3222_v33  ;;  %v2764_v16 = vadd.f32 %v2705_v0, %v13649_v7  ;;  %v5312_v7 = vrot.slane %v5310_v56, 4  ;;  %v4856_v0 = vsel %vm13330_vm7, %v4854_v60, %v4855_v27  ;;  %v12542_v27 = vld [vmem:[#allocation2 + $0x1f8] sm:$0xff] }
 0x283   : > { %v3904_v3 = vpop.f32.mrf.mxu0  ;;  %v4980_v55 = vunpack.c.l.b16 %v4856_v0  ;;  %v4759_v0 = vld [vmem:[#allocation2 + $0x220] sm:$0x3] }
 0x284   : > { %2744 = vmatmul.bf16.gmra.mxu1 %v2596_v38  ;;  %3203 = vmatmul.bf16.gmra.mxu2 %v3055_v11  ;;  %v13923_v18 = vadd.f32 %v3901_v49, %v3680_v22  ;;  %v4395_v38 = vsel %vm13334_vm8, %v11567_v14, %v4394_v8  ;;  %v4398_v49 = vsel %vm13334_vm8, %v4396_v39, %v4397_v57  ;;  %v4300_v14 = vld [vmem:[#allocation2 + $0x218] sm:$0xf]  ;;  %v4758_v39 = vld [vmem:[#allocation2 + $0x21c] sm:$0xf] }
 0x285   : > { %3661 = vmatmul.bf16.gmra.mxu3 %v3513_v4  ;;  %v4853_v11 = vsel %vm13330_vm7, %v11615_v12, %v4852_v30  ;;  %v5314_v22 = vsel %vm13254_vm2, %v5312_v7, %v5313_v54  ;;  %v4521_v8 = vunpack.c.l.b16 %v4395_v38  ;;  %v5437_v30 = vunpack.c.l.b16 %v5311_v20  ;;  %v5216_v12 = vld [vmem:[#allocation2 + $0x220] sm:$0xf]  ;;  %v4299_v54 = vld [vmem:[#allocation2 + $0x214] sm:$0x8]  ;;  %v5215_v20 = vld [vmem:[#allocation2 + $0x21c] sm:$0xe] }
 0x286   : > { %3943 = vmatmul.bf16.gmra.mxu0 %v12533_v15  ;;  %v4979_v35 = vunpack.c.l.b16 %v4853_v11  ;;  %v5438_v45 = vunpack.c.l.b16 %v5314_v22  ;;  %v4401_v56 = vrot.slane %v4300_v14, 7  ;;  %v4757_v11 = vld [vmem:[#allocation2 + $0x218] sm:$0xc]  ;;  %v5217_v22 = vld [vmem:[#allocation2 + $0x224] sm:$0x1] }
 0x287   : > { %v3164_v28 = vpop.f32.mrf.mxu2  ;;  %v12620_v14 = vld [vmem:[#allocation4 + $0x3b0] sm:$0xff] }
 0x288   : > { %v3223_v33 = vadd.f32 %v3164_v28, %v2764_v16  ;;  %v3622_v51 = vpop.f32.mrf.mxu3  ;;  %v4522_v16 = vunpack.c.l.b16 %v4398_v49  ;;  %v5469_v7 = vpack.c.b16 %v5438_v45, %v5437_v30  ;;  %v4862_v45 = vrot.slane %v4759_v0, 6  ;;  %6290 = vmatpush.bf16.msra.mxu2 %v12620_v14  ;;  %v12636_v0 = vld [vmem:[#allocation4 + $0x430] sm:$0xff]  ;;  %v5219_v14 = vld [vmem:[#allocation2 + $0x23c] sm:$0xf] }
 0x289   : > { %v2707_v52 = vpop.f32.mrf.mxu1  ;;  %7207 = vmatpush.bf16.msra.mxu0 %v12636_v0  ;;  %v5220_v0 = vld [vmem:[#allocation2 + $0x240] sm:$0x1] }
 0x28a   : > { %v3681_v4 = vadd.f32 %v3622_v51, %v3223_v33  ;;  %v2765_v15 = vadd.f32 %v2707_v52, %v13652_v59  ;;  %v4553_v28 = vpack.c.b16 %v4522_v16, %v4521_v8  ;;  %v5011_v33 = vpack.c.b16 %v4980_v55, %v4979_v35  ;;  %v4301_v51 = vld [vmem:[#allocation2 + $0x21c] sm:$0x7] }
 0x28b   : > { %v3906_v47 = vpop.f32.mrf.mxu0  ;;  %v4403_v8 = vrot.slane %v4401_v56, 4  ;;  %v4404_v35 = vrot.slane %v4301_v51, 7  ;;  %v11616_v55 = vrot.slane %v4757_v11, 10 }
 0x28c   : > { %v13938_v21 = vadd.f32 %v3904_v3, %v3681_v4  ;;  %v4859_v3 = vrot.slane %v4758_v39, 6  ;;  %v5317_v4 = vrot.slane %v5216_v12, 5  ;;  %v11664_v39 = vrot.slane %v5215_v20, 9 }
 0x28e   : > { %v4861_v30 = vrot.slane %v4859_v3, 4 }
 0x28f   : > { %v3166_v57 = vpop.f32.mrf.mxu2 }
 0x290   : > { %v3224_v59 = vadd.f32 %v3166_v57, %v2765_v15  ;;  %v3624_v60 = vpop.f32.mrf.mxu3  ;;  %v11568_v15 = vrot.slane %v4299_v54, 11  ;;  %v5319_v57 = vrot.slane %v5317_v4, 4 }
 0x291   : > { %v2710_v31 = vpop.f32.mrf.mxu1 }
 0x292   : > { %v3682_v52 = vadd.f32 %v3624_v60, %v3224_v59  ;;  %v2766_v38 = vadd.f32 %v2710_v31, %v13667_v53  ;;  %v12628_v53 = vld [vmem:[#allocation4 + $0x3f0] sm:$0xff]  ;;  %v5320_v59 = vrot.slane %v5217_v22, 5  ;;  %v4405_v31 = vsel %vm13334_vm8, %v4403_v8, %v4404_v35 }
 0x293   : > { %v3909_v49 = vpop.f32.mrf.mxu0  ;;  %6748 = vmatpush.bf16.msra.mxu3 %v12628_v53  ;;  %v4524_v22 = vunpack.c.l.b16 %v4405_v31 }
 0x294   : > { %4183 = vmatmul.bf16.vlgmr.msrb.gmra.mxu1 %v12542_v27  ;;  %4641 = vmatmul.bf16.vlgmr.msrb.gmra.mxu2 %v4553_v28  ;;  %v13941_v16 = vadd.f32 %v3906_v47, %v3682_v52  ;;  %v4402_v47 = vsel %vm13334_vm8, %v11568_v15, %v4401_v56  ;;  %v5321_v11 = vsel %vm13254_vm2, %v5319_v57, %v5320_v59  ;;  %v12612_v56 = vld [vmem:[#allocation4 + $0x370] sm:$0xff] }
 0x295   : > { %5099 = vmatmul.bf16.vlgmr.msrb.gmra.mxu3 %v5011_v33  ;;  %v4860_v33 = vsel %vm13330_vm7, %v11616_v55, %v4859_v3  ;;  %v4523_v20 = vunpack.c.l.b16 %v4402_v47  ;;  %5832 = vmatpush.bf16.msra.mxu1 %v12612_v56  ;;  %v5440_v55 = vunpack.c.l.b16 %v5321_v11  ;;  %v4304_v47 = vld [vmem:[#allocation2 + $0x238] sm:$0x7]  ;;  %v5324_v11 = vrot.slane %v5219_v14, 5 }
 0x296   : > { %5557 = vmatmul.bf16.vlgmr.msrb.gmra.mxu0 %v5469_v7  ;;  %v4863_v7 = vsel %vm13330_vm7, %v4861_v30, %v4862_v45  ;;  %v4981_v15 = vunpack.c.l.b16 %v4860_v33  ;;  %v4761_v30 = vld [vmem:[#allocation2 + $0x238] sm:$0xf] }
 0x297   : > { %v3169_v12 = vpop.f32.mrf.mxu2  ;;  %v4982_v8 = vunpack.c.l.b16 %v4863_v7  ;;  %v4554_v57 = vpack.c.b16 %v4524_v22, %v4523_v20  ;;  %v5218_v56 = vld [vmem:[#allocation2 + $0x238] sm:$0xe] }
 0x298   : > { %v3225_v60 = vadd.f32 %v3169_v12, %v2766_v38  ;;  %v3627_v27 = vpop.f32.mrf.mxu3  ;;  %v5318_v38 = vsel %vm13254_vm2, %v11664_v39, %v5317_v4  ;;  %v12543_v39 = vld [vmem:[#allocation2 + $0x214] sm:$0xff] }
 0x299   : > { %v2712_v28 = vpop.f32.mrf.mxu1  ;;  %v5439_v35 = vunpack.c.l.b16 %v5318_v38  ;;  %v4762_v38 = vld [vmem:[#allocation2 + $0x23c] sm:$0x3] }
 0x29a   : > { %v3683_v54 = vadd.f32 %v3627_v27, %v3225_v60  ;;  %v2767_v51 = vadd.f32 %v2712_v28, %v13670_v19  ;;  %v4303_v19 = vld [vmem:[#allocation2 + $0x234] sm:$0xf]  ;;  %v5012_v60 = vpack.c.b16 %v4982_v8, %v4981_v15  ;;  %v4302_v28 = vld [vmem:[#allocation2 + $0x230] sm:$0x8]  ;;  %v4411_v15 = vrot.slane %v4304_v47, 7 }
 0x29b   : > { %v3911_v52 = vpop.f32.mrf.mxu0  ;;  %v4408_v59 = vrot.slane %v4303_v19, 7  ;;  %v5470_v27 = vpack.c.b16 %v5440_v55, %v5439_v35  ;;  %v4869_v55 = vrot.slane %v4762_v38, 6  ;;  %v11665_v19 = vrot.slane %v5218_v56, 9 }
 0x29c   : > { %v13956_v3 = vadd.f32 %v3909_v49, %v3683_v54  ;;  %v4866_v49 = vrot.slane %v4761_v30, 6  ;;  %v4760_v54 = vld [vmem:[#allocation2 + $0x234] sm:$0xc]  ;;  %v5327_v30 = vrot.slane %v5220_v0, 5 }
 0x29d   : > { %v4410_v20 = vrot.slane %v4408_v59, 4  ;;  %v11617_v8 = vrot.slane %v4760_v54, 10  ;;  %v5325_v47 = vsel %vm13254_vm2, %v11665_v19, %v5324_v11 }
 0x29e   : > { %v4868_v35 = vrot.slane %v4866_v49, 4 }
 0x29f   : > { %v3171_v45 = vpop.f32.mrf.mxu2 }
 0x2a0   : > { %v3226_v4 = vadd.f32 %v3171_v45, %v2767_v51  ;;  %v3629_v53 = vpop.f32.mrf.mxu3  ;;  %v11569_v51 = vrot.slane %v4302_v28, 11 }
 0x2a1   : > { %v2715_v12 = vpop.f32.mrf.mxu1 }
 0x2a2   : > { %v3684_v31 = vadd.f32 %v3629_v53, %v3226_v4  ;;  %v2768_v33 = vadd.f32 %v2715_v12, %v13685_v42  ;;  %v5326_v42 = vrot.slane %v5324_v11, 4  ;;  %v4870_v12 = vsel %vm13330_vm7, %v4868_v35, %v4869_v55  ;;  %v12544_v55 = vld [vmem:[#allocation2 + $0x230] sm:$0xff] }
 0x2a3   : > { %v3914_v7 = vpop.f32.mrf.mxu0  ;;  %v4984_v56 = vunpack.c.l.b16 %v4870_v12  ;;  %v4765_v12 = vld [vmem:[#allocation2 + $0x258] sm:$0x3] }
 0x2a4   : > { %4188 = vmatmul.bf16.gmra.mxu1 %v12543_v39  ;;  %4646 = vmatmul.bf16.gmra.mxu2 %v4554_v57  ;;  %v13959_v22 = vadd.f32 %v3911_v52, %v3684_v31  ;;  %v4409_v39 = vsel %vm13334_vm8, %v11569_v51, %v4408_v59  ;;  %v4412_v52 = vsel %vm13334_vm8, %v4410_v20, %v4411_v15  ;;  %v4306_v51 = vld [vmem:[#allocation2 + $0x250] sm:$0xf]  ;;  %v4764_v20 = vld [vmem:[#allocation2 + $0x254] sm:$0xf] }
 0x2a5   : > { %5104 = vmatmul.bf16.gmra.mxu3 %v5012_v60  ;;  %v4867_v57 = vsel %vm13330_vm7, %v11617_v8, %v4866_v49  ;;  %v5328_v31 = vsel %vm13254_vm2, %v5326_v42, %v5327_v30  ;;  %v4525_v59 = vunpack.c.l.b16 %v4409_v39  ;;  %v5441_v49 = vunpack.c.l.b16 %v5325_v47  ;;  %v5222_v8 = vld [vmem:[#allocation2 + $0x258] sm:$0xf]  ;;  %v4305_v30 = vld [vmem:[#allocation2 + $0x24c] sm:$0x8]  ;;  %v5221_v47 = vld [vmem:[#allocation2 + $0x254] sm:$0xe] }
 0x2a6   : > { %5562 = vmatmul.bf16.gmra.mxu0 %v5470_v27  ;;  %v4983_v38 = vunpack.c.l.b16 %v4867_v57  ;;  %v5442_v0 = vunpack.c.l.b16 %v5328_v31  ;;  %v4415_v11 = vrot.slane %v4306_v51, 7  ;;  %v4763_v57 = vld [vmem:[#allocation2 + $0x250] sm:$0xc]  ;;  %v5223_v31 = vld [vmem:[#allocation2 + $0x25c] sm:$0x1] }
 0x2a7   : > { %v3174_v45 = vpop.f32.mrf.mxu2  ;;  %v12619_v51 = vld [vmem:[#allocation4 + $0x3a8] sm:$0xff] }
 0x2a8   : > { %v3227_v4 = vadd.f32 %v3174_v45, %v2768_v33  ;;  %v3632_v14 = vpop.f32.mrf.mxu3  ;;  %v4526_v33 = vunpack.c.l.b16 %v4412_v52  ;;  %v5471_v42 = vpack.c.b16 %v5442_v0, %v5441_v49  ;;  %v4876_v0 = vrot.slane %v4765_v12, 6  ;;  %6291 = vmatpush.bf16.msra.mxu2 %v12619_v51  ;;  %v12635_v12 = vld [vmem:[#allocation4 + $0x428] sm:$0xff]  ;;  %v5225_v51 = vld [vmem:[#allocation2 + $0x274] sm:$0xf] }
 0x2a9   : > { %v2717_v53 = vpop.f32.mrf.mxu1  ;;  %7208 = vmatpush.bf16.msra.mxu0 %v12635_v12  ;;  %v5226_v12 = vld [vmem:[#allocation2 + $0x278] sm:$0x1] }
 0x2aa   : > { %v3685_v60 = vadd.f32 %v3632_v14, %v3227_v4  ;;  %v2769_v27 = vadd.f32 %v2717_v53, %v13688_v58  ;;  %v4555_v45 = vpack.c.b16 %v4526_v33, %v4525_v59  ;;  %v5013_v4 = vpack.c.b16 %v4984_v56, %v4983_v38  ;;  %v4307_v14 = vld [vmem:[#allocation2 + $0x254] sm:$0x7] }
 0x2ab   : > { %v3916_v28 = vpop.f32.mrf.mxu0  ;;  %v4417_v59 = vrot.slane %v4415_v11, 4  ;;  %v4418_v38 = vrot.slane %v4307_v14, 7  ;;  %v11618_v56 = vrot.slane %v4763_v57, 10 }
 0x2ac   : > { %v13974_v54 = vadd.f32 %v3914_v7, %v3685_v60  ;;  %v4873_v7 = vrot.slane %v4764_v20, 6  ;;  %v5331_v60 = vrot.slane %v5222_v8, 5  ;;  %v11666_v20 = vrot.slane %v5221_v47, 9 }
 0x2ae   : > { %v4875_v49 = vrot.slane %v4873_v7, 4 }
 0x2af   : > { %v3176_v15 = vpop.f32.mrf.mxu2 }
 0x2b0   : > { %v3228_v58 = vadd.f32 %v3176_v15, %v2769_v27  ;;  %v3634_v35 = vpop.f32.mrf.mxu3  ;;  %v11570_v27 = vrot.slane %v4305_v30, 11  ;;  %v5333_v15 = vrot.slane %v5331_v60, 4 }
 0x2b1   : > { %v2720_v19 = vpop.f32.mrf.mxu1 }
 0x2b2   : > { %v3686_v53 = vadd.f32 %v3634_v35, %v3228_v58  ;;  %v2770_v39 = vadd.f32 %v2720_v19, %v13703_v25  ;;  %v12627_v25 = vld [vmem:[#allocation4 + $0x3e8] sm:$0xff]  ;;  %v5334_v58 = vrot.slane %v5223_v31, 5  ;;  %v4419_v19 = vsel %vm13334_vm8, %v4417_v59, %v4418_v38 }
 0x2b3   : > { %v3919_v52 = vpop.f32.mrf.mxu0  ;;  %6749 = vmatpush.bf16.msra.mxu3 %v12627_v25  ;;  %v4528_v31 = vunpack.c.l.b16 %v4419_v19 }
 0x2b4   : > { %4193 = vmatmul.bf16.gmra.mxu1 %v12544_v55  ;;  %4651 = vmatmul.bf16.gmra.mxu2 %v4555_v45  ;;  %v13977_v33 = vadd.f32 %v3916_v28, %v3686_v53  ;;  %v4416_v28 = vsel %vm13334_vm8, %v11570_v27, %v4415_v11  ;;  %v5335_v57 = vsel %vm13254_vm2, %v5333_v15, %v5334_v58  ;;  %v12611_v11 = vld [vmem:[#allocation4 + $0x368] sm:$0xff] }
 0x2b5   : > { %5109 = vmatmul.bf16.gmra.mxu3 %v5013_v4  ;;  %v4874_v4 = vsel %vm13330_vm7, %v11618_v56, %v4873_v7  ;;  %v4527_v47 = vunpack.c.l.b16 %v4416_v28  ;;  %5833 = vmatpush.bf16.msra.mxu1 %v12611_v11  ;;  %v5444_v56 = vunpack.c.l.b16 %v5335_v57  ;;  %v4310_v28 = vld [vmem:[#allocation2 + $0x270] sm:$0x7]  ;;  %v5338_v57 = vrot.slane %v5225_v51, 5 }
 0x2b6   : > { %5567 = vmatmul.bf16.gmra.mxu0 %v5471_v42  ;;  %v4877_v42 = vsel %vm13330_vm7, %v4875_v49, %v4876_v0  ;;  %v4985_v27 = vunpack.c.l.b16 %v4874_v4  ;;  %v4767_v49 = vld [vmem:[#allocation2 + $0x270] sm:$0xf] }
 0x2b7   : > { %v3179_v8 = vpop.f32.mrf.mxu2  ;;  %v4986_v59 = vunpack.c.l.b16 %v4877_v42  ;;  %v4556_v15 = vpack.c.b16 %v4528_v31, %v4527_v47  ;;  %v5224_v11 = vld [vmem:[#allocation2 + $0x270] sm:$0xe] }
 0x2b8   : > { %v3229_v35 = vadd.f32 %v3179_v8, %v2770_v39  ;;  %v3637_v55 = vpop.f32.mrf.mxu3  ;;  %v5332_v39 = vsel %vm13254_vm2, %v11666_v20, %v5331_v60  ;;  %v12545_v20 = vld [vmem:[#allocation2 + $0x24c] sm:$0xff] }
 0x2b9   : > { %v2722_v45 = vpop.f32.mrf.mxu1  ;;  %v5443_v38 = vunpack.c.l.b16 %v5332_v39  ;;  %v4768_v39 = vld [vmem:[#allocation2 + $0x274] sm:$0x3] }
 0x2ba   : > { %v3687_v30 = vadd.f32 %v3637_v55, %v3229_v35  ;;  %v2771_v14 = vadd.f32 %v2722_v45, %v13706_v32  ;;  %v4309_v32 = vld [vmem:[#allocation2 + $0x26c] sm:$0xf]  ;;  %v5014_v35 = vpack.c.b16 %v4986_v59, %v4985_v27  ;;  %v4308_v45 = vld [vmem:[#allocation2 + $0x268] sm:$0x8]  ;;  %v4425_v27 = vrot.slane %v4310_v28, 7 }
 0x2bb   : > { %v3921_v53 = vpop.f32.mrf.mxu0  ;;  %v4422_v58 = vrot.slane %v4309_v32, 7  ;;  %v5472_v55 = vpack.c.b16 %v5444_v56, %v5443_v38  ;;  %v4883_v56 = vrot.slane %v4768_v39, 6  ;;  %v11667_v32 = vrot.slane %v5224_v11, 9 }
 0x2bc   : > { %v13992_v7 = vadd.f32 %v3919_v52, %v3687_v30  ;;  %v4880_v52 = vrot.slane %v4767_v49, 6  ;;  %v4766_v30 = vld [vmem:[#allocation2 + $0x26c] sm:$0xc]  ;;  %v5341_v49 = vrot.slane %v5226_v12, 5 }
 0x2bd   : > { %v4424_v47 = vrot.slane %v4422_v58, 4  ;;  %v11619_v59 = vrot.slane %v4766_v30, 10  ;;  %v5339_v28 = vsel %vm13254_vm2, %v11667_v32, %v5338_v57 }
 0x2be   : > { %v4882_v38 = vrot.slane %v4880_v52, 4 }
 0x2bf   : > { %v3181_v0 = vpop.f32.mrf.mxu2 }
 0x2c0   : > { %v3230_v60 = vadd.f32 %v3181_v0, %v2771_v14  ;;  %v3639_v25 = vpop.f32.mrf.mxu3  ;;  %v11571_v14 = vrot.slane %v4308_v45, 11 }
 0x2c1   : > { %v2725_v8 = vpop.f32.mrf.mxu1 }
 0x2c2   : > { %v3688_v19 = vadd.f32 %v3639_v25, %v3230_v60  ;;  %v2772_v4 = vadd.f32 %v2725_v8, %v13721_v36  ;;  %v5340_v36 = vrot.slane %v5338_v57, 4  ;;  %v4884_v8 = vsel %vm13330_vm7, %v4882_v38, %v4883_v56  ;;  %v12546_v56 = vld [vmem:[#allocation2 + $0x268] sm:$0xff] }
 0x2c3   : > { %v3924_v42 = vpop.f32.mrf.mxu0  ;;  %v4988_v11 = vunpack.c.l.b16 %v4884_v8  ;;  %v4771_v8 = vld [vmem:[#allocation2 + $0x290] sm:$0x3] }
 0x2c4   : > { %4198 = vmatmul.bf16.gmra.mxu1 %v12545_v20  ;;  %4656 = vmatmul.bf16.gmra.mxu2 %v4556_v15  ;;  %v13995_v31 = vadd.f32 %v3921_v53, %v3688_v19  ;;  %v4423_v20 = vsel %vm13334_vm8, %v11571_v14, %v4422_v58  ;;  %v4426_v53 = vsel %vm13334_vm8, %v4424_v47, %v4425_v27  ;;  %v4312_v14 = vld [vmem:[#allocation2 + $0x288] sm:$0xf]  ;;  %v4770_v47 = vld [vmem:[#allocation2 + $0x28c] sm:$0xf] }
 0x2c5   : > { %5114 = vmatmul.bf16.gmra.mxu3 %v5014_v35  ;;  %v4881_v15 = vsel %vm13330_vm7, %v11619_v59, %v4880_v52  ;;  %v5342_v19 = vsel %vm13254_vm2, %v5340_v36, %v5341_v49  ;;  %v4529_v58 = vunpack.c.l.b16 %v4423_v20  ;;  %v5445_v52 = vunpack.c.l.b16 %v5339_v28  ;;  %v5228_v59 = vld [vmem:[#allocation2 + $0x290] sm:$0xf]  ;;  %v4311_v49 = vld [vmem:[#allocation2 + $0x284] sm:$0x8]  ;;  %v5227_v28 = vld [vmem:[#allocation2 + $0x28c] sm:$0xe] }
 0x2c6   : > { %5572 = vmatmul.bf16.gmra.mxu0 %v5472_v55  ;;  %v4987_v39 = vunpack.c.l.b16 %v4881_v15  ;;  %v5446_v12 = vunpack.c.l.b16 %v5342_v19  ;;  %v4429_v57 = vrot.slane %v4312_v14, 7  ;;  %v4769_v15 = vld [vmem:[#allocation2 + $0x288] sm:$0xc]  ;;  %v5229_v19 = vld [vmem:[#allocation2 + $0x294] sm:$0x1] }
 0x2c7   : > { %v3184_v0 = vpop.f32.mrf.mxu2  ;;  %v12618_v14 = vld [vmem:[#allocation4 + $0x3a0] sm:$0xff] }
 0x2c8   : > { %v3231_v60 = vadd.f32 %v3184_v0, %v2772_v4  ;;  %v3642_v51 = vpop.f32.mrf.mxu3  ;;  %v4530_v4 = vunpack.c.l.b16 %v4426_v53  ;;  %v5473_v36 = vpack.c.b16 %v5446_v12, %v5445_v52  ;;  %v4890_v12 = vrot.slane %v4771_v8, 6  ;;  %6292 = vmatpush.bf16.msra.mxu2 %v12618_v14  ;;  %v12634_v8 = vld [vmem:[#allocation4 + $0x420] sm:$0xff]  ;;  %v5231_v14 = vld [vmem:[#allocation2 + $0x2ac] sm:$0xf] }
 0x2c9   : > { %v2727_v25 = vpop.f32.mrf.mxu1  ;;  %7209 = vmatpush.bf16.msra.mxu0 %v12634_v8  ;;  %v5232_v8 = vld [vmem:[#allocation2 + $0x2b0] sm:$0x1] }
 0x2ca   : > { %v3689_v35 = vadd.f32 %v3642_v51, %v3231_v60  ;;  %v2773_v55 = vadd.f32 %v2727_v25, %v13724_v29  ;;  %v4557_v0 = vpack.c.b16 %v4530_v4, %v4529_v58  ;;  %v5015_v60 = vpack.c.b16 %v4988_v11, %v4987_v39  ;;  %v4313_v51 = vld [vmem:[#allocation2 + $0x28c] sm:$0x7] }
 0x2cb   : > { %v3926_v45 = vpop.f32.mrf.mxu0  ;;  %v4431_v58 = vrot.slane %v4429_v57, 4  ;;  %v4432_v39 = vrot.slane %v4313_v51, 7  ;;  %v11620_v11 = vrot.slane %v4769_v15, 10 }
 0x2cc   : > { %v14010_v30 = vadd.f32 %v3924_v42, %v3689_v35  ;;  %v4887_v42 = vrot.slane %v4770_v47, 6  ;;  %v5345_v35 = vrot.slane %v5228_v59, 5  ;;  %v11668_v47 = vrot.slane %v5227_v28, 9 }
 0x2ce   : > { %v4889_v52 = vrot.slane %v4887_v42, 4 }
 0x2cf   : > { %v3186_v27 = vpop.f32.mrf.mxu2 }
 0x2d0   : > { %v3232_v29 = vadd.f32 %v3186_v27, %v2773_v55  ;;  %v3644_v38 = vpop.f32.mrf.mxu3  ;;  %v11572_v55 = vrot.slane %v4311_v49, 11  ;;  %v5347_v27 = vrot.slane %v5345_v35, 4 }
 0x2d1   : > { %v2730_v32 = vpop.f32.mrf.mxu1 }
 0x2d2   : > { %v3690_v25 = vadd.f32 %v3644_v38, %v3232_v29  ;;  %v2774_v20 = vadd.f32 %v2730_v32, %v13739_v41  ;;  %v12626_v41 = vld [vmem:[#allocation4 + $0x3e0] sm:$0xff]  ;;  %v5348_v29 = vrot.slane %v5229_v19, 5  ;;  %v4433_v32 = vsel %vm13334_vm8, %v4431_v58, %v4432_v39 }
 0x2d3   : > { %v3929_v53 = vpop.f32.mrf.mxu0  ;;  %6750 = vmatpush.bf16.msra.mxu3 %v12626_v41  ;;  %v4532_v19 = vunpack.c.l.b16 %v4433_v32 }
 0x2d4   : > { %4203 = vmatmul.bf16.gmra.mxu1 %v12546_v56  ;;  %4661 = vmatmul.bf16.gmra.mxu2 %v4557_v0  ;;  %v14013_v4 = vadd.f32 %v3926_v45, %v3690_v25  ;;  %v4430_v45 = vsel %vm13334_vm8, %v11572_v55, %v4429_v57  ;;  %v5349_v15 = vsel %vm13254_vm2, %v5347_v27, %v5348_v29  ;;  %v12610_v57 = vld [vmem:[#allocation4 + $0x360] sm:$0xff] }
 0x2d5   : > { %5119 = vmatmul.bf16.gmra.mxu3 %v5015_v60  ;;  %v4888_v60 = vsel %vm13330_vm7, %v11620_v11, %v4887_v42  ;;  %v4531_v28 = vunpack.c.l.b16 %v4430_v45  ;;  %5834 = vmatpush.bf16.msra.mxu1 %v12610_v57  ;;  %v5448_v11 = vunpack.c.l.b16 %v5349_v15  ;;  %v4316_v45 = vld [vmem:[#allocation2 + $0x2a8] sm:$0x7]  ;;  %v5352_v15 = vrot.slane %v5231_v14, 5 }
 0x2d6   : > { %5577 = vmatmul.bf16.gmra.mxu0 %v5473_v36  ;;  %v4891_v36 = vsel %vm13330_vm7, %v4889_v52, %v4890_v12  ;;  %v4989_v55 = vunpack.c.l.b16 %v4888_v60  ;;  %v4773_v52 = vld [vmem:[#allocation2 + $0x2a8] sm:$0xf] }
 0x2d7   : > { %v3189_v59 = vpop.f32.mrf.mxu2  ;;  %v4990_v58 = vunpack.c.l.b16 %v4891_v36  ;;  %v4558_v27 = vpack.c.b16 %v4532_v19, %v4531_v28  ;;  %v5230_v57 = vld [vmem:[#allocation2 + $0x2a8] sm:$0xe] }
 0x2d8   : > { %v3233_v38 = vadd.f32 %v3189_v59, %v2774_v20  ;;  %v3647_v56 = vpop.f32.mrf.mxu3  ;;  %v5346_v20 = vsel %vm13254_vm2, %v11668_v47, %v5345_v35  ;;  %v12547_v47 = vld [vmem:[#allocation2 + $0x284] sm:$0xff] }
 0x2d9   : > { %v2732_v0 = vpop.f32.mrf.mxu1  ;;  %v5447_v39 = vunpack.c.l.b16 %v5346_v20  ;;  %v4774_v20 = vld [vmem:[#allocation2 + $0x2ac] sm:$0x3] }
 0x2da   : > { %v3691_v49 = vadd.f32 %v3647_v56, %v3233_v38  ;;  %v2775_v51 = vadd.f32 %v2732_v0, %v13742_v50  ;;  %v4315_v50 = vld [vmem:[#allocation2 + $0x2a4] sm:$0xf]  ;;  %v5016_v38 = vpack.c.b16 %v4990_v58, %v4989_v55  ;;  %v4314_v0 = vld [vmem:[#allocation2 + $0x2a0] sm:$0x8]  ;;  %v4439_v55 = vrot.slane %v4316_v45, 7 }
 0x2db   : > { %v3931_v25 = vpop.f32.mrf.mxu0  ;;  %v4436_v29 = vrot.slane %v4315_v50, 7  ;;  %v5474_v56 = vpack.c.b16 %v5448_v11, %v5447_v39  ;;  %v4897_v11 = vrot.slane %v4774_v20, 6  ;;  %v11669_v50 = vrot.slane %v5230_v57, 9 }
 0x2dc   : > { %v14028_v42 = vadd.f32 %v3929_v53, %v3691_v49  ;;  %v4894_v53 = vrot.slane %v4773_v52, 6  ;;  %v4772_v49 = vld [vmem:[#allocation2 + $0x2a4] sm:$0xc]  ;;  %v5355_v52 = vrot.slane %v5232_v8, 5 }
 0x2dd   : > { %v4438_v28 = vrot.slane %v4436_v29, 4  ;;  %v11621_v58 = vrot.slane %v4772_v49, 10  ;;  %v5353_v45 = vsel %vm13254_vm2, %v11669_v50, %v5352_v15 }
 0x2de   : > { %v4896_v39 = vrot.slane %v4894_v53, 4 }
 0x2df   : > { %v3191_v12 = vpop.f32.mrf.mxu2 }
 0x2e0   : > { %v3234_v35 = vadd.f32 %v3191_v12, %v2775_v51  ;;  %v3649_v41 = vpop.f32.mrf.mxu3  ;;  %v11573_v51 = vrot.slane %v4314_v0, 11 }
 0x2e1   : > { %v2735_v59 = vpop.f32.mrf.mxu1 }
 0x2e2   : > { %v3692_v32 = vadd.f32 %v3649_v41, %v3234_v35  ;;  %v2776_v60 = vadd.f32 %v2735_v59, %v13757_v44  ;;  %v5354_v44 = vrot.slane %v5352_v15, 4  ;;  %v4898_v59 = vsel %vm13330_vm7, %v4896_v39, %v4897_v11  ;;  %v12548_v11 = vld [vmem:[#allocation2 + $0x2a0] sm:$0xff] }
 0x2e3   : > { %v3934_v36 = vpop.f32.mrf.mxu0  ;;  %v4992_v57 = vunpack.c.l.b16 %v4898_v59  ;;  %v4777_v59 = vld [vmem:[#allocation2 + $0x2c8] sm:$0x3] }
 0x2e4   : > { %4208 = vmatmul.bf16.gmra.mxu1 %v12547_v47  ;;  %4666 = vmatmul.bf16.gmra.mxu2 %v4558_v27  ;;  %v14031_v19 = vadd.f32 %v3931_v25, %v3692_v32  ;;  %v4437_v47 = vsel %vm13334_vm8, %v11573_v51, %v4436_v29  ;;  %v4440_v25 = vsel %vm13334_vm8, %v4438_v28, %v4439_v55  ;;  %v4318_v51 = vld [vmem:[#allocation2 + $0x2c0] sm:$0xf]  ;;  %v4776_v28 = vld [vmem:[#allocation2 + $0x2c4] sm:$0xf] }
 0x2e5   : > { %5124 = vmatmul.bf16.gmra.mxu3 %v5016_v38  ;;  %v4895_v27 = vsel %vm13330_vm7, %v11621_v58, %v4894_v53  ;;  %v5356_v32 = vsel %vm13254_vm2, %v5354_v44, %v5355_v52  ;;  %v4533_v29 = vunpack.c.l.b16 %v4437_v47  ;;  %v5449_v53 = vunpack.c.l.b16 %v5353_v45  ;;  %v5234_v58 = vld [vmem:[#allocation2 + $0x2c8] sm:$0xf]  ;;  %v4317_v52 = vld [vmem:[#allocation2 + $0x2bc] sm:$0x8]  ;;  %v5233_v45 = vld [vmem:[#allocation2 + $0x2c4] sm:$0xe] }
 0x2e6   : > { %5582 = vmatmul.bf16.gmra.mxu0 %v5474_v56  ;;  %v4991_v20 = vunpack.c.l.b16 %v4895_v27  ;;  %v5450_v8 = vunpack.c.l.b16 %v5356_v32  ;;  %v4443_v15 = vrot.slane %v4318_v51, 7  ;;  %v4775_v27 = vld [vmem:[#allocation2 + $0x2c0] sm:$0xc]  ;;  %v5235_v32 = vld [vmem:[#allocation2 + $0x2cc] sm:$0x1] }
 0x2e7   : > { %v3194_v12 = vpop.f32.mrf.mxu2  ;;  %v12617_v51 = vld [vmem:[#allocation4 + $0x398] sm:$0xff] }
 0x2e8   : > { %v3235_v35 = vadd.f32 %v3194_v12, %v2776_v60  ;;  %v3652_v14 = vpop.f32.mrf.mxu3  ;;  %v4534_v60 = vunpack.c.l.b16 %v4440_v25  ;;  %v5475_v44 = vpack.c.b16 %v5450_v8, %v5449_v53  ;;  %v4904_v8 = vrot.slane %v4777_v59, 6  ;;  %6293 = vmatpush.bf16.msra.mxu2 %v12617_v51  ;;  %v12633_v59 = vld [vmem:[#allocation4 + $0x418] sm:$0xff]  ;;  %v5237_v51 = vld [vmem:[#allocation2 + $0x2e4] sm:$0xf] }
 0x2e9   : > { %v2737_v41 = vpop.f32.mrf.mxu1  ;;  %7210 = vmatpush.bf16.msra.mxu0 %v12633_v59  ;;  %v5236_v59 = vld [vmem:[#allocation2 + $0x2e0] sm:$0xe] }
 0x2ea   : > { %v3693_v38 = vadd.f32 %v3652_v14, %v3235_v35  ;;  %v2777_v56 = vadd.f32 %v2737_v41, %v13760_v13  ;;  %v4559_v12 = vpack.c.b16 %v4534_v60, %v4533_v29  ;;  %v5017_v35 = vpack.c.b16 %v4992_v57, %v4991_v20  ;;  %v4319_v14 = vld [vmem:[#allocation2 + $0x2c4] sm:$0x7] }
 0x2eb   : > { %v3936_v0 = vpop.f32.mrf.mxu0  ;;  %v4445_v29 = vrot.slane %v4443_v15, 4  ;;  %v4446_v20 = vrot.slane %v4319_v14, 7  ;;  %v11622_v57 = vrot.slane %v4775_v27, 10 }
 0x2ec   : > { %v14046_v49 = vadd.f32 %v3934_v36, %v3693_v38  ;;  %v4901_v36 = vrot.slane %v4776_v28, 6  ;;  %v5359_v38 = vrot.slane %v5234_v58, 5  ;;  %v11670_v28 = vrot.slane %v5233_v45, 9 }
 0x2ee   : > { %v4903_v53 = vrot.slane %v4901_v36, 4 }
 0x2ef   : > { %v3196_v55 = vpop.f32.mrf.mxu2 }
 0x2f0   : > { %v3236_v13 = vadd.f32 %v3196_v55, %v2777_v56  ;;  %v3654_v39 = vpop.f32.mrf.mxu3  ;;  %v11574_v56 = vrot.slane %v4317_v52, 11  ;;  %v5361_v55 = vrot.slane %v5359_v38, 4 }
 0x2f1   : > { %v2740_v50 = vpop.f32.mrf.mxu1 }
 0x2f2   : > { %v3694_v41 = vadd.f32 %v3654_v39, %v3236_v13  ;;  %v2778_v47 = vadd.f32 %v2740_v50, %v13775_v23  ;;  %v12625_v23 = vld [vmem:[#allocation4 + $0x3d8] sm:$0xff]  ;;  %v5362_v13 = vrot.slane %v5235_v32, 5  ;;  %v4447_v50 = vsel %vm13334_vm8, %v4445_v29, %v4446_v20 }
 0x2f3   : > { %v3939_v25 = vpop.f32.mrf.mxu0  ;;  %6751 = vmatpush.bf16.msra.mxu3 %v12625_v23  ;;  %v4536_v32 = vunpack.c.l.b16 %v4447_v50 }
 0x2f4   : > { %4213 = vmatmul.bf16.gmra.mxu1 %v12548_v11  ;;  %4671 = vmatmul.bf16.gmra.mxu2 %v4559_v12  ;;  %v14049_v60 = vadd.f32 %v3936_v0, %v3694_v41  ;;  %v4444_v0 = vsel %vm13334_vm8, %v11574_v56, %v4443_v15  ;;  %v5363_v27 = vsel %vm13254_vm2, %v5361_v55, %v5362_v13  ;;  %v12609_v15 = vld [vmem:[#allocation4 + $0x358] sm:$0xff] }
 0x2f5   : > { %5129 = vmatmul.bf16.gmra.mxu3 %v5017_v35  ;;  %v4902_v35 = vsel %vm13330_vm7, %v11622_v57, %v4901_v36  ;;  %v4535_v45 = vunpack.c.l.b16 %v4444_v0  ;;  %5835 = vmatpush.bf16.msra.mxu1 %v12609_v15  ;;  %v5452_v57 = vunpack.c.l.b16 %v5363_v27  ;;  %v4322_v0 = vld [vmem:[#allocation2 + $0x2e0] sm:$0x7]  ;;  %v4780_v27 = vld [vmem:[#allocation2 + $0x2e4] sm:$0x3]  ;;  %v5366_v15 = vrot.slane %v5237_v51, 5 }
 0x2f6   : > { %5587 = vmatmul.bf16.gmra.mxu0 %v5475_v44  ;;  %v4905_v44 = vsel %vm13330_vm7, %v4903_v53, %v4904_v8  ;;  %v4993_v56 = vunpack.c.l.b16 %v4902_v35  ;;  %v4779_v53 = vld [vmem:[#allocation2 + $0x2e0] sm:$0xf] }
 0x2f7   : > { %v3199_v58 = vpop.f32.mrf.mxu2  ;;  %v4994_v29 = vunpack.c.l.b16 %v4905_v44  ;;  %v4560_v55 = vpack.c.b16 %v4536_v32, %v4535_v45  ;;  %v15181_v35 = vld [vmem:[#allocation19_spill] sm:$0xff] }
 0x2f8   : > { %v3237_v39 = vadd.f32 %v3199_v58, %v2778_v47  ;;  %v3657_v11 = vpop.f32.mrf.mxu3  ;;  %v5360_v47 = vsel %vm13254_vm2, %v11670_v28, %v5359_v38  ;;  %v12549_v28 = vld [vmem:[#allocation2 + $0x2bc] sm:$0xff] }
 0x2f9   : > { %v2742_v12 = vpop.f32.mrf.mxu1  ;;  %v5451_v20 = vunpack.c.l.b16 %v5360_v47  ;;  %v4778_v47 = vld [vmem:[#allocation2 + $0x2dc] sm:$0xc] }
 0x2fa   : > { %v3695_v52 = vadd.f32 %v3657_v11, %v3237_v39  ;;  %v2779_v14 = vadd.f32 %v2742_v12, %v13778_v34  ;;  %v4321_v34 = vld [vmem:[#allocation2 + $0x2dc] sm:$0xf]  ;;  %v5018_v39 = vpack.c.b16 %v4994_v29, %v4993_v56  ;;  %v4320_v12 = vld [vmem:[#allocation2 + $0x2d8] sm:$0x8]  ;;  %v4453_v56 = vrot.slane %v4322_v0, 7 }
 0x2fb   : > { %v3941_v41 = vpop.f32.mrf.mxu0  ;;  %v4450_v13 = vrot.slane %v4321_v34, 7  ;;  %v5476_v11 = vpack.c.b16 %v5452_v57, %v5451_v20  ;;  %v11623_v29 = vrot.slane %v4778_v47, 10  ;;  %v4911_v57 = vrot.slane %v4780_v27, 6 }
 0x2fc   : > { %v14064_v36 = vadd.f32 %v3939_v25, %v3695_v52  ;;  %v4908_v25 = vrot.slane %v4779_v53, 6  ;;  %v11671_v34 = vrot.slane %v5236_v59, 9  ;;  %v5368_v53 = vrot.slane %v5366_v15, 4 }
 0x2fd   : > { %v4452_v45 = vrot.slane %v4450_v13, 4 }
 0x2fe   : > { %15180 = vst [vmem:[#allocation18_spill] sm:$0xff] %v14064_v36  ;;  %v5238_v36 = vld [vmem:[#allocation2 + $0x2e8] sm:$0x1]  ;;  %v4910_v20 = vrot.slane %v4908_v25, 4  ;;  %v5367_v0 = vsel %vm13254_vm2, %v11671_v34, %v5366_v15 }
 0x2ff   : > { %v3201_v8 = vpop.f32.mrf.mxu2 }
 0x300   : > { %v3238_v38 = vadd.f32 %v3201_v8, %v2779_v14  ;;  %v3659_v23 = vpop.f32.mrf.mxu3  ;;  %v11575_v14 = vrot.slane %v4320_v12, 11  ;;  %v5369_v8 = vrot.slane %v5238_v36, 5 }
 0x301   : > { %v2745_v58 = vpop.f32.mrf.mxu1 }
 0x302   : > { %v3696_v50 = vadd.f32 %v3659_v23, %v3238_v38  ;;  %v2780_v44 = vadd.f32 %v2745_v58, %v15181_v35 }
 0x303   : > { %v3944_v52 = vpop.f32.mrf.mxu0 }
 0x304   : > { %4218 = vmatmul.bf16.gmra.mxu1 %v12549_v28  ;;  %4676 = vmatmul.bf16.gmra.mxu2 %v4560_v55  ;;  %v14067_v32 = vadd.f32 %v3941_v41, %v3696_v50  ;;  %v4451_v28 = vsel %vm13334_vm8, %v11575_v14, %v4450_v13  ;;  %v4454_v41 = vsel %vm13334_vm8, %v4452_v45, %v4453_v56  ;;  %v4324_v14 = vld [vmem:[#allocation2 + $0x2f8] sm:$0xf]  ;;  %v4782_v45 = vld [vmem:[#allocation2 + $0x2fc] sm:$0xf] }
 0x305   : > { %5134 = vmatmul.bf16.gmra.mxu3 %v5018_v39  ;;  %v4909_v55 = vsel %vm13330_vm7, %v11623_v29, %v4908_v25  ;;  %v4912_v39 = vsel %vm13330_vm7, %v4910_v20, %v4911_v57  ;;  %v5370_v50 = vsel %vm13254_vm2, %v5368_v53, %v5369_v8  ;;  %v4537_v13 = vunpack.c.l.b16 %v4451_v28  ;;  %v5240_v29 = vld [vmem:[#allocation2 + $0x300] sm:$0xf]  ;;  %v12550_v57 = vld [vmem:[#allocation2 + $0x2d8] sm:$0xff]  ;;  %v4323_v8 = vld [vmem:[#allocation2 + $0x2f4] sm:$0x8] }
 0x306   : > { %5592 = vmatmul.bf16.gmra.mxu0 %v5476_v11  ;;  %v4538_v35 = vunpack.c.l.b16 %v4454_v41  ;;  %v4995_v47 = vunpack.c.l.b16 %v4909_v55  ;;  %v4996_v27 = vunpack.c.l.b16 %v4912_v39  ;;  %v5453_v25 = vunpack.c.l.b16 %v5367_v0  ;;  %v4781_v55 = vld [vmem:[#allocation2 + $0x2f8] sm:$0xc]  ;;  %v4783_v39 = vld [vmem:[#allocation2 + $0x300] sm:$0x3]  ;;  %v5239_v0 = vld [vmem:[#allocation2 + $0x2fc] sm:$0xe] }
 0x307   : > { %v3204_v38 = vpop.f32.mrf.mxu2  ;;  %v5454_v59 = vunpack.c.l.b16 %v5370_v50  ;;  %v4457_v15 = vrot.slane %v4324_v14, 7  ;;  %v5241_v50 = vld [vmem:[#allocation2 + $0x304] sm:$0x1] }
 0x308   : > { %v3239_v23 = vadd.f32 %v3204_v38, %v2780_v44  ;;  %v3662_v51 = vpop.f32.mrf.mxu3  ;;  %v4561_v38 = vpack.c.b16 %v4538_v35, %v4537_v13  ;;  %v12616_v14 = vld [vmem:[#allocation4 + $0x390] sm:$0xff] }
 0x309   : > { %v2747_v58 = vpop.f32.mrf.mxu1  ;;  %v5477_v53 = vpack.c.b16 %v5454_v59, %v5453_v25  ;;  %v4459_v13 = vrot.slane %v4457_v15, 4  ;;  %v4918_v59 = vrot.slane %v4783_v39, 6  ;;  %6294 = vmatpush.bf16.msra.mxu2 %v12616_v14  ;;  %v12632_v39 = vld [vmem:[#allocation4 + $0x410] sm:$0xff]  ;;  %v5243_v14 = vld [vmem:[#allocation2 + $0x31c] sm:$0xf] }
 0x30a   : > { %v3697_v11 = vadd.f32 %v3662_v51, %v3239_v23  ;;  %v2781_v12 = vadd.f32 %v2747_v58, %v13797_v10  ;;  %v5019_v23 = vpack.c.b16 %v4996_v27, %v4995_v47  ;;  %v4325_v51 = vld [vmem:[#allocation2 + $0x2fc] sm:$0x7]  ;;  %v11624_v27 = vrot.slane %v4781_v55, 10  ;;  %7211 = vmatpush.bf16.msra.mxu0 %v12632_v39  ;;  %v5244_v39 = vld [vmem:[#allocation2 + $0x320] sm:$0x1] }
 0x30b   : > { %v3946_v36 = vpop.f32.mrf.mxu0  ;;  %v4460_v47 = vrot.slane %v4325_v51, 7 }
 0x30c   : > { %v14082_v44 = vadd.f32 %v3944_v52, %v3697_v11  ;;  %v4915_v52 = vrot.slane %v4782_v45, 6  ;;  %v5373_v11 = vrot.slane %v5240_v29, 5  ;;  %v11672_v45 = vrot.slane %v5239_v0, 9 }
 0x30e   : > { %v4917_v25 = vrot.slane %v4915_v52, 4 }
 0x30f   : > { %v3206_v56 = vpop.f32.mrf.mxu2 }
 0x310   : > { %v3240_v10 = vadd.f32 %v3206_v56, %v2781_v12  ;;  %v3664_v20 = vpop.f32.mrf.mxu3  ;;  %v11576_v12 = vrot.slane %v4323_v8, 11  ;;  %v5375_v56 = vrot.slane %v5373_v11, 4 }
 0x311   : > { %v4184_v34 = vpop.f32.mrf.mxu1 }
 0x312   : > { %v3698_v58 = vadd.f32 %v3664_v20, %v3240_v10  ;;  %v4264_v28 = vadd.f32 %v4184_v34, %v13812_v24  ;;  %v12624_v24 = vld [vmem:[#allocation4 + $0x3d0] sm:$0xff]  ;;  %v5376_v10 = vrot.slane %v5241_v50, 5  ;;  %v4461_v34 = vsel %vm13334_vm8, %v4459_v13, %v4460_v47 }
 0x313   : > { %v5558_v41 = vpop.f32.mrf.mxu0  ;;  %6752 = vmatpush.bf16.msra.mxu3 %v12624_v24  ;;  %v4540_v50 = vunpack.c.l.b16 %v4461_v34 }
 0x314   : > { %4223 = vmatmul.bf16.gmra.mxu1 %v12550_v57  ;;  %4681 = vmatmul.bf16.gmra.mxu2 %v4561_v38  ;;  %v14085_v35 = vadd.f32 %v3946_v36, %v3698_v58  ;;  %v4458_v36 = vsel %vm13334_vm8, %v11576_v12, %v4457_v15  ;;  %v5377_v55 = vsel %vm13254_vm2, %v5375_v56, %v5376_v10  ;;  %v12608_v15 = vld [vmem:[#allocation4 + $0x350] sm:$0xff] }
 0x315   : > { %5139 = vmatmul.bf16.gmra.mxu3 %v5019_v23  ;;  %v4916_v23 = vsel %vm13330_vm7, %v11624_v27, %v4915_v52  ;;  %v4539_v0 = vunpack.c.l.b16 %v4458_v36  ;;  %5836 = vmatpush.bf16.msra.mxu1 %v12608_v15  ;;  %v5456_v27 = vunpack.c.l.b16 %v5377_v55  ;;  %v4328_v36 = vld [vmem:[#allocation2 + $0x318] sm:$0x7]  ;;  %v5380_v55 = vrot.slane %v5243_v14, 5 }
 0x316   : > { %5597 = vmatmul.bf16.gmra.mxu0 %v5477_v53  ;;  %v4919_v53 = vsel %vm13330_vm7, %v4917_v25, %v4918_v59  ;;  %v4997_v12 = vunpack.c.l.b16 %v4916_v23  ;;  %v4785_v25 = vld [vmem:[#allocation2 + $0x318] sm:$0xf] }
 0x317   : > { %v4642_v29 = vpop.f32.mrf.mxu2  ;;  %v4998_v13 = vunpack.c.l.b16 %v4919_v53  ;;  %v4562_v56 = vpack.c.b16 %v4540_v50, %v4539_v0  ;;  %v5242_v15 = vld [vmem:[#allocation2 + $0x318] sm:$0xe] }
 0x318   : > { %v4722_v20 = vadd.f32 %v4642_v29, %v4264_v28  ;;  %v5100_v57 = vpop.f32.mrf.mxu3  ;;  %v5374_v28 = vsel %vm13254_vm2, %v11672_v45, %v5373_v11  ;;  %v12551_v45 = vld [vmem:[#allocation2 + $0x2f4] sm:$0xff] }
 0x319   : > { %v4186_v38 = vpop.f32.mrf.mxu1  ;;  %v5455_v47 = vunpack.c.l.b16 %v5374_v28  ;;  %v4786_v28 = vld [vmem:[#allocation2 + $0x31c] sm:$0x3] }
 0x31a   : > { %v5180_v8 = vadd.f32 %v5100_v57, %v4722_v20  ;;  %v4265_v51 = vadd.f32 %v4186_v38, %v13815_v5  ;;  %v4327_v5 = vld [vmem:[#allocation2 + $0x314] sm:$0xf]  ;;  %v5020_v20 = vpack.c.b16 %v4998_v13, %v4997_v12  ;;  %v4326_v38 = vld [vmem:[#allocation2 + $0x310] sm:$0x8]  ;;  %v4467_v12 = vrot.slane %v4328_v36, 7 }
 0x31b   : > { %v5560_v58 = vpop.f32.mrf.mxu0  ;;  %v4464_v10 = vrot.slane %v4327_v5, 7  ;;  %v5478_v57 = vpack.c.b16 %v5456_v27, %v5455_v47  ;;  %v4925_v27 = vrot.slane %v4786_v28, 6  ;;  %v11673_v5 = vrot.slane %v5242_v15, 9 }
 0x31c   : > { %v14100_v52 = vadd.f32 %v5558_v41, %v5180_v8  ;;  %v4922_v41 = vrot.slane %v4785_v25, 6  ;;  %v4784_v8 = vld [vmem:[#allocation2 + $0x314] sm:$0xc]  ;;  %v5383_v25 = vrot.slane %v5244_v39, 5 }
 0x31d   : > { %v4466_v0 = vrot.slane %v4464_v10, 4  ;;  %v11625_v13 = vrot.slane %v4784_v8, 10  ;;  %v5381_v36 = vsel %vm13254_vm2, %v11673_v5, %v5380_v55 }
 0x31e   : > { %v4924_v47 = vrot.slane %v4922_v41, 4 }
 0x31f   : > { %v4644_v59 = vpop.f32.mrf.mxu2 }
 0x320   : > { %v4723_v11 = vadd.f32 %v4644_v59, %v4265_v51  ;;  %v5102_v24 = vpop.f32.mrf.mxu3  ;;  %v11577_v51 = vrot.slane %v4326_v38, 11 }
 0x321   : > { %v4189_v29 = vpop.f32.mrf.mxu1 }
 0x322   : > { %v5181_v34 = vadd.f32 %v5102_v24, %v4723_v11  ;;  %v4266_v23 = vadd.f32 %v4189_v29, %v13830_v48  ;;  %v5382_v48 = vrot.slane %v5380_v55, 4  ;;  %v4926_v29 = vsel %vm13330_vm7, %v4924_v47, %v4925_v27  ;;  %v12552_v27 = vld [vmem:[#allocation2 + $0x310] sm:$0xff] }
 0x323   : > { %v5563_v53 = vpop.f32.mrf.mxu0  ;;  %v5000_v15 = vunpack.c.l.b16 %v4926_v29  ;;  %v4789_v29 = vld [vmem:[#allocation2 + $0x338] sm:$0x3] }
 0x324   : > { %4228 = vmatmul.bf16.gmra.mxu1 %v12551_v45  ;;  %4686 = vmatmul.bf16.gmra.mxu2 %v4562_v56  ;;  %v14103_v50 = vadd.f32 %v5560_v58, %v5181_v34  ;;  %v4465_v45 = vsel %vm13334_vm8, %v11577_v51, %v4464_v10  ;;  %v4468_v58 = vsel %vm13334_vm8, %v4466_v0, %v4467_v12  ;;  %v4330_v51 = vld [vmem:[#allocation2 + $0x330] sm:$0xf]  ;;  %v4788_v0 = vld [vmem:[#allocation2 + $0x334] sm:$0xf] }
 0x325   : > { %5144 = vmatmul.bf16.gmra.mxu3 %v5020_v20  ;;  %v4923_v56 = vsel %vm13330_vm7, %v11625_v13, %v4922_v41  ;;  %v5384_v34 = vsel %vm13254_vm2, %v5382_v48, %v5383_v25  ;;  %v4541_v10 = vunpack.c.l.b16 %v4465_v45  ;;  %v5457_v41 = vunpack.c.l.b16 %v5381_v36  ;;  %v5246_v13 = vld [vmem:[#allocation2 + $0x338] sm:$0xf]  ;;  %v4329_v25 = vld [vmem:[#allocation2 + $0x32c] sm:$0x8]  ;;  %v5245_v36 = vld [vmem:[#allocation2 + $0x334] sm:$0xe] }
 0x326   : > { %5602 = vmatmul.bf16.gmra.mxu0 %v5478_v57  ;;  %v4999_v28 = vunpack.c.l.b16 %v4923_v56  ;;  %v5458_v39 = vunpack.c.l.b16 %v5384_v34  ;;  %v4471_v55 = vrot.slane %v4330_v51, 7  ;;  %v4787_v56 = vld [vmem:[#allocation2 + $0x330] sm:$0xc]  ;;  %v5247_v34 = vld [vmem:[#allocation2 + $0x33c] sm:$0x1] }
 0x327   : > { %v4647_v59 = vpop.f32.mrf.mxu2  ;;  %v12615_v51 = vld [vmem:[#allocation4 + $0x388] sm:$0xff] }
 0x328   : > { %v4724_v11 = vadd.f32 %v4647_v59, %v4266_v23  ;;  %v5105_v14 = vpop.f32.mrf.mxu3  ;;  %v4542_v23 = vunpack.c.l.b16 %v4468_v58  ;;  %v5479_v48 = vpack.c.b16 %v5458_v39, %v5457_v41  ;;  %v4932_v39 = vrot.slane %v4789_v29, 6  ;;  %6295 = vmatpush.bf16.msra.mxu2 %v12615_v51  ;;  %v12631_v29 = vld [vmem:[#allocation4 + $0x408] sm:$0xff]  ;;  %v5249_v51 = vld [vmem:[#allocation2 + $0x354] sm:$0xf] }
 0x329   : > { %v4191_v24 = vpop.f32.mrf.mxu1  ;;  %7212 = vmatpush.bf16.msra.mxu0 %v12631_v29  ;;  %v5250_v29 = vld [vmem:[#allocation2 + $0x358] sm:$0x1] }
 0x32a   : > { %v5182_v20 = vadd.f32 %v5105_v14, %v4724_v11  ;;  %v4267_v57 = vadd.f32 %v4191_v24, %v13833_v37  ;;  %v4563_v59 = vpack.c.b16 %v4542_v23, %v4541_v10  ;;  %v5021_v11 = vpack.c.b16 %v5000_v15, %v4999_v28  ;;  %v4331_v14 = vld [vmem:[#allocation2 + $0x334] sm:$0x7] }
 0x32b   : > { %v5565_v38 = vpop.f32.mrf.mxu0  ;;  %v4473_v10 = vrot.slane %v4471_v55, 4  ;;  %v4474_v28 = vrot.slane %v4331_v14, 7  ;;  %v11626_v15 = vrot.slane %v4787_v56, 10 }
 0x32c   : > { %v14118_v8 = vadd.f32 %v5563_v53, %v5182_v20  ;;  %v4929_v53 = vrot.slane %v4788_v0, 6  ;;  %v5387_v20 = vrot.slane %v5246_v13, 5  ;;  %v11674_v0 = vrot.slane %v5245_v36, 9 }
 0x32e   : > { %v4931_v41 = vrot.slane %v4929_v53, 4 }
 0x32f   : > { %v4649_v12 = vpop.f32.mrf.mxu2 }
 0x330   : > { %v4725_v37 = vadd.f32 %v4649_v12, %v4267_v57  ;;  %v5107_v47 = vpop.f32.mrf.mxu3  ;;  %v11578_v57 = vrot.slane %v4329_v25, 11  ;;  %v5389_v12 = vrot.slane %v5387_v20, 4 }
 0x331   : > { %v4194_v5 = vpop.f32.mrf.mxu1 }
 0x332   : > { %v5183_v24 = vadd.f32 %v5107_v47, %v4725_v37  ;;  %v4268_v45 = vadd.f32 %v4194_v5, %v13848_v40  ;;  %v12623_v40 = vld [vmem:[#allocation4 + $0x3c8] sm:$0xff]  ;;  %v5390_v37 = vrot.slane %v5247_v34, 5  ;;  %v4475_v5 = vsel %vm13334_vm8, %v4473_v10, %v4474_v28 }
 0x333   : > { %v5568_v58 = vpop.f32.mrf.mxu0  ;;  %6753 = vmatpush.bf16.msra.mxu3 %v12623_v40  ;;  %v4544_v34 = vunpack.c.l.b16 %v4475_v5 }
 0x334   : > { %4233 = vmatmul.bf16.gmra.mxu1 %v12552_v27  ;;  %4691 = vmatmul.bf16.gmra.mxu2 %v4563_v59  ;;  %v14121_v23 = vadd.f32 %v5565_v38, %v5183_v24  ;;  %v4472_v38 = vsel %vm13334_vm8, %v11578_v57, %v4471_v55  ;;  %v5391_v56 = vsel %vm13254_vm2, %v5389_v12, %v5390_v37  ;;  %v12607_v55 = vld [vmem:[#allocation4 + $0x348] sm:$0xff] }
 0x335   : > { %5149 = vmatmul.bf16.gmra.mxu3 %v5021_v11  ;;  %v4930_v11 = vsel %vm13330_vm7, %v11626_v15, %v4929_v53  ;;  %v4543_v36 = vunpack.c.l.b16 %v4472_v38  ;;  %5837 = vmatpush.bf16.msra.mxu1 %v12607_v55  ;;  %v5460_v15 = vunpack.c.l.b16 %v5391_v56  ;;  %v4334_v38 = vld [vmem:[#allocation2 + $0x350] sm:$0x7]  ;;  %v5394_v56 = vrot.slane %v5249_v51, 5 }
 0x336   : > { %5607 = vmatmul.bf16.gmra.mxu0 %v5479_v48  ;;  %v4933_v48 = vsel %vm13330_vm7, %v4931_v41, %v4932_v39  ;;  %v5001_v57 = vunpack.c.l.b16 %v4930_v11  ;;  %v4791_v41 = vld [vmem:[#allocation2 + $0x350] sm:$0xf] }
 0x337   : > { %v4652_v13 = vpop.f32.mrf.mxu2  ;;  %v5002_v10 = vunpack.c.l.b16 %v4933_v48  ;;  %v4564_v12 = vpack.c.b16 %v4544_v34, %v4543_v36  ;;  %v5248_v55 = vld [vmem:[#allocation2 + $0x350] sm:$0xe] }
 0x338   : > { %v4726_v47 = vadd.f32 %v4652_v13, %v4268_v45  ;;  %v5110_v27 = vpop.f32.mrf.mxu3  ;;  %v5388_v45 = vsel %vm13254_vm2, %v11674_v0, %v5387_v20  ;;  %v12553_v0 = vld [vmem:[#allocation2 + $0x32c] sm:$0xff] }
 0x339   : > { %v4196_v59 = vpop.f32.mrf.mxu1  ;;  %v5459_v28 = vunpack.c.l.b16 %v5388_v45  ;;  %v4792_v45 = vld [vmem:[#allocation2 + $0x354] sm:$0x3] }
 0x33a   : > { %v5184_v25 = vadd.f32 %v5110_v27, %v4726_v47  ;;  %v4269_v14 = vadd.f32 %v4196_v59, %v13851_v43  ;;  %v4333_v43 = vld [vmem:[#allocation2 + $0x34c] sm:$0xf]  ;;  %v5022_v47 = vpack.c.b16 %v5002_v10, %v5001_v57  ;;  %v4332_v59 = vld [vmem:[#allocation2 + $0x348] sm:$0x8]  ;;  %v4481_v57 = vrot.slane %v4334_v38, 7 }
 0x33b   : > { %v5570_v24 = vpop.f32.mrf.mxu0  ;;  %v4478_v37 = vrot.slane %v4333_v43, 7  ;;  %v5480_v27 = vpack.c.b16 %v5460_v15, %v5459_v28  ;;  %v4939_v15 = vrot.slane %v4792_v45, 6  ;;  %v11675_v43 = vrot.slane %v5248_v55, 9 }
 0x33c   : > { %v14136_v53 = vadd.f32 %v5568_v58, %v5184_v25  ;;  %v4936_v58 = vrot.slane %v4791_v41, 6  ;;  %v4790_v25 = vld [vmem:[#allocation2 + $0x34c] sm:$0xc]  ;;  %v5397_v41 = vrot.slane %v5250_v29, 5 }
 0x33d   : > { %v4480_v36 = vrot.slane %v4478_v37, 4  ;;  %v11627_v10 = vrot.slane %v4790_v25, 10  ;;  %v5395_v38 = vsel %vm13254_vm2, %v11675_v43, %v5394_v56 }
 0x33e   : > { %v4938_v28 = vrot.slane %v4936_v58, 4 }
 0x33f   : > { %v4654_v39 = vpop.f32.mrf.mxu2 }
 0x340   : > { %v4727_v20 = vadd.f32 %v4654_v39, %v4269_v14  ;;  %v5112_v40 = vpop.f32.mrf.mxu3  ;;  %v11579_v14 = vrot.slane %v4332_v59, 11 }
 0x341   : > { %v4199_v13 = vpop.f32.mrf.mxu1 }
 0x342   : > { %v5185_v5 = vadd.f32 %v5112_v40, %v4727_v20  ;;  %v4270_v11 = vadd.f32 %v4199_v13, %v13866_v17  ;;  %v5396_v17 = vrot.slane %v5394_v56, 4  ;;  %v4940_v13 = vsel %vm13330_vm7, %v4938_v28, %v4939_v15  ;;  %v12554_v15 = vld [vmem:[#allocation2 + $0x348] sm:$0xff] }
 0x343   : > { %v5573_v48 = vpop.f32.mrf.mxu0  ;;  %v5004_v55 = vunpack.c.l.b16 %v4940_v13  ;;  %v4795_v13 = vld [vmem:[#allocation2 + $0x370] sm:$0x3] }
 0x344   : > { %4238 = vmatmul.bf16.gmra.mxu1 %v12553_v0  ;;  %4696 = vmatmul.bf16.gmra.mxu2 %v4564_v12  ;;  %v14139_v34 = vadd.f32 %v5570_v24, %v5185_v5  ;;  %v4479_v0 = vsel %vm13334_vm8, %v11579_v14, %v4478_v37  ;;  %v4482_v24 = vsel %vm13334_vm8, %v4480_v36, %v4481_v57  ;;  %v4336_v14 = vld [vmem:[#allocation2 + $0x368] sm:$0xf]  ;;  %v4794_v36 = vld [vmem:[#allocation2 + $0x36c] sm:$0xf] }
 0x345   : > { %5154 = vmatmul.bf16.gmra.mxu3 %v5022_v47  ;;  %v4937_v12 = vsel %vm13330_vm7, %v11627_v10, %v4936_v58  ;;  %v5398_v5 = vsel %vm13254_vm2, %v5396_v17, %v5397_v41  ;;  %v4545_v37 = vunpack.c.l.b16 %v4479_v0  ;;  %v5461_v58 = vunpack.c.l.b16 %v5395_v38  ;;  %v5252_v10 = vld [vmem:[#allocation2 + $0x370] sm:$0xf]  ;;  %v4335_v41 = vld [vmem:[#allocation2 + $0x364] sm:$0x8]  ;;  %v5251_v38 = vld [vmem:[#allocation2 + $0x36c] sm:$0xe] }
 0x346   : > { %5612 = vmatmul.bf16.gmra.mxu0 %v5480_v27  ;;  %v5003_v45 = vunpack.c.l.b16 %v4937_v12  ;;  %v5462_v29 = vunpack.c.l.b16 %v5398_v5  ;;  %v4485_v56 = vrot.slane %v4336_v14, 7  ;;  %v4793_v12 = vld [vmem:[#allocation2 + $0x368] sm:$0xc]  ;;  %v5253_v5 = vld [vmem:[#allocation2 + $0x374] sm:$0x1] }
 0x347   : > { %v4657_v39 = vpop.f32.mrf.mxu2  ;;  %v12614_v14 = vld [vmem:[#allocation4 + $0x380] sm:$0xff] }
 0x348   : > { %v4728_v20 = vadd.f32 %v4657_v39, %v4270_v11  ;;  %v5115_v51 = vpop.f32.mrf.mxu3  ;;  %v4546_v11 = vunpack.c.l.b16 %v4482_v24  ;;  %v5481_v17 = vpack.c.b16 %v5462_v29, %v5461_v58  ;;  %v4946_v29 = vrot.slane %v4795_v13, 6  ;;  %6296 = vmatpush.bf16.msra.mxu2 %v12614_v14  ;;  %v12630_v13 = vld [vmem:[#allocation4 + $0x400] sm:$0xff]  ;;  %v5255_v14 = vld [vmem:[#allocation2 + $0x38c] sm:$0xf] }
 0x349   : > { %v4201_v40 = vpop.f32.mrf.mxu1  ;;  %7213 = vmatpush.bf16.msra.mxu0 %v12630_v13  ;;  %v5256_v13 = vld [vmem:[#allocation2 + $0x390] sm:$0x1] }
 0x34a   : > { %v5186_v47 = vadd.f32 %v5115_v51, %v4728_v20  ;;  %v4271_v27 = vadd.f32 %v4201_v40, %v13869_v46  ;;  %v4565_v39 = vpack.c.b16 %v4546_v11, %v4545_v37  ;;  %v5023_v20 = vpack.c.b16 %v5004_v55, %v5003_v45  ;;  %v4337_v51 = vld [vmem:[#allocation2 + $0x36c] sm:$0x7] }
 0x34b   : > { %v5575_v59 = vpop.f32.mrf.mxu0  ;;  %v4487_v37 = vrot.slane %v4485_v56, 4  ;;  %v4488_v45 = vrot.slane %v4337_v51, 7  ;;  %v11628_v55 = vrot.slane %v4793_v12, 10 }
 0x34c   : > { %v14154_v25 = vadd.f32 %v5573_v48, %v5186_v47  ;;  %v4943_v48 = vrot.slane %v4794_v36, 6  ;;  %v5401_v47 = vrot.slane %v5252_v10, 5  ;;  %v11676_v36 = vrot.slane %v5251_v38, 9 }
 0x34e   : > { %v4945_v58 = vrot.slane %v4943_v48, 4 }
 0x34f   : > { %v4659_v57 = vpop.f32.mrf.mxu2 }
 0x350   : > { %v4729_v46 = vadd.f32 %v4659_v57, %v4271_v27  ;;  %v5117_v28 = vpop.f32.mrf.mxu3  ;;  %v11580_v27 = vrot.slane %v4335_v41, 11  ;;  %v5403_v57 = vrot.slane %v5401_v47, 4 }
 0x351   : > { %v4204_v43 = vpop.f32.mrf.mxu1 }
 0x352   : > { %v5187_v40 = vadd.f32 %v5117_v28, %v4729_v46  ;;  %v4272_v0 = vadd.f32 %v4204_v43, %v13884_v63  ;;  %v12622_v63 = vld [vmem:[#allocation4 + $0x3c0] sm:$0xff]  ;;  %v5404_v46 = vrot.slane %v5253_v5, 5  ;;  %v4489_v43 = vsel %vm13334_vm8, %v4487_v37, %v4488_v45 }
 0x353   : > { %v5578_v24 = vpop.f32.mrf.mxu0  ;;  %6754 = vmatpush.bf16.msra.mxu3 %v12622_v63  ;;  %v4548_v5 = vunpack.c.l.b16 %v4489_v43 }
 0x354   : > { %4243 = vmatmul.bf16.gmra.mxu1 %v12554_v15  ;;  %4701 = vmatmul.bf16.gmra.mxu2 %v4565_v39  ;;  %v14157_v11 = vadd.f32 %v5575_v59, %v5187_v40  ;;  %v4486_v59 = vsel %vm13334_vm8, %v11580_v27, %v4485_v56  ;;  %v5405_v12 = vsel %vm13254_vm2, %v5403_v57, %v5404_v46  ;;  %v12606_v56 = vld [vmem:[#allocation4 + $0x340] sm:$0xff] }
 0x355   : > { %5159 = vmatmul.bf16.gmra.mxu3 %v5023_v20  ;;  %v4944_v20 = vsel %vm13330_vm7, %v11628_v55, %v4943_v48  ;;  %v4547_v38 = vunpack.c.l.b16 %v4486_v59  ;;  %5838 = vmatpush.bf16.msra.mxu1 %v12606_v56  ;;  %v5464_v55 = vunpack.c.l.b16 %v5405_v12  ;;  %v4340_v59 = vld [vmem:[#allocation2 + $0x388] sm:$0x7]  ;;  %v5408_v12 = vrot.slane %v5255_v14, 5 }
 0x356   : > { %5617 = vmatmul.bf16.gmra.mxu0 %v5481_v17  ;;  %v4947_v17 = vsel %vm13330_vm7, %v4945_v58, %v4946_v29  ;;  %v5005_v27 = vunpack.c.l.b16 %v4944_v20  ;;  %v4797_v58 = vld [vmem:[#allocation2 + $0x388] sm:$0xf] }
 0x357   : > { %v4662_v10 = vpop.f32.mrf.mxu2  ;;  %v5006_v37 = vunpack.c.l.b16 %v4947_v17  ;;  %v4566_v57 = vpack.c.b16 %v4548_v5, %v4547_v38  ;;  %v5254_v56 = vld [vmem:[#allocation2 + $0x388] sm:$0xe] }
 0x358   : > { %v4730_v28 = vadd.f32 %v4662_v10, %v4272_v0  ;;  %v5120_v15 = vpop.f32.mrf.mxu3  ;;  %v5402_v0 = vsel %vm13254_vm2, %v11676_v36, %v5401_v47  ;;  %v12555_v36 = vld [vmem:[#allocation2 + $0x364] sm:$0xff] }
 0x359   : > { %v4206_v39 = vpop.f32.mrf.mxu1  ;;  %v5463_v45 = vunpack.c.l.b16 %v5402_v0  ;;  %v4798_v0 = vld [vmem:[#allocation2 + $0x38c] sm:$0x3] }
 0x35a   : > { %v5188_v41 = vadd.f32 %v5120_v15, %v4730_v28  ;;  %v4273_v51 = vadd.f32 %v4206_v39, %v13887_v9  ;;  %v4339_v9 = vld [vmem:[#allocation2 + $0x384] sm:$0xf]  ;;  %v5024_v28 = vpack.c.b16 %v5006_v37, %v5005_v27  ;;  %v4338_v39 = vld [vmem:[#allocation2 + $0x380] sm:$0x8]  ;;  %v4495_v27 = vrot.slane %v4340_v59, 7 }
 0x35b   : > { %v5580_v40 = vpop.f32.mrf.mxu0  ;;  %v4492_v46 = vrot.slane %v4339_v9, 7  ;;  %v5482_v15 = vpack.c.b16 %v5464_v55, %v5463_v45  ;;  %v4953_v55 = vrot.slane %v4798_v0, 6  ;;  %v11677_v9 = vrot.slane %v5254_v56, 9 }
 0x35c   : > { %v14172_v48 = vadd.f32 %v5578_v24, %v5188_v41  ;;  %v4950_v24 = vrot.slane %v4797_v58, 6  ;;  %v4796_v41 = vld [vmem:[#allocation2 + $0x384] sm:$0xc]  ;;  %v5411_v58 = vrot.slane %v5256_v13, 5 }
 0x35d   : > { %v4494_v38 = vrot.slane %v4492_v46, 4  ;;  %v11629_v37 = vrot.slane %v4796_v41, 10  ;;  %v5409_v59 = vsel %vm13254_vm2, %v11677_v9, %v5408_v12 }
 0x35e   : > { %v4952_v45 = vrot.slane %v4950_v24, 4 }
 0x35f   : > { %v4664_v29 = vpop.f32.mrf.mxu2 }
 0x360   : > { %v4731_v47 = vadd.f32 %v4664_v29, %v4273_v51  ;;  %v5122_v63 = vpop.f32.mrf.mxu3  ;;  %v11581_v51 = vrot.slane %v4338_v39, 11 }
 0x361   : > { %v4209_v10 = vpop.f32.mrf.mxu1 }
 0x362   : > { %v5189_v43 = vadd.f32 %v5122_v63, %v4731_v47  ;;  %v4274_v20 = vadd.f32 %v4209_v10, %v13902_v62  ;;  %v5410_v62 = vrot.slane %v5408_v12, 4  ;;  %v4954_v10 = vsel %vm13330_vm7, %v4952_v45, %v4953_v55  ;;  %v12556_v55 = vld [vmem:[#allocation2 + $0x380] sm:$0xff] }
 0x363   : > { %v5583_v17 = vpop.f32.mrf.mxu0  ;;  %v5008_v56 = vunpack.c.l.b16 %v4954_v10  ;;  %v4801_v10 = vld [vmem:[#allocation2 + $0x3a8] sm:$0x3] }
 0x364   : > { %4248 = vmatmul.bf16.gmra.mxu1 %v12555_v36  ;;  %4706 = vmatmul.bf16.gmra.mxu2 %v4566_v57  ;;  %v14175_v5 = vadd.f32 %v5580_v40, %v5189_v43  ;;  %v4493_v36 = vsel %vm13334_vm8, %v11581_v51, %v4492_v46  ;;  %v4496_v40 = vsel %vm13334_vm8, %v4494_v38, %v4495_v27  ;;  %v4342_v51 = vld [vmem:[#allocation2 + $0x3a0] sm:$0xf]  ;;  %v4800_v38 = vld [vmem:[#allocation2 + $0x3a4] sm:$0xf] }
 0x365   : > { %5164 = vmatmul.bf16.gmra.mxu3 %v5024_v28  ;;  %v4951_v57 = vsel %vm13330_vm7, %v11629_v37, %v4950_v24  ;;  %v5412_v43 = vsel %vm13254_vm2, %v5410_v62, %v5411_v58  ;;  %v4549_v46 = vunpack.c.l.b16 %v4493_v36  ;;  %v5465_v24 = vunpack.c.l.b16 %v5409_v59  ;;  %v5258_v37 = vld [vmem:[#allocation2 + $0x3a8] sm:$0xf]  ;;  %v4341_v58 = vld [vmem:[#allocation2 + $0x39c] sm:$0x8]  ;;  %v5257_v59 = vld [vmem:[#allocation2 + $0x3a4] sm:$0xe] }
 0x366   : > { %5622 = vmatmul.bf16.gmra.mxu0 %v5482_v15  ;;  %v5007_v0 = vunpack.c.l.b16 %v4951_v57  ;;  %v5466_v13 = vunpack.c.l.b16 %v5412_v43  ;;  %v4499_v12 = vrot.slane %v4342_v51, 7  ;;  %v4799_v57 = vld [vmem:[#allocation2 + $0x3a0] sm:$0xc]  ;;  %v5259_v43 = vld [vmem:[#allocation2 + $0x3ac] sm:$0x1] }
 0x367   : > { %v4667_v29 = vpop.f32.mrf.mxu2  ;;  %v12669_v51 = vld [vmem:[#allocation4 + $0x4b8] sm:$0xff] }
 0x368   : > { %v4732_v47 = vadd.f32 %v4667_v29, %v4274_v20  ;;  %v5125_v14 = vpop.f32.mrf.mxu3  ;;  %v4550_v20 = vunpack.c.l.b16 %v4496_v40  ;;  %v5483_v62 = vpack.c.b16 %v5466_v13, %v5465_v24  ;;  %v4960_v13 = vrot.slane %v4801_v10, 6  ;;  %7946 = vmatpush.bf16.msrb.mxu2 %v12669_v51  ;;  %v12685_v10 = vld [vmem:[#allocation4 + $0x538] sm:$0xff] }
 0x369   : > { %v4211_v63 = vpop.f32.mrf.mxu1  ;;  %8863 = vmatpush.bf16.msrb.mxu0 %v12685_v10  ;;  %v6870_v51 = vld [vmem:[#allocation2 + $0x2a8] sm:$0xf]  ;;  %v6871_v10 = vld [vmem:[#allocation2 + $0x2ac] sm:$0x3] }
 0x36a   : > { %v5190_v28 = vadd.f32 %v5125_v14, %v4732_v47  ;;  %v4275_v15 = vadd.f32 %v4211_v63, %v13905_v2  ;;  %v4567_v29 = vpack.c.b16 %v4550_v20, %v4549_v46  ;;  %v5025_v47 = vpack.c.b16 %v5008_v56, %v5007_v0  ;;  %v4343_v14 = vld [vmem:[#allocation2 + $0x3a4] sm:$0x7] }
 0x36b   : > { %v5585_v39 = vpop.f32.mrf.mxu0  ;;  %v4501_v46 = vrot.slane %v4499_v12, 4  ;;  %v4502_v0 = vrot.slane %v4343_v14, 7  ;;  %v11630_v56 = vrot.slane %v4799_v57, 10 }
 0x36c   : > { %v14190_v41 = vadd.f32 %v5583_v17, %v5190_v28  ;;  %v4957_v17 = vrot.slane %v4800_v38, 6  ;;  %v5415_v28 = vrot.slane %v5258_v37, 5  ;;  %v11678_v38 = vrot.slane %v5257_v59, 9 }
 0x36e   : > { %v4959_v24 = vrot.slane %v4957_v17, 4 }
 0x36f   : > { %v4669_v27 = vpop.f32.mrf.mxu2 }
 0x370   : > { %v4733_v2 = vadd.f32 %v4669_v27, %v4275_v15  ;;  %v5127_v45 = vpop.f32.mrf.mxu3  ;;  %v11582_v15 = vrot.slane %v4341_v58, 11  ;;  %v5417_v27 = vrot.slane %v5415_v28, 4 }
 0x371   : > { %v4214_v9 = vpop.f32.mrf.mxu1 }
 0x372   : > { %v5191_v63 = vadd.f32 %v5127_v45, %v4733_v2  ;;  %v4276_v36 = vadd.f32 %v4214_v9, %v13920_v61  ;;  %v12677_v61 = vld [vmem:[#allocation4 + $0x4f8] sm:$0xff]  ;;  %v5418_v2 = vrot.slane %v5259_v43, 5  ;;  %v4503_v9 = vsel %vm13334_vm8, %v4501_v46, %v4502_v0 }
 0x373   : > { %v5588_v40 = vpop.f32.mrf.mxu0  ;;  %8405 = vmatpush.bf16.msrb.mxu3 %v12677_v61  ;;  %v4552_v43 = vunpack.c.l.b16 %v4503_v9 }
 0x374   : > { %4253 = vmatmul.bf16.gmra.mxu1 %v12556_v55  ;;  %4711 = vmatmul.bf16.gmra.mxu2 %v4567_v29  ;;  %v14193_v20 = vadd.f32 %v5585_v39, %v5191_v63  ;;  %v4500_v39 = vsel %vm13334_vm8, %v11582_v15, %v4499_v12  ;;  %v5419_v57 = vsel %vm13254_vm2, %v5417_v27, %v5418_v2  ;;  %v12645_v12 = vld [vmem:[#allocation4 + $0x478] sm:$0xff] }
 0x375   : > { %5169 = vmatmul.bf16.gmra.mxu3 %v5025_v47  ;;  %v4958_v47 = vsel %vm13330_vm7, %v11630_v56, %v4957_v17  ;;  %v4551_v59 = vunpack.c.l.b16 %v4500_v39  ;;  %7664 = vmatpush.bf16.msrb.mxu1 %v12645_v12  ;;  %v5468_v56 = vunpack.c.l.b16 %v5419_v57  ;;  %v5954_v39 = vld [vmem:[#allocation2 + $0x20c] sm:$0x7]  ;;  %v6967_v57 = vrot.slane %v6870_v51, 6  ;;  %v6869_v12 = vld [vmem:[#allocation2 + $0x2a4] sm:$0xc] }
 0x376   : > { %5627 = vmatmul.bf16.gmra.mxu0 %v5483_v62  ;;  %v4961_v62 = vsel %vm13330_vm7, %v4959_v24, %v4960_v13  ;;  %v5009_v15 = vunpack.c.l.b16 %v4958_v47  ;;  %v6411_v24 = vld [vmem:[#allocation2 + $0x20c] sm:$0xf] }
 0x377   : > { %v4672_v37 = vpop.f32.mrf.mxu2  ;;  %v5010_v46 = vunpack.c.l.b16 %v4961_v62  ;;  %v4568_v27 = vpack.c.b16 %v4552_v43, %v4551_v59 }
 0x378   : > { %v4734_v45 = vadd.f32 %v4672_v37, %v4276_v36  ;;  %v5130_v55 = vpop.f32.mrf.mxu3  ;;  %v5416_v36 = vsel %vm13254_vm2, %v11678_v38, %v5415_v28  ;;  %v12557_v38 = vld [vmem:[#allocation2 + $0x39c] sm:$0xff] }
 0x379   : > { %v4216_v29 = vpop.f32.mrf.mxu1  ;;  %v5467_v0 = vunpack.c.l.b16 %v5416_v36  ;;  %v6412_v36 = vld [vmem:[#allocation2 + $0x210] sm:$0x3] }
 0x37a   : > { %v5192_v58 = vadd.f32 %v5130_v55, %v4734_v45  ;;  %v4277_v14 = vadd.f32 %v4216_v29, %v13923_v18  ;;  %v5953_v18 = vld [vmem:[#allocation2 + $0x208] sm:$0xf]  ;;  %v5026_v45 = vpack.c.b16 %v5010_v46, %v5009_v15  ;;  %v5952_v29 = vld [vmem:[#allocation2 + $0x204] sm:$0x8]  ;;  %v6053_v15 = vrot.slane %v5954_v39, 7 }
 0x37b   : > { %v5590_v63 = vpop.f32.mrf.mxu0  ;;  %v6050_v2 = vrot.slane %v5953_v18, 7  ;;  %v5484_v55 = vpack.c.b16 %v5468_v56, %v5467_v0  ;;  %v6511_v56 = vrot.slane %v6412_v36, 6  ;;  %v11903_v18 = vrot.slane %v6869_v12, 10 }
 0x37c   : > { %v14208_v17 = vadd.f32 %v5588_v40, %v5192_v58  ;;  %v6508_v40 = vrot.slane %v6411_v24, 6  ;;  %v6410_v58 = vld [vmem:[#allocation2 + $0x208] sm:$0xc]  ;;  %v6970_v24 = vrot.slane %v6871_v10, 6 }
 0x37d   : > { %v6052_v59 = vrot.slane %v6050_v2, 4  ;;  %v11855_v46 = vrot.slane %v6410_v58, 10  ;;  %v6968_v39 = vsel %vm13330_vm7, %v11903_v18, %v6967_v57 }
 0x37e   : > { %v6510_v0 = vrot.slane %v6508_v40, 4 }
 0x37f   : > { %v4674_v13 = vpop.f32.mrf.mxu2 }
 0x380   : > { %v4735_v28 = vadd.f32 %v4674_v13, %v4277_v14  ;;  %v5132_v61 = vpop.f32.mrf.mxu3  ;;  %v11807_v14 = vrot.slane %v5952_v29, 11 }
 0x381   : > { %v4219_v37 = vpop.f32.mrf.mxu1 }
 0x382   : > { %v5193_v9 = vadd.f32 %v5132_v61, %v4735_v28  ;;  %v4278_v47 = vadd.f32 %v4219_v37, %v13938_v21  ;;  %v6969_v21 = vrot.slane %v6967_v57, 4  ;;  %v6512_v37 = vsel %vm13330_vm7, %v6510_v0, %v6511_v56  ;;  %v12590_v56 = vld [vmem:[#allocation2 + $0x204] sm:$0xff] }
 0x383   : > { %v5593_v62 = vpop.f32.mrf.mxu0  ;;  %v6636_v12 = vunpack.c.l.b16 %v6512_v37  ;;  %v6415_v37 = vld [vmem:[#allocation2 + $0x22c] sm:$0x3] }
 0x384   : > { %4258 = vmatmul.bf16.gmra.mxu1 %v12557_v38  ;;  %4716 = vmatmul.bf16.gmra.mxu2 %v4568_v27  ;;  %v14211_v43 = vadd.f32 %v5590_v63, %v5193_v9  ;;  %v6051_v38 = vsel %vm13334_vm8, %v11807_v14, %v6050_v2  ;;  %v6054_v63 = vsel %vm13334_vm8, %v6052_v59, %v6053_v15  ;;  %v5956_v14 = vld [vmem:[#allocation2 + $0x224] sm:$0xf]  ;;  %v6414_v59 = vld [vmem:[#allocation2 + $0x228] sm:$0xf] }
 0x385   : > { %5174 = vmatmul.bf16.gmra.mxu3 %v5026_v45  ;;  %v6509_v27 = vsel %vm13330_vm7, %v11855_v46, %v6508_v40  ;;  %v6971_v9 = vsel %vm13330_vm7, %v6969_v21, %v6970_v24  ;;  %v6177_v2 = vunpack.c.l.b16 %v6051_v38  ;;  %v7094_v40 = vunpack.c.l.b16 %v6968_v39  ;;  %v6873_v46 = vld [vmem:[#allocation2 + $0x2c4] sm:$0xf]  ;;  %v5955_v24 = vld [vmem:[#allocation2 + $0x220] sm:$0x8] }
 0x386   : > { %5632 = vmatmul.bf16.gmra.mxu0 %v5484_v55  ;;  %v6635_v36 = vunpack.c.l.b16 %v6509_v27  ;;  %v7095_v10 = vunpack.c.l.b16 %v6971_v9  ;;  %v6057_v57 = vrot.slane %v5956_v14, 7  ;;  %v6413_v27 = vld [vmem:[#allocation2 + $0x224] sm:$0xc]  ;;  %v6872_v39 = vld [vmem:[#allocation2 + $0x2c0] sm:$0xc] }
 0x387   : > { %v4677_v13 = vpop.f32.mrf.mxu2  ;;  %v6874_v9 = vld [vmem:[#allocation2 + $0x2c8] sm:$0x3]  ;;  %v12668_v14 = vld [vmem:[#allocation4 + $0x4b0] sm:$0xff] }
 0x388   : > { %v4736_v28 = vadd.f32 %v4677_v13, %v4278_v47  ;;  %v5135_v51 = vpop.f32.mrf.mxu3  ;;  %v6178_v47 = vunpack.c.l.b16 %v6054_v63  ;;  %v7126_v21 = vpack.c.b16 %v7095_v10, %v7094_v40  ;;  %v6518_v10 = vrot.slane %v6415_v37, 6  ;;  %7947 = vmatpush.bf16.msrb.mxu2 %v12668_v14  ;;  %v12684_v37 = vld [vmem:[#allocation4 + $0x530] sm:$0xff] }
 0x389   : > { %v4221_v61 = vpop.f32.mrf.mxu1  ;;  %8864 = vmatpush.bf16.msrb.mxu0 %v12684_v37  ;;  %v6876_v14 = vld [vmem:[#allocation2 + $0x2e0] sm:$0xf]  ;;  %v6877_v37 = vld [vmem:[#allocation2 + $0x2e4] sm:$0x3] }
 0x38a   : > { %v5194_v45 = vadd.f32 %v5135_v51, %v4736_v28  ;;  %v4279_v55 = vadd.f32 %v4221_v61, %v13941_v16  ;;  %v6209_v13 = vpack.c.b16 %v6178_v47, %v6177_v2  ;;  %v6667_v28 = vpack.c.b16 %v6636_v12, %v6635_v36  ;;  %v5957_v51 = vld [vmem:[#allocation2 + $0x228] sm:$0x7] }
 0x38b   : > { %v5595_v29 = vpop.f32.mrf.mxu0  ;;  %v6059_v2 = vrot.slane %v6057_v57, 4  ;;  %v6060_v36 = vrot.slane %v5957_v51, 7  ;;  %v11856_v12 = vrot.slane %v6413_v27, 10 }
 0x38c   : > { %v14226_v58 = vadd.f32 %v5593_v62, %v5194_v45  ;;  %v6515_v62 = vrot.slane %v6414_v59, 6  ;;  %v6974_v45 = vrot.slane %v6873_v46, 6  ;;  %v11904_v59 = vrot.slane %v6872_v39, 10 }
 0x38e   : > { %v6517_v40 = vrot.slane %v6515_v62, 4 }
 0x38f   : > { %v4679_v15 = vpop.f32.mrf.mxu2 }
 0x390   : > { %v4737_v16 = vadd.f32 %v4679_v15, %v4279_v55  ;;  %v5137_v0 = vpop.f32.mrf.mxu3  ;;  %v11808_v55 = vrot.slane %v5955_v24, 11  ;;  %v6976_v15 = vrot.slane %v6974_v45, 4 }
 0x391   : > { %v4224_v18 = vpop.f32.mrf.mxu1 }
 0x392   : > { %v5195_v61 = vadd.f32 %v5137_v0, %v4737_v16  ;;  %v4280_v38 = vadd.f32 %v4224_v18, %v13956_v3  ;;  %v12676_v3 = vld [vmem:[#allocation4 + $0x4f0] sm:$0xff]  ;;  %v6977_v16 = vrot.slane %v6874_v9, 6  ;;  %v6061_v18 = vsel %vm13334_vm8, %v6059_v2, %v6060_v36 }
 0x393   : > { %v5598_v63 = vpop.f32.mrf.mxu0  ;;  %8406 = vmatpush.bf16.msrb.mxu3 %v12676_v3  ;;  %v6180_v9 = vunpack.c.l.b16 %v6061_v18 }
 0x394   : > { %5839 = vmatmul.bf16.vlgmr.msra.gmra.mxu1 %v12590_v56  ;;  %6297 = vmatmul.bf16.vlgmr.msra.gmra.mxu2 %v6209_v13  ;;  %v14229_v47 = vadd.f32 %v5595_v29, %v5195_v61  ;;  %v6058_v29 = vsel %vm13334_vm8, %v11808_v55, %v6057_v57  ;;  %v6978_v27 = vsel %vm13330_vm7, %v6976_v15, %v6977_v16  ;;  %v12644_v57 = vld [vmem:[#allocation4 + $0x470] sm:$0xff] }
 0x395   : > { %6755 = vmatmul.bf16.vlgmr.msra.gmra.mxu3 %v6667_v28  ;;  %v6516_v28 = vsel %vm13330_vm7, %v11856_v12, %v6515_v62  ;;  %v6179_v39 = vunpack.c.l.b16 %v6058_v29  ;;  %7665 = vmatpush.bf16.msrb.mxu1 %v12644_v57  ;;  %v7097_v12 = vunpack.c.l.b16 %v6978_v27  ;;  %v5960_v29 = vld [vmem:[#allocation2 + $0x244] sm:$0x7]  ;;  %v6981_v27 = vrot.slane %v6876_v14, 6  ;;  %v6875_v57 = vld [vmem:[#allocation2 + $0x2dc] sm:$0xc] }
 0x396   : > { %7214 = vmatmul.bf16.vlgmr.msra.gmra.mxu0 %v7126_v21  ;;  %v6519_v21 = vsel %vm13330_vm7, %v6517_v40, %v6518_v10  ;;  %v6637_v55 = vunpack.c.l.b16 %v6516_v28  ;;  %v6417_v40 = vld [vmem:[#allocation2 + $0x244] sm:$0xf] }
 0x397   : > { %v4682_v46 = vpop.f32.mrf.mxu2  ;;  %v6638_v2 = vunpack.c.l.b16 %v6519_v21  ;;  %v6210_v15 = vpack.c.b16 %v6180_v9, %v6179_v39 }
 0x398   : > { %v4738_v0 = vadd.f32 %v4682_v46, %v4280_v38  ;;  %v5140_v56 = vpop.f32.mrf.mxu3  ;;  %v6975_v38 = vsel %vm13330_vm7, %v11904_v59, %v6974_v45  ;;  %v12591_v59 = vld [vmem:[#allocation2 + $0x220] sm:$0xff] }
 0x399   : > { %v4226_v13 = vpop.f32.mrf.mxu1  ;;  %v7096_v36 = vunpack.c.l.b16 %v6975_v38  ;;  %v6418_v38 = vld [vmem:[#allocation2 + $0x248] sm:$0x3] }
 0x39a   : > { %v5196_v24 = vadd.f32 %v5140_v56, %v4738_v0  ;;  %v4281_v51 = vadd.f32 %v4226_v13, %v13959_v22  ;;  %v5959_v22 = vld [vmem:[#allocation2 + $0x240] sm:$0xf]  ;;  %v6668_v0 = vpack.c.b16 %v6638_v2, %v6637_v55  ;;  %v5958_v13 = vld [vmem:[#allocation2 + $0x23c] sm:$0x8]  ;;  %v6067_v55 = vrot.slane %v5960_v29, 7 }
 0x39b   : > { %v5600_v61 = vpop.f32.mrf.mxu0  ;;  %v6064_v16 = vrot.slane %v5959_v22, 7  ;;  %v7127_v56 = vpack.c.b16 %v7097_v12, %v7096_v36  ;;  %v6525_v12 = vrot.slane %v6418_v38, 6  ;;  %v11905_v22 = vrot.slane %v6875_v57, 10 }
 0x39c   : > { %v14244_v62 = vadd.f32 %v5598_v63, %v5196_v24  ;;  %v6522_v63 = vrot.slane %v6417_v40, 6  ;;  %v6416_v24 = vld [vmem:[#allocation2 + $0x240] sm:$0xc]  ;;  %v6984_v40 = vrot.slane %v6877_v37, 6 }
 0x39d   : > { %v6066_v39 = vrot.slane %v6064_v16, 4  ;;  %v11857_v2 = vrot.slane %v6416_v24, 10  ;;  %v6982_v29 = vsel %vm13330_vm7, %v11905_v22, %v6981_v27 }
 0x39e   : > { %v6524_v36 = vrot.slane %v6522_v63, 4 }
 0x39f   : > { %v4684_v10 = vpop.f32.mrf.mxu2 }
 0x3a0   : > { %v4739_v45 = vadd.f32 %v4684_v10, %v4281_v51  ;;  %v5142_v3 = vpop.f32.mrf.mxu3  ;;  %v11809_v51 = vrot.slane %v5958_v13, 11 }
 0x3a1   : > { %v4229_v46 = vpop.f32.mrf.mxu1 }
 0x3a2   : > { %v5197_v18 = vadd.f32 %v5142_v3, %v4739_v45  ;;  %v4282_v28 = vadd.f32 %v4229_v46, %v13974_v54  ;;  %v6983_v54 = vrot.slane %v6981_v27, 4  ;;  %v6526_v46 = vsel %vm13330_vm7, %v6524_v36, %v6525_v12  ;;  %v12592_v12 = vld [vmem:[#allocation2 + $0x23c] sm:$0xff] }
 0x3a3   : > { %v5603_v21 = vpop.f32.mrf.mxu0  ;;  %v6640_v57 = vunpack.c.l.b16 %v6526_v46  ;;  %v6421_v46 = vld [vmem:[#allocation2 + $0x264] sm:$0x3] }
 0x3a4   : > { %5844 = vmatmul.bf16.gmra.mxu1 %v12591_v59  ;;  %6302 = vmatmul.bf16.gmra.mxu2 %v6210_v15  ;;  %v14247_v9 = vadd.f32 %v5600_v61, %v5197_v18  ;;  %v6065_v59 = vsel %vm13334_vm8, %v11809_v51, %v6064_v16  ;;  %v6068_v61 = vsel %vm13334_vm8, %v6066_v39, %v6067_v55  ;;  %v5962_v51 = vld [vmem:[#allocation2 + $0x25c] sm:$0xf]  ;;  %v6420_v39 = vld [vmem:[#allocation2 + $0x260] sm:$0xf] }
 0x3a5   : > { %6760 = vmatmul.bf16.gmra.mxu3 %v6668_v0  ;;  %v6523_v15 = vsel %vm13330_vm7, %v11857_v2, %v6522_v63  ;;  %v6985_v18 = vsel %vm13330_vm7, %v6983_v54, %v6984_v40  ;;  %v6181_v16 = vunpack.c.l.b16 %v6065_v59  ;;  %v7098_v63 = vunpack.c.l.b16 %v6982_v29  ;;  %v6879_v2 = vld [vmem:[#allocation2 + $0x2fc] sm:$0xf]  ;;  %v5961_v40 = vld [vmem:[#allocation2 + $0x258] sm:$0x8] }
 0x3a6   : > { %7219 = vmatmul.bf16.gmra.mxu0 %v7127_v56  ;;  %v6639_v38 = vunpack.c.l.b16 %v6523_v15  ;;  %v7099_v37 = vunpack.c.l.b16 %v6985_v18  ;;  %v6071_v27 = vrot.slane %v5962_v51, 7  ;;  %v6419_v15 = vld [vmem:[#allocation2 + $0x25c] sm:$0xc]  ;;  %v6878_v29 = vld [vmem:[#allocation2 + $0x2f8] sm:$0xc] }
 0x3a7   : > { %v4687_v10 = vpop.f32.mrf.mxu2  ;;  %v6880_v18 = vld [vmem:[#allocation2 + $0x300] sm:$0x3]  ;;  %v12667_v51 = vld [vmem:[#allocation4 + $0x4a8] sm:$0xff] }
 0x3a8   : > { %v4740_v45 = vadd.f32 %v4687_v10, %v4282_v28  ;;  %v5145_v14 = vpop.f32.mrf.mxu3  ;;  %v6182_v28 = vunpack.c.l.b16 %v6068_v61  ;;  %v7128_v54 = vpack.c.b16 %v7099_v37, %v7098_v63  ;;  %v6532_v37 = vrot.slane %v6421_v46, 6  ;;  %7948 = vmatpush.bf16.msrb.mxu2 %v12667_v51  ;;  %v12683_v46 = vld [vmem:[#allocation4 + $0x528] sm:$0xff] }
 0x3a9   : > { %v4231_v3 = vpop.f32.mrf.mxu1  ;;  %8865 = vmatpush.bf16.msrb.mxu0 %v12683_v46  ;;  %v6882_v51 = vld [vmem:[#allocation2 + $0x318] sm:$0xf]  ;;  %v6883_v46 = vld [vmem:[#allocation2 + $0x31c] sm:$0x3] }
 0x3aa   : > { %v5198_v0 = vadd.f32 %v5145_v14, %v4740_v45  ;;  %v4283_v56 = vadd.f32 %v4231_v3, %v13977_v33  ;;  %v6211_v10 = vpack.c.b16 %v6182_v28, %v6181_v16  ;;  %v6669_v45 = vpack.c.b16 %v6640_v57, %v6639_v38  ;;  %v5963_v14 = vld [vmem:[#allocation2 + $0x260] sm:$0x7] }
 0x3ab   : > { %v5605_v13 = vpop.f32.mrf.mxu0  ;;  %v6073_v16 = vrot.slane %v6071_v27, 4  ;;  %v6074_v38 = vrot.slane %v5963_v14, 7  ;;  %v11858_v57 = vrot.slane %v6419_v15, 10 }
 0x3ac   : > { %v14262_v24 = vadd.f32 %v5603_v21, %v5198_v0  ;;  %v6529_v21 = vrot.slane %v6420_v39, 6  ;;  %v6988_v0 = vrot.slane %v6879_v2, 6  ;;  %v11906_v39 = vrot.slane %v6878_v29, 10 }
 0x3ae   : > { %v6531_v63 = vrot.slane %v6529_v21, 4 }
 0x3af   : > { %v4689_v55 = vpop.f32.mrf.mxu2 }
 0x3b0   : > { %v4741_v33 = vadd.f32 %v4689_v55, %v4283_v56  ;;  %v5147_v36 = vpop.f32.mrf.mxu3  ;;  %v11810_v56 = vrot.slane %v5961_v40, 11  ;;  %v6990_v55 = vrot.slane %v6988_v0, 4 }
 0x3b1   : > { %v4234_v22 = vpop.f32.mrf.mxu1 }
 0x3b2   : > { %v5199_v3 = vadd.f32 %v5147_v36, %v4741_v33  ;;  %v4284_v59 = vadd.f32 %v4234_v22, %v13992_v7  ;;  %v12675_v7 = vld [vmem:[#allocation4 + $0x4e8] sm:$0xff]  ;;  %v6991_v33 = vrot.slane %v6880_v18, 6  ;;  %v6075_v22 = vsel %vm13334_vm8, %v6073_v16, %v6074_v38 }
 0x3b3   : > { %v5608_v61 = vpop.f32.mrf.mxu0  ;;  %8407 = vmatpush.bf16.msrb.mxu3 %v12675_v7  ;;  %v6184_v18 = vunpack.c.l.b16 %v6075_v22 }
 0x3b4   : > { %5849 = vmatmul.bf16.gmra.mxu1 %v12592_v12  ;;  %6307 = vmatmul.bf16.gmra.mxu2 %v6211_v10  ;;  %v14265_v28 = vadd.f32 %v5605_v13, %v5199_v3  ;;  %v6072_v13 = vsel %vm13334_vm8, %v11810_v56, %v6071_v27  ;;  %v6992_v15 = vsel %vm13330_vm7, %v6990_v55, %v6991_v33  ;;  %v12643_v27 = vld [vmem:[#allocation4 + $0x468] sm:$0xff] }
 0x3b5   : > { %6765 = vmatmul.bf16.gmra.mxu3 %v6669_v45  ;;  %v6530_v45 = vsel %vm13330_vm7, %v11858_v57, %v6529_v21  ;;  %v6183_v29 = vunpack.c.l.b16 %v6072_v13  ;;  %7666 = vmatpush.bf16.msrb.mxu1 %v12643_v27  ;;  %v7101_v57 = vunpack.c.l.b16 %v6992_v15  ;;  %v5966_v13 = vld [vmem:[#allocation2 + $0x27c] sm:$0x7]  ;;  %v6995_v15 = vrot.slane %v6882_v51, 6  ;;  %v6881_v27 = vld [vmem:[#allocation2 + $0x314] sm:$0xc] }
 0x3b6   : > { %7224 = vmatmul.bf16.gmra.mxu0 %v7128_v54  ;;  %v6533_v54 = vsel %vm13330_vm7, %v6531_v63, %v6532_v37  ;;  %v6641_v56 = vunpack.c.l.b16 %v6530_v45  ;;  %v6423_v63 = vld [vmem:[#allocation2 + $0x27c] sm:$0xf] }
 0x3b7   : > { %v4692_v2 = vpop.f32.mrf.mxu2  ;;  %v6642_v16 = vunpack.c.l.b16 %v6533_v54  ;;  %v6212_v55 = vpack.c.b16 %v6184_v18, %v6183_v29 }
 0x3b8   : > { %v4742_v36 = vadd.f32 %v4692_v2, %v4284_v59  ;;  %v5150_v12 = vpop.f32.mrf.mxu3  ;;  %v6989_v59 = vsel %vm13330_vm7, %v11906_v39, %v6988_v0  ;;  %v12593_v39 = vld [vmem:[#allocation2 + $0x258] sm:$0xff] }
 0x3b9   : > { %v4236_v10 = vpop.f32.mrf.mxu1  ;;  %v7100_v38 = vunpack.c.l.b16 %v6989_v59  ;;  %v6424_v59 = vld [vmem:[#allocation2 + $0x280] sm:$0x3] }
 0x3ba   : > { %v5200_v40 = vadd.f32 %v5150_v12, %v4742_v36  ;;  %v4285_v14 = vadd.f32 %v4236_v10, %v13995_v31  ;;  %v5965_v31 = vld [vmem:[#allocation2 + $0x278] sm:$0xf]  ;;  %v6670_v36 = vpack.c.b16 %v6642_v16, %v6641_v56  ;;  %v5964_v10 = vld [vmem:[#allocation2 + $0x274] sm:$0x8]  ;;  %v6081_v56 = vrot.slane %v5966_v13, 7 }
 0x3bb   : > { %v5610_v3 = vpop.f32.mrf.mxu0  ;;  %v6078_v33 = vrot.slane %v5965_v31, 7  ;;  %v7129_v12 = vpack.c.b16 %v7101_v57, %v7100_v38  ;;  %v6539_v57 = vrot.slane %v6424_v59, 6  ;;  %v11907_v31 = vrot.slane %v6881_v27, 10 }
 0x3bc   : > { %v14280_v21 = vadd.f32 %v5608_v61, %v5200_v40  ;;  %v6536_v61 = vrot.slane %v6423_v63, 6  ;;  %v6422_v40 = vld [vmem:[#allocation2 + $0x278] sm:$0xc]  ;;  %v6998_v63 = vrot.slane %v6883_v46, 6 }
 0x3bd   : > { %v6080_v29 = vrot.slane %v6078_v33, 4  ;;  %v11859_v16 = vrot.slane %v6422_v40, 10  ;;  %v6996_v13 = vsel %vm13330_vm7, %v11907_v31, %v6995_v15 }
 0x3be   : > { %v6538_v38 = vrot.slane %v6536_v61, 4 }
 0x3bf   : > { %v4694_v37 = vpop.f32.mrf.mxu2 }
 0x3c0   : > { %v4743_v0 = vadd.f32 %v4694_v37, %v4285_v14  ;;  %v5152_v7 = vpop.f32.mrf.mxu3  ;;  %v11811_v14 = vrot.slane %v5964_v10, 11 }
 0x3c1   : > { %v4239_v2 = vpop.f32.mrf.mxu1 }
 0x3c2   : > { %v5201_v22 = vadd.f32 %v5152_v7, %v4743_v0  ;;  %v4286_v45 = vadd.f32 %v4239_v2, %v14010_v30  ;;  %v6997_v30 = vrot.slane %v6995_v15, 4  ;;  %v6540_v2 = vsel %vm13330_vm7, %v6538_v38, %v6539_v57  ;;  %v12594_v57 = vld [vmem:[#allocation2 + $0x274] sm:$0xff] }
 0x3c3   : > { %v5613_v54 = vpop.f32.mrf.mxu0  ;;  %v6644_v27 = vunpack.c.l.b16 %v6540_v2  ;;  %v6427_v2 = vld [vmem:[#allocation2 + $0x29c] sm:$0x3] }
 0x3c4   : > { %5854 = vmatmul.bf16.gmra.mxu1 %v12593_v39  ;;  %6312 = vmatmul.bf16.gmra.mxu2 %v6212_v55  ;;  %v14283_v18 = vadd.f32 %v5610_v3, %v5201_v22  ;;  %v6079_v39 = vsel %vm13334_vm8, %v11811_v14, %v6078_v33  ;;  %v6082_v3 = vsel %vm13334_vm8, %v6080_v29, %v6081_v56  ;;  %v5968_v14 = vld [vmem:[#allocation2 + $0x294] sm:$0xf]  ;;  %v6426_v29 = vld [vmem:[#allocation2 + $0x298] sm:$0xf] }
 0x3c5   : > { %6770 = vmatmul.bf16.gmra.mxu3 %v6670_v36  ;;  %v6537_v55 = vsel %vm13330_vm7, %v11859_v16, %v6536_v61  ;;  %v6999_v22 = vsel %vm13330_vm7, %v6997_v30, %v6998_v63  ;;  %v6185_v33 = vunpack.c.l.b16 %v6079_v39  ;;  %v7102_v61 = vunpack.c.l.b16 %v6996_v13  ;;  %v6885_v16 = vld [vmem:[#allocation2 + $0x334] sm:$0xf]  ;;  %v5967_v63 = vld [vmem:[#allocation2 + $0x290] sm:$0x8] }
 0x3c6   : > { %7229 = vmatmul.bf16.gmra.mxu0 %v7129_v12  ;;  %v6643_v59 = vunpack.c.l.b16 %v6537_v55  ;;  %v7103_v46 = vunpack.c.l.b16 %v6999_v22  ;;  %v6085_v15 = vrot.slane %v5968_v14, 7  ;;  %v6425_v55 = vld [vmem:[#allocation2 + $0x294] sm:$0xc]  ;;  %v6884_v13 = vld [vmem:[#allocation2 + $0x330] sm:$0xc] }
 0x3c7   : > { %v4697_v37 = vpop.f32.mrf.mxu2  ;;  %v6886_v22 = vld [vmem:[#allocation2 + $0x338] sm:$0x3]  ;;  %v12666_v14 = vld [vmem:[#allocation4 + $0x4a0] sm:$0xff] }
 0x3c8   : > { %v4744_v0 = vadd.f32 %v4697_v37, %v4286_v45  ;;  %v5155_v51 = vpop.f32.mrf.mxu3  ;;  %v6186_v45 = vunpack.c.l.b16 %v6082_v3  ;;  %v7130_v30 = vpack.c.b16 %v7103_v46, %v7102_v61  ;;  %v6546_v46 = vrot.slane %v6427_v2, 6  ;;  %7949 = vmatpush.bf16.msrb.mxu2 %v12666_v14  ;;  %v12682_v2 = vld [vmem:[#allocation4 + $0x520] sm:$0xff] }
 0x3c9   : > { %v4241_v7 = vpop.f32.mrf.mxu1  ;;  %8866 = vmatpush.bf16.msrb.mxu0 %v12682_v2  ;;  %v6888_v14 = vld [vmem:[#allocation2 + $0x350] sm:$0xf]  ;;  %v6889_v2 = vld [vmem:[#allocation2 + $0x354] sm:$0x3] }
 0x3ca   : > { %v5202_v36 = vadd.f32 %v5155_v51, %v4744_v0  ;;  %v4287_v12 = vadd.f32 %v4241_v7, %v14013_v4  ;;  %v6213_v37 = vpack.c.b16 %v6186_v45, %v6185_v33  ;;  %v6671_v0 = vpack.c.b16 %v6644_v27, %v6643_v59  ;;  %v5969_v51 = vld [vmem:[#allocation2 + $0x298] sm:$0x7] }
 0x3cb   : > { %v5615_v10 = vpop.f32.mrf.mxu0  ;;  %v6087_v33 = vrot.slane %v6085_v15, 4  ;;  %v6088_v59 = vrot.slane %v5969_v51, 7  ;;  %v11860_v27 = vrot.slane %v6425_v55, 10 }
 0x3cc   : > { %v14298_v40 = vadd.f32 %v5613_v54, %v5202_v36  ;;  %v6543_v54 = vrot.slane %v6426_v29, 6  ;;  %v7002_v36 = vrot.slane %v6885_v16, 6  ;;  %v11908_v29 = vrot.slane %v6884_v13, 10 }
 0x3ce   : > { %v6545_v61 = vrot.slane %v6543_v54, 4 }
 0x3cf   : > { %v4699_v56 = vpop.f32.mrf.mxu2 }
 0x3d0   : > { %v4745_v4 = vadd.f32 %v4699_v56, %v4287_v12  ;;  %v5157_v38 = vpop.f32.mrf.mxu3  ;;  %v11812_v12 = vrot.slane %v5967_v63, 11  ;;  %v7004_v56 = vrot.slane %v7002_v36, 4 }
 0x3d1   : > { %v4244_v31 = vpop.f32.mrf.mxu1 }
 0x3d2   : > { %v5203_v7 = vadd.f32 %v5157_v38, %v4745_v4  ;;  %v4288_v39 = vadd.f32 %v4244_v31, %v14028_v42  ;;  %v12674_v42 = vld [vmem:[#allocation4 + $0x4e0] sm:$0xff]  ;;  %v7005_v4 = vrot.slane %v6886_v22, 6  ;;  %v6089_v31 = vsel %vm13334_vm8, %v6087_v33, %v6088_v59 }
 0x3d3   : > { %v5618_v3 = vpop.f32.mrf.mxu0  ;;  %8408 = vmatpush.bf16.msrb.mxu3 %v12674_v42  ;;  %v6188_v22 = vunpack.c.l.b16 %v6089_v31 }
 0x3d4   : > { %5859 = vmatmul.bf16.gmra.mxu1 %v12594_v57  ;;  %6317 = vmatmul.bf16.gmra.mxu2 %v6213_v37  ;;  %v14301_v45 = vadd.f32 %v5615_v10, %v5203_v7  ;;  %v6086_v10 = vsel %vm13334_vm8, %v11812_v12, %v6085_v15  ;;  %v7006_v55 = vsel %vm13330_vm7, %v7004_v56, %v7005_v4  ;;  %v12642_v15 = vld [vmem:[#allocation4 + $0x460] sm:$0xff] }
 0x3d5   : > { %6775 = vmatmul.bf16.gmra.mxu3 %v6671_v0  ;;  %v6544_v0 = vsel %vm13330_vm7, %v11860_v27, %v6543_v54  ;;  %v6187_v13 = vunpack.c.l.b16 %v6086_v10  ;;  %7667 = vmatpush.bf16.msrb.mxu1 %v12642_v15  ;;  %v7105_v27 = vunpack.c.l.b16 %v7006_v55  ;;  %v5972_v10 = vld [vmem:[#allocation2 + $0x2b4] sm:$0x7]  ;;  %v7009_v55 = vrot.slane %v6888_v14, 6  ;;  %v6887_v15 = vld [vmem:[#allocation2 + $0x34c] sm:$0xc] }
 0x3d6   : > { %7234 = vmatmul.bf16.gmra.mxu0 %v7130_v30  ;;  %v6547_v30 = vsel %vm13330_vm7, %v6545_v61, %v6546_v46  ;;  %v6645_v12 = vunpack.c.l.b16 %v6544_v0  ;;  %v6429_v61 = vld [vmem:[#allocation2 + $0x2b4] sm:$0xf] }
 0x3d7   : > { %v4702_v16 = vpop.f32.mrf.mxu2  ;;  %v6646_v33 = vunpack.c.l.b16 %v6547_v30  ;;  %v6214_v56 = vpack.c.b16 %v6188_v22, %v6187_v13 }
 0x3d8   : > { %v4746_v38 = vadd.f32 %v4702_v16, %v4288_v39  ;;  %v5160_v57 = vpop.f32.mrf.mxu3  ;;  %v7003_v39 = vsel %vm13330_vm7, %v11908_v29, %v7002_v36  ;;  %v12595_v29 = vld [vmem:[#allocation2 + $0x290] sm:$0xff] }
 0x3d9   : > { %v4246_v37 = vpop.f32.mrf.mxu1  ;;  %v7104_v59 = vunpack.c.l.b16 %v7003_v39  ;;  %v6430_v39 = vld [vmem:[#allocation2 + $0x2b8] sm:$0x3] }
 0x3da   : > { %v5204_v63 = vadd.f32 %v5160_v57, %v4746_v38  ;;  %v4289_v51 = vadd.f32 %v4246_v37, %v14031_v19  ;;  %v5971_v19 = vld [vmem:[#allocation2 + $0x2b0] sm:$0xf]  ;;  %v6672_v38 = vpack.c.b16 %v6646_v33, %v6645_v12  ;;  %v5970_v37 = vld [vmem:[#allocation2 + $0x2ac] sm:$0x8]  ;;  %v6095_v12 = vrot.slane %v5972_v10, 7 }
 0x3db   : > { %v5620_v7 = vpop.f32.mrf.mxu0  ;;  %v6092_v4 = vrot.slane %v5971_v19, 7  ;;  %v7131_v57 = vpack.c.b16 %v7105_v27, %v7104_v59  ;;  %v6553_v27 = vrot.slane %v6430_v39, 6  ;;  %v11909_v19 = vrot.slane %v6887_v15, 10 }
 0x3dc   : > { %v14316_v54 = vadd.f32 %v5618_v3, %v5204_v63  ;;  %v6550_v3 = vrot.slane %v6429_v61, 6  ;;  %v6428_v63 = vld [vmem:[#allocation2 + $0x2b0] sm:$0xc]  ;;  %v7012_v61 = vrot.slane %v6889_v2, 6 }
 0x3dd   : > { %v6094_v13 = vrot.slane %v6092_v4, 4  ;;  %v11861_v33 = vrot.slane %v6428_v63, 10  ;;  %v7010_v10 = vsel %vm13330_vm7, %v11909_v19, %v7009_v55 }
 0x3de   : > { %v6552_v59 = vrot.slane %v6550_v3, 4 }
 0x3df   : > { %v4704_v46 = vpop.f32.mrf.mxu2 }
 0x3e0   : > { %v4747_v36 = vadd.f32 %v4704_v46, %v4289_v51  ;;  %v5162_v42 = vpop.f32.mrf.mxu3  ;;  %v11813_v51 = vrot.slane %v5970_v37, 11 }
 0x3e1   : > { %v4249_v16 = vpop.f32.mrf.mxu1 }
 0x3e2   : > { %v5205_v31 = vadd.f32 %v5162_v42, %v4747_v36  ;;  %v4290_v0 = vadd.f32 %v4249_v16, %v14046_v49  ;;  %v7011_v49 = vrot.slane %v7009_v55, 4  ;;  %v6554_v16 = vsel %vm13330_vm7, %v6552_v59, %v6553_v27  ;;  %v12596_v27 = vld [vmem:[#allocation2 + $0x2ac] sm:$0xff] }
 0x3e3   : > { %v5623_v30 = vpop.f32.mrf.mxu0  ;;  %v6648_v15 = vunpack.c.l.b16 %v6554_v16  ;;  %v6431_v16 = vld [vmem:[#allocation2 + $0x2cc] sm:$0xc] }
 0x3e4   : > { %5864 = vmatmul.bf16.gmra.mxu1 %v12595_v29  ;;  %6322 = vmatmul.bf16.gmra.mxu2 %v6214_v56  ;;  %v14319_v22 = vadd.f32 %v5620_v7, %v5205_v31  ;;  %v6093_v29 = vsel %vm13334_vm8, %v11813_v51, %v6092_v4  ;;  %v6096_v7 = vsel %vm13334_vm8, %v6094_v13, %v6095_v12  ;;  %v5974_v51 = vld [vmem:[#allocation2 + $0x2cc] sm:$0xf]  ;;  %v6432_v13 = vld [vmem:[#allocation2 + $0x2d0] sm:$0xf] }
 0x3e5   : > { %6780 = vmatmul.bf16.gmra.mxu3 %v6672_v38  ;;  %v6551_v56 = vsel %vm13330_vm7, %v11861_v33, %v6550_v3  ;;  %v7013_v31 = vsel %vm13330_vm7, %v7011_v49, %v7012_v61  ;;  %v6189_v4 = vunpack.c.l.b16 %v6093_v29  ;;  %v7106_v3 = vunpack.c.l.b16 %v7010_v10  ;;  %v6891_v33 = vld [vmem:[#allocation2 + $0x36c] sm:$0xf]  ;;  %v5973_v61 = vld [vmem:[#allocation2 + $0x2c8] sm:$0x8]  ;;  %v15183_v29 = vld [vmem:[#allocation18_spill] sm:$0xff] }
 0x3e6   : > { %7239 = vmatmul.bf16.gmra.mxu0 %v7131_v57  ;;  %v6647_v39 = vunpack.c.l.b16 %v6551_v56  ;;  %v7107_v2 = vunpack.c.l.b16 %v7013_v31  ;;  %v6099_v55 = vrot.slane %v5974_v51, 7  ;;  %v7016_v10 = vrot.slane %v6891_v33, 6  ;;  %v6890_v31 = vld [vmem:[#allocation2 + $0x368] sm:$0xc] }
 0x3e7   : > { %v4707_v46 = vpop.f32.mrf.mxu2  ;;  %v12665_v51 = vld [vmem:[#allocation4 + $0x498] sm:$0xff] }
 0x3e8   : > { %v4748_v36 = vadd.f32 %v4707_v46, %v4290_v0  ;;  %v5165_v14 = vpop.f32.mrf.mxu3  ;;  %v6190_v0 = vunpack.c.l.b16 %v6096_v7  ;;  %v7132_v49 = vpack.c.b16 %v7107_v2, %v7106_v3  ;;  %7950 = vmatpush.bf16.msrb.mxu2 %v12665_v51  ;;  %v6894_v51 = vld [vmem:[#allocation2 + $0x388] sm:$0xf] }
 0x3e9   : > { %v4251_v42 = vpop.f32.mrf.mxu1 }
 0x3ea   : > { %v5206_v38 = vadd.f32 %v5165_v14, %v4748_v36  ;;  %v4291_v57 = vadd.f32 %v4251_v42, %v14049_v60  ;;  %v6215_v46 = vpack.c.b16 %v6190_v0, %v6189_v4  ;;  %v6673_v36 = vpack.c.b16 %v6648_v15, %v6647_v39  ;;  %v5975_v14 = vld [vmem:[#allocation2 + $0x2d0] sm:$0x7] }
 0x3eb   : > { %v5625_v37 = vpop.f32.mrf.mxu0  ;;  %v6101_v4 = vrot.slane %v6099_v55, 4  ;;  %v6102_v39 = vrot.slane %v5975_v14, 7  ;;  %v11862_v15 = vrot.slane %v6431_v16, 10  ;;  %v12681_v16 = vld [vmem:[#allocation4 + $0x518] sm:$0xff] }
 0x3ec   : > { %v14334_v63 = vadd.f32 %v5623_v30, %v5206_v38  ;;  %v6557_v30 = vrot.slane %v6432_v13, 6  ;;  %v6433_v38 = vld [vmem:[#allocation2 + $0x2d4] sm:$0x3]  ;;  %v12673_v13 = vld [vmem:[#allocation4 + $0x4d8] sm:$0xff]  ;;  %8867 = vmatpush.bf16.msrb.mxu0 %v12681_v16 }
 0x3ed   : > { %v6560_v2 = vrot.slane %v6433_v38, 6  ;;  %8409 = vmatpush.bf16.msrb.mxu3 %v12673_v13  ;;  %v6895_v16 = vld [vmem:[#allocation2 + $0x38c] sm:$0x3] }
 0x3ee   : > { %15182 = vst [vmem:[#allocation19_spill] sm:$0xff] %v14334_v63  ;;  %v6892_v63 = vld [vmem:[#allocation2 + $0x370] sm:$0x3]  ;;  %v6559_v3 = vrot.slane %v6557_v30, 4 }
 0x3ef   : > { %v4709_v12 = vpop.f32.mrf.mxu2 }
 0x3f0   : > { %v4749_v60 = vadd.f32 %v4709_v12, %v4291_v57  ;;  %v5167_v59 = vpop.f32.mrf.mxu3  ;;  %v11814_v57 = vrot.slane %v5973_v61, 11  ;;  %v11910_v12 = vrot.slane %v6890_v31, 10  ;;  %v6561_v61 = vsel %vm13330_vm7, %v6559_v3, %v6560_v2  ;;  %v6435_v3 = vld [vmem:[#allocation2 + $0x2ec] sm:$0xf] }
 0x3f1   : > { %v4254_v19 = vpop.f32.mrf.mxu1 }
 0x3f2   : > { %v5207_v42 = vadd.f32 %v5167_v59, %v4749_v60  ;;  %v4292_v7 = vadd.f32 %v4254_v19, %v15183_v29  ;;  %v7018_v60 = vrot.slane %v7016_v10, 4  ;;  %v7019_v59 = vrot.slane %v6892_v63, 6 }
 0x3f3   : > { %v5628_v56 = vpop.f32.mrf.mxu0  ;;  %v7017_v29 = vsel %vm13330_vm7, %v11910_v12, %v7016_v10  ;;  %v12597_v12 = vld [vmem:[#allocation2 + $0x2c8] sm:$0xff] }
 0x3f4   : > { %5869 = vmatmul.bf16.gmra.mxu1 %v12596_v27  ;;  %6327 = vmatmul.bf16.gmra.mxu2 %v6215_v46  ;;  %v14337_v0 = vadd.f32 %v5625_v37, %v5207_v42  ;;  %v6100_v37 = vsel %vm13334_vm8, %v11814_v57, %v6099_v55  ;;  %v12641_v55 = vld [vmem:[#allocation4 + $0x458] sm:$0xff] }
 0x3f5   : > { %6785 = vmatmul.bf16.gmra.mxu3 %v6673_v36  ;;  %v6103_v36 = vsel %vm13334_vm8, %v6101_v4, %v6102_v39  ;;  %v6191_v38 = vunpack.c.l.b16 %v6100_v37  ;;  %7668 = vmatpush.bf16.msrb.mxu1 %v12641_v55  ;;  %v6650_v4 = vunpack.c.l.b16 %v6561_v61  ;;  %v7108_v39 = vunpack.c.l.b16 %v7017_v29  ;;  %v5978_v37 = vld [vmem:[#allocation2 + $0x2ec] sm:$0x7]  ;;  %v6436_v29 = vld [vmem:[#allocation2 + $0x2f0] sm:$0x3]  ;;  %v6893_v55 = vld [vmem:[#allocation2 + $0x384] sm:$0xc] }
 0x3f6   : > { %7244 = vmatmul.bf16.gmra.mxu0 %v7132_v49  ;;  %v6558_v49 = vsel %vm13330_vm7, %v11862_v15, %v6557_v30  ;;  %v6192_v31 = vunpack.c.l.b16 %v6103_v36 }
 0x3f7   : > { %v4712_v33 = vpop.f32.mrf.mxu2  ;;  %v6649_v57 = vunpack.c.l.b16 %v6558_v49 }
 0x3f8   : > { %v4750_v27 = vadd.f32 %v4712_v33, %v4292_v7  ;;  %v5170_v46 = vpop.f32.mrf.mxu3  ;;  %v7020_v7 = vsel %vm13330_vm7, %v7018_v60, %v7019_v59  ;;  %v6216_v60 = vpack.c.b16 %v6192_v31, %v6191_v38 }
 0x3f9   : > { %v4256_v19 = vpop.f32.mrf.mxu1  ;;  %v7109_v15 = vunpack.c.l.b16 %v7020_v7  ;;  %v7023_v7 = vrot.slane %v6894_v51, 6 }
 0x3fa   : > { %v5208_v14 = vadd.f32 %v5170_v46, %v4750_v27  ;;  %v4293_v63 = vadd.f32 %v4256_v19, %v14067_v32  ;;  %v5977_v32 = vld [vmem:[#allocation2 + $0x2e8] sm:$0xf]  ;;  %v6674_v27 = vpack.c.b16 %v6650_v4, %v6649_v57  ;;  %v5976_v19 = vld [vmem:[#allocation2 + $0x2e4] sm:$0x8]  ;;  %v6109_v57 = vrot.slane %v5978_v37, 7 }
 0x3fb   : > { %v5630_v42 = vpop.f32.mrf.mxu0  ;;  %v6106_v59 = vrot.slane %v5977_v32, 7  ;;  %v7133_v46 = vpack.c.b16 %v7109_v15, %v7108_v39  ;;  %v6567_v15 = vrot.slane %v6436_v29, 6  ;;  %v11911_v32 = vrot.slane %v6893_v55, 10 }
 0x3fc   : > { %v14352_v30 = vadd.f32 %v5628_v56, %v5208_v14  ;;  %v6564_v56 = vrot.slane %v6435_v3, 6  ;;  %v6434_v14 = vld [vmem:[#allocation2 + $0x2e8] sm:$0xc]  ;;  %v7026_v3 = vrot.slane %v6895_v16, 6 }
 0x3fd   : > { %v6108_v38 = vrot.slane %v6106_v59, 4  ;;  %v11863_v4 = vrot.slane %v6434_v14, 10  ;;  %v7024_v37 = vsel %vm13330_vm7, %v11911_v32, %v7023_v7 }
 0x3fe   : > { %v6566_v39 = vrot.slane %v6564_v56, 4 }
 0x3ff   : > { %v4714_v2 = vpop.f32.mrf.mxu2 }
 0x400   : > { %v4751_v10 = vadd.f32 %v4714_v2, %v4293_v63  ;;  %v5172_v13 = vpop.f32.mrf.mxu3  ;;  %v11815_v63 = vrot.slane %v5976_v19, 11 }
 0x401   : > { %v4259_v33 = vpop.f32.mrf.mxu1 }
 0x402   : > { %v5209_v36 = vadd.f32 %v5172_v13, %v4751_v10  ;;  %v4294_v49 = vadd.f32 %v4259_v33, %v14082_v44  ;;  %v7025_v44 = vrot.slane %v7023_v7, 4  ;;  %v6568_v33 = vsel %vm13330_vm7, %v6566_v39, %v6567_v15  ;;  %v12598_v15 = vld [vmem:[#allocation2 + $0x2e4] sm:$0xff] }
 0x403   : > { %v5633_v61 = vpop.f32.mrf.mxu0  ;;  %v6652_v55 = vunpack.c.l.b16 %v6568_v33  ;;  %v6439_v33 = vld [vmem:[#allocation2 + $0x30c] sm:$0x3] }
 0x404   : > { %5874 = vmatmul.bf16.gmra.mxu1 %v12597_v12  ;;  %6332 = vmatmul.bf16.gmra.mxu2 %v6216_v60  ;;  %v14355_v31 = vadd.f32 %v5630_v42, %v5209_v36  ;;  %v6107_v12 = vsel %vm13334_vm8, %v11815_v63, %v6106_v59  ;;  %v6110_v42 = vsel %vm13334_vm8, %v6108_v38, %v6109_v57  ;;  %v5980_v63 = vld [vmem:[#allocation2 + $0x304] sm:$0xf]  ;;  %v6438_v38 = vld [vmem:[#allocation2 + $0x308] sm:$0xf] }
 0x405   : > { %6790 = vmatmul.bf16.gmra.mxu3 %v6674_v27  ;;  %v6565_v60 = vsel %vm13330_vm7, %v11863_v4, %v6564_v56  ;;  %v7027_v36 = vsel %vm13330_vm7, %v7025_v44, %v7026_v3  ;;  %v6193_v59 = vunpack.c.l.b16 %v6107_v12  ;;  %v7110_v56 = vunpack.c.l.b16 %v7024_v37  ;;  %v6897_v4 = vld [vmem:[#allocation2 + $0x3a4] sm:$0xf]  ;;  %v5979_v3 = vld [vmem:[#allocation2 + $0x300] sm:$0x8] }
 0x406   : > { %7249 = vmatmul.bf16.gmra.mxu0 %v7133_v46  ;;  %v6651_v29 = vunpack.c.l.b16 %v6565_v60  ;;  %v7111_v16 = vunpack.c.l.b16 %v7027_v36  ;;  %v6113_v7 = vrot.slane %v5980_v63, 7  ;;  %v6437_v60 = vld [vmem:[#allocation2 + $0x304] sm:$0xc]  ;;  %v6896_v37 = vld [vmem:[#allocation2 + $0x3a0] sm:$0xc] }
 0x407   : > { %v4717_v2 = vpop.f32.mrf.mxu2  ;;  %v6898_v36 = vld [vmem:[#allocation2 + $0x3a8] sm:$0x3]  ;;  %v12664_v63 = vld [vmem:[#allocation4 + $0x490] sm:$0xff] }
 0x408   : > { %v4752_v10 = vadd.f32 %v4717_v2, %v4294_v49  ;;  %v5175_v51 = vpop.f32.mrf.mxu3  ;;  %v6194_v49 = vunpack.c.l.b16 %v6110_v42  ;;  %v7134_v44 = vpack.c.b16 %v7111_v16, %v7110_v56  ;;  %v6574_v16 = vrot.slane %v6439_v33, 6  ;;  %7951 = vmatpush.bf16.msrb.mxu2 %v12664_v63  ;;  %v12680_v33 = vld [vmem:[#allocation4 + $0x510] sm:$0xff] }
 0x409   : > { %v4261_v13 = vpop.f32.mrf.mxu1  ;;  %8868 = vmatpush.bf16.msrb.mxu0 %v12680_v33  ;;  %v6900_v63 = vld [vmem:[#allocation2 + $0x3c0] sm:$0xf]  ;;  %v6901_v33 = vld [vmem:[#allocation2 + $0x3c4] sm:$0x3] }
 0x40a   : > { %v5210_v27 = vadd.f32 %v5175_v51, %v4752_v10  ;;  %v4295_v46 = vadd.f32 %v4261_v13, %v14085_v35  ;;  %v6217_v2 = vpack.c.b16 %v6194_v49, %v6193_v59  ;;  %v6675_v10 = vpack.c.b16 %v6652_v55, %v6651_v29  ;;  %v5981_v51 = vld [vmem:[#allocation2 + $0x308] sm:$0x7] }
 0x40b   : > { %v5635_v19 = vpop.f32.mrf.mxu0  ;;  %v6115_v59 = vrot.slane %v6113_v7, 4  ;;  %v6116_v29 = vrot.slane %v5981_v51, 7  ;;  %v11864_v55 = vrot.slane %v6437_v60, 10 }
 0x40c   : > { %v14370_v14 = vadd.f32 %v5633_v61, %v5210_v27  ;;  %v6571_v61 = vrot.slane %v6438_v38, 6  ;;  %v7030_v27 = vrot.slane %v6897_v4, 6  ;;  %v11912_v38 = vrot.slane %v6896_v37, 10 }
 0x40e   : > { %v6573_v56 = vrot.slane %v6571_v61, 4 }
 0x40f   : > { %v4719_v57 = vpop.f32.mrf.mxu2 }
 0x410   : > { %v4753_v35 = vadd.f32 %v4719_v57, %v4295_v46  ;;  %v5177_v39 = vpop.f32.mrf.mxu3  ;;  %v11816_v46 = vrot.slane %v5979_v3, 11  ;;  %v7032_v57 = vrot.slane %v7030_v27, 4 }
 0x411   : > { %v5840_v32 = vpop.f32.mrf.mxu1 }
 0x412   : > { %v5211_v13 = vadd.f32 %v5177_v39, %v4753_v35  ;;  %v5920_v12 = vadd.f32 %v5840_v32, %v14100_v52  ;;  %v12672_v52 = vld [vmem:[#allocation4 + $0x4d0] sm:$0xff]  ;;  %v7033_v35 = vrot.slane %v6898_v36, 6  ;;  %v6117_v32 = vsel %vm13334_vm8, %v6115_v59, %v6116_v29 }
 0x413   : > { %v7215_v42 = vpop.f32.mrf.mxu0  ;;  %8410 = vmatpush.bf16.msrb.mxu3 %v12672_v52  ;;  %v6196_v36 = vunpack.c.l.b16 %v6117_v32 }
 0x414   : > { %5879 = vmatmul.bf16.gmra.mxu1 %v12598_v15  ;;  %6337 = vmatmul.bf16.gmra.mxu2 %v6217_v2  ;;  %v14373_v49 = vadd.f32 %v5635_v19, %v5211_v13  ;;  %v6114_v19 = vsel %vm13334_vm8, %v11816_v46, %v6113_v7  ;;  %v7034_v60 = vsel %vm13330_vm7, %v7032_v57, %v7033_v35  ;;  %v12640_v7 = vld [vmem:[#allocation4 + $0x450] sm:$0xff] }
 0x415   : > { %6795 = vmatmul.bf16.gmra.mxu3 %v6675_v10  ;;  %v6572_v10 = vsel %vm13330_vm7, %v11864_v55, %v6571_v61  ;;  %v6195_v37 = vunpack.c.l.b16 %v6114_v19  ;;  %7669 = vmatpush.bf16.msrb.mxu1 %v12640_v7  ;;  %v7113_v55 = vunpack.c.l.b16 %v7034_v60  ;;  %v5984_v19 = vld [vmem:[#allocation2 + $0x324] sm:$0x7]  ;;  %v7037_v60 = vrot.slane %v6900_v63, 6  ;;  %v6899_v7 = vld [vmem:[#allocation2 + $0x3bc] sm:$0xc] }
 0x416   : > { %7254 = vmatmul.bf16.gmra.mxu0 %v7134_v44  ;;  %v6575_v44 = vsel %vm13330_vm7, %v6573_v56, %v6574_v16  ;;  %v6653_v46 = vunpack.c.l.b16 %v6572_v10  ;;  %v6441_v56 = vld [vmem:[#allocation2 + $0x324] sm:$0xf] }
 0x417   : > { %v6298_v4 = vpop.f32.mrf.mxu2  ;;  %v6654_v59 = vunpack.c.l.b16 %v6575_v44  ;;  %v6218_v57 = vpack.c.b16 %v6196_v36, %v6195_v37 }
 0x418   : > { %v6378_v39 = vadd.f32 %v6298_v4, %v5920_v12  ;;  %v6756_v15 = vpop.f32.mrf.mxu3  ;;  %v7031_v12 = vsel %vm13330_vm7, %v11912_v38, %v7030_v27  ;;  %v12599_v38 = vld [vmem:[#allocation2 + $0x300] sm:$0xff] }
 0x419   : > { %v5842_v2 = vpop.f32.mrf.mxu1  ;;  %v7112_v29 = vunpack.c.l.b16 %v7031_v12  ;;  %v6442_v12 = vld [vmem:[#allocation2 + $0x328] sm:$0x3] }
 0x41a   : > { %v6836_v3 = vadd.f32 %v6756_v15, %v6378_v39  ;;  %v5921_v51 = vadd.f32 %v5842_v2, %v14103_v50  ;;  %v5983_v50 = vld [vmem:[#allocation2 + $0x320] sm:$0xf]  ;;  %v6676_v39 = vpack.c.b16 %v6654_v59, %v6653_v46  ;;  %v5982_v2 = vld [vmem:[#allocation2 + $0x31c] sm:$0x8]  ;;  %v6123_v46 = vrot.slane %v5984_v19, 7 }
 0x41b   : > { %v7217_v13 = vpop.f32.mrf.mxu0  ;;  %v6120_v35 = vrot.slane %v5983_v50, 7  ;;  %v7135_v15 = vpack.c.b16 %v7113_v55, %v7112_v29  ;;  %v6581_v55 = vrot.slane %v6442_v12, 6  ;;  %v11913_v50 = vrot.slane %v6899_v7, 10 }
 0x41c   : > { %v14388_v61 = vadd.f32 %v7215_v42, %v6836_v3  ;;  %v6578_v42 = vrot.slane %v6441_v56, 6  ;;  %v6440_v3 = vld [vmem:[#allocation2 + $0x320] sm:$0xc]  ;;  %v7040_v56 = vrot.slane %v6901_v33, 6 }
 0x41d   : > { %v6122_v37 = vrot.slane %v6120_v35, 4  ;;  %v11865_v59 = vrot.slane %v6440_v3, 10  ;;  %v7038_v19 = vsel %vm13330_vm7, %v11913_v50, %v7037_v60 }
 0x41e   : > { %v6580_v29 = vrot.slane %v6578_v42, 4 }
 0x41f   : > { %v6300_v16 = vpop.f32.mrf.mxu2 }
 0x420   : > { %v6379_v27 = vadd.f32 %v6300_v16, %v5921_v51  ;;  %v6758_v52 = vpop.f32.mrf.mxu3  ;;  %v11817_v51 = vrot.slane %v5982_v2, 11 }
 0x421   : > { %v5845_v4 = vpop.f32.mrf.mxu1 }
 0x422   : > { %v6837_v32 = vadd.f32 %v6758_v52, %v6379_v27  ;;  %v5922_v10 = vadd.f32 %v5845_v4, %v14118_v8  ;;  %v7039_v8 = vrot.slane %v7037_v60, 4  ;;  %v6582_v4 = vsel %vm13330_vm7, %v6580_v29, %v6581_v55  ;;  %v12600_v55 = vld [vmem:[#allocation2 + $0x31c] sm:$0xff] }
 0x423   : > { %v7220_v44 = vpop.f32.mrf.mxu0  ;;  %v6656_v7 = vunpack.c.l.b16 %v6582_v4  ;;  %v6445_v4 = vld [vmem:[#allocation2 + $0x344] sm:$0x3] }
 0x424   : > { %5884 = vmatmul.bf16.gmra.mxu1 %v12599_v38  ;;  %6342 = vmatmul.bf16.gmra.mxu2 %v6218_v57  ;;  %v14391_v36 = vadd.f32 %v7217_v13, %v6837_v32  ;;  %v6121_v38 = vsel %vm13334_vm8, %v11817_v51, %v6120_v35  ;;  %v6124_v13 = vsel %vm13334_vm8, %v6122_v37, %v6123_v46  ;;  %v5986_v51 = vld [vmem:[#allocation2 + $0x33c] sm:$0xf]  ;;  %v6444_v37 = vld [vmem:[#allocation2 + $0x340] sm:$0xf] }
 0x425   : > { %6800 = vmatmul.bf16.gmra.mxu3 %v6676_v39  ;;  %v6579_v57 = vsel %vm13330_vm7, %v11865_v59, %v6578_v42  ;;  %v7041_v32 = vsel %vm13330_vm7, %v7039_v8, %v7040_v56  ;;  %v6197_v35 = vunpack.c.l.b16 %v6121_v38  ;;  %v7114_v42 = vunpack.c.l.b16 %v7038_v19  ;;  %v6903_v59 = vld [vmem:[#allocation2 + $0x3dc] sm:$0xf]  ;;  %v5985_v56 = vld [vmem:[#allocation2 + $0x338] sm:$0x8] }
 0x426   : > { %7259 = vmatmul.bf16.gmra.mxu0 %v7135_v15  ;;  %v6655_v12 = vunpack.c.l.b16 %v6579_v57  ;;  %v7115_v33 = vunpack.c.l.b16 %v7041_v32  ;;  %v6127_v60 = vrot.slane %v5986_v51, 7  ;;  %v6443_v57 = vld [vmem:[#allocation2 + $0x33c] sm:$0xc]  ;;  %v6902_v19 = vld [vmem:[#allocation2 + $0x3d8] sm:$0xc] }
 0x427   : > { %v6303_v16 = vpop.f32.mrf.mxu2  ;;  %v6904_v32 = vld [vmem:[#allocation2 + $0x3e0] sm:$0x3]  ;;  %v12663_v51 = vld [vmem:[#allocation4 + $0x488] sm:$0xff] }
 0x428   : > { %v6380_v27 = vadd.f32 %v6303_v16, %v5922_v10  ;;  %v6761_v63 = vpop.f32.mrf.mxu3  ;;  %v6198_v10 = vunpack.c.l.b16 %v6124_v13  ;;  %v7136_v8 = vpack.c.b16 %v7115_v33, %v7114_v42  ;;  %v6588_v33 = vrot.slane %v6445_v4, 6  ;;  %7952 = vmatpush.bf16.msrb.mxu2 %v12663_v51  ;;  %v12679_v4 = vld [vmem:[#allocation4 + $0x508] sm:$0xff] }
 0x429   : > { %v5847_v52 = vpop.f32.mrf.mxu1  ;;  %8869 = vmatpush.bf16.msrb.mxu0 %v12679_v4  ;;  %v6906_v51 = vld [vmem:[#allocation2 + $0x3f8] sm:$0xf]  ;;  %v6907_v4 = vld [vmem:[#allocation2 + $0x3fc] sm:$0x3] }
 0x42a   : > { %v6838_v39 = vadd.f32 %v6761_v63, %v6380_v27  ;;  %v5923_v15 = vadd.f32 %v5847_v52, %v14121_v23  ;;  %v6219_v16 = vpack.c.b16 %v6198_v10, %v6197_v35  ;;  %v6677_v27 = vpack.c.b16 %v6656_v7, %v6655_v12  ;;  %v5987_v63 = vld [vmem:[#allocation2 + $0x340] sm:$0x7] }
 0x42b   : > { %v7222_v2 = vpop.f32.mrf.mxu0  ;;  %v6129_v35 = vrot.slane %v6127_v60, 4  ;;  %v6130_v12 = vrot.slane %v5987_v63, 7  ;;  %v11866_v7 = vrot.slane %v6443_v57, 10 }
 0x42c   : > { %v14406_v3 = vadd.f32 %v7220_v44, %v6838_v39  ;;  %v6585_v44 = vrot.slane %v6444_v37, 6  ;;  %v7044_v39 = vrot.slane %v6903_v59, 6  ;;  %v11914_v37 = vrot.slane %v6902_v19, 10 }
 0x42e   : > { %v6587_v42 = vrot.slane %v6585_v44, 4 }
 0x42f   : > { %v6305_v46 = vpop.f32.mrf.mxu2 }
 0x430   : > { %v6381_v23 = vadd.f32 %v6305_v46, %v5923_v15  ;;  %v6763_v29 = vpop.f32.mrf.mxu3  ;;  %v11818_v15 = vrot.slane %v5985_v56, 11  ;;  %v7046_v46 = vrot.slane %v7044_v39, 4 }
 0x431   : > { %v5850_v50 = vpop.f32.mrf.mxu1 }
 0x432   : > { %v6839_v52 = vadd.f32 %v6763_v29, %v6381_v23  ;;  %v5924_v38 = vadd.f32 %v5850_v50, %v14136_v53  ;;  %v12671_v53 = vld [vmem:[#allocation4 + $0x4c8] sm:$0xff]  ;;  %v7047_v23 = vrot.slane %v6904_v32, 6  ;;  %v6131_v50 = vsel %vm13334_vm8, %v6129_v35, %v6130_v12 }
 0x433   : > { %v7225_v13 = vpop.f32.mrf.mxu0  ;;  %8411 = vmatpush.bf16.msrb.mxu3 %v12671_v53  ;;  %v6200_v32 = vunpack.c.l.b16 %v6131_v50 }
 0x434   : > { %5889 = vmatmul.bf16.gmra.mxu1 %v12600_v55  ;;  %6347 = vmatmul.bf16.gmra.mxu2 %v6219_v16  ;;  %v14409_v10 = vadd.f32 %v7222_v2, %v6839_v52  ;;  %v6128_v2 = vsel %vm13334_vm8, %v11818_v15, %v6127_v60  ;;  %v7048_v57 = vsel %vm13330_vm7, %v7046_v46, %v7047_v23  ;;  %v12639_v60 = vld [vmem:[#allocation4 + $0x448] sm:$0xff] }
 0x435   : > { %6805 = vmatmul.bf16.gmra.mxu3 %v6677_v27  ;;  %v6586_v27 = vsel %vm13330_vm7, %v11866_v7, %v6585_v44  ;;  %v6199_v19 = vunpack.c.l.b16 %v6128_v2  ;;  %7670 = vmatpush.bf16.msrb.mxu1 %v12639_v60  ;;  %v7117_v7 = vunpack.c.l.b16 %v7048_v57  ;;  %v5990_v2 = vld [vmem:[#allocation2 + $0x35c] sm:$0x7]  ;;  %v7051_v57 = vrot.slane %v6906_v51, 6  ;;  %v6905_v60 = vld [vmem:[#allocation2 + $0x3f4] sm:$0xc] }
 0x436   : > { %7264 = vmatmul.bf16.gmra.mxu0 %v7136_v8  ;;  %v6589_v8 = vsel %vm13330_vm7, %v6587_v42, %v6588_v33  ;;  %v6657_v15 = vunpack.c.l.b16 %v6586_v27  ;;  %v6447_v42 = vld [vmem:[#allocation2 + $0x35c] sm:$0xf] }
 0x437   : > { %v6308_v59 = vpop.f32.mrf.mxu2  ;;  %v6658_v35 = vunpack.c.l.b16 %v6589_v8  ;;  %v6220_v46 = vpack.c.b16 %v6200_v32, %v6199_v19 }
 0x438   : > { %v6382_v29 = vadd.f32 %v6308_v59, %v5924_v38  ;;  %v6766_v55 = vpop.f32.mrf.mxu3  ;;  %v7045_v38 = vsel %vm13330_vm7, %v11914_v37, %v7044_v39  ;;  %v12601_v37 = vld [vmem:[#allocation2 + $0x338] sm:$0xff] }
 0x439   : > { %v5852_v16 = vpop.f32.mrf.mxu1  ;;  %v7116_v12 = vunpack.c.l.b16 %v7045_v38  ;;  %v6448_v38 = vld [vmem:[#allocation2 + $0x360] sm:$0x3] }
 0x43a   : > { %v6840_v56 = vadd.f32 %v6766_v55, %v6382_v29  ;;  %v5925_v63 = vadd.f32 %v5852_v16, %v14139_v34  ;;  %v5989_v34 = vld [vmem:[#allocation2 + $0x358] sm:$0xf]  ;;  %v6678_v29 = vpack.c.b16 %v6658_v35, %v6657_v15  ;;  %v5988_v16 = vld [vmem:[#allocation2 + $0x354] sm:$0x8]  ;;  %v6137_v15 = vrot.slane %v5990_v2, 7 }
 0x43b   : > { %v7227_v52 = vpop.f32.mrf.mxu0  ;;  %v6134_v23 = vrot.slane %v5989_v34, 7  ;;  %v7137_v55 = vpack.c.b16 %v7117_v7, %v7116_v12  ;;  %v6595_v7 = vrot.slane %v6448_v38, 6  ;;  %v11915_v34 = vrot.slane %v6905_v60, 10 }
 0x43c   : > { %v14424_v44 = vadd.f32 %v7225_v13, %v6840_v56  ;;  %v6592_v13 = vrot.slane %v6447_v42, 6  ;;  %v6446_v56 = vld [vmem:[#allocation2 + $0x358] sm:$0xc]  ;;  %v7054_v42 = vrot.slane %v6907_v4, 6 }
 0x43d   : > { %v6136_v19 = vrot.slane %v6134_v23, 4  ;;  %v11867_v35 = vrot.slane %v6446_v56, 10  ;;  %v7052_v2 = vsel %vm13330_vm7, %v11915_v34, %v7051_v57 }
 0x43e   : > { %v6594_v12 = vrot.slane %v6592_v13, 4 }
 0x43f   : > { %v6310_v33 = vpop.f32.mrf.mxu2 }
 0x440   : > { %v6383_v39 = vadd.f32 %v6310_v33, %v5925_v63  ;;  %v6768_v53 = vpop.f32.mrf.mxu3  ;;  %v11819_v63 = vrot.slane %v5988_v16, 11 }
 0x441   : > { %v5855_v59 = vpop.f32.mrf.mxu1 }
 0x442   : > { %v6841_v50 = vadd.f32 %v6768_v53, %v6383_v39  ;;  %v5926_v27 = vadd.f32 %v5855_v59, %v14154_v25  ;;  %v7053_v25 = vrot.slane %v7051_v57, 4  ;;  %v6596_v59 = vsel %vm13330_vm7, %v6594_v12, %v6595_v7  ;;  %v12602_v7 = vld [vmem:[#allocation2 + $0x354] sm:$0xff] }
 0x443   : > { %v7230_v8 = vpop.f32.mrf.mxu0  ;;  %v6660_v60 = vunpack.c.l.b16 %v6596_v59  ;;  %v6451_v59 = vld [vmem:[#allocation2 + $0x37c] sm:$0x3] }
 0x444   : > { %5894 = vmatmul.bf16.gmra.mxu1 %v12601_v37  ;;  %6352 = vmatmul.bf16.gmra.mxu2 %v6220_v46  ;;  %v14427_v32 = vadd.f32 %v7227_v52, %v6841_v50  ;;  %v6135_v37 = vsel %vm13334_vm8, %v11819_v63, %v6134_v23  ;;  %v6138_v52 = vsel %vm13334_vm8, %v6136_v19, %v6137_v15  ;;  %v5992_v63 = vld [vmem:[#allocation2 + $0x374] sm:$0xf]  ;;  %v6450_v19 = vld [vmem:[#allocation2 + $0x378] sm:$0xf] }
 0x445   : > { %6810 = vmatmul.bf16.gmra.mxu3 %v6678_v29  ;;  %v6593_v46 = vsel %vm13330_vm7, %v11867_v35, %v6592_v13  ;;  %v7055_v50 = vsel %vm13330_vm7, %v7053_v25, %v7054_v42  ;;  %v6201_v23 = vunpack.c.l.b16 %v6135_v37  ;;  %v7118_v13 = vunpack.c.l.b16 %v7052_v2  ;;  %v6909_v35 = vld [vmem:[#allocation2 + $0x414] sm:$0xf]  ;;  %v5991_v42 = vld [vmem:[#allocation2 + $0x370] sm:$0x8] }
 0x446   : > { %7269 = vmatmul.bf16.gmra.mxu0 %v7137_v55  ;;  %v6659_v38 = vunpack.c.l.b16 %v6593_v46  ;;  %v7119_v4 = vunpack.c.l.b16 %v7055_v50  ;;  %v6141_v57 = vrot.slane %v5992_v63, 7  ;;  %v6449_v46 = vld [vmem:[#allocation2 + $0x374] sm:$0xc]  ;;  %v6908_v2 = vld [vmem:[#allocation2 + $0x410] sm:$0xc] }
 0x447   : > { %v6313_v33 = vpop.f32.mrf.mxu2  ;;  %v6910_v50 = vld [vmem:[#allocation2 + $0x418] sm:$0x3]  ;;  %v12662_v63 = vld [vmem:[#allocation4 + $0x480] sm:$0xff] }
 0x448   : > { %v6384_v39 = vadd.f32 %v6313_v33, %v5926_v27  ;;  %v6771_v51 = vpop.f32.mrf.mxu3  ;;  %v6202_v27 = vunpack.c.l.b16 %v6138_v52  ;;  %v7138_v25 = vpack.c.b16 %v7119_v4, %v7118_v13  ;;  %v6602_v4 = vrot.slane %v6451_v59, 6  ;;  %7953 = vmatpush.bf16.msrb.mxu2 %v12662_v63  ;;  %v12678_v59 = vld [vmem:[#allocation4 + $0x500] sm:$0xff] }
 0x449   : > { %v5857_v53 = vpop.f32.mrf.mxu1  ;;  %8870 = vmatpush.bf16.msrb.mxu0 %v12678_v59  ;;  %v6912_v63 = vld [vmem:[#allocation2 + $0x430] sm:$0xf]  ;;  %v6913_v59 = vld [vmem:[#allocation2 + $0x434] sm:$0x3] }
 0x44a   : > { %v6842_v29 = vadd.f32 %v6771_v51, %v6384_v39  ;;  %v5927_v55 = vadd.f32 %v5857_v53, %v14157_v11  ;;  %v6221_v33 = vpack.c.b16 %v6202_v27, %v6201_v23  ;;  %v6679_v39 = vpack.c.b16 %v6660_v60, %v6659_v38  ;;  %v5993_v51 = vld [vmem:[#allocation2 + $0x378] sm:$0x7] }
 0x44b   : > { %v7232_v16 = vpop.f32.mrf.mxu0  ;;  %v6143_v23 = vrot.slane %v6141_v57, 4  ;;  %v6144_v38 = vrot.slane %v5993_v51, 7  ;;  %v11868_v60 = vrot.slane %v6449_v46, 10 }
 0x44c   : > { %v14442_v56 = vadd.f32 %v7230_v8, %v6842_v29  ;;  %v6599_v8 = vrot.slane %v6450_v19, 6  ;;  %v7058_v29 = vrot.slane %v6909_v35, 6  ;;  %v11916_v19 = vrot.slane %v6908_v2, 10 }
 0x44e   : > { %v6601_v13 = vrot.slane %v6599_v8, 4 }
 0x44f   : > { %v6315_v15 = vpop.f32.mrf.mxu2 }
 0x450   : > { %v6385_v11 = vadd.f32 %v6315_v15, %v5927_v55  ;;  %v6773_v12 = vpop.f32.mrf.mxu3  ;;  %v11820_v55 = vrot.slane %v5991_v42, 11  ;;  %v7060_v15 = vrot.slane %v7058_v29, 4 }
 0x451   : > { %v5860_v34 = vpop.f32.mrf.mxu1 }
 0x452   : > { %v6843_v53 = vadd.f32 %v6773_v12, %v6385_v11  ;;  %v5928_v37 = vadd.f32 %v5860_v34, %v14172_v48  ;;  %v12670_v48 = vld [vmem:[#allocation4 + $0x4c0] sm:$0xff]  ;;  %v7061_v11 = vrot.slane %v6910_v50, 6  ;;  %v6145_v34 = vsel %vm13334_vm8, %v6143_v23, %v6144_v38 }
 0x453   : > { %v7235_v52 = vpop.f32.mrf.mxu0  ;;  %8412 = vmatpush.bf16.msrb.mxu3 %v12670_v48  ;;  %v6204_v50 = vunpack.c.l.b16 %v6145_v34 }
 0x454   : > { %5899 = vmatmul.bf16.gmra.mxu1 %v12602_v7  ;;  %6357 = vmatmul.bf16.gmra.mxu2 %v6221_v33  ;;  %v14445_v27 = vadd.f32 %v7232_v16, %v6843_v53  ;;  %v6142_v16 = vsel %vm13334_vm8, %v11820_v55, %v6141_v57  ;;  %v7062_v46 = vsel %vm13330_vm7, %v7060_v15, %v7061_v11  ;;  %v12638_v57 = vld [vmem:[#allocation4 + $0x440] sm:$0xff] }
 0x455   : > { %6815 = vmatmul.bf16.gmra.mxu3 %v6679_v39  ;;  %v6600_v39 = vsel %vm13330_vm7, %v11868_v60, %v6599_v8  ;;  %v6203_v2 = vunpack.c.l.b16 %v6142_v16  ;;  %7671 = vmatpush.bf16.msrb.mxu1 %v12638_v57  ;;  %v7121_v60 = vunpack.c.l.b16 %v7062_v46  ;;  %v5996_v16 = vld [vmem:[#allocation2 + $0x394] sm:$0x7]  ;;  %v7065_v46 = vrot.slane %v6912_v63, 6  ;;  %v6911_v57 = vld [vmem:[#allocation2 + $0x42c] sm:$0xc] }
 0x456   : > { %7274 = vmatmul.bf16.gmra.mxu0 %v7138_v25  ;;  %v6603_v25 = vsel %vm13330_vm7, %v6601_v13, %v6602_v4  ;;  %v6661_v55 = vunpack.c.l.b16 %v6600_v39  ;;  %v6453_v13 = vld [vmem:[#allocation2 + $0x394] sm:$0xf] }
 0x457   : > { %v6318_v35 = vpop.f32.mrf.mxu2  ;;  %v6662_v23 = vunpack.c.l.b16 %v6603_v25  ;;  %v6222_v15 = vpack.c.b16 %v6204_v50, %v6203_v2 }
 0x458   : > { %v6386_v12 = vadd.f32 %v6318_v35, %v5928_v37  ;;  %v6776_v7 = vpop.f32.mrf.mxu3  ;;  %v7059_v37 = vsel %vm13330_vm7, %v11916_v19, %v7058_v29  ;;  %v12603_v19 = vld [vmem:[#allocation2 + $0x370] sm:$0xff] }
 0x459   : > { %v5862_v33 = vpop.f32.mrf.mxu1  ;;  %v7120_v38 = vunpack.c.l.b16 %v7059_v37  ;;  %v6454_v37 = vld [vmem:[#allocation2 + $0x398] sm:$0x3] }
 0x45a   : > { %v6844_v42 = vadd.f32 %v6776_v7, %v6386_v12  ;;  %v5929_v51 = vadd.f32 %v5862_v33, %v14175_v5  ;;  %v5995_v5 = vld [vmem:[#allocation2 + $0x390] sm:$0xf]  ;;  %v6680_v12 = vpack.c.b16 %v6662_v23, %v6661_v55  ;;  %v5994_v33 = vld [vmem:[#allocation2 + $0x38c] sm:$0x8]  ;;  %v6151_v55 = vrot.slane %v5996_v16, 7 }
 0x45b   : > { %v7237_v53 = vpop.f32.mrf.mxu0  ;;  %v6148_v11 = vrot.slane %v5995_v5, 7  ;;  %v7139_v7 = vpack.c.b16 %v7121_v60, %v7120_v38  ;;  %v6609_v60 = vrot.slane %v6454_v37, 6  ;;  %v11917_v5 = vrot.slane %v6911_v57, 10 }
 0x45c   : > { %v14460_v8 = vadd.f32 %v7235_v52, %v6844_v42  ;;  %v6606_v52 = vrot.slane %v6453_v13, 6  ;;  %v6452_v42 = vld [vmem:[#allocation2 + $0x390] sm:$0xc]  ;;  %v7068_v13 = vrot.slane %v6913_v59, 6 }
 0x45d   : > { %v6150_v2 = vrot.slane %v6148_v11, 4  ;;  %v11869_v23 = vrot.slane %v6452_v42, 10  ;;  %v7066_v16 = vsel %vm13330_vm7, %v11917_v5, %v7065_v46 }
 0x45e   : > { %v6608_v38 = vrot.slane %v6606_v52, 4 }
 0x45f   : > { %v6320_v4 = vpop.f32.mrf.mxu2 }
 0x460   : > { %v6387_v29 = vadd.f32 %v6320_v4, %v5929_v51  ;;  %v6778_v48 = vpop.f32.mrf.mxu3  ;;  %v11821_v51 = vrot.slane %v5994_v33, 11 }
 0x461   : > { %v5865_v35 = vpop.f32.mrf.mxu1 }
 0x462   : > { %v6845_v34 = vadd.f32 %v6778_v48, %v6387_v29  ;;  %v5930_v39 = vadd.f32 %v5865_v35, %v14190_v41  ;;  %v7067_v41 = vrot.slane %v7065_v46, 4  ;;  %v6610_v35 = vsel %vm13330_vm7, %v6608_v38, %v6609_v60  ;;  %v12604_v60 = vld [vmem:[#allocation2 + $0x38c] sm:$0xff] }
 0x463   : > { %v7240_v25 = vpop.f32.mrf.mxu0  ;;  %v6664_v57 = vunpack.c.l.b16 %v6610_v35  ;;  %v6457_v35 = vld [vmem:[#allocation2 + $0x3b4] sm:$0x3] }
 0x464   : > { %5904 = vmatmul.bf16.gmra.mxu1 %v12603_v19  ;;  %6362 = vmatmul.bf16.gmra.mxu2 %v6222_v15  ;;  %v14463_v50 = vadd.f32 %v7237_v53, %v6845_v34  ;;  %v6149_v19 = vsel %vm13334_vm8, %v11821_v51, %v6148_v11  ;;  %v6152_v53 = vsel %vm13334_vm8, %v6150_v2, %v6151_v55  ;;  %v5998_v51 = vld [vmem:[#allocation2 + $0x3ac] sm:$0xf]  ;;  %v6456_v2 = vld [vmem:[#allocation2 + $0x3b0] sm:$0xf] }
 0x465   : > { %6820 = vmatmul.bf16.gmra.mxu3 %v6680_v12  ;;  %v6607_v15 = vsel %vm13330_vm7, %v11869_v23, %v6606_v52  ;;  %v7069_v34 = vsel %vm13330_vm7, %v7067_v41, %v7068_v13  ;;  %v6205_v11 = vunpack.c.l.b16 %v6149_v19  ;;  %v7122_v52 = vunpack.c.l.b16 %v7066_v16  ;;  %v6915_v23 = vld [vmem:[#allocation2 + $0x44c] sm:$0xf]  ;;  %v5997_v13 = vld [vmem:[#allocation2 + $0x3a8] sm:$0x8] }
 0x466   : > { %7279 = vmatmul.bf16.gmra.mxu0 %v7139_v7  ;;  %v6663_v37 = vunpack.c.l.b16 %v6607_v15  ;;  %v7123_v59 = vunpack.c.l.b16 %v7069_v34  ;;  %v6155_v46 = vrot.slane %v5998_v51, 7  ;;  %v6455_v15 = vld [vmem:[#allocation2 + $0x3ac] sm:$0xc]  ;;  %v6914_v16 = vld [vmem:[#allocation2 + $0x448] sm:$0xc] }
 0x467   : > { %v6323_v4 = vpop.f32.mrf.mxu2  ;;  %v6916_v34 = vld [vmem:[#allocation2 + $0x450] sm:$0x3]  ;;  %v12717_v51 = vld [vmem:[#allocation4 + $0x5b8] sm:$0xff] }
 0x468   : > { %v6388_v29 = vadd.f32 %v6323_v4, %v5930_v39  ;;  %v6781_v63 = vpop.f32.mrf.mxu3  ;;  %v6206_v39 = vunpack.c.l.b16 %v6152_v53  ;;  %v7140_v41 = vpack.c.b16 %v7123_v59, %v7122_v52  ;;  %v6616_v59 = vrot.slane %v6457_v35, 6  ;;  %9636 = vmatpush.bf16.msra.mxu2 %v12717_v51  ;;  %v12733_v35 = vld [vmem:[#allocation4 + $0x638] sm:$0xff]  ;;  %v8527_v51 = vld [vmem:[#allocation2 + $0x354] sm:$0xf] }
 0x469   : > { %v5867_v48 = vpop.f32.mrf.mxu1  ;;  %10552 = vmatpush.bf16.msra.mxu0 %v12733_v35  ;;  %v8528_v35 = vld [vmem:[#allocation2 + $0x358] sm:$0x1] }
 0x46a   : > { %v6846_v12 = vadd.f32 %v6781_v63, %v6388_v29  ;;  %v5931_v7 = vadd.f32 %v5867_v48, %v14193_v20  ;;  %v6223_v4 = vpack.c.b16 %v6206_v39, %v6205_v11  ;;  %v6681_v29 = vpack.c.b16 %v6664_v57, %v6663_v37  ;;  %v5999_v63 = vld [vmem:[#allocation2 + $0x3b0] sm:$0x7] }
 0x46b   : > { %v7242_v33 = vpop.f32.mrf.mxu0  ;;  %v6157_v11 = vrot.slane %v6155_v46, 4  ;;  %v6158_v37 = vrot.slane %v5999_v63, 7  ;;  %v11870_v57 = vrot.slane %v6455_v15, 10 }
 0x46c   : > { %v14478_v42 = vadd.f32 %v7240_v25, %v6846_v12  ;;  %v6613_v25 = vrot.slane %v6456_v2, 6  ;;  %v7072_v12 = vrot.slane %v6915_v23, 6  ;;  %v11918_v2 = vrot.slane %v6914_v16, 10 }
 0x46e   : > { %v6615_v52 = vrot.slane %v6613_v25, 4 }
 0x46f   : > { %v6325_v55 = vpop.f32.mrf.mxu2 }
 0x470   : > { %v6389_v20 = vadd.f32 %v6325_v55, %v5931_v7  ;;  %v6783_v38 = vpop.f32.mrf.mxu3  ;;  %v11822_v7 = vrot.slane %v5997_v13, 11  ;;  %v7074_v55 = vrot.slane %v7072_v12, 4 }
 0x471   : > { %v5870_v5 = vpop.f32.mrf.mxu1 }
 0x472   : > { %v6847_v48 = vadd.f32 %v6783_v38, %v6389_v20  ;;  %v5932_v19 = vadd.f32 %v5870_v5, %v14208_v17  ;;  %v12725_v17 = vld [vmem:[#allocation4 + $0x5f8] sm:$0xff]  ;;  %v7075_v20 = vrot.slane %v6916_v34, 6  ;;  %v6159_v5 = vsel %vm13334_vm8, %v6157_v11, %v6158_v37 }
 0x473   : > { %v7245_v53 = vpop.f32.mrf.mxu0  ;;  %10094 = vmatpush.bf16.msra.mxu3 %v12725_v17  ;;  %v6208_v34 = vunpack.c.l.b16 %v6159_v5 }
 0x474   : > { %5909 = vmatmul.bf16.gmra.mxu1 %v12604_v60  ;;  %6367 = vmatmul.bf16.gmra.mxu2 %v6223_v4  ;;  %v14481_v39 = vadd.f32 %v7242_v33, %v6847_v48  ;;  %v6156_v33 = vsel %vm13334_vm8, %v11822_v7, %v6155_v46  ;;  %v7076_v15 = vsel %vm13330_vm7, %v7074_v55, %v7075_v20  ;;  %v12693_v46 = vld [vmem:[#allocation4 + $0x578] sm:$0xff] }
 0x475   : > { %6825 = vmatmul.bf16.gmra.mxu3 %v6681_v29  ;;  %v6614_v29 = vsel %vm13330_vm7, %v11870_v57, %v6613_v25  ;;  %v6207_v16 = vunpack.c.l.b16 %v6156_v33  ;;  %9321 = vmatpush.bf16.msra.mxu1 %v12693_v46  ;;  %v7125_v57 = vunpack.c.l.b16 %v7076_v15  ;;  %v7329_v33 = vld [vmem:[#allocation2 + $0x2b0] sm:$0x1]  ;;  %v8624_v15 = vrot.slane %v8527_v51, 5  ;;  %v8526_v46 = vld [vmem:[#allocation2 + $0x350] sm:$0xe] }
 0x476   : > { %7284 = vmatmul.bf16.gmra.mxu0 %v7140_v41  ;;  %v6617_v41 = vsel %vm13330_vm7, %v6615_v52, %v6616_v59  ;;  %v6665_v7 = vunpack.c.l.b16 %v6614_v29  ;;  %v8069_v52 = vld [vmem:[#allocation2 + $0x34c] sm:$0xf] }
 0x477   : > { %v6328_v23 = vpop.f32.mrf.mxu2  ;;  %v6666_v11 = vunpack.c.l.b16 %v6617_v41  ;;  %v6224_v55 = vpack.c.b16 %v6208_v34, %v6207_v16 }
 0x478   : > { %v6390_v38 = vadd.f32 %v6328_v23, %v5932_v19  ;;  %v6786_v60 = vpop.f32.mrf.mxu3  ;;  %v7073_v19 = vsel %vm13330_vm7, %v11918_v2, %v7072_v12  ;;  %v12605_v2 = vld [vmem:[#allocation2 + $0x3a8] sm:$0xff] }
 0x479   : > { %v5872_v4 = vpop.f32.mrf.mxu1  ;;  %v7124_v37 = vunpack.c.l.b16 %v7073_v19  ;;  %v8070_v19 = vld [vmem:[#allocation2 + $0x350] sm:$0x7] }
 0x47a   : > { %v6848_v13 = vadd.f32 %v6786_v60, %v6390_v38  ;;  %v5933_v63 = vadd.f32 %v5872_v4, %v14211_v43  ;;  %v7328_v43 = vld [vmem:[#allocation2 + $0x2ac] sm:$0xf]  ;;  %v6682_v38 = vpack.c.b16 %v6666_v11, %v6665_v7  ;;  %v7327_v4 = vld [vmem:[#allocation2 + $0x2a8] sm:$0xe]  ;;  %v7428_v7 = vrot.slane %v7329_v33, 5 }
 0x47b   : > { %v7247_v48 = vpop.f32.mrf.mxu0  ;;  %v7425_v20 = vrot.slane %v7328_v43, 5  ;;  %v7141_v60 = vpack.c.b16 %v7125_v57, %v7124_v37  ;;  %v8169_v57 = vrot.slane %v8070_v19, 7  ;;  %v12143_v43 = vrot.slane %v8526_v46, 9 }
 0x47c   : > { %v14496_v25 = vadd.f32 %v7245_v53, %v6848_v13  ;;  %v8166_v53 = vrot.slane %v8069_v52, 7  ;;  %v8068_v13 = vld [vmem:[#allocation2 + $0x348] sm:$0x8]  ;;  %v8627_v52 = vrot.slane %v8528_v35, 5 }
 0x47d   : > { %v7427_v16 = vrot.slane %v7425_v20, 4  ;;  %v12095_v11 = vrot.slane %v8068_v13, 11  ;;  %v8625_v33 = vsel %vm13254_vm2, %v12143_v43, %v8624_v15 }
 0x47e   : > { %v8168_v37 = vrot.slane %v8166_v53, 4 }
 0x47f   : > { %v6330_v59 = vpop.f32.mrf.mxu2 }
 0x480   : > { %v6391_v12 = vadd.f32 %v6330_v59, %v5933_v63  ;;  %v6788_v17 = vpop.f32.mrf.mxu3  ;;  %v11951_v63 = vrot.slane %v7327_v4, 9 }
 0x481   : > { %v5875_v23 = vpop.f32.mrf.mxu1 }
 0x482   : > { %v6849_v5 = vadd.f32 %v6788_v17, %v6391_v12  ;;  %v5934_v29 = vadd.f32 %v5875_v23, %v14226_v58  ;;  %v8626_v58 = vrot.slane %v8624_v15, 4  ;;  %v8170_v23 = vsel %vm13334_vm8, %v8168_v37, %v8169_v57 }
 0x483   : > { %v7250_v41 = vpop.f32.mrf.mxu0  ;;  %v8294_v46 = vunpack.c.l.b16 %v8170_v23  ;;  %v8073_v23 = vld [vmem:[#allocation2 + $0x36c] sm:$0x7] }
 0x484   : > { %5914 = vmatmul.bf16.gmra.mxu1 %v12605_v2  ;;  %6372 = vmatmul.bf16.gmra.mxu2 %v6224_v55  ;;  %v14499_v34 = vadd.f32 %v7247_v48, %v6849_v5  ;;  %v7426_v2 = vsel %vm13254_vm2, %v11951_v63, %v7425_v20  ;;  %v7429_v48 = vsel %vm13254_vm2, %v7427_v16, %v7428_v7  ;;  %v7331_v63 = vld [vmem:[#allocation2 + $0x2c8] sm:$0xf] }
 0x485   : > { %6830 = vmatmul.bf16.gmra.mxu3 %v6682_v38  ;;  %v8167_v55 = vsel %vm13334_vm8, %v12095_v11, %v8166_v53  ;;  %v8628_v5 = vsel %vm13254_vm2, %v8626_v58, %v8627_v52  ;;  %v7552_v20 = vunpack.c.l.b16 %v7426_v2  ;;  %v8751_v53 = vunpack.c.l.b16 %v8625_v33  ;;  %v8072_v16 = vld [vmem:[#allocation2 + $0x368] sm:$0xf]  ;;  %v8530_v11 = vld [vmem:[#allocation2 + $0x370] sm:$0xf]  ;;  %v7330_v52 = vld [vmem:[#allocation2 + $0x2c4] sm:$0xe] }
 0x486   : > { %7289 = vmatmul.bf16.gmra.mxu0 %v7141_v60  ;;  %v8293_v19 = vunpack.c.l.b16 %v8167_v55  ;;  %v8752_v35 = vunpack.c.l.b16 %v8628_v5  ;;  %v7432_v15 = vrot.slane %v7331_v63, 5  ;;  %v8071_v55 = vld [vmem:[#allocation2 + $0x364] sm:$0x8]  ;;  %v8529_v33 = vld [vmem:[#allocation2 + $0x36c] sm:$0xe] }
 0x487   : > { %v6333_v59 = vpop.f32.mrf.mxu2  ;;  %v8531_v5 = vld [vmem:[#allocation2 + $0x374] sm:$0x1]  ;;  %v12716_v63 = vld [vmem:[#allocation4 + $0x5b0] sm:$0xff] }
 0x488   : > { %v6392_v12 = vadd.f32 %v6333_v59, %v5934_v29  ;;  %v6791_v51 = vpop.f32.mrf.mxu3  ;;  %v7553_v29 = vunpack.c.l.b16 %v7429_v48  ;;  %v12646_v59 = vld [vmem:[#allocation2 + $0x2ac] sm:$0xff]  ;;  %v8783_v58 = vpack.c.b16 %v8752_v35, %v8751_v53  ;;  %v8176_v35 = vrot.slane %v8073_v23, 7  ;;  %9637 = vmatpush.bf16.msra.mxu2 %v12716_v63  ;;  %v12732_v23 = vld [vmem:[#allocation4 + $0x630] sm:$0xff] }
 0x489   : > { %v5877_v17 = vpop.f32.mrf.mxu1  ;;  %10553 = vmatpush.bf16.msra.mxu0 %v12732_v23  ;;  %v8533_v63 = vld [vmem:[#allocation2 + $0x38c] sm:$0xf]  ;;  %v8534_v23 = vld [vmem:[#allocation2 + $0x390] sm:$0x1] }
 0x48a   : > { %v6850_v38 = vadd.f32 %v6791_v51, %v6392_v12  ;;  %v5935_v60 = vadd.f32 %v5877_v17, %v14229_v47  ;;  %v7584_v57 = vpack.c.b16 %v7553_v29, %v7552_v20  ;;  %v8325_v12 = vpack.c.b16 %v8294_v46, %v8293_v19  ;;  %v7332_v51 = vld [vmem:[#allocation2 + $0x2cc] sm:$0x1] }
 0x48b   : > { %v7252_v4 = vpop.f32.mrf.mxu0  ;;  %v7434_v20 = vrot.slane %v7432_v15, 4  ;;  %v7435_v19 = vrot.slane %v7332_v51, 5  ;;  %v12096_v46 = vrot.slane %v8071_v55, 11 }
 0x48c   : > { %v14514_v13 = vadd.f32 %v7250_v41, %v6850_v38  ;;  %v8173_v41 = vrot.slane %v8072_v16, 7  ;;  %v8631_v38 = vrot.slane %v8530_v11, 5  ;;  %v12144_v16 = vrot.slane %v8529_v33, 9 }
 0x48e   : > { %v8175_v53 = vrot.slane %v8173_v41, 4 }
 0x48f   : > { %v6335_v7 = vpop.f32.mrf.mxu2 }
 0x490   : > { %v6393_v47 = vadd.f32 %v6335_v7, %v5935_v60  ;;  %v6793_v37 = vpop.f32.mrf.mxu3  ;;  %v11952_v60 = vrot.slane %v7330_v52, 9  ;;  %v8633_v7 = vrot.slane %v8631_v38, 4 }
 0x491   : > { %v5880_v43 = vpop.f32.mrf.mxu1 }
 0x492   : > { %v6851_v17 = vadd.f32 %v6793_v37, %v6393_v47  ;;  %v5936_v2 = vadd.f32 %v5880_v43, %v14244_v62  ;;  %v12724_v62 = vld [vmem:[#allocation4 + $0x5f0] sm:$0xff]  ;;  %v8634_v47 = vrot.slane %v8531_v5, 5  ;;  %v7436_v43 = vsel %vm13254_vm2, %v7434_v20, %v7435_v19 }
 0x493   : > { %v7255_v48 = vpop.f32.mrf.mxu0  ;;  %10095 = vmatpush.bf16.msra.mxu3 %v12724_v62  ;;  %v7555_v5 = vunpack.c.l.b16 %v7436_v43 }
 0x494   : > { %7672 = vmatmul.bf16.vlgmr.msrb.gmra.mxu1 %v7584_v57  ;;  %7954 = vmatmul.bf16.vlgmr.msrb.gmra.mxu2 %v12646_v59  ;;  %v14517_v29 = vadd.f32 %v7252_v4, %v6851_v17  ;;  %v7433_v4 = vsel %vm13254_vm2, %v11952_v60, %v7432_v15  ;;  %v8635_v55 = vsel %vm13254_vm2, %v8633_v7, %v8634_v47  ;;  %v12692_v15 = vld [vmem:[#allocation4 + $0x570] sm:$0xff]  ;;  %v12647_v7 = vld [vmem:[#allocation2 + $0x2c8] sm:$0xff] }
 0x495   : > { %8413 = vmatmul.bf16.vlgmr.msrb.gmra.mxu3 %v8325_v12  ;;  %v8174_v12 = vsel %vm13334_vm8, %v12096_v46, %v8173_v41  ;;  %v7554_v33 = vunpack.c.l.b16 %v7433_v4  ;;  %9322 = vmatpush.bf16.msra.mxu1 %v12692_v15  ;;  %v8754_v46 = vunpack.c.l.b16 %v8635_v55  ;;  %v7335_v4 = vld [vmem:[#allocation2 + $0x2e8] sm:$0x1]  ;;  %v8638_v55 = vrot.slane %v8533_v63, 5  ;;  %v8532_v15 = vld [vmem:[#allocation2 + $0x388] sm:$0xe] }
 0x496   : > { %8871 = vmatmul.bf16.vlgmr.msrb.gmra.mxu0 %v8783_v58  ;;  %v8177_v58 = vsel %vm13334_vm8, %v8175_v53, %v8176_v35  ;;  %v8295_v60 = vunpack.c.l.b16 %v8174_v12  ;;  %v8075_v53 = vld [vmem:[#allocation2 + $0x384] sm:$0xf] }
 0x497   : > { %v6338_v11 = vpop.f32.mrf.mxu2  ;;  %v8296_v20 = vunpack.c.l.b16 %v8177_v58 }
 0x498   : > { %v6394_v37 = vadd.f32 %v6338_v11, %v5936_v2  ;;  %v6796_v57 = vpop.f32.mrf.mxu3  ;;  %v8632_v2 = vsel %vm13254_vm2, %v12144_v16, %v8631_v38  ;;  %v7585_v16 = vpack.c.b16 %v7555_v5, %v7554_v33 }
 0x499   : > { %v5882_v59 = vpop.f32.mrf.mxu1  ;;  %v8753_v19 = vunpack.c.l.b16 %v8632_v2  ;;  %v8076_v2 = vld [vmem:[#allocation2 + $0x388] sm:$0x7] }
 0x49a   : > { %v6852_v52 = vadd.f32 %v6796_v57, %v6394_v37  ;;  %v5937_v51 = vadd.f32 %v5882_v59, %v14247_v9  ;;  %v7334_v9 = vld [vmem:[#allocation2 + $0x2e4] sm:$0xf]  ;;  %v8326_v37 = vpack.c.b16 %v8296_v20, %v8295_v60  ;;  %v7333_v59 = vld [vmem:[#allocation2 + $0x2e0] sm:$0xe]  ;;  %v7442_v60 = vrot.slane %v7335_v4, 5 }
 0x49b   : > { %v7257_v17 = vpop.f32.mrf.mxu0  ;;  %v7439_v47 = vrot.slane %v7334_v9, 5  ;;  %v8784_v57 = vpack.c.b16 %v8754_v46, %v8753_v19  ;;  %v8183_v46 = vrot.slane %v8076_v2, 7  ;;  %v12145_v9 = vrot.slane %v8532_v15, 9 }
 0x49c   : > { %v14532_v41 = vadd.f32 %v7255_v48, %v6852_v52  ;;  %v8180_v48 = vrot.slane %v8075_v53, 7  ;;  %v8074_v52 = vld [vmem:[#allocation2 + $0x380] sm:$0x8]  ;;  %v8641_v53 = vrot.slane %v8534_v23, 5 }
 0x49d   : > { %v7441_v33 = vrot.slane %v7439_v47, 4  ;;  %v12097_v20 = vrot.slane %v8074_v52, 11  ;;  %v8639_v4 = vsel %vm13254_vm2, %v12145_v9, %v8638_v55 }
 0x49e   : > { %v8182_v19 = vrot.slane %v8180_v48, 4 }
 0x49f   : > { %v6340_v35 = vpop.f32.mrf.mxu2 }
 0x4a0   : > { %v6395_v38 = vadd.f32 %v6340_v35, %v5937_v51  ;;  %v6798_v62 = vpop.f32.mrf.mxu3  ;;  %v11953_v51 = vrot.slane %v7333_v59, 9 }
 0x4a1   : > { %v5885_v11 = vpop.f32.mrf.mxu1 }
 0x4a2   : > { %v6853_v43 = vadd.f32 %v6798_v62, %v6395_v38  ;;  %v5938_v12 = vadd.f32 %v5885_v11, %v14262_v24  ;;  %v8640_v24 = vrot.slane %v8638_v55, 4  ;;  %v8184_v11 = vsel %vm13334_vm8, %v8182_v19, %v8183_v46 }
 0x4a3   : > { %v7260_v58 = vpop.f32.mrf.mxu0  ;;  %v8298_v15 = vunpack.c.l.b16 %v8184_v11  ;;  %v8079_v11 = vld [vmem:[#allocation2 + $0x3a4] sm:$0x7] }
 0x4a4   : > { %7677 = vmatmul.bf16.gmra.mxu1 %v7585_v16  ;;  %7959 = vmatmul.bf16.gmra.mxu2 %v12647_v7  ;;  %v14535_v5 = vadd.f32 %v7257_v17, %v6853_v43  ;;  %v7440_v16 = vsel %vm13254_vm2, %v11953_v51, %v7439_v47  ;;  %v7443_v17 = vsel %vm13254_vm2, %v7441_v33, %v7442_v60  ;;  %v7337_v51 = vld [vmem:[#allocation2 + $0x300] sm:$0xf] }
 0x4a5   : > { %8418 = vmatmul.bf16.gmra.mxu3 %v8326_v37  ;;  %v8181_v7 = vsel %vm13334_vm8, %v12097_v20, %v8180_v48  ;;  %v8642_v43 = vsel %vm13254_vm2, %v8640_v24, %v8641_v53  ;;  %v7556_v47 = vunpack.c.l.b16 %v7440_v16  ;;  %v8755_v48 = vunpack.c.l.b16 %v8639_v4  ;;  %v8078_v33 = vld [vmem:[#allocation2 + $0x3a0] sm:$0xf]  ;;  %v8536_v20 = vld [vmem:[#allocation2 + $0x3a8] sm:$0xf]  ;;  %v7336_v53 = vld [vmem:[#allocation2 + $0x2fc] sm:$0xe] }
 0x4a6   : > { %8876 = vmatmul.bf16.gmra.mxu0 %v8784_v57  ;;  %v8297_v2 = vunpack.c.l.b16 %v8181_v7  ;;  %v8756_v23 = vunpack.c.l.b16 %v8642_v43  ;;  %v7446_v55 = vrot.slane %v7337_v51, 5  ;;  %v8077_v7 = vld [vmem:[#allocation2 + $0x39c] sm:$0x8]  ;;  %v8535_v4 = vld [vmem:[#allocation2 + $0x3a4] sm:$0xe] }
 0x4a7   : > { %v6343_v35 = vpop.f32.mrf.mxu2  ;;  %v8537_v43 = vld [vmem:[#allocation2 + $0x3ac] sm:$0x1]  ;;  %v12715_v51 = vld [vmem:[#allocation4 + $0x5a8] sm:$0xff] }
 0x4a8   : > { %v6396_v38 = vadd.f32 %v6343_v35, %v5938_v12  ;;  %v6801_v63 = vpop.f32.mrf.mxu3  ;;  %v7557_v12 = vunpack.c.l.b16 %v7443_v17  ;;  %v12648_v35 = vld [vmem:[#allocation2 + $0x2e4] sm:$0xff]  ;;  %v8785_v24 = vpack.c.b16 %v8756_v23, %v8755_v48  ;;  %v8190_v23 = vrot.slane %v8079_v11, 7  ;;  %9638 = vmatpush.bf16.msra.mxu2 %v12715_v51  ;;  %v12731_v11 = vld [vmem:[#allocation4 + $0x628] sm:$0xff] }
 0x4a9   : > { %v5887_v62 = vpop.f32.mrf.mxu1  ;;  %10554 = vmatpush.bf16.msra.mxu0 %v12731_v11  ;;  %v8539_v51 = vld [vmem:[#allocation2 + $0x3c4] sm:$0xf]  ;;  %v8540_v11 = vld [vmem:[#allocation2 + $0x3c8] sm:$0x1] }
 0x4aa   : > { %v6854_v37 = vadd.f32 %v6801_v63, %v6396_v38  ;;  %v5939_v57 = vadd.f32 %v5887_v62, %v14265_v28  ;;  %v7586_v46 = vpack.c.b16 %v7557_v12, %v7556_v47  ;;  %v8327_v38 = vpack.c.b16 %v8298_v15, %v8297_v2  ;;  %v7338_v63 = vld [vmem:[#allocation2 + $0x304] sm:$0x1] }
 0x4ab   : > { %v7262_v59 = vpop.f32.mrf.mxu0  ;;  %v7448_v47 = vrot.slane %v7446_v55, 4  ;;  %v7449_v2 = vrot.slane %v7338_v63, 5  ;;  %v12098_v15 = vrot.slane %v8077_v7, 11 }
 0x4ac   : > { %v14550_v52 = vadd.f32 %v7260_v58, %v6854_v37  ;;  %v8187_v58 = vrot.slane %v8078_v33, 7  ;;  %v8645_v37 = vrot.slane %v8536_v20, 5  ;;  %v12146_v33 = vrot.slane %v8535_v4, 9 }
 0x4ae   : > { %v8189_v48 = vrot.slane %v8187_v58, 4 }
 0x4af   : > { %v6345_v60 = vpop.f32.mrf.mxu2 }
 0x4b0   : > { %v6397_v28 = vadd.f32 %v6345_v60, %v5939_v57  ;;  %v6803_v19 = vpop.f32.mrf.mxu3  ;;  %v11954_v57 = vrot.slane %v7336_v53, 9  ;;  %v8647_v60 = vrot.slane %v8645_v37, 4 }
 0x4b1   : > { %v5890_v9 = vpop.f32.mrf.mxu1 }
 0x4b2   : > { %v6855_v62 = vadd.f32 %v6803_v19, %v6397_v28  ;;  %v5940_v16 = vadd.f32 %v5890_v9, %v14280_v21  ;;  %v12723_v21 = vld [vmem:[#allocation4 + $0x5e8] sm:$0xff]  ;;  %v8648_v28 = vrot.slane %v8537_v43, 5  ;;  %v7450_v9 = vsel %vm13254_vm2, %v7448_v47, %v7449_v2 }
 0x4b3   : > { %v7265_v17 = vpop.f32.mrf.mxu0  ;;  %10096 = vmatpush.bf16.msra.mxu3 %v12723_v21  ;;  %v7559_v43 = vunpack.c.l.b16 %v7450_v9 }
 0x4b4   : > { %7682 = vmatmul.bf16.gmra.mxu1 %v7586_v46  ;;  %7964 = vmatmul.bf16.gmra.mxu2 %v12648_v35  ;;  %v14553_v12 = vadd.f32 %v7262_v59, %v6855_v62  ;;  %v7447_v59 = vsel %vm13254_vm2, %v11954_v57, %v7446_v55  ;;  %v8649_v7 = vsel %vm13254_vm2, %v8647_v60, %v8648_v28  ;;  %v12691_v55 = vld [vmem:[#allocation4 + $0x568] sm:$0xff]  ;;  %v12649_v60 = vld [vmem:[#allocation2 + $0x300] sm:$0xff] }
 0x4b5   : > { %8423 = vmatmul.bf16.gmra.mxu3 %v8327_v38  ;;  %v8188_v38 = vsel %vm13334_vm8, %v12098_v15, %v8187_v58  ;;  %v7558_v4 = vunpack.c.l.b16 %v7447_v59  ;;  %9323 = vmatpush.bf16.msra.mxu1 %v12691_v55  ;;  %v8758_v15 = vunpack.c.l.b16 %v8649_v7  ;;  %v7341_v59 = vld [vmem:[#allocation2 + $0x320] sm:$0x1]  ;;  %v8652_v7 = vrot.slane %v8539_v51, 5  ;;  %v8538_v55 = vld [vmem:[#allocation2 + $0x3c0] sm:$0xe] }
 0x4b6   : > { %8881 = vmatmul.bf16.gmra.mxu0 %v8785_v24  ;;  %v8191_v24 = vsel %vm13334_vm8, %v8189_v48, %v8190_v23  ;;  %v8299_v57 = vunpack.c.l.b16 %v8188_v38  ;;  %v8081_v48 = vld [vmem:[#allocation2 + $0x3bc] sm:$0xf] }
 0x4b7   : > { %v6348_v20 = vpop.f32.mrf.mxu2  ;;  %v8300_v47 = vunpack.c.l.b16 %v8191_v24 }
 0x4b8   : > { %v6398_v19 = vadd.f32 %v6348_v20, %v5940_v16  ;;  %v6806_v46 = vpop.f32.mrf.mxu3  ;;  %v8646_v16 = vsel %vm13254_vm2, %v12146_v33, %v8645_v37  ;;  %v7587_v33 = vpack.c.b16 %v7559_v43, %v7558_v4 }
 0x4b9   : > { %v5892_v35 = vpop.f32.mrf.mxu1  ;;  %v8757_v2 = vunpack.c.l.b16 %v8646_v16  ;;  %v8082_v16 = vld [vmem:[#allocation2 + $0x3c0] sm:$0x7] }
 0x4ba   : > { %v6856_v53 = vadd.f32 %v6806_v46, %v6398_v19  ;;  %v5941_v63 = vadd.f32 %v5892_v35, %v14283_v18  ;;  %v7340_v18 = vld [vmem:[#allocation2 + $0x31c] sm:$0xf]  ;;  %v8328_v19 = vpack.c.b16 %v8300_v47, %v8299_v57  ;;  %v7339_v35 = vld [vmem:[#allocation2 + $0x318] sm:$0xe]  ;;  %v7456_v57 = vrot.slane %v7341_v59, 5 }
 0x4bb   : > { %v7267_v62 = vpop.f32.mrf.mxu0  ;;  %v7453_v28 = vrot.slane %v7340_v18, 5  ;;  %v8786_v46 = vpack.c.b16 %v8758_v15, %v8757_v2  ;;  %v8197_v15 = vrot.slane %v8082_v16, 7  ;;  %v12147_v18 = vrot.slane %v8538_v55, 9 }
 0x4bc   : > { %v14568_v58 = vadd.f32 %v7265_v17, %v6856_v53  ;;  %v8194_v17 = vrot.slane %v8081_v48, 7  ;;  %v8080_v53 = vld [vmem:[#allocation2 + $0x3b8] sm:$0x8]  ;;  %v8655_v48 = vrot.slane %v8540_v11, 5 }
 0x4bd   : > { %v7455_v4 = vrot.slane %v7453_v28, 4  ;;  %v12099_v47 = vrot.slane %v8080_v53, 11  ;;  %v8653_v59 = vsel %vm13254_vm2, %v12147_v18, %v8652_v7 }
 0x4be   : > { %v8196_v2 = vrot.slane %v8194_v17, 4 }
 0x4bf   : > { %v6350_v23 = vpop.f32.mrf.mxu2 }
 0x4c0   : > { %v6399_v37 = vadd.f32 %v6350_v23, %v5941_v63  ;;  %v6808_v21 = vpop.f32.mrf.mxu3  ;;  %v11955_v63 = vrot.slane %v7339_v35, 9 }
 0x4c1   : > { %v5895_v20 = vpop.f32.mrf.mxu1 }
 0x4c2   : > { %v6857_v9 = vadd.f32 %v6808_v21, %v6399_v37  ;;  %v5942_v38 = vadd.f32 %v5895_v20, %v14298_v40  ;;  %v8654_v40 = vrot.slane %v8652_v7, 4  ;;  %v8198_v20 = vsel %vm13334_vm8, %v8196_v2, %v8197_v15 }
 0x4c3   : > { %v7270_v24 = vpop.f32.mrf.mxu0  ;;  %v8302_v55 = vunpack.c.l.b16 %v8198_v20  ;;  %v8085_v20 = vld [vmem:[#allocation2 + $0x3dc] sm:$0x7] }
 0x4c4   : > { %7687 = vmatmul.bf16.gmra.mxu1 %v7587_v33  ;;  %7969 = vmatmul.bf16.gmra.mxu2 %v12649_v60  ;;  %v14571_v43 = vadd.f32 %v7267_v62, %v6857_v9  ;;  %v7454_v33 = vsel %vm13254_vm2, %v11955_v63, %v7453_v28  ;;  %v7457_v62 = vsel %vm13254_vm2, %v7455_v4, %v7456_v57  ;;  %v7343_v63 = vld [vmem:[#allocation2 + $0x338] sm:$0xf] }
 0x4c5   : > { %8428 = vmatmul.bf16.gmra.mxu3 %v8328_v19  ;;  %v8195_v60 = vsel %vm13334_vm8, %v12099_v47, %v8194_v17  ;;  %v8656_v9 = vsel %vm13254_vm2, %v8654_v40, %v8655_v48  ;;  %v7560_v28 = vunpack.c.l.b16 %v7454_v33  ;;  %v8759_v17 = vunpack.c.l.b16 %v8653_v59  ;;  %v8084_v4 = vld [vmem:[#allocation2 + $0x3d8] sm:$0xf]  ;;  %v8542_v47 = vld [vmem:[#allocation2 + $0x3e0] sm:$0xf]  ;;  %v7342_v48 = vld [vmem:[#allocation2 + $0x334] sm:$0xe] }
 0x4c6   : > { %8886 = vmatmul.bf16.gmra.mxu0 %v8786_v46  ;;  %v8301_v16 = vunpack.c.l.b16 %v8195_v60  ;;  %v8760_v11 = vunpack.c.l.b16 %v8656_v9  ;;  %v7460_v7 = vrot.slane %v7343_v63, 5  ;;  %v8083_v60 = vld [vmem:[#allocation2 + $0x3d4] sm:$0x8]  ;;  %v8541_v59 = vld [vmem:[#allocation2 + $0x3dc] sm:$0xe] }
 0x4c7   : > { %v6353_v23 = vpop.f32.mrf.mxu2  ;;  %v8543_v9 = vld [vmem:[#allocation2 + $0x3e4] sm:$0x1]  ;;  %v12714_v63 = vld [vmem:[#allocation4 + $0x5a0] sm:$0xff] }
 0x4c8   : > { %v6400_v37 = vadd.f32 %v6353_v23, %v5942_v38  ;;  %v6811_v51 = vpop.f32.mrf.mxu3  ;;  %v7561_v38 = vunpack.c.l.b16 %v7457_v62  ;;  %v12650_v23 = vld [vmem:[#allocation2 + $0x31c] sm:$0xff]  ;;  %v8787_v40 = vpack.c.b16 %v8760_v11, %v8759_v17  ;;  %v8204_v11 = vrot.slane %v8085_v20, 7  ;;  %9639 = vmatpush.bf16.msra.mxu2 %v12714_v63  ;;  %v12730_v20 = vld [vmem:[#allocation4 + $0x620] sm:$0xff] }
 0x4c9   : > { %v5897_v21 = vpop.f32.mrf.mxu1  ;;  %10555 = vmatpush.bf16.msra.mxu0 %v12730_v20  ;;  %v8545_v63 = vld [vmem:[#allocation2 + $0x3fc] sm:$0xf]  ;;  %v8544_v20 = vld [vmem:[#allocation2 + $0x3f8] sm:$0xe] }
 0x4ca   : > { %v6858_v19 = vadd.f32 %v6811_v51, %v6400_v37  ;;  %v5943_v46 = vadd.f32 %v5897_v21, %v14301_v45  ;;  %v7588_v15 = vpack.c.b16 %v7561_v38, %v7560_v28  ;;  %v8329_v37 = vpack.c.b16 %v8302_v55, %v8301_v16  ;;  %v7344_v51 = vld [vmem:[#allocation2 + $0x33c] sm:$0x1] }
 0x4cb   : > { %v7272_v35 = vpop.f32.mrf.mxu0  ;;  %v7462_v28 = vrot.slane %v7460_v7, 4  ;;  %v7463_v16 = vrot.slane %v7344_v51, 5  ;;  %v12100_v55 = vrot.slane %v8083_v60, 11 }
 0x4cc   : > { %v14586_v53 = vadd.f32 %v7270_v24, %v6858_v19  ;;  %v8201_v24 = vrot.slane %v8084_v4, 7  ;;  %v8659_v19 = vrot.slane %v8542_v47, 5  ;;  %v12148_v4 = vrot.slane %v8541_v59, 9 }
 0x4ce   : > { %v8203_v17 = vrot.slane %v8201_v24, 4 }
 0x4cf   : > { %v6355_v57 = vpop.f32.mrf.mxu2 }
 0x4d0   : > { %v6401_v45 = vadd.f32 %v6355_v57, %v5943_v46  ;;  %v6813_v2 = vpop.f32.mrf.mxu3  ;;  %v11956_v46 = vrot.slane %v7342_v48, 9  ;;  %v8661_v57 = vrot.slane %v8659_v19, 4 }
 0x4d1   : > { %v5900_v18 = vpop.f32.mrf.mxu1 }
 0x4d2   : > { %v6859_v21 = vadd.f32 %v6813_v2, %v6401_v45  ;;  %v5944_v33 = vadd.f32 %v5900_v18, %v14316_v54  ;;  %v12722_v54 = vld [vmem:[#allocation4 + $0x5e0] sm:$0xff]  ;;  %v8662_v45 = vrot.slane %v8543_v9, 5  ;;  %v7464_v18 = vsel %vm13254_vm2, %v7462_v28, %v7463_v16 }
 0x4d3   : > { %v7275_v62 = vpop.f32.mrf.mxu0  ;;  %10097 = vmatpush.bf16.msra.mxu3 %v12722_v54  ;;  %v7563_v9 = vunpack.c.l.b16 %v7464_v18 }
 0x4d4   : > { %7692 = vmatmul.bf16.gmra.mxu1 %v7588_v15  ;;  %7974 = vmatmul.bf16.gmra.mxu2 %v12650_v23  ;;  %v14589_v38 = vadd.f32 %v7272_v35, %v6859_v21  ;;  %v7461_v35 = vsel %vm13254_vm2, %v11956_v46, %v7460_v7  ;;  %v8663_v60 = vsel %vm13254_vm2, %v8661_v57, %v8662_v45  ;;  %v12690_v7 = vld [vmem:[#allocation4 + $0x560] sm:$0xff]  ;;  %v12651_v57 = vld [vmem:[#allocation2 + $0x338] sm:$0xff] }
 0x4d5   : > { %8433 = vmatmul.bf16.gmra.mxu3 %v8329_v37  ;;  %v8202_v37 = vsel %vm13334_vm8, %v12100_v55, %v8201_v24  ;;  %v7562_v59 = vunpack.c.l.b16 %v7461_v35  ;;  %9324 = vmatpush.bf16.msra.mxu1 %v12690_v7  ;;  %v8762_v55 = vunpack.c.l.b16 %v8663_v60  ;;  %v7347_v35 = vld [vmem:[#allocation2 + $0x358] sm:$0x1]  ;;  %v8666_v7 = vrot.slane %v8545_v63, 5 }
 0x4d6   : > { %8891 = vmatmul.bf16.gmra.mxu0 %v8787_v40  ;;  %v8205_v40 = vsel %vm13334_vm8, %v8203_v17, %v8204_v11  ;;  %v8303_v46 = vunpack.c.l.b16 %v8202_v37  ;;  %v8087_v17 = vld [vmem:[#allocation2 + $0x3f4] sm:$0xf]  ;;  %v15185_v37 = vld [vmem:[#allocation19_spill] sm:$0xff] }
 0x4d7   : > { %v6358_v47 = vpop.f32.mrf.mxu2  ;;  %v8304_v28 = vunpack.c.l.b16 %v8205_v40  ;;  %v8088_v60 = vld [vmem:[#allocation2 + $0x3f8] sm:$0x7] }
 0x4d8   : > { %v6402_v2 = vadd.f32 %v6358_v47, %v5944_v33  ;;  %v6816_v15 = vpop.f32.mrf.mxu3  ;;  %v8660_v33 = vsel %vm13254_vm2, %v12148_v4, %v8659_v19  ;;  %v7589_v4 = vpack.c.b16 %v7563_v9, %v7562_v59 }
 0x4d9   : > { %v5902_v23 = vpop.f32.mrf.mxu1  ;;  %v8761_v16 = vunpack.c.l.b16 %v8660_v33  ;;  %v8086_v33 = vld [vmem:[#allocation2 + $0x3f0] sm:$0x8] }
 0x4da   : > { %v6860_v48 = vadd.f32 %v6816_v15, %v6402_v2  ;;  %v5945_v51 = vadd.f32 %v5902_v23, %v14319_v22  ;;  %v7346_v22 = vld [vmem:[#allocation2 + $0x354] sm:$0xf]  ;;  %v8330_v2 = vpack.c.b16 %v8304_v28, %v8303_v46  ;;  %v7345_v23 = vld [vmem:[#allocation2 + $0x350] sm:$0xe]  ;;  %v7470_v46 = vrot.slane %v7347_v35, 5 }
 0x4db   : > { %v7277_v21 = vpop.f32.mrf.mxu0  ;;  %v7467_v45 = vrot.slane %v7346_v22, 5  ;;  %v8788_v15 = vpack.c.b16 %v8762_v55, %v8761_v16  ;;  %v12101_v28 = vrot.slane %v8086_v33, 11  ;;  %v8211_v55 = vrot.slane %v8088_v60, 7 }
 0x4dc   : > { %v14604_v24 = vadd.f32 %v7275_v62, %v6860_v48  ;;  %v8208_v62 = vrot.slane %v8087_v17, 7  ;;  %v12149_v22 = vrot.slane %v8544_v20, 9  ;;  %v8668_v17 = vrot.slane %v8666_v7, 4 }
 0x4dd   : > { %v7469_v59 = vrot.slane %v7467_v45, 4 }
 0x4de   : > { %15184 = vst [vmem:[#allocation18_spill] sm:$0xff] %v14604_v24  ;;  %v8546_v24 = vld [vmem:[#allocation2 + $0x400] sm:$0x1]  ;;  %v8210_v16 = vrot.slane %v8208_v62, 4  ;;  %v8667_v35 = vsel %vm13254_vm2, %v12149_v22, %v8666_v7 }
 0x4df   : > { %v6360_v11 = vpop.f32.mrf.mxu2 }
 0x4e0   : > { %v6403_v19 = vadd.f32 %v6360_v11, %v5945_v51  ;;  %v6818_v54 = vpop.f32.mrf.mxu3  ;;  %v11957_v51 = vrot.slane %v7345_v23, 9  ;;  %v8669_v11 = vrot.slane %v8546_v24, 5 }
 0x4e1   : > { %v5905_v47 = vpop.f32.mrf.mxu1 }
 0x4e2   : > { %v6861_v18 = vadd.f32 %v6818_v54, %v6403_v19  ;;  %v5946_v40 = vadd.f32 %v5905_v47, %v15185_v37 }
 0x4e3   : > { %v7280_v48 = vpop.f32.mrf.mxu0 }
 0x4e4   : > { %7697 = vmatmul.bf16.gmra.mxu1 %v7589_v4  ;;  %7979 = vmatmul.bf16.gmra.mxu2 %v12651_v57  ;;  %v14607_v9 = vadd.f32 %v7277_v21, %v6861_v18  ;;  %v7468_v4 = vsel %vm13254_vm2, %v11957_v51, %v7467_v45  ;;  %v7471_v21 = vsel %vm13254_vm2, %v7469_v59, %v7470_v46  ;;  %v7349_v51 = vld [vmem:[#allocation2 + $0x370] sm:$0xf] }
 0x4e5   : > { %8438 = vmatmul.bf16.gmra.mxu3 %v8330_v2  ;;  %v8209_v57 = vsel %vm13334_vm8, %v12101_v28, %v8208_v62  ;;  %v8212_v2 = vsel %vm13334_vm8, %v8210_v16, %v8211_v55  ;;  %v8670_v18 = vsel %vm13254_vm2, %v8668_v17, %v8669_v11  ;;  %v7564_v45 = vunpack.c.l.b16 %v7468_v4  ;;  %v8090_v59 = vld [vmem:[#allocation2 + $0x410] sm:$0xf]  ;;  %v8548_v28 = vld [vmem:[#allocation2 + $0x418] sm:$0xf]  ;;  %v7348_v11 = vld [vmem:[#allocation2 + $0x36c] sm:$0xe] }
 0x4e6   : > { %8896 = vmatmul.bf16.gmra.mxu0 %v8788_v15  ;;  %v7565_v37 = vunpack.c.l.b16 %v7471_v21  ;;  %v8305_v33 = vunpack.c.l.b16 %v8209_v57  ;;  %v8306_v60 = vunpack.c.l.b16 %v8212_v2  ;;  %v8763_v62 = vunpack.c.l.b16 %v8667_v35  ;;  %v8089_v57 = vld [vmem:[#allocation2 + $0x40c] sm:$0x8]  ;;  %v8091_v2 = vld [vmem:[#allocation2 + $0x414] sm:$0x7] }
 0x4e7   : > { %v6363_v19 = vpop.f32.mrf.mxu2  ;;  %v8764_v20 = vunpack.c.l.b16 %v8670_v18  ;;  %v7474_v7 = vrot.slane %v7349_v51, 5  ;;  %v8547_v35 = vld [vmem:[#allocation2 + $0x414] sm:$0xe]  ;;  %v8549_v18 = vld [vmem:[#allocation2 + $0x41c] sm:$0x1]  ;;  %v12713_v51 = vld [vmem:[#allocation4 + $0x598] sm:$0xff] }
 0x4e8   : > { %v6404_v54 = vadd.f32 %v6363_v19, %v5946_v40  ;;  %v6821_v63 = vpop.f32.mrf.mxu3  ;;  %v7590_v55 = vpack.c.b16 %v7565_v37, %v7564_v45  ;;  %v12652_v19 = vld [vmem:[#allocation2 + $0x354] sm:$0xff]  ;;  %9640 = vmatpush.bf16.msra.mxu2 %v12713_v51 }
 0x4e9   : > { %v5907_v47 = vpop.f32.mrf.mxu1  ;;  %v8789_v17 = vpack.c.b16 %v8764_v20, %v8763_v62  ;;  %v7476_v45 = vrot.slane %v7474_v7, 4  ;;  %v8218_v20 = vrot.slane %v8091_v2, 7  ;;  %v12729_v2 = vld [vmem:[#allocation4 + $0x618] sm:$0xff]  ;;  %v8551_v51 = vld [vmem:[#allocation2 + $0x434] sm:$0xf] }
 0x4ea   : > { %v6862_v15 = vadd.f32 %v6821_v63, %v6404_v54  ;;  %v5947_v23 = vadd.f32 %v5907_v47, %v14337_v0  ;;  %v8331_v54 = vpack.c.b16 %v8306_v60, %v8305_v33  ;;  %v7350_v63 = vld [vmem:[#allocation2 + $0x374] sm:$0x1]  ;;  %v12102_v60 = vrot.slane %v8089_v57, 11  ;;  %10556 = vmatpush.bf16.msra.mxu0 %v12729_v2  ;;  %v8552_v2 = vld [vmem:[#allocation2 + $0x438] sm:$0x1] }
 0x4eb   : > { %v7282_v24 = vpop.f32.mrf.mxu0  ;;  %v7477_v33 = vrot.slane %v7350_v63, 5 }
 0x4ec   : > { %v14622_v40 = vadd.f32 %v7280_v48, %v6862_v15  ;;  %v8215_v48 = vrot.slane %v8090_v59, 7  ;;  %v8673_v15 = vrot.slane %v8548_v28, 5  ;;  %v12150_v59 = vrot.slane %v8547_v35, 9 }
 0x4ee   : > { %v8217_v62 = vrot.slane %v8215_v48, 4 }
 0x4ef   : > { %v6365_v46 = vpop.f32.mrf.mxu2 }
 0x4f0   : > { %v6405_v0 = vadd.f32 %v6365_v46, %v5947_v23  ;;  %v6823_v16 = vpop.f32.mrf.mxu3  ;;  %v11958_v23 = vrot.slane %v7348_v11, 9  ;;  %v8675_v46 = vrot.slane %v8673_v15, 4 }
 0x4f1   : > { %v5910_v22 = vpop.f32.mrf.mxu1 }
 0x4f2   : > { %v6863_v47 = vadd.f32 %v6823_v16, %v6405_v0  ;;  %v5948_v4 = vadd.f32 %v5910_v22, %v14352_v30  ;;  %v12721_v30 = vld [vmem:[#allocation4 + $0x5d8] sm:$0xff]  ;;  %v8676_v0 = vrot.slane %v8549_v18, 5  ;;  %v7478_v22 = vsel %vm13254_vm2, %v7476_v45, %v7477_v33 }
 0x4f3   : > { %v7285_v21 = vpop.f32.mrf.mxu0  ;;  %10098 = vmatpush.bf16.msra.mxu3 %v12721_v30  ;;  %v7567_v18 = vunpack.c.l.b16 %v7478_v22 }
 0x4f4   : > { %7702 = vmatmul.bf16.gmra.mxu1 %v7590_v55  ;;  %7984 = vmatmul.bf16.gmra.mxu2 %v12652_v19  ;;  %v14625_v37 = vadd.f32 %v7282_v24, %v6863_v47  ;;  %v7475_v24 = vsel %vm13254_vm2, %v11958_v23, %v7474_v7  ;;  %v8677_v57 = vsel %vm13254_vm2, %v8675_v46, %v8676_v0  ;;  %v12689_v7 = vld [vmem:[#allocation4 + $0x558] sm:$0xff]  ;;  %v12653_v46 = vld [vmem:[#allocation2 + $0x370] sm:$0xff] }
 0x4f5   : > { %8443 = vmatmul.bf16.gmra.mxu3 %v8331_v54  ;;  %v8216_v54 = vsel %vm13334_vm8, %v12102_v60, %v8215_v48  ;;  %v7566_v35 = vunpack.c.l.b16 %v7475_v24  ;;  %9325 = vmatpush.bf16.msra.mxu1 %v12689_v7  ;;  %v8766_v60 = vunpack.c.l.b16 %v8677_v57  ;;  %v7353_v24 = vld [vmem:[#allocation2 + $0x390] sm:$0x1]  ;;  %v8680_v57 = vrot.slane %v8551_v51, 5  ;;  %v8550_v7 = vld [vmem:[#allocation2 + $0x430] sm:$0xe] }
 0x4f6   : > { %8901 = vmatmul.bf16.gmra.mxu0 %v8789_v17  ;;  %v8219_v17 = vsel %vm13334_vm8, %v8217_v62, %v8218_v20  ;;  %v8307_v23 = vunpack.c.l.b16 %v8216_v54  ;;  %v8093_v62 = vld [vmem:[#allocation2 + $0x42c] sm:$0xf] }
 0x4f7   : > { %v6368_v28 = vpop.f32.mrf.mxu2  ;;  %v8308_v45 = vunpack.c.l.b16 %v8219_v17 }
 0x4f8   : > { %v6406_v16 = vadd.f32 %v6368_v28, %v5948_v4  ;;  %v6826_v55 = vpop.f32.mrf.mxu3  ;;  %v8674_v4 = vsel %vm13254_vm2, %v12150_v59, %v8673_v15  ;;  %v7591_v59 = vpack.c.b16 %v7567_v18, %v7566_v35 }
 0x4f9   : > { %v5912_v19 = vpop.f32.mrf.mxu1  ;;  %v8765_v33 = vunpack.c.l.b16 %v8674_v4  ;;  %v8094_v4 = vld [vmem:[#allocation2 + $0x430] sm:$0x7] }
 0x4fa   : > { %v6864_v11 = vadd.f32 %v6826_v55, %v6406_v16  ;;  %v5949_v63 = vadd.f32 %v5912_v19, %v14355_v31  ;;  %v7352_v31 = vld [vmem:[#allocation2 + $0x38c] sm:$0xf]  ;;  %v8332_v16 = vpack.c.b16 %v8308_v45, %v8307_v23  ;;  %v7351_v19 = vld [vmem:[#allocation2 + $0x388] sm:$0xe]  ;;  %v7484_v23 = vrot.slane %v7353_v24, 5 }
 0x4fb   : > { %v7287_v47 = vpop.f32.mrf.mxu0  ;;  %v7481_v0 = vrot.slane %v7352_v31, 5  ;;  %v8790_v55 = vpack.c.b16 %v8766_v60, %v8765_v33  ;;  %v8225_v60 = vrot.slane %v8094_v4, 7  ;;  %v12151_v31 = vrot.slane %v8550_v7, 9 }
 0x4fc   : > { %v14640_v48 = vadd.f32 %v7285_v21, %v6864_v11  ;;  %v8222_v21 = vrot.slane %v8093_v62, 7  ;;  %v8092_v11 = vld [vmem:[#allocation2 + $0x428] sm:$0x8]  ;;  %v8683_v62 = vrot.slane %v8552_v2, 5 }
 0x4fd   : > { %v7483_v35 = vrot.slane %v7481_v0, 4  ;;  %v12103_v45 = vrot.slane %v8092_v11, 11  ;;  %v8681_v24 = vsel %vm13254_vm2, %v12151_v31, %v8680_v57 }
 0x4fe   : > { %v8224_v33 = vrot.slane %v8222_v21, 4 }
 0x4ff   : > { %v6370_v20 = vpop.f32.mrf.mxu2 }
 0x500   : > { %v6407_v15 = vadd.f32 %v6370_v20, %v5949_v63  ;;  %v6828_v30 = vpop.f32.mrf.mxu3  ;;  %v11959_v63 = vrot.slane %v7351_v19, 9 }
 0x501   : > { %v5915_v28 = vpop.f32.mrf.mxu1 }
 0x502   : > { %v6865_v22 = vadd.f32 %v6828_v30, %v6407_v15  ;;  %v5950_v54 = vadd.f32 %v5915_v28, %v14370_v14  ;;  %v8682_v14 = vrot.slane %v8680_v57, 4  ;;  %v8226_v28 = vsel %vm13334_vm8, %v8224_v33, %v8225_v60 }
 0x503   : > { %v7290_v17 = vpop.f32.mrf.mxu0  ;;  %v8310_v7 = vunpack.c.l.b16 %v8226_v28  ;;  %v8097_v28 = vld [vmem:[#allocation2 + $0x44c] sm:$0x7] }
 0x504   : > { %7707 = vmatmul.bf16.gmra.mxu1 %v7591_v59  ;;  %7989 = vmatmul.bf16.gmra.mxu2 %v12653_v46  ;;  %v14643_v18 = vadd.f32 %v7287_v47, %v6865_v22  ;;  %v7482_v59 = vsel %vm13254_vm2, %v11959_v63, %v7481_v0  ;;  %v7485_v47 = vsel %vm13254_vm2, %v7483_v35, %v7484_v23  ;;  %v7355_v63 = vld [vmem:[#allocation2 + $0x3a8] sm:$0xf] }
 0x505   : > { %8448 = vmatmul.bf16.gmra.mxu3 %v8332_v16  ;;  %v8223_v46 = vsel %vm13334_vm8, %v12103_v45, %v8222_v21  ;;  %v8684_v22 = vsel %vm13254_vm2, %v8682_v14, %v8683_v62  ;;  %v7568_v0 = vunpack.c.l.b16 %v7482_v59  ;;  %v8767_v21 = vunpack.c.l.b16 %v8681_v24  ;;  %v8096_v35 = vld [vmem:[#allocation2 + $0x448] sm:$0xf]  ;;  %v8554_v45 = vld [vmem:[#allocation2 + $0x450] sm:$0xf]  ;;  %v7354_v62 = vld [vmem:[#allocation2 + $0x3a4] sm:$0xe] }
 0x506   : > { %8906 = vmatmul.bf16.gmra.mxu0 %v8790_v55  ;;  %v8309_v4 = vunpack.c.l.b16 %v8223_v46  ;;  %v8768_v2 = vunpack.c.l.b16 %v8684_v22  ;;  %v7488_v57 = vrot.slane %v7355_v63, 5  ;;  %v8095_v46 = vld [vmem:[#allocation2 + $0x444] sm:$0x8]  ;;  %v8553_v24 = vld [vmem:[#allocation2 + $0x44c] sm:$0xe] }
 0x507   : > { %v6373_v20 = vpop.f32.mrf.mxu2  ;;  %v8555_v22 = vld [vmem:[#allocation2 + $0x454] sm:$0x1]  ;;  %v12712_v63 = vld [vmem:[#allocation4 + $0x590] sm:$0xff] }
 0x508   : > { %v6408_v15 = vadd.f32 %v6373_v20, %v5950_v54  ;;  %v6831_v51 = vpop.f32.mrf.mxu3  ;;  %v7569_v54 = vunpack.c.l.b16 %v7485_v47  ;;  %v12654_v20 = vld [vmem:[#allocation2 + $0x38c] sm:$0xff]  ;;  %v8791_v14 = vpack.c.b16 %v8768_v2, %v8767_v21  ;;  %v8232_v2 = vrot.slane %v8097_v28, 7  ;;  %9641 = vmatpush.bf16.msra.mxu2 %v12712_v63  ;;  %v12728_v28 = vld [vmem:[#allocation4 + $0x610] sm:$0xff] }
 0x509   : > { %v5917_v30 = vpop.f32.mrf.mxu1  ;;  %10557 = vmatpush.bf16.msra.mxu0 %v12728_v28  ;;  %v8557_v63 = vld [vmem:[#allocation2 + $0x46c] sm:$0xf]  ;;  %v8558_v28 = vld [vmem:[#allocation2 + $0x470] sm:$0x1] }
 0x50a   : > { %v6866_v16 = vadd.f32 %v6831_v51, %v6408_v15  ;;  %v5951_v55 = vadd.f32 %v5917_v30, %v14373_v49  ;;  %v7592_v60 = vpack.c.b16 %v7569_v54, %v7568_v0  ;;  %v8333_v15 = vpack.c.b16 %v8310_v7, %v8309_v4  ;;  %v7356_v51 = vld [vmem:[#allocation2 + $0x3ac] sm:$0x1] }
 0x50b   : > { %v7292_v19 = vpop.f32.mrf.mxu0  ;;  %v7490_v0 = vrot.slane %v7488_v57, 4  ;;  %v7491_v4 = vrot.slane %v7356_v51, 5  ;;  %v12104_v7 = vrot.slane %v8095_v46, 11 }
 0x50c   : > { %v14658_v11 = vadd.f32 %v7290_v17, %v6866_v16  ;;  %v8229_v17 = vrot.slane %v8096_v35, 7  ;;  %v8687_v16 = vrot.slane %v8554_v45, 5  ;;  %v12152_v35 = vrot.slane %v8553_v24, 9 }
 0x50e   : > { %v8231_v21 = vrot.slane %v8229_v17, 4 }
 0x50f   : > { %v6375_v23 = vpop.f32.mrf.mxu2 }
 0x510   : > { %v6409_v49 = vadd.f32 %v6375_v23, %v5951_v55  ;;  %v6833_v33 = vpop.f32.mrf.mxu3  ;;  %v11960_v55 = vrot.slane %v7354_v62, 9  ;;  %v8689_v23 = vrot.slane %v8687_v16, 4 }
 0x511   : > { %v7673_v31 = vpop.f32.mrf.mxu1 }
 0x512   : > { %v6867_v30 = vadd.f32 %v6833_v33, %v6409_v49  ;;  %v7753_v59 = vadd.f32 %v7673_v31, %v14388_v61  ;;  %v12720_v61 = vld [vmem:[#allocation4 + $0x5d0] sm:$0xff]  ;;  %v8690_v49 = vrot.slane %v8555_v22, 5  ;;  %v7492_v31 = vsel %vm13254_vm2, %v7490_v0, %v7491_v4 }
 0x513   : > { %v8872_v47 = vpop.f32.mrf.mxu0  ;;  %10099 = vmatpush.bf16.msra.mxu3 %v12720_v61  ;;  %v7571_v22 = vunpack.c.l.b16 %v7492_v31 }
 0x514   : > { %7712 = vmatmul.bf16.gmra.mxu1 %v7592_v60  ;;  %7994 = vmatmul.bf16.gmra.mxu2 %v12654_v20  ;;  %v14661_v54 = vadd.f32 %v7292_v19, %v6867_v30  ;;  %v7489_v19 = vsel %vm13254_vm2, %v11960_v55, %v7488_v57  ;;  %v8691_v46 = vsel %vm13254_vm2, %v8689_v23, %v8690_v49  ;;  %v12688_v57 = vld [vmem:[#allocation4 + $0x550] sm:$0xff]  ;;  %v12655_v23 = vld [vmem:[#allocation2 + $0x3a8] sm:$0xff] }
 0x515   : > { %8453 = vmatmul.bf16.gmra.mxu3 %v8333_v15  ;;  %v8230_v15 = vsel %vm13334_vm8, %v12104_v7, %v8229_v17  ;;  %v7570_v24 = vunpack.c.l.b16 %v7489_v19  ;;  %9326 = vmatpush.bf16.msra.mxu1 %v12688_v57  ;;  %v8770_v7 = vunpack.c.l.b16 %v8691_v46  ;;  %v7359_v19 = vld [vmem:[#allocation2 + $0x3c8] sm:$0x1]  ;;  %v8694_v46 = vrot.slane %v8557_v63, 5  ;;  %v8556_v57 = vld [vmem:[#allocation2 + $0x468] sm:$0xe] }
 0x516   : > { %8911 = vmatmul.bf16.gmra.mxu0 %v8791_v14  ;;  %v8233_v14 = vsel %vm13334_vm8, %v8231_v21, %v8232_v2  ;;  %v8311_v55 = vunpack.c.l.b16 %v8230_v15  ;;  %v8099_v21 = vld [vmem:[#allocation2 + $0x464] sm:$0xf] }
 0x517   : > { %v7955_v45 = vpop.f32.mrf.mxu2  ;;  %v8312_v0 = vunpack.c.l.b16 %v8233_v14 }
 0x518   : > { %v8035_v33 = vadd.f32 %v7955_v45, %v7753_v59  ;;  %v8414_v60 = vpop.f32.mrf.mxu3  ;;  %v8688_v59 = vsel %vm13254_vm2, %v12152_v35, %v8687_v16  ;;  %v7593_v35 = vpack.c.b16 %v7571_v22, %v7570_v24 }
 0x519   : > { %v7675_v20 = vpop.f32.mrf.mxu1  ;;  %v8769_v4 = vunpack.c.l.b16 %v8688_v59  ;;  %v8100_v59 = vld [vmem:[#allocation2 + $0x468] sm:$0x7] }
 0x51a   : > { %v8494_v62 = vadd.f32 %v8414_v60, %v8035_v33  ;;  %v7754_v51 = vadd.f32 %v7675_v20, %v14391_v36  ;;  %v7358_v36 = vld [vmem:[#allocation2 + $0x3c4] sm:$0xf]  ;;  %v8334_v33 = vpack.c.b16 %v8312_v0, %v8311_v55  ;;  %v7357_v20 = vld [vmem:[#allocation2 + $0x3c0] sm:$0xe]  ;;  %v7498_v55 = vrot.slane %v7359_v19, 5 }
 0x51b   : > { %v8874_v30 = vpop.f32.mrf.mxu0  ;;  %v7495_v49 = vrot.slane %v7358_v36, 5  ;;  %v8792_v60 = vpack.c.b16 %v8770_v7, %v8769_v4  ;;  %v8239_v7 = vrot.slane %v8100_v59, 7  ;;  %v12153_v36 = vrot.slane %v8556_v57, 9 }
 0x51c   : > { %v14676_v17 = vadd.f32 %v8872_v47, %v8494_v62  ;;  %v8236_v47 = vrot.slane %v8099_v21, 7  ;;  %v8098_v62 = vld [vmem:[#allocation2 + $0x460] sm:$0x8]  ;;  %v8697_v21 = vrot.slane %v8558_v28, 5 }
 0x51d   : > { %v7497_v24 = vrot.slane %v7495_v49, 4  ;;  %v12105_v0 = vrot.slane %v8098_v62, 11  ;;  %v8695_v19 = vsel %vm13254_vm2, %v12153_v36, %v8694_v46 }
 0x51e   : > { %v8238_v4 = vrot.slane %v8236_v47, 4 }
 0x51f   : > { %v7957_v2 = vpop.f32.mrf.mxu2 }
 0x520   : > { %v8036_v16 = vadd.f32 %v7957_v2, %v7754_v51  ;;  %v8416_v61 = vpop.f32.mrf.mxu3  ;;  %v11961_v51 = vrot.slane %v7357_v20, 9 }
 0x521   : > { %v7678_v45 = vpop.f32.mrf.mxu1 }
 0x522   : > { %v8495_v31 = vadd.f32 %v8416_v61, %v8036_v16  ;;  %v7755_v15 = vadd.f32 %v7678_v45, %v14406_v3  ;;  %v8696_v3 = vrot.slane %v8694_v46, 4  ;;  %v8240_v45 = vsel %vm13334_vm8, %v8238_v4, %v8239_v7 }
 0x523   : > { %v8877_v14 = vpop.f32.mrf.mxu0  ;;  %v8314_v57 = vunpack.c.l.b16 %v8240_v45  ;;  %v8103_v45 = vld [vmem:[#allocation2 + $0x484] sm:$0x7] }
 0x524   : > { %7717 = vmatmul.bf16.gmra.mxu1 %v7593_v35  ;;  %7999 = vmatmul.bf16.gmra.mxu2 %v12655_v23  ;;  %v14679_v22 = vadd.f32 %v8874_v30, %v8495_v31  ;;  %v7496_v35 = vsel %vm13254_vm2, %v11961_v51, %v7495_v49  ;;  %v7499_v30 = vsel %vm13254_vm2, %v7497_v24, %v7498_v55  ;;  %v7361_v51 = vld [vmem:[#allocation2 + $0x3e0] sm:$0xf] }
 0x525   : > { %8458 = vmatmul.bf16.gmra.mxu3 %v8334_v33  ;;  %v8237_v23 = vsel %vm13334_vm8, %v12105_v0, %v8236_v47  ;;  %v8698_v31 = vsel %vm13254_vm2, %v8696_v3, %v8697_v21  ;;  %v7572_v49 = vunpack.c.l.b16 %v7496_v35  ;;  %v8771_v47 = vunpack.c.l.b16 %v8695_v19  ;;  %v8102_v24 = vld [vmem:[#allocation2 + $0x480] sm:$0xf]  ;;  %v8560_v0 = vld [vmem:[#allocation2 + $0x488] sm:$0xf]  ;;  %v7360_v21 = vld [vmem:[#allocation2 + $0x3dc] sm:$0xe] }
 0x526   : > { %8916 = vmatmul.bf16.gmra.mxu0 %v8792_v60  ;;  %v8313_v59 = vunpack.c.l.b16 %v8237_v23  ;;  %v8772_v28 = vunpack.c.l.b16 %v8698_v31  ;;  %v7502_v46 = vrot.slane %v7361_v51, 5  ;;  %v8101_v23 = vld [vmem:[#allocation2 + $0x47c] sm:$0x8]  ;;  %v8559_v19 = vld [vmem:[#allocation2 + $0x484] sm:$0xe] }
 0x527   : > { %v7960_v2 = vpop.f32.mrf.mxu2  ;;  %v8561_v31 = vld [vmem:[#allocation2 + $0x48c] sm:$0x1]  ;;  %v12711_v51 = vld [vmem:[#allocation4 + $0x588] sm:$0xff] }
 0x528   : > { %v8037_v16 = vadd.f32 %v7960_v2, %v7755_v15  ;;  %v8419_v63 = vpop.f32.mrf.mxu3  ;;  %v7573_v15 = vunpack.c.l.b16 %v7499_v30  ;;  %v12656_v2 = vld [vmem:[#allocation2 + $0x3c4] sm:$0xff]  ;;  %v8793_v3 = vpack.c.b16 %v8772_v28, %v8771_v47  ;;  %v8246_v28 = vrot.slane %v8103_v45, 7  ;;  %9642 = vmatpush.bf16.msra.mxu2 %v12711_v51  ;;  %v12727_v45 = vld [vmem:[#allocation4 + $0x608] sm:$0xff] }
 0x529   : > { %v7680_v61 = vpop.f32.mrf.mxu1  ;;  %10558 = vmatpush.bf16.msra.mxu0 %v12727_v45  ;;  %v8563_v51 = vld [vmem:[#allocation2 + $0x4a4] sm:$0xf]  ;;  %v8564_v45 = vld [vmem:[#allocation2 + $0x4a8] sm:$0x1] }
 0x52a   : > { %v8496_v33 = vadd.f32 %v8419_v63, %v8037_v16  ;;  %v7756_v60 = vadd.f32 %v7680_v61, %v14409_v10  ;;  %v7594_v7 = vpack.c.b16 %v7573_v15, %v7572_v49  ;;  %v8335_v16 = vpack.c.b16 %v8314_v57, %v8313_v59  ;;  %v7362_v63 = vld [vmem:[#allocation2 + $0x3e4] sm:$0x1] }
 0x52b   : > { %v8879_v20 = vpop.f32.mrf.mxu0  ;;  %v7504_v49 = vrot.slane %v7502_v46, 4  ;;  %v7505_v59 = vrot.slane %v7362_v63, 5  ;;  %v12106_v57 = vrot.slane %v8101_v23, 11 }
 0x52c   : > { %v14694_v62 = vadd.f32 %v8877_v14, %v8496_v33  ;;  %v8243_v14 = vrot.slane %v8102_v24, 7  ;;  %v8701_v33 = vrot.slane %v8560_v0, 5  ;;  %v12154_v24 = vrot.slane %v8559_v19, 9 }
 0x52e   : > { %v8245_v47 = vrot.slane %v8243_v14, 4 }
 0x52f   : > { %v7962_v55 = vpop.f32.mrf.mxu2 }
 0x530   : > { %v8038_v10 = vadd.f32 %v7962_v55, %v7756_v60  ;;  %v8421_v4 = vpop.f32.mrf.mxu3  ;;  %v11962_v60 = vrot.slane %v7360_v21, 9  ;;  %v8703_v55 = vrot.slane %v8701_v33, 4 }
 0x531   : > { %v7683_v36 = vpop.f32.mrf.mxu1 }
 0x532   : > { %v8497_v61 = vadd.f32 %v8421_v4, %v8038_v10  ;;  %v7757_v35 = vadd.f32 %v7683_v36, %v14424_v44  ;;  %v12719_v44 = vld [vmem:[#allocation4 + $0x5c8] sm:$0xff]  ;;  %v8704_v10 = vrot.slane %v8561_v31, 5  ;;  %v7506_v36 = vsel %vm13254_vm2, %v7504_v49, %v7505_v59 }
 0x533   : > { %v8882_v30 = vpop.f32.mrf.mxu0  ;;  %10100 = vmatpush.bf16.msra.mxu3 %v12719_v44  ;;  %v7575_v31 = vunpack.c.l.b16 %v7506_v36 }
 0x534   : > { %7722 = vmatmul.bf16.gmra.mxu1 %v7594_v7  ;;  %8004 = vmatmul.bf16.gmra.mxu2 %v12656_v2  ;;  %v14697_v15 = vadd.f32 %v8879_v20, %v8497_v61  ;;  %v7503_v20 = vsel %vm13254_vm2, %v11962_v60, %v7502_v46  ;;  %v8705_v23 = vsel %vm13254_vm2, %v8703_v55, %v8704_v10  ;;  %v12687_v46 = vld [vmem:[#allocation4 + $0x548] sm:$0xff]  ;;  %v12657_v55 = vld [vmem:[#allocation2 + $0x3e0] sm:$0xff] }
 0x535   : > { %8463 = vmatmul.bf16.gmra.mxu3 %v8335_v16  ;;  %v8244_v16 = vsel %vm13334_vm8, %v12106_v57, %v8243_v14  ;;  %v7574_v19 = vunpack.c.l.b16 %v7503_v20  ;;  %9327 = vmatpush.bf16.msra.mxu1 %v12687_v46  ;;  %v8774_v57 = vunpack.c.l.b16 %v8705_v23  ;;  %v7365_v20 = vld [vmem:[#allocation2 + $0x400] sm:$0x1]  ;;  %v8708_v23 = vrot.slane %v8563_v51, 5  ;;  %v8562_v46 = vld [vmem:[#allocation2 + $0x4a0] sm:$0xe] }
 0x536   : > { %8921 = vmatmul.bf16.gmra.mxu0 %v8793_v3  ;;  %v8247_v3 = vsel %vm13334_vm8, %v8245_v47, %v8246_v28  ;;  %v8315_v60 = vunpack.c.l.b16 %v8244_v16  ;;  %v8105_v47 = vld [vmem:[#allocation2 + $0x49c] sm:$0xf] }
 0x537   : > { %v7965_v0 = vpop.f32.mrf.mxu2  ;;  %v8316_v49 = vunpack.c.l.b16 %v8247_v3 }
 0x538   : > { %v8039_v4 = vadd.f32 %v7965_v0, %v7757_v35  ;;  %v8424_v7 = vpop.f32.mrf.mxu3  ;;  %v8702_v35 = vsel %vm13254_vm2, %v12154_v24, %v8701_v33  ;;  %v7595_v24 = vpack.c.b16 %v7575_v31, %v7574_v19 }
 0x539   : > { %v7685_v2 = vpop.f32.mrf.mxu1  ;;  %v8773_v59 = vunpack.c.l.b16 %v8702_v35  ;;  %v8106_v35 = vld [vmem:[#allocation2 + $0x4a0] sm:$0x7] }
 0x53a   : > { %v8498_v21 = vadd.f32 %v8424_v7, %v8039_v4  ;;  %v7758_v63 = vadd.f32 %v7685_v2, %v14427_v32  ;;  %v7364_v32 = vld [vmem:[#allocation2 + $0x3fc] sm:$0xf]  ;;  %v8336_v4 = vpack.c.b16 %v8316_v49, %v8315_v60  ;;  %v7363_v2 = vld [vmem:[#allocation2 + $0x3f8] sm:$0xe]  ;;  %v7512_v60 = vrot.slane %v7365_v20, 5 }
 0x53b   : > { %v8884_v61 = vpop.f32.mrf.mxu0  ;;  %v7509_v10 = vrot.slane %v7364_v32, 5  ;;  %v8794_v7 = vpack.c.b16 %v8774_v57, %v8773_v59  ;;  %v8253_v57 = vrot.slane %v8106_v35, 7  ;;  %v12155_v32 = vrot.slane %v8562_v46, 9 }
 0x53c   : > { %v14712_v14 = vadd.f32 %v8882_v30, %v8498_v21  ;;  %v8250_v30 = vrot.slane %v8105_v47, 7  ;;  %v8104_v21 = vld [vmem:[#allocation2 + $0x498] sm:$0x8]  ;;  %v8711_v47 = vrot.slane %v8564_v45, 5 }
 0x53d   : > { %v7511_v19 = vrot.slane %v7509_v10, 4  ;;  %v12107_v49 = vrot.slane %v8104_v21, 11  ;;  %v8709_v20 = vsel %vm13254_vm2, %v12155_v32, %v8708_v23 }
 0x53e   : > { %v8252_v59 = vrot.slane %v8250_v30, 4 }
 0x53f   : > { %v7967_v28 = vpop.f32.mrf.mxu2 }
 0x540   : > { %v8040_v33 = vadd.f32 %v7967_v28, %v7758_v63  ;;  %v8426_v44 = vpop.f32.mrf.mxu3  ;;  %v11963_v63 = vrot.slane %v7363_v2, 9 }
 0x541   : > { %v7688_v0 = vpop.f32.mrf.mxu1 }
 0x542   : > { %v8499_v36 = vadd.f32 %v8426_v44, %v8040_v33  ;;  %v7759_v16 = vadd.f32 %v7688_v0, %v14442_v56  ;;  %v8710_v56 = vrot.slane %v8708_v23, 4  ;;  %v8254_v0 = vsel %vm13334_vm8, %v8252_v59, %v8253_v57 }
 0x543   : > { %v8887_v3 = vpop.f32.mrf.mxu0  ;;  %v8318_v46 = vunpack.c.l.b16 %v8254_v0  ;;  %v8109_v0 = vld [vmem:[#allocation2 + $0x4bc] sm:$0x7] }
 0x544   : > { %7727 = vmatmul.bf16.gmra.mxu1 %v7595_v24  ;;  %8009 = vmatmul.bf16.gmra.mxu2 %v12657_v55  ;;  %v14715_v31 = vadd.f32 %v8884_v61, %v8499_v36  ;;  %v7510_v24 = vsel %vm13254_vm2, %v11963_v63, %v7509_v10  ;;  %v7513_v61 = vsel %vm13254_vm2, %v7511_v19, %v7512_v60  ;;  %v7367_v63 = vld [vmem:[#allocation2 + $0x418] sm:$0xf] }
 0x545   : > { %8468 = vmatmul.bf16.gmra.mxu3 %v8336_v4  ;;  %v8251_v55 = vsel %vm13334_vm8, %v12107_v49, %v8250_v30  ;;  %v8712_v36 = vsel %vm13254_vm2, %v8710_v56, %v8711_v47  ;;  %v7576_v10 = vunpack.c.l.b16 %v7510_v24  ;;  %v8775_v30 = vunpack.c.l.b16 %v8709_v20  ;;  %v8108_v19 = vld [vmem:[#allocation2 + $0x4b8] sm:$0xf]  ;;  %v8566_v49 = vld [vmem:[#allocation2 + $0x4c0] sm:$0xf]  ;;  %v7366_v47 = vld [vmem:[#allocation2 + $0x414] sm:$0xe] }
 0x546   : > { %8926 = vmatmul.bf16.gmra.mxu0 %v8794_v7  ;;  %v8317_v35 = vunpack.c.l.b16 %v8251_v55  ;;  %v8776_v45 = vunpack.c.l.b16 %v8712_v36  ;;  %v7516_v23 = vrot.slane %v7367_v63, 5  ;;  %v8107_v55 = vld [vmem:[#allocation2 + $0x4b4] sm:$0x8]  ;;  %v8565_v20 = vld [vmem:[#allocation2 + $0x4bc] sm:$0xe] }
 0x547   : > { %v7970_v28 = vpop.f32.mrf.mxu2  ;;  %v8567_v36 = vld [vmem:[#allocation2 + $0x4c4] sm:$0x1]  ;;  %v12710_v63 = vld [vmem:[#allocation4 + $0x580] sm:$0xff] }
 0x548   : > { %v8041_v33 = vadd.f32 %v7970_v28, %v7759_v16  ;;  %v8429_v51 = vpop.f32.mrf.mxu3  ;;  %v7577_v16 = vunpack.c.l.b16 %v7513_v61  ;;  %v12658_v28 = vld [vmem:[#allocation2 + $0x3fc] sm:$0xff]  ;;  %v8795_v56 = vpack.c.b16 %v8776_v45, %v8775_v30  ;;  %v8260_v45 = vrot.slane %v8109_v0, 7  ;;  %9643 = vmatpush.bf16.msra.mxu2 %v12710_v63  ;;  %v12726_v0 = vld [vmem:[#allocation4 + $0x600] sm:$0xff] }
 0x549   : > { %v7690_v44 = vpop.f32.mrf.mxu1  ;;  %10559 = vmatpush.bf16.msra.mxu0 %v12726_v0  ;;  %v8569_v63 = vld [vmem:[#allocation2 + $0x4dc] sm:$0xf]  ;;  %v8570_v0 = vld [vmem:[#allocation2 + $0x4e0] sm:$0x1] }
 0x54a   : > { %v8500_v4 = vadd.f32 %v8429_v51, %v8041_v33  ;;  %v7760_v7 = vadd.f32 %v7690_v44, %v14445_v27  ;;  %v7596_v57 = vpack.c.b16 %v7577_v16, %v7576_v10  ;;  %v8337_v33 = vpack.c.b16 %v8318_v46, %v8317_v35  ;;  %v7368_v51 = vld [vmem:[#allocation2 + $0x41c] sm:$0x1] }
 0x54b   : > { %v8889_v2 = vpop.f32.mrf.mxu0  ;;  %v7518_v10 = vrot.slane %v7516_v23, 4  ;;  %v7519_v35 = vrot.slane %v7368_v51, 5  ;;  %v12108_v46 = vrot.slane %v8107_v55, 11 }
 0x54c   : > { %v14730_v21 = vadd.f32 %v8887_v3, %v8500_v4  ;;  %v8257_v3 = vrot.slane %v8108_v19, 7  ;;  %v8715_v4 = vrot.slane %v8566_v49, 5  ;;  %v12156_v19 = vrot.slane %v8565_v20, 9 }
 0x54e   : > { %v8259_v30 = vrot.slane %v8257_v3, 4 }
 0x54f   : > { %v7972_v60 = vpop.f32.mrf.mxu2 }
 0x550   : > { %v8042_v27 = vadd.f32 %v7972_v60, %v7760_v7  ;;  %v8431_v59 = vpop.f32.mrf.mxu3  ;;  %v11964_v7 = vrot.slane %v7366_v47, 9  ;;  %v8717_v60 = vrot.slane %v8715_v4, 4 }
 0x551   : > { %v7693_v32 = vpop.f32.mrf.mxu1 }
 0x552   : > { %v8501_v44 = vadd.f32 %v8431_v59, %v8042_v27  ;;  %v7761_v24 = vadd.f32 %v7693_v32, %v14460_v8  ;;  %v12718_v8 = vld [vmem:[#allocation4 + $0x5c0] sm:$0xff]  ;;  %v8718_v27 = vrot.slane %v8567_v36, 5  ;;  %v7520_v32 = vsel %vm13254_vm2, %v7518_v10, %v7519_v35 }
 0x553   : > { %v8892_v61 = vpop.f32.mrf.mxu0  ;;  %10101 = vmatpush.bf16.msra.mxu3 %v12718_v8  ;;  %v7579_v36 = vunpack.c.l.b16 %v7520_v32 }
 0x554   : > { %7732 = vmatmul.bf16.gmra.mxu1 %v7596_v57  ;;  %8014 = vmatmul.bf16.gmra.mxu2 %v12658_v28  ;;  %v14733_v16 = vadd.f32 %v8889_v2, %v8501_v44  ;;  %v7517_v2 = vsel %vm13254_vm2, %v11964_v7, %v7516_v23  ;;  %v8719_v55 = vsel %vm13254_vm2, %v8717_v60, %v8718_v27  ;;  %v12686_v23 = vld [vmem:[#allocation4 + $0x540] sm:$0xff]  ;;  %v12659_v60 = vld [vmem:[#allocation2 + $0x418] sm:$0xff] }
 0x555   : > { %8473 = vmatmul.bf16.gmra.mxu3 %v8337_v33  ;;  %v8258_v33 = vsel %vm13334_vm8, %v12108_v46, %v8257_v3  ;;  %v7578_v20 = vunpack.c.l.b16 %v7517_v2  ;;  %9328 = vmatpush.bf16.msra.mxu1 %v12686_v23  ;;  %v8778_v46 = vunpack.c.l.b16 %v8719_v55  ;;  %v7371_v2 = vld [vmem:[#allocation2 + $0x438] sm:$0x1]  ;;  %v8722_v55 = vrot.slane %v8569_v63, 5  ;;  %v8568_v23 = vld [vmem:[#allocation2 + $0x4d8] sm:$0xe] }
 0x556   : > { %8931 = vmatmul.bf16.gmra.mxu0 %v8795_v56  ;;  %v8261_v56 = vsel %vm13334_vm8, %v8259_v30, %v8260_v45  ;;  %v8319_v7 = vunpack.c.l.b16 %v8258_v33  ;;  %v8111_v30 = vld [vmem:[#allocation2 + $0x4d4] sm:$0xf] }
 0x557   : > { %v7975_v49 = vpop.f32.mrf.mxu2  ;;  %v8320_v10 = vunpack.c.l.b16 %v8261_v56 }
 0x558   : > { %v8043_v59 = vadd.f32 %v7975_v49, %v7761_v24  ;;  %v8434_v57 = vpop.f32.mrf.mxu3  ;;  %v8716_v24 = vsel %vm13254_vm2, %v12156_v19, %v8715_v4  ;;  %v7597_v19 = vpack.c.b16 %v7579_v36, %v7578_v20 }
 0x559   : > { %v7695_v28 = vpop.f32.mrf.mxu1  ;;  %v8777_v35 = vunpack.c.l.b16 %v8716_v24  ;;  %v8112_v24 = vld [vmem:[#allocation2 + $0x4d8] sm:$0x7] }
 0x55a   : > { %v8502_v47 = vadd.f32 %v8434_v57, %v8043_v59  ;;  %v7762_v51 = vadd.f32 %v7695_v28, %v14463_v50  ;;  %v7370_v50 = vld [vmem:[#allocation2 + $0x434] sm:$0xf]  ;;  %v8338_v59 = vpack.c.b16 %v8320_v10, %v8319_v7  ;;  %v7369_v28 = vld [vmem:[#allocation2 + $0x430] sm:$0xe]  ;;  %v7526_v7 = vrot.slane %v7371_v2, 5 }
 0x55b   : > { %v8894_v44 = vpop.f32.mrf.mxu0  ;;  %v7523_v27 = vrot.slane %v7370_v50, 5  ;;  %v8796_v57 = vpack.c.b16 %v8778_v46, %v8777_v35  ;;  %v8267_v46 = vrot.slane %v8112_v24, 7  ;;  %v12157_v50 = vrot.slane %v8568_v23, 9 }
 0x55c   : > { %v14748_v3 = vadd.f32 %v8892_v61, %v8502_v47  ;;  %v8264_v61 = vrot.slane %v8111_v30, 7  ;;  %v8110_v47 = vld [vmem:[#allocation2 + $0x4d0] sm:$0x8]  ;;  %v8725_v30 = vrot.slane %v8570_v0, 5 }
 0x55d   : > { %v7525_v20 = vrot.slane %v7523_v27, 4  ;;  %v12109_v10 = vrot.slane %v8110_v47, 11  ;;  %v8723_v2 = vsel %vm13254_vm2, %v12157_v50, %v8722_v55 }
 0x55e   : > { %v8266_v35 = vrot.slane %v8264_v61, 4 }
 0x55f   : > { %v7977_v45 = vpop.f32.mrf.mxu2 }
 0x560   : > { %v8044_v4 = vadd.f32 %v7977_v45, %v7762_v51  ;;  %v8436_v8 = vpop.f32.mrf.mxu3  ;;  %v11965_v51 = vrot.slane %v7369_v28, 9 }
 0x561   : > { %v7698_v49 = vpop.f32.mrf.mxu1 }
 0x562   : > { %v8503_v32 = vadd.f32 %v8436_v8, %v8044_v4  ;;  %v7763_v33 = vadd.f32 %v7698_v49, %v14478_v42  ;;  %v8724_v42 = vrot.slane %v8722_v55, 4  ;;  %v8268_v49 = vsel %vm13334_vm8, %v8266_v35, %v8267_v46 }
 0x563   : > { %v8897_v56 = vpop.f32.mrf.mxu0  ;;  %v8322_v23 = vunpack.c.l.b16 %v8268_v49  ;;  %v8115_v49 = vld [vmem:[#allocation2 + $0x4f4] sm:$0x7] }
 0x564   : > { %7737 = vmatmul.bf16.gmra.mxu1 %v7597_v19  ;;  %8019 = vmatmul.bf16.gmra.mxu2 %v12659_v60  ;;  %v14751_v36 = vadd.f32 %v8894_v44, %v8503_v32  ;;  %v7524_v19 = vsel %vm13254_vm2, %v11965_v51, %v7523_v27  ;;  %v7527_v44 = vsel %vm13254_vm2, %v7525_v20, %v7526_v7  ;;  %v7373_v51 = vld [vmem:[#allocation2 + $0x450] sm:$0xf] }
 0x565   : > { %8478 = vmatmul.bf16.gmra.mxu3 %v8338_v59  ;;  %v8265_v60 = vsel %vm13334_vm8, %v12109_v10, %v8264_v61  ;;  %v8726_v32 = vsel %vm13254_vm2, %v8724_v42, %v8725_v30  ;;  %v7580_v27 = vunpack.c.l.b16 %v7524_v19  ;;  %v8779_v61 = vunpack.c.l.b16 %v8723_v2  ;;  %v8114_v20 = vld [vmem:[#allocation2 + $0x4f0] sm:$0xf]  ;;  %v8572_v10 = vld [vmem:[#allocation2 + $0x4f8] sm:$0xf]  ;;  %v7372_v30 = vld [vmem:[#allocation2 + $0x44c] sm:$0xe] }
 0x566   : > { %8936 = vmatmul.bf16.gmra.mxu0 %v8796_v57  ;;  %v8321_v24 = vunpack.c.l.b16 %v8265_v60  ;;  %v8780_v0 = vunpack.c.l.b16 %v8726_v32  ;;  %v7530_v55 = vrot.slane %v7373_v51, 5  ;;  %v8113_v60 = vld [vmem:[#allocation2 + $0x4ec] sm:$0x8]  ;;  %v8571_v2 = vld [vmem:[#allocation2 + $0x4f4] sm:$0xe] }
 0x567   : > { %v7980_v45 = vpop.f32.mrf.mxu2  ;;  %v8573_v32 = vld [vmem:[#allocation2 + $0x4fc] sm:$0x1]  ;;  %v12158_v51 = vrot.slane %v8571_v2, 9 }
 0x568   : > { %v8045_v4 = vadd.f32 %v7980_v45, %v7763_v33  ;;  %v8439_v63 = vpop.f32.mrf.mxu3  ;;  %v7581_v33 = vunpack.c.l.b16 %v7527_v44  ;;  %v12660_v45 = vld [vmem:[#allocation2 + $0x434] sm:$0xff]  ;;  %v8797_v42 = vpack.c.b16 %v8780_v0, %v8779_v61  ;;  %v8274_v0 = vrot.slane %v8115_v49, 7 }
 0x569   : > { %v7700_v8 = vpop.f32.mrf.mxu1 }
 0x56a   : > { %v8504_v59 = vadd.f32 %v8439_v63, %v8045_v4  ;;  %v7764_v57 = vadd.f32 %v7700_v8, %v14481_v39  ;;  %v7598_v46 = vpack.c.b16 %v7581_v33, %v7580_v27  ;;  %v8339_v4 = vpack.c.b16 %v8322_v23, %v8321_v24  ;;  %v7374_v63 = vld [vmem:[#allocation2 + $0x454] sm:$0x1] }
 0x56b   : > { %v8899_v28 = vpop.f32.mrf.mxu0  ;;  %v7532_v27 = vrot.slane %v7530_v55, 4  ;;  %v7533_v24 = vrot.slane %v7374_v63, 5  ;;  %v12110_v23 = vrot.slane %v8113_v60, 11 }
 0x56c   : > { %v14766_v47 = vadd.f32 %v8897_v56, %v8504_v59  ;;  %v8271_v56 = vrot.slane %v8114_v20, 7  ;;  %v8729_v59 = vrot.slane %v8572_v10, 5  ;;  %v8732_v20 = vrot.slane %v8573_v32, 5 }
 0x56e   : > { %v8273_v61 = vrot.slane %v8271_v56, 4  ;;  %v8730_v63 = vsel %vm13254_vm2, %v12158_v51, %v8729_v59 }
 0x56f   : > { %v7982_v7 = vpop.f32.mrf.mxu2 }
 0x570   : > { %v8046_v39 = vadd.f32 %v7982_v7, %v7764_v57  ;;  %v8441_v35 = vpop.f32.mrf.mxu3  ;;  %v11966_v57 = vrot.slane %v7372_v30, 9 }
 0x571   : > { %v7703_v50 = vpop.f32.mrf.mxu1 }
 0x572   : > { %v8505_v8 = vadd.f32 %v8441_v35, %v8046_v39  ;;  %v7765_v19 = vadd.f32 %v7703_v50, %v14496_v25  ;;  %v8731_v25 = vrot.slane %v8729_v59, 4  ;;  %v8275_v50 = vsel %vm13334_vm8, %v8273_v61, %v8274_v0 }
 0x573   : > { %v8902_v44 = vpop.f32.mrf.mxu0  ;;  %v8324_v2 = vunpack.c.l.b16 %v8275_v50  ;;  %v9759_v50 = vld [vmem:[#allocation2 + $0x400] sm:$0x1] }
 0x574   : > { %7742 = vmatmul.bf16.gmra.mxu1 %v7598_v46  ;;  %8024 = vmatmul.bf16.gmra.mxu2 %v12660_v45  ;;  %v14769_v33 = vadd.f32 %v8899_v28, %v8505_v8  ;;  %v7531_v46 = vsel %vm13254_vm2, %v11966_v57, %v7530_v55  ;;  %v7534_v28 = vsel %vm13254_vm2, %v7532_v27, %v7533_v24  ;;  %v8985_v57 = vld [vmem:[#allocation2 + $0x358] sm:$0xf]  ;;  %v9758_v27 = vld [vmem:[#allocation2 + $0x3fc] sm:$0xf] }
 0x575   : > { %8483 = vmatmul.bf16.gmra.mxu3 %v8339_v4  ;;  %v8272_v45 = vsel %vm13334_vm8, %v12110_v23, %v8271_v56  ;;  %v8733_v8 = vsel %vm13254_vm2, %v8731_v25, %v8732_v20  ;;  %v7582_v55 = vunpack.c.l.b16 %v7531_v46  ;;  %v8781_v56 = vunpack.c.l.b16 %v8730_v63  ;;  %v10216_v23 = vld [vmem:[#allocation2 + $0x404] sm:$0xf]  ;;  %v8984_v20 = vld [vmem:[#allocation2 + $0x354] sm:$0x8]  ;;  %v10215_v63 = vld [vmem:[#allocation2 + $0x400] sm:$0xc] }
 0x576   : > { %8941 = vmatmul.bf16.gmra.mxu0 %v8797_v42  ;;  %v8323_v49 = vunpack.c.l.b16 %v8272_v45  ;;  %v8782_v32 = vunpack.c.l.b16 %v8733_v8  ;;  %v9082_v59 = vrot.slane %v8985_v57, 7  ;;  %v9757_v45 = vld [vmem:[#allocation2 + $0x3f8] sm:$0xe]  ;;  %v10217_v8 = vld [vmem:[#allocation2 + $0x408] sm:$0x3]  ;;  %v12383_v57 = vrot.slane %v10215_v63, 10 }
 0x577   : > { %v7985_v7 = vpop.f32.mrf.mxu2 }
 0x578   : > { %v8047_v39 = vadd.f32 %v7985_v7, %v7765_v19  ;;  %v8444_v10 = vpop.f32.mrf.mxu3  ;;  %v7583_v19 = vunpack.c.l.b16 %v7534_v28  ;;  %v12661_v7 = vld [vmem:[#allocation2 + $0x450] sm:$0xff]  ;;  %v8798_v25 = vpack.c.b16 %v8782_v32, %v8781_v56  ;;  %v9858_v32 = vrot.slane %v9759_v50, 5 }
 0x579   : > { %v7705_v35 = vpop.f32.mrf.mxu1 }
 0x57a   : > { %v8506_v4 = vadd.f32 %v8444_v10, %v8047_v39  ;;  %v7766_v42 = vadd.f32 %v7705_v35, %v14499_v34  ;;  %v7599_v0 = vpack.c.b16 %v7583_v19, %v7582_v55  ;;  %v8340_v39 = vpack.c.b16 %v8324_v2, %v8323_v49  ;;  %v8986_v10 = vld [vmem:[#allocation2 + $0x35c] sm:$0x7] }
 0x57b   : > { %v8904_v30 = vpop.f32.mrf.mxu0  ;;  %v9084_v55 = vrot.slane %v9082_v59, 4  ;;  %v9085_v49 = vrot.slane %v8986_v10, 7  ;;  %v12335_v2 = vrot.slane %v9757_v45, 9 }
 0x57c   : > { %v14784_v60 = vadd.f32 %v8902_v44, %v8506_v4  ;;  %v9855_v44 = vrot.slane %v9758_v27, 5  ;;  %v10313_v4 = vrot.slane %v10216_v23, 6  ;;  %v10316_v27 = vrot.slane %v10217_v8, 6 }
 0x57e   : > { %v9857_v56 = vrot.slane %v9855_v44, 4  ;;  %v10314_v10 = vsel %vm13330_vm7, %v12383_v57, %v10313_v4 }
 0x57f   : > { %v7987_v24 = vpop.f32.mrf.mxu2 }
 0x580   : > { %v8048_v34 = vadd.f32 %v7987_v24, %v7766_v42  ;;  %v8446_v61 = vpop.f32.mrf.mxu3  ;;  %v12191_v42 = vrot.slane %v8984_v20, 11 }
 0x581   : > { %v7708_v51 = vpop.f32.mrf.mxu1 }
 0x582   : > { %v8507_v35 = vadd.f32 %v8446_v61, %v8048_v34  ;;  %v7767_v46 = vadd.f32 %v7708_v51, %v14514_v13  ;;  %v10315_v13 = vrot.slane %v10313_v4, 4  ;;  %v9859_v51 = vsel %vm13254_vm2, %v9857_v56, %v9858_v32 }
 0x583   : > { %v8907_v28 = vpop.f32.mrf.mxu0  ;;  %v9983_v63 = vunpack.c.l.b16 %v9859_v51  ;;  %v9762_v51 = vld [vmem:[#allocation2 + $0x41c] sm:$0x1] }
 0x584   : > { %7747 = vmatmul.bf16.gmra.mxu1 %v7599_v0  ;;  %8029 = vmatmul.bf16.gmra.mxu2 %v12661_v7  ;;  %v14787_v19 = vadd.f32 %v8904_v30, %v8507_v35  ;;  %v9083_v0 = vsel %vm13334_vm8, %v12191_v42, %v9082_v59  ;;  %v9086_v30 = vsel %vm13334_vm8, %v9084_v55, %v9085_v49  ;;  %v8988_v42 = vld [vmem:[#allocation2 + $0x374] sm:$0xf]  ;;  %v9761_v55 = vld [vmem:[#allocation2 + $0x418] sm:$0xf] }
 0x585   : > { %8488 = vmatmul.bf16.gmra.mxu3 %v8340_v39  ;;  %v9856_v7 = vsel %vm13254_vm2, %v12335_v2, %v9855_v44  ;;  %v10317_v35 = vsel %vm13330_vm7, %v10315_v13, %v10316_v27  ;;  %v9209_v59 = vunpack.c.l.b16 %v9083_v0  ;;  %v10440_v44 = vunpack.c.l.b16 %v10314_v10  ;;  %v10219_v2 = vld [vmem:[#allocation2 + $0x420] sm:$0xf]  ;;  %v8987_v27 = vld [vmem:[#allocation2 + $0x370] sm:$0x8]  ;;  %v10218_v10 = vld [vmem:[#allocation2 + $0x41c] sm:$0xc] }
 0x586   : > { %8946 = vmatmul.bf16.gmra.mxu0 %v8798_v25  ;;  %v9982_v50 = vunpack.c.l.b16 %v9856_v7  ;;  %v10441_v8 = vunpack.c.l.b16 %v10317_v35  ;;  %v9089_v4 = vrot.slane %v8988_v42, 7  ;;  %v9760_v7 = vld [vmem:[#allocation2 + $0x414] sm:$0xe]  ;;  %v10220_v35 = vld [vmem:[#allocation2 + $0x424] sm:$0x3]  ;;  %v12384_v42 = vrot.slane %v10218_v10, 10 }
 0x587   : > { %v7990_v24 = vpop.f32.mrf.mxu2 }
 0x588   : > { %v8049_v34 = vadd.f32 %v7990_v24, %v7767_v46  ;;  %v8449_v23 = vpop.f32.mrf.mxu3  ;;  %v9210_v46 = vunpack.c.l.b16 %v9086_v30  ;;  %v12694_v24 = vld [vmem:[#allocation2 + $0x3f0] sm:$0xff]  ;;  %v10472_v13 = vpack.c.b16 %v10441_v8, %v10440_v44  ;;  %v9865_v8 = vrot.slane %v9762_v51, 5 }
 0x589   : > { %v7710_v61 = vpop.f32.mrf.mxu1 }
 0x58a   : > { %v8508_v39 = vadd.f32 %v8449_v23, %v8049_v34  ;;  %v7768_v25 = vadd.f32 %v7710_v61, %v14517_v29  ;;  %v9241_v32 = vpack.c.b16 %v9210_v46, %v9209_v59  ;;  %v10014_v34 = vpack.c.b16 %v9983_v63, %v9982_v50  ;;  %v8989_v23 = vld [vmem:[#allocation2 + $0x378] sm:$0x7] }
 0x58b   : > { %v8909_v20 = vpop.f32.mrf.mxu0  ;;  %v9091_v59 = vrot.slane %v9089_v4, 4  ;;  %v9092_v50 = vrot.slane %v8989_v23, 7  ;;  %v12336_v63 = vrot.slane %v9760_v7, 9 }
 0x58c   : > { %v14802_v45 = vadd.f32 %v8907_v28, %v8508_v39  ;;  %v9862_v28 = vrot.slane %v9761_v55, 5  ;;  %v10320_v39 = vrot.slane %v10219_v2, 6  ;;  %v10323_v55 = vrot.slane %v10220_v35, 6 }
 0x58e   : > { %v9864_v44 = vrot.slane %v9862_v28, 4  ;;  %v10321_v23 = vsel %vm13330_vm7, %v12384_v42, %v10320_v39 }
 0x58f   : > { %v7992_v49 = vpop.f32.mrf.mxu2 }
 0x590   : > { %v8050_v29 = vadd.f32 %v7992_v49, %v7768_v25  ;;  %v8451_v56 = vpop.f32.mrf.mxu3  ;;  %v12192_v25 = vrot.slane %v8987_v27, 11 }
 0x591   : > { %v7713_v57 = vpop.f32.mrf.mxu1 }
 0x592   : > { %v8509_v61 = vadd.f32 %v8451_v56, %v8050_v29  ;;  %v7769_v0 = vadd.f32 %v7713_v57, %v14532_v41  ;;  %v10322_v41 = vrot.slane %v10320_v39, 4  ;;  %v9866_v57 = vsel %vm13254_vm2, %v9864_v44, %v9865_v8 }
 0x593   : > { %v8912_v30 = vpop.f32.mrf.mxu0  ;;  %v9985_v10 = vunpack.c.l.b16 %v9866_v57  ;;  %v9765_v57 = vld [vmem:[#allocation2 + $0x438] sm:$0x1] }
 0x594   : > { %9329 = vmatmul.bf16.vlgmr.msra.gmra.mxu1 %v9241_v32  ;;  %9644 = vmatmul.bf16.vlgmr.msra.gmra.mxu2 %v12694_v24  ;;  %v14805_v46 = vadd.f32 %v8909_v20, %v8509_v61  ;;  %v9090_v32 = vsel %vm13334_vm8, %v12192_v25, %v9089_v4  ;;  %v9093_v20 = vsel %vm13334_vm8, %v9091_v59, %v9092_v50  ;;  %v8991_v25 = vld [vmem:[#allocation2 + $0x390] sm:$0xf]  ;;  %v9764_v59 = vld [vmem:[#allocation2 + $0x434] sm:$0xf] }
 0x595   : > { %10102 = vmatmul.bf16.vlgmr.msra.gmra.mxu3 %v10014_v34  ;;  %v9863_v24 = vsel %vm13254_vm2, %v12336_v63, %v9862_v28  ;;  %v10324_v61 = vsel %vm13330_vm7, %v10322_v41, %v10323_v55  ;;  %v9211_v4 = vunpack.c.l.b16 %v9090_v32  ;;  %v10442_v28 = vunpack.c.l.b16 %v10321_v23  ;;  %v10222_v63 = vld [vmem:[#allocation2 + $0x43c] sm:$0xf]  ;;  %v8990_v55 = vld [vmem:[#allocation2 + $0x38c] sm:$0x8]  ;;  %v10221_v23 = vld [vmem:[#allocation2 + $0x438] sm:$0xc] }
 0x596   : > { %10560 = vmatmul.bf16.vlgmr.msra.gmra.mxu0 %v10472_v13  ;;  %v9984_v51 = vunpack.c.l.b16 %v9863_v24  ;;  %v10443_v35 = vunpack.c.l.b16 %v10324_v61  ;;  %v9096_v39 = vrot.slane %v8991_v25, 7  ;;  %v9763_v24 = vld [vmem:[#allocation2 + $0x430] sm:$0xe]  ;;  %v10223_v61 = vld [vmem:[#allocation2 + $0x440] sm:$0x3]  ;;  %v12385_v25 = vrot.slane %v10221_v23, 10 }
 0x597   : > { %v7995_v49 = vpop.f32.mrf.mxu2 }
 0x598   : > { %v8051_v29 = vadd.f32 %v7995_v49, %v7769_v0  ;;  %v8454_v2 = vpop.f32.mrf.mxu3  ;;  %v9212_v0 = vunpack.c.l.b16 %v9093_v20  ;;  %v12695_v49 = vld [vmem:[#allocation2 + $0x40c] sm:$0xff]  ;;  %v10473_v41 = vpack.c.b16 %v10443_v35, %v10442_v28  ;;  %v9872_v35 = vrot.slane %v9765_v57, 5 }
 0x599   : > { %v7715_v56 = vpop.f32.mrf.mxu1 }
 0x59a   : > { %v8510_v34 = vadd.f32 %v8454_v2, %v8051_v29  ;;  %v7770_v13 = vadd.f32 %v7715_v56, %v14535_v5  ;;  %v9242_v8 = vpack.c.b16 %v9212_v0, %v9211_v4  ;;  %v10015_v29 = vpack.c.b16 %v9985_v10, %v9984_v51  ;;  %v8992_v2 = vld [vmem:[#allocation2 + $0x394] sm:$0x7] }
 0x59b   : > { %v8914_v27 = vpop.f32.mrf.mxu0  ;;  %v9098_v4 = vrot.slane %v9096_v39, 4  ;;  %v9099_v51 = vrot.slane %v8992_v2, 7  ;;  %v12337_v10 = vrot.slane %v9763_v24, 9 }
 0x59c   : > { %v14820_v7 = vadd.f32 %v8912_v30, %v8510_v34  ;;  %v9869_v30 = vrot.slane %v9764_v59, 5  ;;  %v10327_v34 = vrot.slane %v10222_v63, 6  ;;  %v10330_v59 = vrot.slane %v10223_v61, 6 }
 0x59e   : > { %v9871_v28 = vrot.slane %v9869_v30, 4  ;;  %v10328_v2 = vsel %vm13330_vm7, %v12385_v25, %v10327_v34 }
 0x59f   : > { %v7997_v50 = vpop.f32.mrf.mxu2 }
 0x5a0   : > { %v8052_v5 = vadd.f32 %v7997_v50, %v7770_v13  ;;  %v8456_v44 = vpop.f32.mrf.mxu3  ;;  %v12193_v13 = vrot.slane %v8990_v55, 11 }
 0x5a1   : > { %v7718_v42 = vpop.f32.mrf.mxu1 }
 0x5a2   : > { %v8511_v56 = vadd.f32 %v8456_v44, %v8052_v5  ;;  %v7771_v32 = vadd.f32 %v7718_v42, %v14550_v52  ;;  %v10329_v52 = vrot.slane %v10327_v34, 4  ;;  %v9873_v42 = vsel %vm13254_vm2, %v9871_v28, %v9872_v35 }
 0x5a3   : > { %v8917_v20 = vpop.f32.mrf.mxu0  ;;  %v9987_v23 = vunpack.c.l.b16 %v9873_v42  ;;  %v9768_v42 = vld [vmem:[#allocation2 + $0x454] sm:$0x1] }
 0x5a4   : > { %9334 = vmatmul.bf16.gmra.mxu1 %v9242_v8  ;;  %9649 = vmatmul.bf16.gmra.mxu2 %v12695_v49  ;;  %v14823_v0 = vadd.f32 %v8914_v27, %v8511_v56  ;;  %v9097_v8 = vsel %vm13334_vm8, %v12193_v13, %v9096_v39  ;;  %v9100_v27 = vsel %vm13334_vm8, %v9098_v4, %v9099_v51  ;;  %v8994_v13 = vld [vmem:[#allocation2 + $0x3ac] sm:$0xf]  ;;  %v9767_v4 = vld [vmem:[#allocation2 + $0x450] sm:$0xf] }
 0x5a5   : > { %10107 = vmatmul.bf16.gmra.mxu3 %v10015_v29  ;;  %v9870_v49 = vsel %vm13254_vm2, %v12337_v10, %v9869_v30  ;;  %v10331_v56 = vsel %vm13330_vm7, %v10329_v52, %v10330_v59  ;;  %v9213_v39 = vunpack.c.l.b16 %v9097_v8  ;;  %v10444_v30 = vunpack.c.l.b16 %v10328_v2  ;;  %v10225_v10 = vld [vmem:[#allocation2 + $0x458] sm:$0xf]  ;;  %v8993_v59 = vld [vmem:[#allocation2 + $0x3a8] sm:$0x8]  ;;  %v10224_v2 = vld [vmem:[#allocation2 + $0x454] sm:$0xc] }
 0x5a6   : > { %10565 = vmatmul.bf16.gmra.mxu0 %v10473_v41  ;;  %v9986_v57 = vunpack.c.l.b16 %v9870_v49  ;;  %v10445_v61 = vunpack.c.l.b16 %v10331_v56  ;;  %v9103_v34 = vrot.slane %v8994_v13, 7  ;;  %v9766_v49 = vld [vmem:[#allocation2 + $0x44c] sm:$0xe]  ;;  %v10226_v56 = vld [vmem:[#allocation2 + $0x45c] sm:$0x3]  ;;  %v12386_v13 = vrot.slane %v10224_v2, 10 }
 0x5a7   : > { %v8000_v50 = vpop.f32.mrf.mxu2 }
 0x5a8   : > { %v8053_v5 = vadd.f32 %v8000_v50, %v7771_v32  ;;  %v8459_v63 = vpop.f32.mrf.mxu3  ;;  %v9214_v32 = vunpack.c.l.b16 %v9100_v27  ;;  %v12696_v50 = vld [vmem:[#allocation2 + $0x428] sm:$0xff]  ;;  %v10474_v52 = vpack.c.b16 %v10445_v61, %v10444_v30  ;;  %v9879_v61 = vrot.slane %v9768_v42, 5 }
 0x5a9   : > { %v7720_v44 = vpop.f32.mrf.mxu1 }
 0x5aa   : > { %v8512_v29 = vadd.f32 %v8459_v63, %v8053_v5  ;;  %v7772_v41 = vadd.f32 %v7720_v44, %v14553_v12  ;;  %v9243_v35 = vpack.c.b16 %v9214_v32, %v9213_v39  ;;  %v10016_v5 = vpack.c.b16 %v9987_v23, %v9986_v57  ;;  %v8995_v63 = vld [vmem:[#allocation2 + $0x3b0] sm:$0x7] }
 0x5ab   : > { %v8919_v55 = vpop.f32.mrf.mxu0  ;;  %v9105_v39 = vrot.slane %v9103_v34, 4  ;;  %v9106_v57 = vrot.slane %v8995_v63, 7  ;;  %v12338_v23 = vrot.slane %v9766_v49, 9 }
 0x5ac   : > { %v14838_v24 = vadd.f32 %v8917_v20, %v8512_v29  ;;  %v9876_v20 = vrot.slane %v9767_v4, 5  ;;  %v10334_v29 = vrot.slane %v10225_v10, 6  ;;  %v10337_v4 = vrot.slane %v10226_v56, 6 }
 0x5ae   : > { %v9878_v30 = vrot.slane %v9876_v20, 4  ;;  %v10335_v63 = vsel %vm13330_vm7, %v12386_v13, %v10334_v29 }
 0x5af   : > { %v8002_v51 = vpop.f32.mrf.mxu2 }
 0x5b0   : > { %v8054_v12 = vadd.f32 %v8002_v51, %v7772_v41  ;;  %v8461_v28 = vpop.f32.mrf.mxu3  ;;  %v12194_v41 = vrot.slane %v8993_v59, 11 }
 0x5b1   : > { %v7723_v25 = vpop.f32.mrf.mxu1 }
 0x5b2   : > { %v8513_v44 = vadd.f32 %v8461_v28, %v8054_v12  ;;  %v7773_v8 = vadd.f32 %v7723_v25, %v14568_v58  ;;  %v10336_v58 = vrot.slane %v10334_v29, 4  ;;  %v9880_v25 = vsel %vm13254_vm2, %v9878_v30, %v9879_v61 }
 0x5b3   : > { %v8922_v27 = vpop.f32.mrf.mxu0  ;;  %v9989_v2 = vunpack.c.l.b16 %v9880_v25  ;;  %v9771_v25 = vld [vmem:[#allocation2 + $0x470] sm:$0x1] }
 0x5b4   : > { %9339 = vmatmul.bf16.gmra.mxu1 %v9243_v35  ;;  %9654 = vmatmul.bf16.gmra.mxu2 %v12696_v50  ;;  %v14841_v32 = vadd.f32 %v8919_v55, %v8513_v44  ;;  %v9104_v35 = vsel %vm13334_vm8, %v12194_v41, %v9103_v34  ;;  %v9107_v55 = vsel %vm13334_vm8, %v9105_v39, %v9106_v57  ;;  %v8997_v41 = vld [vmem:[#allocation2 + $0x3c8] sm:$0xf]  ;;  %v9770_v39 = vld [vmem:[#allocation2 + $0x46c] sm:$0xf] }
 0x5b5   : > { %10112 = vmatmul.bf16.gmra.mxu3 %v10016_v5  ;;  %v9877_v50 = vsel %vm13254_vm2, %v12338_v23, %v9876_v20  ;;  %v10338_v44 = vsel %vm13330_vm7, %v10336_v58, %v10337_v4  ;;  %v9215_v34 = vunpack.c.l.b16 %v9104_v35  ;;  %v10446_v20 = vunpack.c.l.b16 %v10335_v63  ;;  %v10228_v23 = vld [vmem:[#allocation2 + $0x474] sm:$0xf]  ;;  %v8996_v4 = vld [vmem:[#allocation2 + $0x3c4] sm:$0x8]  ;;  %v10227_v63 = vld [vmem:[#allocation2 + $0x470] sm:$0xc] }
 0x5b6   : > { %10570 = vmatmul.bf16.gmra.mxu0 %v10474_v52  ;;  %v9988_v42 = vunpack.c.l.b16 %v9877_v50  ;;  %v10447_v56 = vunpack.c.l.b16 %v10338_v44  ;;  %v9110_v29 = vrot.slane %v8997_v41, 7  ;;  %v9769_v50 = vld [vmem:[#allocation2 + $0x468] sm:$0xe]  ;;  %v10229_v44 = vld [vmem:[#allocation2 + $0x478] sm:$0x3]  ;;  %v12387_v41 = vrot.slane %v10227_v63, 10 }
 0x5b7   : > { %v8005_v51 = vpop.f32.mrf.mxu2 }
 0x5b8   : > { %v8055_v12 = vadd.f32 %v8005_v51, %v7773_v8  ;;  %v8464_v10 = vpop.f32.mrf.mxu3  ;;  %v9216_v8 = vunpack.c.l.b16 %v9107_v55  ;;  %v12697_v51 = vld [vmem:[#allocation2 + $0x444] sm:$0xff]  ;;  %v10475_v58 = vpack.c.b16 %v10447_v56, %v10446_v20  ;;  %v9886_v56 = vrot.slane %v9771_v25, 5 }
 0x5b9   : > { %v7725_v28 = vpop.f32.mrf.mxu1 }
 0x5ba   : > { %v8514_v5 = vadd.f32 %v8464_v10, %v8055_v12  ;;  %v7774_v52 = vadd.f32 %v7725_v28, %v14571_v43  ;;  %v9244_v61 = vpack.c.b16 %v9216_v8, %v9215_v34  ;;  %v10017_v12 = vpack.c.b16 %v9989_v2, %v9988_v42  ;;  %v8998_v10 = vld [vmem:[#allocation2 + $0x3cc] sm:$0x7] }
 0x5bb   : > { %v8924_v59 = vpop.f32.mrf.mxu0  ;;  %v9112_v34 = vrot.slane %v9110_v29, 4  ;;  %v9113_v42 = vrot.slane %v8998_v10, 7  ;;  %v12339_v2 = vrot.slane %v9769_v50, 9 }
 0x5bc   : > { %v14856_v49 = vadd.f32 %v8922_v27, %v8514_v5  ;;  %v9883_v27 = vrot.slane %v9770_v39, 5  ;;  %v10341_v5 = vrot.slane %v10228_v23, 6  ;;  %v10344_v39 = vrot.slane %v10229_v44, 6 }
 0x5be   : > { %v9885_v20 = vrot.slane %v9883_v27, 4  ;;  %v10342_v10 = vsel %vm13330_vm7, %v12387_v41, %v10341_v5 }
 0x5bf   : > { %v8007_v57 = vpop.f32.mrf.mxu2 }
 0x5c0   : > { %v8056_v43 = vadd.f32 %v8007_v57, %v7774_v52  ;;  %v8466_v30 = vpop.f32.mrf.mxu3  ;;  %v12195_v52 = vrot.slane %v8996_v4, 11 }
 0x5c1   : > { %v7728_v13 = vpop.f32.mrf.mxu1 }
 0x5c2   : > { %v8515_v28 = vadd.f32 %v8466_v30, %v8056_v43  ;;  %v7775_v35 = vadd.f32 %v7728_v13, %v14586_v53  ;;  %v10343_v53 = vrot.slane %v10341_v5, 4  ;;  %v9887_v13 = vsel %vm13254_vm2, %v9885_v20, %v9886_v56 }
 0x5c3   : > { %v8927_v55 = vpop.f32.mrf.mxu0  ;;  %v9991_v63 = vunpack.c.l.b16 %v9887_v13  ;;  %v9772_v13 = vld [vmem:[#allocation2 + $0x484] sm:$0xe] }
 0x5c4   : > { %9344 = vmatmul.bf16.gmra.mxu1 %v9244_v61  ;;  %9659 = vmatmul.bf16.gmra.mxu2 %v12697_v51  ;;  %v14859_v8 = vadd.f32 %v8924_v59, %v8515_v28  ;;  %v9111_v61 = vsel %vm13334_vm8, %v12195_v52, %v9110_v29  ;;  %v9114_v59 = vsel %vm13334_vm8, %v9112_v34, %v9113_v42  ;;  %v9000_v52 = vld [vmem:[#allocation2 + $0x3e4] sm:$0xf]  ;;  %v9773_v34 = vld [vmem:[#allocation2 + $0x488] sm:$0xf] }
 0x5c5   : > { %10117 = vmatmul.bf16.gmra.mxu3 %v10017_v12  ;;  %v9884_v51 = vsel %vm13254_vm2, %v12339_v2, %v9883_v27  ;;  %v10345_v28 = vsel %vm13330_vm7, %v10343_v53, %v10344_v39  ;;  %v9217_v29 = vunpack.c.l.b16 %v9111_v61  ;;  %v10448_v27 = vunpack.c.l.b16 %v10342_v10  ;;  %v10231_v2 = vld [vmem:[#allocation2 + $0x490] sm:$0xf]  ;;  %v8999_v39 = vld [vmem:[#allocation2 + $0x3e0] sm:$0x8] }
 0x5c6   : > { %10575 = vmatmul.bf16.gmra.mxu0 %v10475_v58  ;;  %v9990_v25 = vunpack.c.l.b16 %v9884_v51  ;;  %v10449_v44 = vunpack.c.l.b16 %v10345_v28  ;;  %v9117_v5 = vrot.slane %v9000_v52, 7  ;;  %v15187_v61 = vld [vmem:[#allocation18_spill] sm:$0xff]  ;;  %v10348_v10 = vrot.slane %v10231_v2, 6  ;;  %v10230_v28 = vld [vmem:[#allocation2 + $0x48c] sm:$0xc] }
 0x5c7   : > { %v8010_v57 = vpop.f32.mrf.mxu2  ;;  %v12388_v52 = vrot.slane %v10230_v28, 10 }
 0x5c8   : > { %v8057_v43 = vadd.f32 %v8010_v57, %v7775_v35  ;;  %v8469_v23 = vpop.f32.mrf.mxu3  ;;  %v9218_v35 = vunpack.c.l.b16 %v9114_v59  ;;  %v12698_v57 = vld [vmem:[#allocation2 + $0x460] sm:$0xff]  ;;  %v10476_v53 = vpack.c.b16 %v10449_v44, %v10448_v27 }
 0x5c9   : > { %v7730_v30 = vpop.f32.mrf.mxu1 }
 0x5ca   : > { %v8516_v12 = vadd.f32 %v8469_v23, %v8057_v43  ;;  %v7776_v58 = vadd.f32 %v7730_v30, %v14589_v38  ;;  %v9245_v56 = vpack.c.b16 %v9218_v35, %v9217_v29  ;;  %v10018_v43 = vpack.c.b16 %v9991_v63, %v9990_v25  ;;  %v9001_v23 = vld [vmem:[#allocation2 + $0x3e8] sm:$0x7] }
 0x5cb   : > { %v8929_v4 = vpop.f32.mrf.mxu0  ;;  %v9119_v29 = vrot.slane %v9117_v5, 4  ;;  %v9120_v25 = vrot.slane %v9001_v23, 7  ;;  %v12340_v63 = vrot.slane %v9772_v13, 9  ;;  %v10349_v23 = vsel %vm13330_vm7, %v12388_v52, %v10348_v10 }
 0x5cc   : > { %v14874_v50 = vadd.f32 %v8927_v55, %v8516_v12  ;;  %v9890_v55 = vrot.slane %v9773_v34, 5  ;;  %v9774_v12 = vld [vmem:[#allocation2 + $0x48c] sm:$0x1]  ;;  %v10350_v34 = vrot.slane %v10348_v10, 4 }
 0x5cd   : > { %v9893_v44 = vrot.slane %v9774_v12, 5 }
 0x5ce   : > { %15186 = vst [vmem:[#allocation19_spill] sm:$0xff] %v14874_v50  ;;  %v10232_v50 = vld [vmem:[#allocation2 + $0x494] sm:$0x3]  ;;  %v9892_v27 = vrot.slane %v9890_v55, 4 }
 0x5cf   : > { %v8012_v42 = vpop.f32.mrf.mxu2 }
 0x5d0   : > { %v8058_v38 = vadd.f32 %v8012_v42, %v7776_v58  ;;  %v8471_v20 = vpop.f32.mrf.mxu3  ;;  %v12196_v58 = vrot.slane %v8999_v39, 11  ;;  %v10351_v42 = vrot.slane %v10232_v50, 6 }
 0x5d1   : > { %v7733_v41 = vpop.f32.mrf.mxu1 }
 0x5d2   : > { %v8517_v30 = vadd.f32 %v8471_v20, %v8058_v38  ;;  %v7777_v59 = vadd.f32 %v7733_v41, %v15187_v61 }
 0x5d3   : > { %v8932_v51 = vpop.f32.mrf.mxu0 }
 0x5d4   : > { %9349 = vmatmul.bf16.gmra.mxu1 %v9245_v56  ;;  %9664 = vmatmul.bf16.gmra.mxu2 %v12698_v57  ;;  %v14877_v35 = vadd.f32 %v8929_v4, %v8517_v30  ;;  %v9118_v56 = vsel %vm13334_vm8, %v12196_v58, %v9117_v5  ;;  %v9121_v4 = vsel %vm13334_vm8, %v9119_v29, %v9120_v25  ;;  %v9003_v58 = vld [vmem:[#allocation2 + $0x400] sm:$0xf]  ;;  %v9776_v29 = vld [vmem:[#allocation2 + $0x4a4] sm:$0xf] }
 0x5d5   : > { %10122 = vmatmul.bf16.gmra.mxu3 %v10018_v43  ;;  %v9891_v57 = vsel %vm13254_vm2, %v12340_v63, %v9890_v55  ;;  %v9894_v43 = vsel %vm13254_vm2, %v9892_v27, %v9893_v44  ;;  %v10352_v30 = vsel %vm13330_vm7, %v10350_v34, %v10351_v42  ;;  %v9219_v5 = vunpack.c.l.b16 %v9118_v56  ;;  %v10234_v63 = vld [vmem:[#allocation2 + $0x4ac] sm:$0xf]  ;;  %v9002_v42 = vld [vmem:[#allocation2 + $0x3fc] sm:$0x8] }
 0x5d6   : > { %10580 = vmatmul.bf16.gmra.mxu0 %v10476_v53  ;;  %v9220_v61 = vunpack.c.l.b16 %v9121_v4  ;;  %v9992_v13 = vunpack.c.l.b16 %v9891_v57  ;;  %v9993_v12 = vunpack.c.l.b16 %v9894_v43  ;;  %v10450_v55 = vunpack.c.l.b16 %v10349_v23  ;;  %v9775_v57 = vld [vmem:[#allocation2 + $0x4a0] sm:$0xe]  ;;  %v9777_v43 = vld [vmem:[#allocation2 + $0x4a8] sm:$0x1]  ;;  %v10233_v23 = vld [vmem:[#allocation2 + $0x4a8] sm:$0xc] }
 0x5d7   : > { %v8015_v38 = vpop.f32.mrf.mxu2  ;;  %v10451_v28 = vunpack.c.l.b16 %v10352_v30  ;;  %v9124_v10 = vrot.slane %v9003_v58, 7  ;;  %v10235_v30 = vld [vmem:[#allocation2 + $0x4b0] sm:$0x3]  ;;  %v12389_v58 = vrot.slane %v10233_v23, 10 }
 0x5d8   : > { %v8059_v20 = vadd.f32 %v8015_v38, %v7777_v59  ;;  %v8474_v2 = vpop.f32.mrf.mxu3  ;;  %v9246_v44 = vpack.c.b16 %v9220_v61, %v9219_v5  ;;  %v12699_v38 = vld [vmem:[#allocation2 + $0x47c] sm:$0xff] }
 0x5d9   : > { %v7735_v41 = vpop.f32.mrf.mxu1  ;;  %v10477_v34 = vpack.c.b16 %v10451_v28, %v10450_v55  ;;  %v9126_v5 = vrot.slane %v9124_v10, 4  ;;  %v9900_v28 = vrot.slane %v9777_v43, 5 }
 0x5da   : > { %v8518_v53 = vadd.f32 %v8474_v2, %v8059_v20  ;;  %v7778_v39 = vadd.f32 %v7735_v41, %v14607_v9  ;;  %v10019_v20 = vpack.c.b16 %v9993_v12, %v9992_v13  ;;  %v9004_v2 = vld [vmem:[#allocation2 + $0x404] sm:$0x7]  ;;  %v12341_v12 = vrot.slane %v9775_v57, 9 }
 0x5db   : > { %v8934_v50 = vpop.f32.mrf.mxu0  ;;  %v9127_v13 = vrot.slane %v9004_v2, 7 }
 0x5dc   : > { %v14892_v59 = vadd.f32 %v8932_v51, %v8518_v53  ;;  %v9897_v51 = vrot.slane %v9776_v29, 5  ;;  %v10355_v53 = vrot.slane %v10234_v63, 6  ;;  %v10358_v29 = vrot.slane %v10235_v30, 6 }
 0x5de   : > { %v9899_v55 = vrot.slane %v9897_v51, 4  ;;  %v10356_v2 = vsel %vm13330_vm7, %v12389_v58, %v10355_v53 }
 0x5df   : > { %v8017_v25 = vpop.f32.mrf.mxu2 }
 0x5e0   : > { %v8060_v9 = vadd.f32 %v8017_v25, %v7778_v39  ;;  %v8476_v27 = vpop.f32.mrf.mxu3  ;;  %v12197_v39 = vrot.slane %v9002_v42, 11 }
 0x5e1   : > { %v7738_v52 = vpop.f32.mrf.mxu1 }
 0x5e2   : > { %v8519_v41 = vadd.f32 %v8476_v27, %v8060_v9  ;;  %v7779_v56 = vadd.f32 %v7738_v52, %v14622_v40  ;;  %v10357_v40 = vrot.slane %v10355_v53, 4  ;;  %v9901_v52 = vsel %vm13254_vm2, %v9899_v55, %v9900_v28 }
 0x5e3   : > { %v8937_v4 = vpop.f32.mrf.mxu0  ;;  %v9995_v23 = vunpack.c.l.b16 %v9901_v52  ;;  %v9780_v52 = vld [vmem:[#allocation2 + $0x4c4] sm:$0x1] }
 0x5e4   : > { %9354 = vmatmul.bf16.gmra.mxu1 %v9246_v44  ;;  %9669 = vmatmul.bf16.gmra.mxu2 %v12699_v38  ;;  %v14895_v61 = vadd.f32 %v8934_v50, %v8519_v41  ;;  %v9125_v44 = vsel %vm13334_vm8, %v12197_v39, %v9124_v10  ;;  %v9128_v50 = vsel %vm13334_vm8, %v9126_v5, %v9127_v13  ;;  %v9006_v39 = vld [vmem:[#allocation2 + $0x41c] sm:$0xf]  ;;  %v9779_v5 = vld [vmem:[#allocation2 + $0x4c0] sm:$0xf] }
 0x5e5   : > { %10127 = vmatmul.bf16.gmra.mxu3 %v10019_v20  ;;  %v9898_v38 = vsel %vm13254_vm2, %v12341_v12, %v9897_v51  ;;  %v10359_v41 = vsel %vm13330_vm7, %v10357_v40, %v10358_v29  ;;  %v9221_v10 = vunpack.c.l.b16 %v9125_v44  ;;  %v10452_v51 = vunpack.c.l.b16 %v10356_v2  ;;  %v10237_v12 = vld [vmem:[#allocation2 + $0x4c8] sm:$0xf]  ;;  %v9005_v29 = vld [vmem:[#allocation2 + $0x418] sm:$0x8]  ;;  %v10236_v2 = vld [vmem:[#allocation2 + $0x4c4] sm:$0xc] }
 0x5e6   : > { %10585 = vmatmul.bf16.gmra.mxu0 %v10477_v34  ;;  %v9994_v43 = vunpack.c.l.b16 %v9898_v38  ;;  %v10453_v30 = vunpack.c.l.b16 %v10359_v41  ;;  %v9131_v53 = vrot.slane %v9006_v39, 7  ;;  %v9778_v38 = vld [vmem:[#allocation2 + $0x4bc] sm:$0xe]  ;;  %v10238_v41 = vld [vmem:[#allocation2 + $0x4cc] sm:$0x3]  ;;  %v12390_v39 = vrot.slane %v10236_v2, 10 }
 0x5e7   : > { %v8020_v25 = vpop.f32.mrf.mxu2 }
 0x5e8   : > { %v8061_v9 = vadd.f32 %v8020_v25, %v7779_v56  ;;  %v8479_v63 = vpop.f32.mrf.mxu3  ;;  %v9222_v56 = vunpack.c.l.b16 %v9128_v50  ;;  %v12700_v25 = vld [vmem:[#allocation2 + $0x498] sm:$0xff]  ;;  %v10478_v40 = vpack.c.b16 %v10453_v30, %v10452_v51  ;;  %v9907_v30 = vrot.slane %v9780_v52, 5 }
 0x5e9   : > { %v7740_v27 = vpop.f32.mrf.mxu1 }
 0x5ea   : > { %v8520_v20 = vadd.f32 %v8479_v63, %v8061_v9  ;;  %v7780_v34 = vadd.f32 %v7740_v27, %v14625_v37  ;;  %v9247_v28 = vpack.c.b16 %v9222_v56, %v9221_v10  ;;  %v10020_v9 = vpack.c.b16 %v9995_v23, %v9994_v43  ;;  %v9007_v63 = vld [vmem:[#allocation2 + $0x420] sm:$0x7] }
 0x5eb   : > { %v8939_v42 = vpop.f32.mrf.mxu0  ;;  %v9133_v10 = vrot.slane %v9131_v53, 4  ;;  %v9134_v43 = vrot.slane %v9007_v63, 7  ;;  %v12342_v23 = vrot.slane %v9778_v38, 9 }
 0x5ec   : > { %v14910_v57 = vadd.f32 %v8937_v4, %v8520_v20  ;;  %v9904_v4 = vrot.slane %v9779_v5, 5  ;;  %v10362_v20 = vrot.slane %v10237_v12, 6  ;;  %v10365_v5 = vrot.slane %v10238_v41, 6 }
 0x5ee   : > { %v9906_v51 = vrot.slane %v9904_v4, 4  ;;  %v10363_v63 = vsel %vm13330_vm7, %v12390_v39, %v10362_v20 }
 0x5ef   : > { %v8022_v13 = vpop.f32.mrf.mxu2 }
 0x5f0   : > { %v8062_v37 = vadd.f32 %v8022_v13, %v7780_v34  ;;  %v8481_v55 = vpop.f32.mrf.mxu3  ;;  %v12198_v34 = vrot.slane %v9005_v29, 11 }
 0x5f1   : > { %v7743_v58 = vpop.f32.mrf.mxu1 }
 0x5f2   : > { %v8521_v27 = vadd.f32 %v8481_v55, %v8062_v37  ;;  %v7781_v44 = vadd.f32 %v7743_v58, %v14640_v48  ;;  %v10364_v48 = vrot.slane %v10362_v20, 4  ;;  %v9908_v58 = vsel %vm13254_vm2, %v9906_v51, %v9907_v30 }
 0x5f3   : > { %v8942_v50 = vpop.f32.mrf.mxu0  ;;  %v9997_v2 = vunpack.c.l.b16 %v9908_v58  ;;  %v9783_v58 = vld [vmem:[#allocation2 + $0x4e0] sm:$0x1] }
 0x5f4   : > { %9359 = vmatmul.bf16.gmra.mxu1 %v9247_v28  ;;  %9674 = vmatmul.bf16.gmra.mxu2 %v12700_v25  ;;  %v14913_v56 = vadd.f32 %v8939_v42, %v8521_v27  ;;  %v9132_v28 = vsel %vm13334_vm8, %v12198_v34, %v9131_v53  ;;  %v9135_v42 = vsel %vm13334_vm8, %v9133_v10, %v9134_v43  ;;  %v9009_v34 = vld [vmem:[#allocation2 + $0x438] sm:$0xf]  ;;  %v9782_v10 = vld [vmem:[#allocation2 + $0x4dc] sm:$0xf] }
 0x5f5   : > { %10132 = vmatmul.bf16.gmra.mxu3 %v10020_v9  ;;  %v9905_v25 = vsel %vm13254_vm2, %v12342_v23, %v9904_v4  ;;  %v10366_v27 = vsel %vm13330_vm7, %v10364_v48, %v10365_v5  ;;  %v9223_v53 = vunpack.c.l.b16 %v9132_v28  ;;  %v10454_v4 = vunpack.c.l.b16 %v10363_v63  ;;  %v10240_v23 = vld [vmem:[#allocation2 + $0x4e4] sm:$0xf]  ;;  %v9008_v5 = vld [vmem:[#allocation2 + $0x434] sm:$0x8]  ;;  %v10239_v63 = vld [vmem:[#allocation2 + $0x4e0] sm:$0xc] }
 0x5f6   : > { %10590 = vmatmul.bf16.gmra.mxu0 %v10478_v40  ;;  %v9996_v52 = vunpack.c.l.b16 %v9905_v25  ;;  %v10455_v41 = vunpack.c.l.b16 %v10366_v27  ;;  %v9138_v20 = vrot.slane %v9009_v34, 7  ;;  %v9781_v25 = vld [vmem:[#allocation2 + $0x4d8] sm:$0xe]  ;;  %v10241_v27 = vld [vmem:[#allocation2 + $0x4e8] sm:$0x3]  ;;  %v12391_v34 = vrot.slane %v10239_v63, 10 }
 0x5f7   : > { %v8025_v13 = vpop.f32.mrf.mxu2 }
 0x5f8   : > { %v8063_v37 = vadd.f32 %v8025_v13, %v7781_v44  ;;  %v8484_v12 = vpop.f32.mrf.mxu3  ;;  %v9224_v44 = vunpack.c.l.b16 %v9135_v42  ;;  %v12701_v13 = vld [vmem:[#allocation2 + $0x4b4] sm:$0xff]  ;;  %v10479_v48 = vpack.c.b16 %v10455_v41, %v10454_v4  ;;  %v9914_v41 = vrot.slane %v9783_v58, 5 }
 0x5f9   : > { %v7745_v55 = vpop.f32.mrf.mxu1 }
 0x5fa   : > { %v8522_v9 = vadd.f32 %v8484_v12, %v8063_v37  ;;  %v7782_v40 = vadd.f32 %v7745_v55, %v14643_v18  ;;  %v9248_v30 = vpack.c.b16 %v9224_v44, %v9223_v53  ;;  %v10021_v37 = vpack.c.b16 %v9997_v2, %v9996_v52  ;;  %v9010_v12 = vld [vmem:[#allocation2 + $0x43c] sm:$0x7] }
 0x5fb   : > { %v8944_v29 = vpop.f32.mrf.mxu0  ;;  %v9140_v53 = vrot.slane %v9138_v20, 4  ;;  %v9141_v52 = vrot.slane %v9010_v12, 7  ;;  %v12343_v2 = vrot.slane %v9781_v25, 9 }
 0x5fc   : > { %v14928_v38 = vadd.f32 %v8942_v50, %v8522_v9  ;;  %v9911_v50 = vrot.slane %v9782_v10, 5  ;;  %v10369_v9 = vrot.slane %v10240_v23, 6  ;;  %v10372_v10 = vrot.slane %v10241_v27, 6 }
 0x5fe   : > { %v9913_v4 = vrot.slane %v9911_v50, 4  ;;  %v10370_v12 = vsel %vm13330_vm7, %v12391_v34, %v10369_v9 }
 0x5ff   : > { %v8027_v43 = vpop.f32.mrf.mxu2 }
 0x600   : > { %v8064_v18 = vadd.f32 %v8027_v43, %v7782_v40  ;;  %v8486_v51 = vpop.f32.mrf.mxu3  ;;  %v12199_v40 = vrot.slane %v9008_v5, 11 }
 0x601   : > { %v7748_v39 = vpop.f32.mrf.mxu1 }
 0x602   : > { %v8523_v55 = vadd.f32 %v8486_v51, %v8064_v18  ;;  %v7783_v28 = vadd.f32 %v7748_v39, %v14658_v11  ;;  %v10371_v11 = vrot.slane %v10369_v9, 4  ;;  %v9915_v39 = vsel %vm13254_vm2, %v9913_v4, %v9914_v41 }
 0x603   : > { %v8947_v42 = vpop.f32.mrf.mxu0  ;;  %v9999_v63 = vunpack.c.l.b16 %v9915_v39 }
 0x604   : > { %9364 = vmatmul.bf16.gmra.mxu1 %v9248_v30  ;;  %9679 = vmatmul.bf16.gmra.mxu2 %v12701_v13  ;;  %v14931_v44 = vadd.f32 %v8944_v29, %v8523_v55  ;;  %v9139_v30 = vsel %vm13334_vm8, %v12199_v40, %v9138_v20  ;;  %v9142_v29 = vsel %vm13334_vm8, %v9140_v53, %v9141_v52  ;;  %v9012_v40 = vld [vmem:[#allocation2 + $0x454] sm:$0xf]  ;;  %v9785_v53 = vld [vmem:[#allocation2 + $0x4f8] sm:$0xf] }
 0x605   : > { %10137 = vmatmul.bf16.gmra.mxu3 %v10021_v37  ;;  %v9912_v13 = vsel %vm13254_vm2, %v12343_v2, %v9911_v50  ;;  %v10373_v55 = vsel %vm13330_vm7, %v10371_v11, %v10372_v10  ;;  %v9225_v20 = vunpack.c.l.b16 %v9139_v30  ;;  %v10456_v50 = vunpack.c.l.b16 %v10370_v12  ;;  %v10243_v2 = vld [vmem:[#allocation2 + $0x500] sm:$0xf]  ;;  %v9011_v10 = vld [vmem:[#allocation2 + $0x450] sm:$0x8]  ;;  %v10244_v12 = vld [vmem:[#allocation2 + $0x504] sm:$0x3] }
 0x606   : > { %10595 = vmatmul.bf16.gmra.mxu0 %v10479_v48  ;;  %v9998_v58 = vunpack.c.l.b16 %v9912_v13  ;;  %v10457_v27 = vunpack.c.l.b16 %v10373_v55  ;;  %v9145_v9 = vrot.slane %v9012_v40, 7  ;;  %v9786_v13 = vld [vmem:[#allocation2 + $0x4fc] sm:$0x1]  ;;  %v10376_v39 = vrot.slane %v10243_v2, 6 }
 0x607   : > { %v8030_v43 = vpop.f32.mrf.mxu2 }
 0x608   : > { %v8065_v18 = vadd.f32 %v8030_v43, %v7783_v28  ;;  %v8489_v23 = vpop.f32.mrf.mxu3  ;;  %v9226_v28 = vunpack.c.l.b16 %v9142_v29  ;;  %v12702_v43 = vld [vmem:[#allocation2 + $0x4d0] sm:$0xff]  ;;  %v10480_v11 = vpack.c.b16 %v10457_v27, %v10456_v50  ;;  %v9147_v55 = vrot.slane %v9145_v9, 4 }
 0x609   : > { %v7750_v51 = vpop.f32.mrf.mxu1  ;;  %v9784_v29 = vld [vmem:[#allocation2 + $0x4f4] sm:$0xe]  ;;  %v9921_v50 = vrot.slane %v9786_v13, 5 }
 0x60a   : > { %v8524_v37 = vadd.f32 %v8489_v23, %v8065_v18  ;;  %v7784_v48 = vadd.f32 %v7750_v51, %v14661_v54  ;;  %v9249_v41 = vpack.c.b16 %v9226_v28, %v9225_v20  ;;  %v10022_v18 = vpack.c.b16 %v9999_v63, %v9998_v58  ;;  %v9013_v23 = vld [vmem:[#allocation2 + $0x458] sm:$0x7] }
 0x60b   : > { %v8949_v5 = vpop.f32.mrf.mxu0  ;;  %v9148_v28 = vrot.slane %v9013_v23, 7  ;;  %v12344_v58 = vrot.slane %v9784_v29, 9 }
 0x60c   : > { %v14946_v25 = vadd.f32 %v8947_v42, %v8524_v37  ;;  %v9918_v42 = vrot.slane %v9785_v53, 5  ;;  %v10242_v37 = vld [vmem:[#allocation2 + $0x4fc] sm:$0xc]  ;;  %v10378_v53 = vrot.slane %v10376_v39, 4 }
 0x60d   : > { %v12392_v40 = vrot.slane %v10242_v37, 10 }
 0x60e   : > { %v9920_v63 = vrot.slane %v9918_v42, 4 }
 0x60f   : > { %v8032_v52 = vpop.f32.mrf.mxu2 }
 0x610   : > { %v8066_v54 = vadd.f32 %v8032_v52, %v7784_v48  ;;  %v8491_v4 = vpop.f32.mrf.mxu3  ;;  %v12200_v48 = vrot.slane %v9011_v10, 11  ;;  %v10379_v52 = vrot.slane %v10244_v12, 6 }
 0x611   : > { %v9330_v34 = vpop.f32.mrf.mxu1 }
 0x612   : > { %v8525_v51 = vadd.f32 %v8491_v4, %v8066_v54  ;;  %v9410_v27 = vadd.f32 %v9330_v34, %v14676_v17  ;;  %v9922_v17 = vsel %vm13254_vm2, %v9920_v63, %v9921_v50  ;;  %v10377_v34 = vsel %vm13330_vm7, %v12392_v40, %v10376_v39  ;;  %v14966_v50 = vld [vmem:[%s187_s28] ss:$0 sm:$0xff] }
 0x613   : > { %v10561_v30 = vpop.f32.mrf.mxu0  ;;  %v10380_v10 = vsel %vm13330_vm7, %v10378_v53, %v10379_v52  ;;  %v10001_v13 = vunpack.c.l.b16 %v9922_v17  ;;  %v10458_v37 = vunpack.c.l.b16 %v10377_v34  ;;  %v12703_v53 = vld [vmem:[#allocation2 + $0x4ec] sm:$0xff]  ;;  %v9789_v34 = vld [vmem:[#allocation2 + $0x518] sm:$0x1] }
 0x614   : > { %9369 = vmatmul.bf16.gmra.mxu1 %v9249_v41  ;;  %9684 = vmatmul.bf16.gmra.mxu2 %v12702_v43  ;;  %v14948_v20 = vadd.f32 %v8949_v5, %v8525_v51  ;;  %v9146_v43 = vsel %vm13334_vm8, %v12200_v48, %v9145_v9  ;;  %v9149_v5 = vsel %vm13334_vm8, %v9147_v55, %v9148_v28  ;;  %v10459_v12 = vunpack.c.l.b16 %v10380_v10  ;;  %v9015_v48 = vld [vmem:[#allocation2 + $0x470] sm:$0xf]  ;;  %v9788_v55 = vld [vmem:[#allocation2 + $0x514] sm:$0xf]  ;;  %v9014_v52 = vld [vmem:[#allocation2 + $0x46c] sm:$0x8] }
 0x615   : > { %10142 = vmatmul.bf16.gmra.mxu3 %v10022_v18  ;;  %v9227_v51 = vunpack.c.l.b16 %v9146_v43  ;;  %v9228_v9 = vunpack.c.l.b16 %v9149_v5  ;;  %v9016_v5 = vld [vmem:[#allocation2 + $0x474] sm:$0x7]  ;;  %v9925_v17 = vrot.slane %v9788_v55, 5  ;;  %v10245_v10 = vld [vmem:[#allocation2 + $0x518] sm:$0xc] }
 0x616   : > { %15188 = vst [vmem:[#allocation18_spill] sm:$0xff] %v14948_v20  ;;  %10600 = vmatmul.bf16.gmra.mxu0 %v10480_v11  ;;  %v9919_v11 = vsel %vm13254_vm2, %v12344_v58, %v9918_v42  ;;  %v10246_v58 = vld [vmem:[#allocation2 + $0x51c] sm:$0xf]  ;;  %v10481_v43 = vpack.c.b16 %v10459_v12, %v10458_v37  ;;  %v10247_v20 = vld [vmem:[#allocation2 + $0x520] sm:$0x3]  ;;  %v9928_v37 = vrot.slane %v9789_v34, 5 }
 0x617   : > { %v9645_v2 = vpop.f32.mrf.mxu2  ;;  %v10000_v29 = vunpack.c.l.b16 %v9919_v11  ;;  %v9250_v40 = vpack.c.b16 %v9228_v9, %v9227_v51  ;;  %v9787_v11 = vld [vmem:[#allocation2 + $0x510] sm:$0xe]  ;;  %v9155_v9 = vrot.slane %v9016_v5, 7  ;;  %v12393_v12 = vrot.slane %v10245_v10, 10 }
 0x618   : > { %v9725_v54 = vadd.f32 %v9645_v2, %v9410_v27  ;;  %v10103_v4 = vpop.f32.mrf.mxu3  ;;  %v9152_v2 = vrot.slane %v9015_v48, 7 }
 0x619   : > { %v9332_v41 = vpop.f32.mrf.mxu1 }
 0x61a   : > { %v10183_v23 = vadd.f32 %v10103_v4, %v9725_v54  ;;  %v9411_v42 = vadd.f32 %v9332_v41, %v14679_v22  ;;  %v10023_v4 = vpack.c.b16 %v10001_v13, %v10000_v29  ;;  %v9154_v51 = vrot.slane %v9152_v2, 4 }
 0x61b   : > { %v10563_v18 = vpop.f32.mrf.mxu0  ;;  %v12345_v29 = vrot.slane %v9787_v11, 9  ;;  %v9927_v13 = vrot.slane %v9925_v17, 4 }
 0x61c   : > { %v10641_v63 = vadd.f32 %v10561_v30, %v10183_v23  ;;  %v10383_v30 = vrot.slane %v10246_v58, 6  ;;  %v12201_v23 = vrot.slane %v9014_v52, 11 }
 0x61d   : > { %v9926_v5 = vsel %vm13254_vm2, %v12345_v29, %v9925_v17  ;;  %v9018_v17 = vld [vmem:[#allocation2 + $0x48c] sm:$0xf]  ;;  %v9791_v29 = vld [vmem:[#allocation2 + $0x530] sm:$0xf] }
 0x61e   : > { %v10385_v58 = vrot.slane %v10383_v30, 4 }
 0x61f   : > { %v9647_v28 = vpop.f32.mrf.mxu2 }
 0x620   : > { %v9726_v39 = vadd.f32 %v9647_v28, %v9411_v42  ;;  %v10105_v27 = vpop.f32.mrf.mxu3  ;;  %v10677_v42 = vadd.f32 %v14966_v50, %v10641_v63 }
 0x621   : > { %v9335_v54 = vpop.f32.mrf.mxu1 }
 0x622   : > { %v10184_v22 = vadd.f32 %v10105_v27, %v9726_v39  ;;  %v9412_v55 = vadd.f32 %v9335_v54, %v14694_v62  ;;  %v10386_v39 = vrot.slane %v10247_v20, 6  ;;  %v10709_v63 = vmax.f32 %v10677_v42, 0.0 }
 0x623   : > { %v10566_v41 = vpop.f32.mrf.mxu0  ;;  %v9929_v20 = vsel %vm13254_vm2, %v9927_v13, %v9928_v37  ;;  %v10384_v54 = vsel %vm13330_vm7, %v12393_v12, %v10383_v30  ;;  %v10249_v13 = vld [vmem:[#allocation2 + $0x538] sm:$0xf] }
 0x624   : > { %v10642_v28 = vadd.f32 %v10563_v18, %v10184_v22  ;;  %9374 = vmatmul.bf16.gmra.mxu1 %v9250_v40  ;;  %9689 = vmatmul.bf16.gmra.mxu2 %v12703_v53  ;;  %v10387_v22 = vsel %vm13330_vm7, %v10385_v58, %v10386_v39  ;;  %v10003_v42 = vunpack.c.l.b16 %v9929_v20  ;;  %v9017_v58 = vld [vmem:[#allocation2 + $0x488] sm:$0x8]  ;;  %v9159_v39 = vrot.slane %v9018_v17, 7  ;;  %v9792_v20 = vld [vmem:[#allocation2 + $0x534] sm:$0x1] }
 0x625   : > { %10147 = vmatmul.bf16.gmra.mxu3 %v10023_v4  ;;  %v9153_v4 = vsel %vm13334_vm8, %v12201_v23, %v9152_v2  ;;  %v10002_v23 = vunpack.c.l.b16 %v9926_v5 }
 0x626   : > { %10605 = vmatmul.bf16.gmra.mxu0 %v10481_v43  ;;  %v10678_v48 = vadd.f32 %v14966_v50, %v10642_v28  ;;  %v9156_v43 = vsel %vm13334_vm8, %v9154_v51, %v9155_v9  ;;  %v9229_v2 = vunpack.c.l.b16 %v9153_v4  ;;  %v10460_v28 = vunpack.c.l.b16 %v10384_v54  ;;  %v9790_v4 = vld [vmem:[#allocation2 + $0x52c] sm:$0xe] }
 0x627   : > { %v9650_v27 = vpop.f32.mrf.mxu2  ;;  %v9230_v10 = vunpack.c.l.b16 %v9156_v43  ;;  %v10461_v51 = vunpack.c.l.b16 %v10387_v22  ;;  %v9932_v43 = vrot.slane %v9791_v29, 5  ;;  %v12202_v54 = vrot.slane %v9017_v58, 11  ;;  %v10250_v22 = vld [vmem:[#allocation2 + $0x53c] sm:$0x3] }
 0x628   : > { %v10710_v18 = vmax.f32 %v10678_v48, 0.0  ;;  %v9727_v40 = vadd.f32 %v9650_v27, %v9412_v55  ;;  %v10108_v53 = vpop.f32.mrf.mxu3  ;;  %v12704_v27 = vld [vmem:[#allocation2 + $0x508] sm:$0xff] }
 0x629   : > { %v9337_v52 = vpop.f32.mrf.mxu1  ;;  %v9251_v12 = vpack.c.b16 %v9230_v10, %v9229_v2  ;;  %v9161_v2 = vrot.slane %v9159_v39, 4 }
 0x62a   : > { %v12738_v11 = vpack.c.bf16 %v10710_v18, %v10709_v63  ;;  %v10185_v34 = vadd.f32 %v10108_v53, %v9727_v40  ;;  %v9413_v9 = vadd.f32 %v9337_v52, %v14697_v15  ;;  %v10024_v18 = vpack.c.b16 %v10003_v42, %v10002_v23  ;;  %v9019_v53 = vld [vmem:[#allocation2 + $0x490] sm:$0x7]  ;;  %v10248_v15 = vld [vmem:[#allocation2 + $0x534] sm:$0xc] }
 0x62b   : > { %v10568_v62 = vpop.f32.mrf.mxu0  ;;  %v10482_v40 = vpack.c.b16 %v10461_v51, %v10460_v28  ;;  %v10390_v52 = vrot.slane %v10249_v13, 6  ;;  %v9162_v10 = vrot.slane %v9019_v53, 7  ;;  %v12346_v23 = vrot.slane %v9790_v4, 9 }
 0x62c   : > { %12739 = vst [vmem:[%s13250_s30] sm:$0xff] %v12738_v11   ;;  %v10643_v37 = vadd.f32 %v10566_v41, %v10185_v34  ;;  %v9934_v42 = vrot.slane %v9932_v43, 4  ;;  %v9935_v28 = vrot.slane %v9792_v20, 5  ;;  %v12394_v51 = vrot.slane %v10248_v15, 10 }
 0x62d   : > { %v10392_v29 = vrot.slane %v10390_v52, 4  ;;  %v9163_v58 = vsel %vm13334_vm8, %v9161_v2, %v9162_v10  ;;  %v9794_v2 = vld [vmem:[#allocation2 + $0x54c] sm:$0xf] }
 0x62e   : > { %v10679_v41 = vadd.f32 %v14966_v50, %v10643_v37  ;;  %v10391_v53 = vsel %vm13330_vm7, %v12394_v51, %v10390_v52  ;;  %v9232_v20 = vunpack.c.l.b16 %v9163_v58 }
 0x62f   : > { %v9652_v48 = vpop.f32.mrf.mxu2 }
 0x630   : > { %v9728_v55 = vadd.f32 %v9652_v48, %v9413_v9  ;;  %v10110_v30 = vpop.f32.mrf.mxu3  ;;  %v10393_v48 = vrot.slane %v10250_v22, 6  ;;  %v10711_v37 = vmax.f32 %v10679_v41, 0.0  ;;  %v10462_v22 = vunpack.c.l.b16 %v10391_v53 }
 0x631   : > { %v9340_v63 = vpop.f32.mrf.mxu1 }
 0x632   : > { %v10186_v5 = vadd.f32 %v10110_v30, %v9728_v55  ;;  %v9414_v9 = vadd.f32 %v9340_v63, %v14712_v14  ;;  %v9936_v63 = vsel %vm13254_vm2, %v9934_v42, %v9935_v28  ;;  %v10394_v4 = vsel %vm13330_vm7, %v10392_v29, %v10393_v48 }
 0x633   : > { %v10571_v11 = vpop.f32.mrf.mxu0  ;;  %v10463_v41 = vunpack.c.l.b16 %v10394_v4 }
 0x634   : > { %v10644_v34 = vadd.f32 %v10568_v62, %v10186_v5  ;;  %9379 = vmatmul.bf16.gmra.mxu1 %v9251_v12  ;;  %9694 = vmatmul.bf16.gmra.mxu2 %v12704_v27  ;;  %v9160_v27 = vsel %vm13334_vm8, %v12202_v54, %v9159_v39  ;;  %v10005_v54 = vunpack.c.l.b16 %v9936_v63  ;;  %v10253_v63 = vld [vmem:[#allocation2 + $0x558] sm:$0x3] }
 0x635   : > { %10152 = vmatmul.bf16.gmra.mxu3 %v10024_v18  ;;  %v9933_v18 = vsel %vm13254_vm2, %v12346_v23, %v9932_v43  ;;  %v9231_v39 = vunpack.c.l.b16 %v9160_v27  ;;  %v9021_v43 = vld [vmem:[#allocation2 + $0x4a8] sm:$0xf]  ;;  %v10252_v23 = vld [vmem:[#allocation2 + $0x554] sm:$0xf] }
 0x636   : > { %10610 = vmatmul.bf16.gmra.mxu0 %v10482_v40  ;;  %v10680_v17 = vadd.f32 %v14966_v50, %v10644_v34  ;;  %v10004_v15 = vunpack.c.l.b16 %v9933_v18  ;;  %v9166_v29 = vrot.slane %v9021_v43, 7  ;;  %v9795_v18 = vld [vmem:[#allocation2 + $0x550] sm:$0x1] }
 0x637   : > { %v9655_v13 = vpop.f32.mrf.mxu2  ;;  %v9252_v51 = vpack.c.b16 %v9232_v20, %v9231_v39 }
 0x638   : > { %v10712_v62 = vmax.f32 %v10680_v17, 0.0  ;;  %v9729_v55 = vadd.f32 %v9655_v13, %v9414_v9  ;;  %v10113_v30 = vpop.f32.mrf.mxu3  ;;  %v12705_v17 = vld [vmem:[#allocation2 + $0x524] sm:$0xff]  ;;  %v10025_v13 = vpack.c.b16 %v10005_v54, %v10004_v15  ;;  %v9168_v4 = vrot.slane %v9166_v29, 4 }
 0x639   : > { %v9342_v12 = vpop.f32.mrf.mxu1  ;;  %v9020_v9 = vld [vmem:[#allocation2 + $0x4a4] sm:$0x8]  ;;  %v9942_v15 = vrot.slane %v9795_v18, 5 }
 0x63a   : > { %v12743_v40 = vpack.c.bf16 %v10712_v62, %v10711_v37  ;;  %v10187_v5 = vadd.f32 %v10113_v30, %v9729_v55  ;;  %v9415_v34 = vadd.f32 %v9342_v12, %v14715_v31  ;;  %v10483_v37 = vpack.c.b16 %v10463_v41, %v10462_v22  ;;  %v9022_v62 = vld [vmem:[#allocation2 + $0x4ac] sm:$0x7]  ;;  %v9793_v55 = vld [vmem:[#allocation2 + $0x548] sm:$0xe]  ;;  %v10251_v31 = vld [vmem:[#allocation2 + $0x550] sm:$0xc] }
 0x63b   : > { %v10573_v14 = vpop.f32.mrf.mxu0  ;;  %v9939_v30 = vrot.slane %v9794_v2, 5  ;;  %v10397_v12 = vrot.slane %v10252_v23, 6  ;;  %v12347_v39 = vrot.slane %v9793_v55, 9  ;;  %v12395_v54 = vrot.slane %v10251_v31, 10 }
 0x63c   : > { %12815 = vst [vmem:[%s13250_s30 + $0x8] sm:$0xff] %v12743_v40   ;;  %v10645_v42 = vadd.f32 %v10571_v11, %v10187_v5  ;;  %v12203_v40 = vrot.slane %v9020_v9, 11  ;;  %v9169_v5 = vrot.slane %v9022_v62, 7 }
 0x63d   : > { %v9941_v20 = vrot.slane %v9939_v30, 4  ;;  %v10399_v43 = vrot.slane %v10397_v12, 4 }
 0x63e   : > { %v10681_v11 = vadd.f32 %v14966_v50, %v10645_v42 }
 0x63f   : > { %v9657_v10 = vpop.f32.mrf.mxu2 }
 0x640   : > { %v9730_v28 = vadd.f32 %v9657_v10, %v9415_v34  ;;  %v10115_v52 = vpop.f32.mrf.mxu3  ;;  %v10400_v34 = vrot.slane %v10253_v63, 6  ;;  %v10713_v10 = vmax.f32 %v10681_v11, 0.0  ;;  %v9797_v11 = vld [vmem:[#allocation2 + $0x568] sm:$0xf] }
 0x641   : > { %v9345_v48 = vpop.f32.mrf.mxu1 }
 0x642   : > { %v10188_v27 = vadd.f32 %v10115_v52, %v9730_v28  ;;  %v9416_v41 = vadd.f32 %v9345_v48, %v14730_v21  ;;  %v9167_v52 = vsel %vm13334_vm8, %v12203_v40, %v9166_v29  ;;  %v9943_v48 = vsel %vm13254_vm2, %v9941_v20, %v9942_v15  ;;  %v12706_v15 = vld [vmem:[#allocation2 + $0x540] sm:$0xff] }
 0x643   : > { %v10576_v58 = vpop.f32.mrf.mxu0  ;;  %v9233_v29 = vunpack.c.l.b16 %v9167_v52  ;;  %v10007_v18 = vunpack.c.l.b16 %v9943_v48  ;;  %v9798_v52 = vld [vmem:[#allocation2 + $0x56c] sm:$0x1] }
 0x644   : > { %v10646_v53 = vadd.f32 %v10573_v14, %v10188_v27  ;;  %9384 = vmatmul.bf16.gmra.mxu1 %v9252_v51  ;;  %9699 = vmatmul.bf16.gmra.mxu2 %v12705_v17  ;;  %v9170_v51 = vsel %vm13334_vm8, %v9168_v4, %v9169_v5  ;;  %v9940_v17 = vsel %vm13254_vm2, %v12347_v39, %v9939_v30  ;;  %v9024_v30 = vld [vmem:[#allocation2 + $0x4c4] sm:$0xf]  ;;  %v10255_v4 = vld [vmem:[#allocation2 + $0x570] sm:$0xf] }
 0x645   : > { %10157 = vmatmul.bf16.gmra.mxu3 %v10025_v13  ;;  %v10398_v13 = vsel %vm13330_vm7, %v12395_v54, %v10397_v12  ;;  %v9234_v55 = vunpack.c.l.b16 %v9170_v51  ;;  %v10006_v27 = vunpack.c.l.b16 %v9940_v17  ;;  %v9023_v54 = vld [vmem:[#allocation2 + $0x4c0] sm:$0x8]  ;;  %v10256_v17 = vld [vmem:[#allocation2 + $0x574] sm:$0x3] }
 0x646   : > { %10615 = vmatmul.bf16.gmra.mxu0 %v10483_v37  ;;  %v10682_v22 = vadd.f32 %v14966_v50, %v10646_v53  ;;  %v10401_v37 = vsel %vm13330_vm7, %v10399_v43, %v10400_v34  ;;  %v10464_v31 = vunpack.c.l.b16 %v10398_v13  ;;  %v12204_v51 = vrot.slane %v9023_v54, 11 }
 0x647   : > { %v9660_v2 = vpop.f32.mrf.mxu2  ;;  %v10465_v40 = vunpack.c.l.b16 %v10401_v37  ;;  %v9253_v20 = vpack.c.b16 %v9234_v55, %v9233_v29  ;;  %v10026_v43 = vpack.c.b16 %v10007_v18, %v10006_v27  ;;  %v9949_v29 = vrot.slane %v9798_v52, 5 }
 0x648   : > { %v10714_v14 = vmax.f32 %v10682_v22, 0.0  ;;  %v9731_v23 = vadd.f32 %v9660_v2, %v9416_v41  ;;  %v10118_v42 = vpop.f32.mrf.mxu3  ;;  %v9173_v22 = vrot.slane %v9024_v30, 7  ;;  %v9025_v2 = vld [vmem:[#allocation2 + $0x4c8] sm:$0x7] }
 0x649   : > { %v9347_v28 = vpop.f32.mrf.mxu1  ;;  %v10484_v34 = vpack.c.b16 %v10465_v40, %v10464_v31  ;;  %v9176_v13 = vrot.slane %v9025_v2, 7  ;;  %v10407_v40 = vrot.slane %v10256_v17, 6 }
 0x64a   : > { %v12748_v9 = vpack.c.bf16 %v10714_v14, %v10713_v10  ;;  %v10189_v62 = vadd.f32 %v10118_v42, %v9731_v23  ;;  %v9417_v63 = vadd.f32 %v9347_v28, %v14733_v16  ;;  %v9796_v10 = vld [vmem:[#allocation2 + $0x564] sm:$0xe]  ;;  %v9946_v14 = vrot.slane %v9797_v11, 5  ;;  %v10254_v16 = vld [vmem:[#allocation2 + $0x56c] sm:$0xc] }
 0x64b   : > { %v10578_v21 = vpop.f32.mrf.mxu0  ;;  %v10404_v28 = vrot.slane %v10255_v4, 6  ;;  %v9175_v48 = vrot.slane %v9173_v22, 4  ;;  %v12348_v37 = vrot.slane %v9796_v10, 9  ;;  %v12396_v55 = vrot.slane %v10254_v16, 10 }
 0x64c   : > { %12816 = vst [vmem:[%s13250_s30 + $0x10] sm:$0xff] %v12748_v9   ;;  %v10647_v5 = vadd.f32 %v10576_v58, %v10189_v62  ;;  %v9948_v62 = vrot.slane %v9946_v14, 4 }
 0x64d   : > { %v10406_v31 = vrot.slane %v10404_v28, 4  ;;  %v10405_v54 = vsel %vm13330_vm7, %v12396_v55, %v10404_v28 }
 0x64e   : > { %v10683_v58 = vadd.f32 %v14966_v50, %v10647_v5  ;;  %v9174_v5 = vsel %vm13334_vm8, %v12204_v51, %v9173_v22  ;;  %v9800_v51 = vld [vmem:[#allocation2 + $0x584] sm:$0xf] }
 0x64f   : > { %v9662_v53 = vpop.f32.mrf.mxu2  ;;  %v9235_v22 = vunpack.c.l.b16 %v9174_v5  ;;  %v10259_v5 = vld [vmem:[#allocation2 + $0x590] sm:$0x3] }
 0x650   : > { %v9732_v39 = vadd.f32 %v9662_v53, %v9417_v63  ;;  %v10120_v12 = vpop.f32.mrf.mxu3  ;;  %v10715_v63 = vmax.f32 %v10683_v58, 0.0  ;;  %v10258_v58 = vld [vmem:[#allocation2 + $0x58c] sm:$0xf] }
 0x651   : > { %v9350_v41 = vpop.f32.mrf.mxu1 }
 0x652   : > { %v10190_v23 = vadd.f32 %v10120_v12, %v9732_v39  ;;  %v9418_v18 = vadd.f32 %v9350_v41, %v14748_v3  ;;  %v9177_v39 = vsel %vm13334_vm8, %v9175_v48, %v9176_v13  ;;  %v9947_v12 = vsel %vm13254_vm2, %v12348_v37, %v9946_v14  ;;  %v9027_v14 = vld [vmem:[#allocation2 + $0x4e0] sm:$0xf] }
 0x653   : > { %v10581_v42 = vpop.f32.mrf.mxu0  ;;  %v10408_v41 = vsel %vm13330_vm7, %v10406_v31, %v10407_v40  ;;  %v10008_v2 = vunpack.c.l.b16 %v9947_v12  ;;  %v12707_v37 = vld [vmem:[#allocation2 + $0x55c] sm:$0xff]  ;;  %v9028_v31 = vld [vmem:[#allocation2 + $0x4e4] sm:$0x7] }
 0x654   : > { %v10648_v9 = vadd.f32 %v10578_v21, %v10190_v23  ;;  %9389 = vmatmul.bf16.gmra.mxu1 %v9253_v20  ;;  %9704 = vmatmul.bf16.gmra.mxu2 %v12706_v15  ;;  %v9950_v15 = vsel %vm13254_vm2, %v9948_v62, %v9949_v29  ;;  %v10466_v23 = vunpack.c.l.b16 %v10405_v54  ;;  %v10467_v52 = vunpack.c.l.b16 %v10408_v41  ;;  %v9026_v62 = vld [vmem:[#allocation2 + $0x4dc] sm:$0x8]  ;;  %v9799_v40 = vld [vmem:[#allocation2 + $0x580] sm:$0xe] }
 0x655   : > { %10162 = vmatmul.bf16.gmra.mxu3 %v10026_v43  ;;  %v10009_v10 = vunpack.c.l.b16 %v9950_v15  ;;  %v9180_v29 = vrot.slane %v9027_v14, 7  ;;  %v12349_v15 = vrot.slane %v9799_v40, 9 }
 0x656   : > { %10620 = vmatmul.bf16.gmra.mxu0 %v10484_v34  ;;  %v10684_v27 = vadd.f32 %v14966_v50, %v10648_v9  ;;  %v9236_v34 = vunpack.c.l.b16 %v9177_v39 }
 0x657   : > { %v9665_v30 = vpop.f32.mrf.mxu2  ;;  %v9182_v12 = vrot.slane %v9180_v29, 4 }
 0x658   : > { %v10716_v21 = vmax.f32 %v10684_v27, 0.0  ;;  %v9733_v11 = vadd.f32 %v9665_v30, %v9418_v18  ;;  %v10123_v53 = vpop.f32.mrf.mxu3  ;;  %v9254_v13 = vpack.c.b16 %v9236_v34, %v9235_v22  ;;  %v10027_v27 = vpack.c.b16 %v10009_v10, %v10008_v2 }
 0x659   : > { %v9352_v4 = vpop.f32.mrf.mxu1  ;;  %v10485_v18 = vpack.c.b16 %v10467_v52, %v10466_v23  ;;  %v9953_v30 = vrot.slane %v9800_v51, 5  ;;  %v10414_v10 = vrot.slane %v10259_v5, 6 }
 0x65a   : > { %v12753_v20 = vpack.c.bf16 %v10716_v21, %v10715_v63  ;;  %v10191_v43 = vadd.f32 %v10123_v53, %v9733_v11  ;;  %v9419_v16 = vadd.f32 %v9352_v4, %v14751_v36  ;;  %v9801_v11 = vld [vmem:[#allocation2 + $0x588] sm:$0x1]  ;;  %v10257_v36 = vld [vmem:[#allocation2 + $0x588] sm:$0xc]  ;;  %v10411_v53 = vrot.slane %v10258_v58, 6 }
 0x65b   : > { %v10583_v3 = vpop.f32.mrf.mxu0  ;;  %v12205_v4 = vrot.slane %v9026_v62, 11  ;;  %v9955_v54 = vrot.slane %v9953_v30, 4  ;;  %v9956_v41 = vrot.slane %v9801_v11, 5  ;;  %v9803_v11 = vld [vmem:[#allocation2 + $0x5a0] sm:$0xf] }
 0x65c   : > { %12817 = vst [vmem:[%s13250_s30 + $0x18] sm:$0xff] %v12753_v20   ;;  %v10649_v9 = vadd.f32 %v10581_v42, %v10191_v43  ;;  %v9183_v20 = vrot.slane %v9028_v31, 7  ;;  %v12397_v43 = vrot.slane %v10257_v36, 10  ;;  %v10413_v2 = vrot.slane %v10411_v53, 4 }
 0x65e   : > { %v10685_v42 = vadd.f32 %v14966_v50, %v10649_v9  ;;  %v9184_v58 = vsel %vm13334_vm8, %v9182_v12, %v9183_v20  ;;  %v9954_v9 = vsel %vm13254_vm2, %v12349_v15, %v9953_v30  ;;  %v9030_v30 = vld [vmem:[#allocation2 + $0x4fc] sm:$0xf]  ;;  %v9029_v20 = vld [vmem:[#allocation2 + $0x4f8] sm:$0x8] }
 0x65f   : > { %v9667_v17 = vpop.f32.mrf.mxu2  ;;  %v12708_v12 = vld [vmem:[#allocation2 + $0x578] sm:$0xff]  ;;  %v9187_v15 = vrot.slane %v9030_v30, 7 }
 0x660   : > { %v9734_v48 = vadd.f32 %v9667_v17, %v9419_v16  ;;  %v10125_v28 = vpop.f32.mrf.mxu3  ;;  %v10717_v52 = vmax.f32 %v10685_v42, 0.0  ;;  %v9181_v17 = vsel %vm13334_vm8, %v12205_v4, %v9180_v29  ;;  %v10261_v4 = vld [vmem:[#allocation2 + $0x5a8] sm:$0xf] }
 0x661   : > { %v9355_v55 = vpop.f32.mrf.mxu1  ;;  %v9237_v29 = vunpack.c.l.b16 %v9181_v17  ;;  %v9189_v17 = vrot.slane %v9187_v15, 4 }
 0x662   : > { %v10192_v63 = vadd.f32 %v10125_v28, %v9734_v48  ;;  %v9420_v34 = vadd.f32 %v9355_v55, %v14766_v47  ;;  %v9957_v28 = vsel %vm13254_vm2, %v9955_v54, %v9956_v41  ;;  %v9238_v55 = vunpack.c.l.b16 %v9184_v58 }
 0x663   : > { %v10586_v21 = vpop.f32.mrf.mxu0 }
 0x664   : > { %v10650_v39 = vadd.f32 %v10583_v3, %v10192_v63  ;;  %9394 = vmatmul.bf16.gmra.mxu1 %v9254_v13  ;;  %9709 = vmatmul.bf16.gmra.mxu2 %v12707_v37  ;;  %v10412_v13 = vsel %vm13330_vm7, %v12397_v43, %v10411_v53  ;;  %v10415_v37 = vsel %vm13330_vm7, %v10413_v2, %v10414_v10  ;;  %v9960_v2 = vrot.slane %v9803_v11, 5 }
 0x665   : > { %10167 = vmatmul.bf16.gmra.mxu3 %v10027_v27  ;;  %v10010_v27 = vunpack.c.l.b16 %v9954_v9  ;;  %v10468_v31 = vunpack.c.l.b16 %v10412_v13  ;;  %v10469_v40 = vunpack.c.l.b16 %v10415_v37 }
 0x666   : > { %10625 = vmatmul.bf16.gmra.mxu0 %v10485_v18  ;;  %v10686_v22 = vadd.f32 %v14966_v50, %v10650_v39  ;;  %v10011_v18 = vunpack.c.l.b16 %v9957_v28  ;;  %v9255_v39 = vpack.c.b16 %v9238_v55, %v9237_v29 }
 0x667   : > { %v9670_v23 = vpop.f32.mrf.mxu2  ;;  %v10486_v43 = vpack.c.b16 %v10469_v40, %v10468_v31 }
 0x668   : > { %v10718_v3 = vmax.f32 %v10686_v22, 0.0  ;;  %v9735_v14 = vadd.f32 %v9670_v23, %v9420_v34  ;;  %v10128_v16 = vpop.f32.mrf.mxu3  ;;  %v10028_v41 = vpack.c.b16 %v10011_v18, %v10010_v27  ;;  %v9031_v22 = vld [vmem:[#allocation2 + $0x500] sm:$0x7]  ;;  %v9802_v34 = vld [vmem:[#allocation2 + $0x59c] sm:$0xe] }
 0x669   : > { %v9357_v51 = vpop.f32.mrf.mxu1  ;;  %v9190_v58 = vrot.slane %v9031_v22, 7  ;;  %v12350_v9 = vrot.slane %v9802_v34, 9 }
 0x66a   : > { %v12758_v48 = vpack.c.bf16 %v10718_v3, %v10717_v52  ;;  %v10193_v62 = vadd.f32 %v10128_v16, %v9735_v14  ;;  %v9421_v63 = vadd.f32 %v9357_v51, %v14769_v33  ;;  %v9804_v52 = vld [vmem:[#allocation2 + $0x5a4] sm:$0x1]  ;;  %v10260_v33 = vld [vmem:[#allocation2 + $0x5a4] sm:$0xc]  ;;  %v10418_v3 = vrot.slane %v10261_v4, 6 }
 0x66b   : > { %v10588_v47 = vpop.f32.mrf.mxu0  ;;  %v12206_v14 = vrot.slane %v9029_v20, 11  ;;  %v10262_v16 = vld [vmem:[#allocation2 + $0x5ac] sm:$0x3]  ;;  %v9963_v28 = vrot.slane %v9804_v52, 5  ;;  %v12398_v13 = vrot.slane %v10260_v33, 10  ;;  %v9191_v11 = vsel %vm13334_vm8, %v9189_v17, %v9190_v58  ;;  %v12709_v52 = vld [vmem:[#allocation2 + $0x594] sm:$0xff] }
 0x66c   : > { %12818 = vst [vmem:[%s13250_s30 + $0x20] sm:$0xff] %v12758_v48   ;;  %v10651_v5 = vadd.f32 %v10586_v21, %v10193_v62  ;;  %v9962_v48 = vrot.slane %v9960_v2, 4  ;;  %v10420_v29 = vrot.slane %v10418_v3, 4  ;;  %v10421_v55 = vrot.slane %v10262_v16, 6 }
 0x66d   : > { %v9240_v20 = vunpack.c.l.b16 %v9191_v11 }
 0x66e   : > { %v10687_v21 = vadd.f32 %v14966_v50, %v10651_v5  ;;  %v9964_v5 = vsel %vm13254_vm2, %v9962_v48, %v9963_v28 }
 0x66f   : > { %v9672_v36 = vpop.f32.mrf.mxu2 }
 0x670   : > { %v9736_v42 = vadd.f32 %v9672_v36, %v9421_v63  ;;  %v10130_v53 = vpop.f32.mrf.mxu3  ;;  %v10719_v18 = vmax.f32 %v10687_v21, 0.0  ;;  %v9188_v63 = vsel %vm13334_vm8, %v12206_v14, %v9187_v15  ;;  %v9961_v36 = vsel %vm13254_vm2, %v12350_v9, %v9960_v2 }
 0x671   : > { %v9360_v54 = vpop.f32.mrf.mxu1  ;;  %v10012_v6 = vunpack.c.l.b16 %v9961_v36  ;;  %v10013_v15 = vunpack.c.l.b16 %v9964_v5 }
 0x672   : > { %v10194_v10 = vadd.f32 %v10130_v53, %v9736_v42  ;;  %v9422_v62 = vadd.f32 %v9360_v54, %v14784_v60  ;;  %v10419_v42 = vsel %vm13330_vm7, %v12398_v13, %v10418_v3  ;;  %v10422_v53 = vsel %vm13330_vm7, %v10420_v29, %v10421_v55 }
 0x673   : > { %v10591_v23 = vpop.f32.mrf.mxu0  ;;  %v10470_v54 = vunpack.c.l.b16 %v10419_v42  ;;  %v10029_v3 = vpack.c.b16 %v10013_v15, %v10012_v6 }
 0x674   : > { %v10652_v51 = vadd.f32 %v10588_v47, %v10194_v10  ;;  %9399 = vmatmul.bf16.gmra.mxu1 %v9255_v39  ;;  %9714 = vmatmul.bf16.gmra.mxu2 %v12708_v12  ;;  %v9239_v12 = vunpack.c.l.b16 %v9188_v63 }
 0x675   : > { %10172 = vmatmul.bf16.gmra.mxu3 %v10028_v41  ;;  %v10471_v41 = vunpack.c.l.b16 %v10422_v53 }
 0x676   : > { %10630 = vmatmul.bf16.gmra.mxu0 %v10486_v43  ;;  %v10688_v37 = vadd.f32 %v14966_v50, %v10652_v51  ;;  %v9256_v10 = vpack.c.b16 %v9240_v20, %v9239_v12 }
 0x677   : > { %v9675_v27 = vpop.f32.mrf.mxu2  ;;  %v10487_v1 = vpack.c.b16 %v10471_v41, %v10470_v54 }
 0x678   : > { %v10720_v47 = vmax.f32 %v10688_v37, 0.0  ;;  %v9737_v31 = vadd.f32 %v9675_v27, %v9422_v62  ;;  %v10133_v40 = vpop.f32.mrf.mxu3 }
 0x679   : > { %v9362_v30 = vpop.f32.mrf.mxu1 }
 0x67a   : > { %v12763_v4 = vpack.c.bf16 %v10720_v47, %v10719_v18  ;;  %v10195_v39 = vadd.f32 %v10133_v40, %v9737_v31  ;;  %v9423_v43 = vadd.f32 %v9362_v30, %v14787_v19 }
 0x67b   : > { %v10593_v60 = vpop.f32.mrf.mxu0 }
 0x67c   : > { %12819 = vst [vmem:[%s13250_s30 + $0x28] sm:$0xff] %v12763_v4   ;;  %v10653_v34 = vadd.f32 %v10591_v23, %v10195_v39 }
 0x67e   : > { %v10689_v21 = vadd.f32 %v14966_v50, %v10653_v34 }
 0x67f   : > { %v9677_v22 = vpop.f32.mrf.mxu2 }
 0x680   : > { %v9738_v26 = vadd.f32 %v9677_v22, %v9423_v43  ;;  %v10135_v2 = vpop.f32.mrf.mxu3  ;;  %v10721_v58 = vmax.f32 %v10689_v21, 0.0 }
 0x681   : > { %v9365_v33 = vpop.f32.mrf.mxu1 }
 0x682   : > { %v10196_v14 = vadd.f32 %v10135_v2, %v9738_v26  ;;  %v9424_v23 = vadd.f32 %v9365_v33, %v14802_v45 }
 0x683   : > { %v10596_v16 = vpop.f32.mrf.mxu0 }
 0x684   : > { %v10654_v51 = vadd.f32 %v10593_v60, %v10196_v14  ;;  %9404 = vmatmul.bf16.gmra.mxu1 %v9256_v10  ;;  %9719 = vmatmul.bf16.gmra.mxu2 %v12709_v52 }
 0x685   : > { %10177 = vmatmul.bf16.gmra.mxu3 %v10029_v3 }
 0x686   : > { %10635 = vmatmul.bf16.gmra.mxu0 %v10487_v1  ;;  %v10690_v19 = vadd.f32 %v14966_v50, %v10654_v51 }
 0x687   : > { %v9680_v17 = vpop.f32.mrf.mxu2 }
 0x688   : > { %v10722_v9 = vmax.f32 %v10690_v19, 0.0  ;;  %v9739_v48 = vadd.f32 %v9680_v17, %v9424_v23  ;;  %v10138_v28 = vpop.f32.mrf.mxu3 }
 0x689   : > { %v9367_v13 = vpop.f32.mrf.mxu1 }
 0x68a   : > { %v12768_v37 = vpack.c.bf16 %v10722_v9, %v10721_v58  ;;  %v10197_v29 = vadd.f32 %v10138_v28, %v9739_v48  ;;  %v9425_v55 = vadd.f32 %v9367_v13, %v14805_v46 }
 0x68b   : > { %v10598_v62 = vpop.f32.mrf.mxu0 }
 0x68c   : > { %12820 = vst [vmem:[%s13250_s30 + $0x30] sm:$0xff] %v12768_v37   ;;  %v10655_v18 = vadd.f32 %v10596_v16, %v10197_v29 }
 0x68e   : > { %v10691_v63 = vadd.f32 %v14966_v50, %v10655_v18 }
 0x68f   : > { %v9682_v27 = vpop.f32.mrf.mxu2 }
 0x690   : > { %v9740_v47 = vadd.f32 %v9682_v27, %v9425_v55  ;;  %v10140_v31 = vpop.f32.mrf.mxu3  ;;  %v10723_v5 = vmax.f32 %v10691_v63, 0.0 }
 0x691   : > { %v9370_v40 = vpop.f32.mrf.mxu1 }
 0x692   : > { %v10198_v30 = vadd.f32 %v10140_v31, %v9740_v47  ;;  %v9426_v4 = vadd.f32 %v9370_v40, %v14820_v7 }
 0x693   : > { %v10601_v45 = vpop.f32.mrf.mxu0 }
 0x694   : > { %v10656_v11 = vadd.f32 %v10598_v62, %v10198_v30 }
 0x696   : > { %v10692_v36 = vadd.f32 %v14966_v50, %v10656_v11 }
 0x697   : > { %v9685_v60 = vpop.f32.mrf.mxu2 }
 0x698   : > { %v10724_v42 = vmax.f32 %v10692_v36, 0.0  ;;  %v9741_v53 = vadd.f32 %v9685_v60, %v9426_v4  ;;  %v10143_v46 = vpop.f32.mrf.mxu3 }
 0x699   : > { %v9372_v39 = vpop.f32.mrf.mxu1 }
 0x69a   : > { %v12773_v12 = vpack.c.bf16 %v10724_v42, %v10723_v5  ;;  %v10199_v6 = vadd.f32 %v10143_v46, %v9741_v53  ;;  %v9427_v15 = vadd.f32 %v9372_v39, %v14823_v0 }
 0x69b   : > { %v10603_v20 = vpop.f32.mrf.mxu0 }
 0x69c   : > { %12821 = vst [vmem:[%s13250_s30 + $0x38] sm:$0xff] %v12773_v12   ;;  %v10657_v41 = vadd.f32 %v10601_v45, %v10199_v6  ;;  %v15189_v6 = vld [vmem:[#allocation19_spill] sm:$0xff] }
 0x69e   : > { %v10693_v2 = vadd.f32 %v14966_v50, %v10657_v41 }
 0x69f   : > { %v9687_v54 = vpop.f32.mrf.mxu2 }
 0x6a0   : > { %v9742_v43 = vadd.f32 %v9687_v54, %v9427_v15  ;;  %v10145_v22 = vpop.f32.mrf.mxu3  ;;  %v10725_v1 = vmax.f32 %v10693_v2, 0.0 }
 0x6a1   : > { %v9375_v34 = vpop.f32.mrf.mxu1 }
 0x6a2   : > { %v10200_v26 = vadd.f32 %v10145_v22, %v9742_v43  ;;  %v9428_v33 = vadd.f32 %v9375_v34, %v14838_v24 }
 0x6a3   : > { %v10606_v7 = vpop.f32.mrf.mxu0 }
 0x6a4   : > { %v10658_v10 = vadd.f32 %v10603_v20, %v10200_v26 }
 0x6a6   : > { %v10694_v52 = vadd.f32 %v14966_v50, %v10658_v10 }
 0x6a7   : > { %v9690_v3 = vpop.f32.mrf.mxu2 }
 0x6a8   : > { %v10726_v14 = vmax.f32 %v10694_v52, 0.0  ;;  %v9743_v16 = vadd.f32 %v9690_v3, %v9428_v33  ;;  %v10148_v0 = vpop.f32.mrf.mxu3 }
 0x6a9   : > { %v9377_v21 = vpop.f32.mrf.mxu1 }
 0x6aa   : > { %v12778_v51 = vpack.c.bf16 %v10726_v14, %v10725_v1  ;;  %v10201_v23 = vadd.f32 %v10148_v0, %v9743_v16  ;;  %v9429_v17 = vadd.f32 %v9377_v21, %v14841_v32 }
 0x6ab   : > { %v10608_v19 = vpop.f32.mrf.mxu0 }
 0x6ac   : > { %12822 = vst [vmem:[%s13250_s30 + $0x40] sm:$0xff] %v12778_v51   ;;  %v10659_v9 = vadd.f32 %v10606_v7, %v10201_v23 }
 0x6ae   : > { %v10695_v62 = vadd.f32 %v14966_v50, %v10659_v9 }
 0x6af   : > { %v9692_v58 = vpop.f32.mrf.mxu2 }
 0x6b0   : > { %v9744_v48 = vadd.f32 %v9692_v58, %v9429_v17  ;;  %v10150_v28 = vpop.f32.mrf.mxu3  ;;  %v10727_v47 = vmax.f32 %v10695_v62, 0.0 }
 0x6b1   : > { %v9380_v13 = vpop.f32.mrf.mxu1 }
 0x6b2   : > { %v10202_v37 = vadd.f32 %v10150_v28, %v9744_v48  ;;  %v9430_v27 = vadd.f32 %v9380_v13, %v14856_v49 }
 0x6b3   : > { %v10611_v24 = vpop.f32.mrf.mxu0 }
 0x6b4   : > { %v10660_v29 = vadd.f32 %v10608_v19, %v10202_v37 }
 0x6b6   : > { %v10696_v55 = vadd.f32 %v14966_v50, %v10660_v29 }
 0x6b7   : > { %v9695_v18 = vpop.f32.mrf.mxu2 }
 0x6b8   : > { %v10728_v31 = vmax.f32 %v10696_v55, 0.0  ;;  %v9745_v40 = vadd.f32 %v9695_v18, %v9430_v27  ;;  %v10153_v32 = vpop.f32.mrf.mxu3 }
 0x6b9   : > { %v9382_v30 = vpop.f32.mrf.mxu1 }
 0x6ba   : > { %v12783_v45 = vpack.c.bf16 %v10728_v31, %v10727_v47  ;;  %v10203_v11 = vadd.f32 %v10153_v32, %v9745_v40  ;;  %v9431_v36 = vadd.f32 %v9382_v30, %v14859_v8  ;;  %v15102_v31 = vld [vmem:[%s187_s28] ss:$0 sm:$0xff]  ;;  %s12734_s28 = sshll.u32 %s13098_s15, 7  ;;  %s10806_s15 = scalar_lea.sflag [#allocation6], %s13231_s26 }
 0x6bb   : > { %v10613_v63 = vpop.f32.mrf.mxu0  ;;  %s10820_s19 = scalar_lea.hbm %s15164_s3, %s12734_s28 }
 0x6bc   : > { %12823 = vst [vmem:[%s13250_s30 + $0x48] sm:$0xff] %v12783_v45   ;;  %v10661_v60 = vadd.f32 %v10611_v24, %v10203_v11  ;;  %s10823_s10 = sshll.u32 %s10820_s19, 4  ;;  %s10824_s10 = int_to_ptr.hbm [resolvable:$true] %s10823_s10 }
 0x6bd   : > { %s13032_s11 = sshra.s32 %s10824_s10, 4  ;;  %s13033_s11 = int_to_ptr.hbm [resolvable:$true] %s13032_s11 }
 0x6be   : > { %v10697_v39 = vadd.f32 %v14966_v50, %v10661_v60  ;;  %s13034_s20 = scalar_lea.hbm %s13033_s11, 128  ;;  %p13039_p2 = scmp.lt.s32.totalorder %s13033_s11, %s15164_s3 }
 0x6bf   : > { %v9697_v4 = vpop.f32.mrf.mxu2  ;;  %p13035_p12 = scmp.ne.s32.totalorder %s13033_s11, %s13034_s20  ;;  %p13040_p5 = scmp.lt.s32.totalorder %s13038_s18, %s13034_s20 }
 0x6c0   : > { %v9746_v5 = vadd.f32 %v9697_v4, %v9431_v36  ;;  %v10155_v42 = vpop.f32.mrf.mxu3  ;;  %v10729_v41 = vmax.f32 %v10697_v39, 0.0 }
 0x6c1   : > { %v9385_v53 = vpop.f32.mrf.mxu1  ;;  %p13036_p13 = pnand %p13035_p12, %p13205_p4  ;;  %p13041_p8 = por %p13040_p5, %p13039_p2 }
 0x6c2   : > { %v10204_v46 = vadd.f32 %v10155_v42, %v9746_v5  ;;  %v9432_v15 = vadd.f32 %v9385_v53, %v15189_v6 }
 0x6c3   : > { %v10616_v49 = vpop.f32.mrf.mxu0  ;;  %p13037_p0 = pneg %p13036_p13 }
 0x6c4   : > { %v10662_v12 = vadd.f32 %v10613_v63, %v10204_v46 }
 0x6c5   : > { %p13042_p1 = pnand %p13041_p8, %p13037_p0 }
 0x6c6   : > { %v10698_v20 = vadd.f32 %v14966_v50, %v10662_v12 }
 0x6c7   : > { %v9700_v54 = vpop.f32.mrf.mxu2 }
 0x6c8   : > { %v10730_v43 = vmax.f32 %v10698_v20, 0.0  ;;  %v9747_v22 = vadd.f32 %v9700_v54, %v9432_v15  ;;  %v10158_v8 = vpop.f32.mrf.mxu3 }
 0x6c9   : > { %v9387_v34 = vpop.f32.mrf.mxu1 }
 0x6ca   : > { %v12788_v26 = vpack.c.bf16 %v10730_v43, %v10729_v41  ;;  %v10205_v2 = vadd.f32 %v10158_v8, %v9747_v22  ;;  %v9433_v10 = vadd.f32 %v9387_v34, %v14877_v35 }
 0x6cb   : > { %v10618_v7 = vpop.f32.mrf.mxu0 }
 0x6cc   : > { %12824 = vst [vmem:[%s13250_s30 + $0x50] sm:$0xff] %v12788_v26   ;;  %v10663_v33 = vadd.f32 %v10616_v49, %v10205_v2 }
 0x6ce   : > { %v10699_v21 = vadd.f32 %v14966_v50, %v10663_v33 }
 0x6cf   : > { %v9702_v52 = vpop.f32.mrf.mxu2 }
 0x6d0   : > { %v9748_v3 = vadd.f32 %v9702_v52, %v9433_v10  ;;  %v10160_v1 = vpop.f32.mrf.mxu3  ;;  %v10731_v58 = vmax.f32 %v10699_v21, 0.0 }
 0x6d1   : > { %v9390_v14 = vpop.f32.mrf.mxu1 }
 0x6d2   : > { %v10206_v16 = vadd.f32 %v10160_v1, %v9748_v3  ;;  %v9434_v23 = vadd.f32 %v9390_v14, %v14892_v59 }
 0x6d3   : > { %v10621_v0 = vpop.f32.mrf.mxu0 }
 0x6d4   : > { %v10664_v51 = vadd.f32 %v10618_v7, %v10206_v16 }
 0x6d6   : > { %v10700_v19 = vadd.f32 %v14966_v50, %v10664_v51 }
 0x6d7   : > { %v9705_v17 = vpop.f32.mrf.mxu2 }
 0x6d8   : > { %v10732_v9 = vmax.f32 %v10700_v19, 0.0  ;;  %v9749_v35 = vadd.f32 %v9705_v17, %v9434_v23  ;;  %v10163_v48 = vpop.f32.mrf.mxu3 }
 0x6d9   : > { %v9392_v28 = vpop.f32.mrf.mxu1 }
 0x6da   : > { %v12793_v13 = vpack.c.bf16 %v10732_v9, %v10731_v58  ;;  %v10207_v24 = vadd.f32 %v10163_v48, %v9749_v35  ;;  %v9435_v62 = vadd.f32 %v9392_v28, %v14895_v61 }
 0x6db   : > { %v10623_v37 = vpop.f32.mrf.mxu0 }
 0x6dc   : > { %12825 = vst [vmem:[%s13250_s30 + $0x58] sm:$0xff] %v12793_v13   ;;  %v10665_v55 = vadd.f32 %v10621_v0, %v10207_v24 }
 0x6de   : > { %v10701_v40 = vadd.f32 %v15102_v31, %v10665_v55 }
 0x6df   : > { %v9707_v29 = vpop.f32.mrf.mxu2 }
 0x6e0   : > { %v9750_v27 = vadd.f32 %v9707_v29, %v9435_v62  ;;  %v10165_v18 = vpop.f32.mrf.mxu3  ;;  %v10733_v61 = vmax.f32 %v10701_v40, 0.0  ;;  %v15190_v62 = vld [vmem:[#allocation18_spill] sm:$0xff] }
 0x6e1   : > { %v9395_v50 = vpop.f32.mrf.mxu1 }
 0x6e2   : > { %v10208_v59 = vadd.f32 %v10165_v18, %v9750_v27  ;;  %v9436_v45 = vadd.f32 %v9395_v50, %v14910_v57 }
 0x6e3   : > { %v10626_v47 = vpop.f32.mrf.mxu0 }
 0x6e4   : > { %v10666_v32 = vadd.f32 %v10623_v37, %v10208_v59 }
 0x6e6   : > { %v10702_v30 = vadd.f32 %v15102_v31, %v10666_v32 }
 0x6e7   : > { %v9710_v63 = vpop.f32.mrf.mxu2 }
 0x6e8   : > { %v10734_v11 = vmax.f32 %v10702_v30, 0.0  ;;  %v9751_v36 = vadd.f32 %v9710_v63, %v9436_v45  ;;  %v10168_v4 = vpop.f32.mrf.mxu3 }
 0x6e9   : > { %v9397_v60 = vpop.f32.mrf.mxu1 }
 0x6ea   : > { %v12798_v5 = vpack.c.bf16 %v10734_v11, %v10733_v61  ;;  %v10209_v53 = vadd.f32 %v10168_v4, %v9751_v36  ;;  %v9437_v46 = vadd.f32 %v9397_v60, %v14913_v56 }
 0x6eb   : > { %v10628_v42 = vpop.f32.mrf.mxu0 }
 0x6ec   : > { %12826 = vst [vmem:[%s13250_s30 + $0x60] sm:$0xff] %v12798_v5   ;;  %v10667_v39 = vadd.f32 %v10626_v47, %v10209_v53 }
 0x6ee   : > { %v10703_v57 = vadd.f32 %v15102_v31, %v10667_v39 }
 0x6ef   : > { %v9712_v49 = vpop.f32.mrf.mxu2 }
 0x6f0   : > { %v9752_v12 = vadd.f32 %v9712_v49, %v9437_v46  ;;  %v10170_v20 = vpop.f32.mrf.mxu3  ;;  %v10735_v34 = vmax.f32 %v10703_v57, 0.0 }
 0x6f1   : > { %v9400_v6 = vpop.f32.mrf.mxu1 }
 0x6f2   : > { %v10210_v15 = vadd.f32 %v10170_v20, %v9752_v12  ;;  %v9438_v22 = vadd.f32 %v9400_v6, %v14928_v38 }
 0x6f3   : > { %v10631_v41 = vpop.f32.mrf.mxu0 }
 0x6f4   : > { %v10668_v54 = vadd.f32 %v10628_v42, %v10210_v15 }
 0x6f6   : > { %v10704_v43 = vadd.f32 %v15102_v31, %v10668_v54 }
 0x6f7   : > { %v9715_v8 = vpop.f32.mrf.mxu2 }
 0x6f8   : > { %v10736_v26 = vmax.f32 %v10704_v43, 0.0  ;;  %v9753_v7 = vadd.f32 %v9715_v8, %v9438_v22  ;;  %v10173_v56 = vpop.f32.mrf.mxu3 }
 0x6f9   : > { %v9402_v2 = vpop.f32.mrf.mxu1 }
 0x6fa   : > { %v12803_v10 = vpack.c.bf16 %v10736_v26, %v10735_v34  ;;  %v10211_v52 = vadd.f32 %v10173_v56, %v9753_v7  ;;  %v9439_v33 = vadd.f32 %v9402_v2, %v14931_v44 }
 0x6fb   : > { %v10633_v3 = vpop.f32.mrf.mxu0 }
 0x6fc   : > { %12827 = vst [vmem:[%s13250_s30 + $0x68] sm:$0xff] %v12803_v10   ;;  %v10669_v14 = vadd.f32 %v10631_v41, %v10211_v52 }
 0x6fe   : > { %v10705_v38 = vadd.f32 %v15102_v31, %v10669_v14 }
 0x6ff   : > { %v9717_v1 = vpop.f32.mrf.mxu2 }
 0x700   : > { %v9754_v16 = vadd.f32 %v9717_v1, %v9439_v33  ;;  %v10175_v0 = vpop.f32.mrf.mxu3  ;;  %v10737_v9 = vmax.f32 %v10705_v38, 0.0 }
 0x701   : > { %v9405_v21 = vpop.f32.mrf.mxu1 }
 0x702   : > { %v10212_v51 = vadd.f32 %v10175_v0, %v9754_v16  ;;  %v9440_v17 = vadd.f32 %v9405_v21, %v14946_v25 }
 0x703   : > { %v10636_v28 = vpop.f32.mrf.mxu0 }
 0x704   : > { %v10670_v19 = vadd.f32 %v10633_v3, %v10212_v51 }
 0x706   : > { %v10706_v23 = vadd.f32 %v15102_v31, %v10670_v19 }
 0x707   : > { %v9720_v58 = vpop.f32.mrf.mxu2 }
 0x708   : > { %v10738_v35 = vmax.f32 %v10706_v23, 0.0  ;;  %v9755_v44 = vadd.f32 %v9720_v58, %v9440_v17  ;;  %v10178_v48 = vpop.f32.mrf.mxu3 }
 0x709   : > { %v9407_v37 = vpop.f32.mrf.mxu1 }
 0x70a   : > { %v12808_v13 = vpack.c.bf16 %v10738_v35, %v10737_v9  ;;  %v10213_v24 = vadd.f32 %v10178_v48, %v9755_v44  ;;  %v9441_v29 = vadd.f32 %v9407_v37, %v15190_v62 }
 0x70b   : > { %v10638_v59 = vpop.f32.mrf.mxu0 }
 0x70c   : > { %12828 = vst [vmem:[%s13250_s30 + $0x70] sm:$0xff] %v12808_v13   ;;  %v10671_v27 = vadd.f32 %v10636_v28, %v10213_v24 }
 0x70e   : > { %v10707_v47 = vadd.f32 %v15102_v31, %v10671_v27 }
 0x70f   : > { %v9722_v55 = vpop.f32.mrf.mxu2 }
 0x710   : > { %v9756_v18 = vadd.f32 %v9722_v55, %v9441_v29  ;;  %v10180_v25 = vpop.f32.mrf.mxu3  ;;  %v10739_v30 = vmax.f32 %v10707_v47, 0.0 }
 0x712   : > { %v10214_v50 = vadd.f32 %v10180_v25, %v9756_v18 }
 0x714   : > { %v10672_v40 = vadd.f32 %v10638_v59, %v10214_v50 }
 0x716   : > { %v10708_v32 = vadd.f32 %v15102_v31, %v10672_v40 }
 0x718   : > { %v10740_v45 = vmax.f32 %v10708_v32, 0.0 }
 0x71a   : > { %v12813_v63 = vpack.c.bf16 %v10740_v45, %v10739_v30 }
 0x71c   : > { %12829 = vst [vmem:[%s13250_s30 + $0x78] sm:$0xff] %v12813_v63  }
 0x71d   : > { %13045 = shalt.err (!%p13042_p1)
}
 0x71e   : > { %s13112_s26 = smov 64   ;;  %s13113_s25 = smov 4  }
 0x71f   : > { %12860 = dma.vmem_to_hbm [thread:$0]  (%p13205_p4), %s10822_s6, 2048, %s10824_s10, %s10806_s15, %s13112_s26, %s13112_s26, %s13113_s25  }
 0x720 PF: > { %s10838_s27 = sand.u32 1, %s13086_s12   ;;  %p12871_p3 = pnand %p10938_p6, %p13213_p7 }
 0x721   : > { %s10839_s30 = scalar_lea.sflag [#allocation6], %s10838_s27 }
 0x722   : > { %p12872_p9 = pneg %p12871_p3 }
 0x724   : > { %13081 = dma.done.wait (%p12872_p9), %s10839_s30, 2048  }
 0x725   : > { %13083 = vsyncadd (%p12872_p9), %s10839_s30, 4294965248  ;;  %s20_s17 = sadd.s32 1, %s13106_s17   ;;  %s15191_s12 = smov %s13090_s13 }
 0x726   : > { %p17_p10 = scmp.ge.s32.totalorder %s20_s17, 4   ;;  %s15192_s13 = smov %s13094_s14 }
 0x727   : > { %s15193_s14 = smov %s13211_s8  ;;  %s15194_s15 = smov %s13102_s16 }
 0x728   : > { %s15195_s16 = smov %s15197_s29  ;;  %19 = sbr.rel (!%p17_p10) target bundleno = 7 (0x7), region = 114 }
 0x72d   :  { %10845 = vsyncpa [#allocation5], 1 }
 0x72e   :  { %10847 = vsyncpa [#allocation5 + $0x1], 1 }
 0x72f   :  { %10848 = vsyncpa [#allocation8], 1 }
 0x730   :  { %10850 = vsyncpa [#allocation8 + $0x1], 1 }
 0x731   :  { %10851 = vsyncpa [#allocation6], 1 }
 0x732   :  { %10853 = vsyncpa [#allocation6 + $0x1], 1 }
 0x733   :  { %10854 = vsyncmov [#allocation3] }
 0x736   :  { %s10855_s7 = vpop.sfrf %10854 }
 0x737   :  { %p12436_p6 = scmp.ne.s32.totalorder %s10855_s7, 0 }
 0x739   :  { %10859 = shalt.err (%p12436_p6)  }

</bundles_post_ra>
